<compile_context>
chip_gen: v5e
topology: v5e:2x2
jax: 0.10.0
libtpu: 0.0.40
codegen_flags: <defaults>
</compile_context>

<pallas_src>
import functools

import jax
import jax.numpy as jnp
from jax.experimental import pallas as pl
from jax.experimental.pallas import tpu as pltpu


# ---------------------------------------------------------------------------
# Kernel: histogram pooling + fused (table @ w_enc @ w1) matmul chain,
#         FF axis chunked, logits emitted lane-dense as a (1, tile_n) block.
#   counts[n, v] = sum_s amask[n, s] * (ids[n, s] == v)              (T, V)
#   pooled = counts / max(sum_s amask, 1)                            (T, V)
#   for each FF chunk c:
#       h1_c   = relu(pooled @ table_fused[:, c] + b_fused[:, c])    (T, FC)
#       logit += w2[:, c] . h1_c^T                                   (1, T)
#   out = logit + b2
# ---------------------------------------------------------------------------
def _pair_classifier_kernel(ids_ref, amask_ref, tfused_ref, bfused_ref,
                            w2_ref, b2_ref, out_ref, *, ff_chunk):
    ids = ids_ref[...]                       # (T, S) int32
    amask = amask_ref[...]                   # (T, S) f32
    tile_n, seq = ids.shape
    vocab, ff = tfused_ref.shape

    # Masked vocab histogram (gather-free pooling). S and V are small & static,
    # temps stay tiny; jnp.where avoids the cast+mul of the v2 formulation.
    vocab_iota = jax.lax.broadcasted_iota(jnp.int32, (tile_n, vocab), 1)
    counts = jnp.zeros((tile_n, vocab), jnp.float32)
    for s in range(seq):
        counts = counts + jnp.where(ids[:, s:s + 1] == vocab_iota,
                                    amask[:, s:s + 1], 0.0)

    # Exact reciprocal of the (tiny) token-count denominator.
    denom = jnp.maximum(jnp.sum(amask, axis=1, keepdims=True), 1.0)   # (T, 1)
    inv_denom = 1.0 / denom
    # NOTE: bf16 cast of the scaled histogram is exact enough for {0,1} masks;
    # soft/fractional attention masks would lose a little precision here.
    pooled = (counts * inv_denom).astype(jnp.bfloat16)                # (T, V)

    # FF-chunked classifier epilogue: keeps each live f32 slab at (T, ff_chunk)
    # instead of (T, F), avoiding the VMEM spill/reload of the unchunked h1.
    logit = jnp.zeros((1, tile_n), jnp.float32)
    for c0 in range(0, ff, ff_chunk):
        tf_c = tfused_ref[:, c0:c0 + ff_chunk]                        # (V, FC) bf16
        h1_c = jnp.dot(pooled, tf_c, preferred_element_type=jnp.float32)
        h1_c = jnp.maximum(h1_c + bfused_ref[:, c0:c0 + ff_chunk], 0.0)
        # (1, FC) . (T, FC)^T -> (1, T): lane-dense partial logits on the MXU.
        logit = logit + jax.lax.dot_general(
            w2_ref[:, c0:c0 + ff_chunk], h1_c.astype(jnp.bfloat16),
            dimension_numbers=(((1,), (1,)), ((), ())),
            preferred_element_type=jnp.float32)

    out_ref[...] = logit + b2_ref[0, 0]


def _fuse_classifier_params(params):
    """Fold tok_embed @ w_enc @ w1 (f32) -> bf16, and b_enc @ w1 + b1 -> f32."""
    table = params["tok_embed"].astype(jnp.float32)
    wenc = params["w_enc"].astype(jnp.float32)
    w1 = params["w1"].astype(jnp.float32)
    table_fused = ((table @ wenc) @ w1).astype(jnp.bfloat16)          # (V, F)
    b_fused = (params["b_enc"].astype(jnp.float32) @ w1
               + params["b1"].astype(jnp.float32))                    # (1, F)
    return table_fused, b_fused


def pair_classifier(input_ids, attention_mask, params, *, tile_n=256, ff_chunk=256):
    """Returns per-pair logits, shape (N,)."""
    n, seq = input_ids.shape

    table_fused, b_fused = _fuse_classifier_params(params)
    vocab, ff = table_fused.shape
    ff_chunk = min(ff_chunk, ff)
    w2 = params["w2"]                        # (1, F) bf16
    b2 = params["b2"]                        # (1, 1) f32 scalar (SMEM)

    # Pick the largest tile that still leaves >= 2 grid steps (v7x has 2 TensorCores;
    # a 1-step grid forfeits the megacore win of the "parallel" annotation).
    tile_n = max(128, min(tile_n, 512))
    while tile_n > 128 and pl.cdiv(n, tile_n) < 2:
        tile_n //= 2

    n_pad = pl.cdiv(n, tile_n) * tile_n
    if n_pad != n:
        pad = n_pad - n
        input_ids = jnp.pad(input_ids, ((0, pad), (0, 0)))
        attention_mask = jnp.pad(attention_mask, ((0, pad), (0, 0)))
    ids = input_ids.astype(jnp.int32)
    amask = attention_mask.astype(jnp.float32)

    rep = lambda i: (0, 0)                   # replicated (constant weight) blocks
    out = pl.pallas_call(
        functools.partial(_pair_classifier_kernel, ff_chunk=ff_chunk),
        out_shape=jax.ShapeDtypeStruct((1, n_pad), jnp.float32),
        grid=(n_pad // tile_n,),
        in_specs=[
            pl.BlockSpec((tile_n, seq), lambda i: (i, 0)),      # token ids (tiled)
            pl.BlockSpec((tile_n, seq), lambda i: (i, 0)),      # attention mask (tiled)
            pl.BlockSpec((vocab, ff), rep),                     # fused table@w_enc@w1
            pl.BlockSpec((1, ff), rep),                         # fused bias
            pl.BlockSpec((1, ff), rep),                         # w2
            pl.BlockSpec(memory_space=pltpu.MemorySpace.SMEM),  # b2 scalar
        ],
        out_specs=pl.BlockSpec((1, tile_n), lambda i: (0, i)),  # lane-dense logits
        compiler_params=pltpu.CompilerParams(
            dimension_semantics=("parallel",)),                 # megacore on v7x
    )(ids, amask, table_fused, b_fused, w2, b2)
    return out[0, :n]


# ---------------------------------------------------------------------------
# masked_softmax over the candidate axis. Plain jnp on purpose: the tensor is
# (B, C) ~ 1-2 KiB, so a dedicated pallas_call costs more in launch overhead and
# (8,128)-padded masked stores than the arithmetic; XLA fuses this for free.
# ---------------------------------------------------------------------------
def masked_softmax(logits, mask):
    xm = jnp.where(mask > 0, logits, jnp.full_like(logits, -1e30))
    x_max = jnp.max(xm, axis=-1, keepdims=True)
    e = jnp.exp(xm - x_max) * mask
    return e / (jnp.sum(e, axis=-1, keepdims=True) + 1e-13)


# ---------------------------------------------------------------------------
# AMELINLI forward (plain JAX glue around the Pallas pair-classifier kernel)
# ---------------------------------------------------------------------------
def amelinli_forward(params, input_ids, attention_mask, label, entity_mask_tensor,
                     *, tile_n=256, ff_chunk=256):
    """input_ids/attention_mask: (N, S) with N = batch * num_candidates."""
    batch_size, num_cand = entity_mask_tensor.shape
    logits = pair_classifier(input_ids, attention_mask, params,
                             tile_n=tile_n, ff_chunk=ff_chunk)
    logits = logits.reshape(batch_size, num_cand)
    probs = masked_softmax(logits, entity_mask_tensor.astype(jnp.float32))
    return (probs, label, probs, probs, probs, probs)


def init_params(key, vocab_size, d_text, max_attribute_num, model_embed_dim,
                dim_feedforward):
    d_in = (max_attribute_num + 1) * model_embed_dim
    ks = jax.random.split(key, 4)
    scale = 0.02
    f32 = jnp.float32
    bf16 = jnp.bfloat16
    return {
        # bf16 storage halves DMA bytes and feeds the MXU natively; biases stay f32.
        "tok_embed": (scale * jax.random.normal(ks[0], (vocab_size, d_text), f32)).astype(bf16),
        "w_enc": (scale * jax.random.normal(ks[1], (d_text, d_in), f32)).astype(bf16),
        "b_enc": jnp.zeros((1, d_in), f32),
        "w1": (scale * jax.random.normal(ks[2], (d_in, dim_feedforward), f32)).astype(bf16),
        "b1": jnp.zeros((1, dim_feedforward), f32),
        "w2": (scale * jax.random.normal(ks[3], (1, dim_feedforward), f32)).astype(bf16),
        "b2": jnp.zeros((1, 1), f32),
    }


# Pure-JAX reference (same math, UNFUSED: gather + masked mean pool + projection
# + MLP + masked softmax) for a correctness check of the fused kernel path.
def reference_forward(params, input_ids, attention_mask, entity_mask):
    table = params["tok_embed"].astype(jnp.float32)
    emb = jnp.take(table, input_ids, axis=0)                      # (N, S, D)
    amask = attention_mask.astype(jnp.float32)
    pooled = jnp.sum(emb * amask[:, :, None], axis=1)
    pooled = pooled / jnp.maximum(jnp.sum(amask, axis=1, keepdims=True), 1.0)
    pair = pooled @ params["w_enc"].astype(jnp.float32) + params["b_enc"]
    h1 = jnp.maximum(pair @ params["w1"].astype(jnp.float32) + params["b1"], 0.0)
    logit = h1 @ params["w2"].astype(jnp.float32).T + params["b2"]
    logits = logit.reshape(entity_mask.shape)
    m = entity_mask.astype(jnp.float32)
    xm = jnp.where(m > 0, logits, -1e30)
    e = jnp.exp(xm - xm.max(-1, keepdims=True)) * m
    return e / (e.sum(-1, keepdims=True) + 1e-13)


if __name__ == "__main__":
    # Small, module-consistent shapes. N = 512 -> 2 grid steps at tile_n = 256
    # (keeps both v7x TensorCores busy while exercising the pipelined grid).
    batch = 16
    num_candidates = 32         # candidate entities per mention
    seq_len = 8
    vocab_size = 64
    d_text_tok = 128            # args.d_text_tok
    max_attribute_num = 3       # args.max_attribute_num
    model_embed_dim = 32        # args.model_embed_dim  -> D_in = 4*32 = 128
    dim_feedforward = 1024

    key = jax.random.PRNGKey(0)
    k_param, k_ids, k_len, k_valid, k_lab = jax.random.split(key, 5)

    params = init_params(k_param, vocab_size, d_text_tok, max_attribute_num,
                         model_embed_dim, dim_feedforward)

    N = batch * num_candidates
    input_ids = jax.random.randint(k_ids, (N, seq_len), 0, vocab_size, dtype=jnp.int32)
    # variable-length attention masks
    lens = jax.random.randint(k_len, (N, 1), 3, seq_len + 1, dtype=jnp.int32)
    attention_mask = (jnp.arange(seq_len)[None, :] < lens).astype(jnp.int32)
    # variable number of valid candidates per batch row
    valid = jax.random.randint(k_valid, (batch, 1), 4, num_candidates + 1, dtype=jnp.int32)
    entity_mask_tensor = (jnp.arange(num_candidates)[None, :] < valid).astype(jnp.float32)
    label = jax.random.randint(k_lab, (batch,), 0, 4, dtype=jnp.int32)

    outs = amelinli_forward(params, input_ids, attention_mask, label,
                            entity_mask_tensor, tile_n=256, ff_chunk=256)
    probs = jax.block_until_ready(outs[0])

    probs_ref = reference_forward(params, input_ids, attention_mask, entity_mask_tensor)

    assert probs.shape == (batch, num_candidates)
    # masked positions must be (near) zero, rows sum to ~1, and match the reference
    assert float(jnp.abs(jnp.where(entity_mask_tensor == 0, probs, 0.0)).max()) < 1e-6
    assert float(jnp.abs(probs.sum(axis=-1) - 1.0).max()) < 1e-4
    assert float(jnp.abs(probs - probs_ref).max()) < 5e-3

    print("KERNEL_OK")
</pallas_src>

<mosaic_0001>
module attributes {stable_mosaic.version = 11 : i64} {
  func.func @_pair_classifier_kernel(%arg0: i32, %arg1: memref<256x8xi32, #tpu.memory_space<vmem>>, %arg2: memref<256x8xf32, #tpu.memory_space<vmem>>, %arg3: memref<64x1024xbf16, #tpu.memory_space<vmem>>, %arg4: memref<1x1024xf32, #tpu.memory_space<vmem>>, %arg5: memref<1x1024xbf16, #tpu.memory_space<vmem>>, %arg6: memref<1x1xf32, #tpu.memory_space<smem>>, %arg7: memref<1x256xf32, #tpu.memory_space<vmem>>) attributes {dimension_semantics = [#tpu.dimension_semantics<parallel>], iteration_bounds = array<i64: 2>, scalar_prefetch = 0 : i64, scratch_operands = 0 : i64, tpu.core_type = #tpu.core_type<tc>, window_params = [{transform_indices = @transform_0, window_bounds = array<i64: 256, 8>}, {transform_indices = @transform_1, window_bounds = array<i64: 256, 8>}, {pipeline_mode = #tpu.pipeline_mode<synchronous>, transform_indices = @transform_2, window_bounds = array<i64: 64, 1024>}, {pipeline_mode = #tpu.pipeline_mode<synchronous>, transform_indices = @transform_3, window_bounds = array<i64: 1, 1024>}, {pipeline_mode = #tpu.pipeline_mode<synchronous>, transform_indices = @transform_4, window_bounds = array<i64: 1, 1024>}, {transform_indices = @transform_5, window_bounds = array<i64: 1, 1>}, {transform_indices = @transform_6, window_bounds = array<i64: 1, 256>}]} {
    %c0 = arith.constant 0 : index
    %c0_0 = arith.constant 0 : index
    %0 = vector.load %arg1[%c0, %c0_0] : memref<256x8xi32, #tpu.memory_space<vmem>>, vector<256x8xi32>
    %c0_1 = arith.constant 0 : index
    %c0_2 = arith.constant 0 : index
    %1 = vector.load %arg2[%c0_1, %c0_2] : memref<256x8xf32, #tpu.memory_space<vmem>>, vector<256x8xf32>
    %2 = tpu.iota {dimensions = array<i32: 1>} : vector<256x64xi32>
    %cst = arith.constant 0.000000e+00 : f32
    %3 = vector.broadcast %cst : f32 to vector<256x64xf32>
    %4 = vector.extract_strided_slice %0 {offsets = [0, 0], sizes = [256, 1], strides = [1, 1]} : vector<256x8xi32> to vector<256x1xi32>
    %5 = vector.broadcast %4 : vector<256x1xi32> to vector<256x64xi32>
    %6 = arith.cmpi eq, %5, %2 : vector<256x64xi32>
    %7 = vector.extract_strided_slice %1 {offsets = [0, 0], sizes = [256, 1], strides = [1, 1]} : vector<256x8xf32> to vector<256x1xf32>
    %cst_3 = arith.constant 0.000000e+00 : f32
    %8 = vector.shape_cast %7 : vector<256x1xf32> to vector<256x1xf32>
    %9 = vector.broadcast %8 : vector<256x1xf32> to vector<256x64xf32>
    %10 = vector.broadcast %cst_3 : f32 to vector<256x64xf32>
    %11 = arith.select %6, %9, %10 : vector<256x64xi1>, vector<256x64xf32>
    %12 = arith.addf %3, %11 : vector<256x64xf32>
    %13 = vector.extract_strided_slice %0 {offsets = [0, 1], sizes = [256, 1], strides = [1, 1]} : vector<256x8xi32> to vector<256x1xi32>
    %14 = vector.broadcast %13 : vector<256x1xi32> to vector<256x64xi32>
    %15 = arith.cmpi eq, %14, %2 : vector<256x64xi32>
    %16 = vector.extract_strided_slice %1 {offsets = [0, 1], sizes = [256, 1], strides = [1, 1]} : vector<256x8xf32> to vector<256x1xf32>
    %cst_4 = arith.constant 0.000000e+00 : f32
    %17 = vector.shape_cast %16 : vector<256x1xf32> to vector<256x1xf32>
    %18 = vector.broadcast %17 : vector<256x1xf32> to vector<256x64xf32>
    %19 = vector.broadcast %cst_4 : f32 to vector<256x64xf32>
    %20 = arith.select %15, %18, %19 : vector<256x64xi1>, vector<256x64xf32>
    %21 = arith.addf %12, %20 : vector<256x64xf32>
    %22 = vector.extract_strided_slice %0 {offsets = [0, 2], sizes = [256, 1], strides = [1, 1]} : vector<256x8xi32> to vector<256x1xi32>
    %23 = vector.broadcast %22 : vector<256x1xi32> to vector<256x64xi32>
    %24 = arith.cmpi eq, %23, %2 : vector<256x64xi32>
    %25 = vector.extract_strided_slice %1 {offsets = [0, 2], sizes = [256, 1], strides = [1, 1]} : vector<256x8xf32> to vector<256x1xf32>
    %cst_5 = arith.constant 0.000000e+00 : f32
    %26 = vector.shape_cast %25 : vector<256x1xf32> to vector<256x1xf32>
    %27 = vector.broadcast %26 : vector<256x1xf32> to vector<256x64xf32>
    %28 = vector.broadcast %cst_5 : f32 to vector<256x64xf32>
    %29 = arith.select %24, %27, %28 : vector<256x64xi1>, vector<256x64xf32>
    %30 = arith.addf %21, %29 : vector<256x64xf32>
    %31 = vector.extract_strided_slice %0 {offsets = [0, 3], sizes = [256, 1], strides = [1, 1]} : vector<256x8xi32> to vector<256x1xi32>
    %32 = vector.broadcast %31 : vector<256x1xi32> to vector<256x64xi32>
    %33 = arith.cmpi eq, %32, %2 : vector<256x64xi32>
    %34 = vector.extract_strided_slice %1 {offsets = [0, 3], sizes = [256, 1], strides = [1, 1]} : vector<256x8xf32> to vector<256x1xf32>
    %cst_6 = arith.constant 0.000000e+00 : f32
    %35 = vector.shape_cast %34 : vector<256x1xf32> to vector<256x1xf32>
    %36 = vector.broadcast %35 : vector<256x1xf32> to vector<256x64xf32>
    %37 = vector.broadcast %cst_6 : f32 to vector<256x64xf32>
    %38 = arith.select %33, %36, %37 : vector<256x64xi1>, vector<256x64xf32>
    %39 = arith.addf %30, %38 : vector<256x64xf32>
    %40 = vector.extract_strided_slice %0 {offsets = [0, 4], sizes = [256, 1], strides = [1, 1]} : vector<256x8xi32> to vector<256x1xi32>
    %41 = vector.broadcast %40 : vector<256x1xi32> to vector<256x64xi32>
    %42 = arith.cmpi eq, %41, %2 : vector<256x64xi32>
    %43 = vector.extract_strided_slice %1 {offsets = [0, 4], sizes = [256, 1], strides = [1, 1]} : vector<256x8xf32> to vector<256x1xf32>
    %cst_7 = arith.constant 0.000000e+00 : f32
    %44 = vector.shape_cast %43 : vector<256x1xf32> to vector<256x1xf32>
    %45 = vector.broadcast %44 : vector<256x1xf32> to vector<256x64xf32>
    %46 = vector.broadcast %cst_7 : f32 to vector<256x64xf32>
    %47 = arith.select %42, %45, %46 : vector<256x64xi1>, vector<256x64xf32>
    %48 = arith.addf %39, %47 : vector<256x64xf32>
    %49 = vector.extract_strided_slice %0 {offsets = [0, 5], sizes = [256, 1], strides = [1, 1]} : vector<256x8xi32> to vector<256x1xi32>
    %50 = vector.broadcast %49 : vector<256x1xi32> to vector<256x64xi32>
    %51 = arith.cmpi eq, %50, %2 : vector<256x64xi32>
    %52 = vector.extract_strided_slice %1 {offsets = [0, 5], sizes = [256, 1], strides = [1, 1]} : vector<256x8xf32> to vector<256x1xf32>
    %cst_8 = arith.constant 0.000000e+00 : f32
    %53 = vector.shape_cast %52 : vector<256x1xf32> to vector<256x1xf32>
    %54 = vector.broadcast %53 : vector<256x1xf32> to vector<256x64xf32>
    %55 = vector.broadcast %cst_8 : f32 to vector<256x64xf32>
    %56 = arith.select %51, %54, %55 : vector<256x64xi1>, vector<256x64xf32>
    %57 = arith.addf %48, %56 : vector<256x64xf32>
    %58 = vector.extract_strided_slice %0 {offsets = [0, 6], sizes = [256, 1], strides = [1, 1]} : vector<256x8xi32> to vector<256x1xi32>
    %59 = vector.broadcast %58 : vector<256x1xi32> to vector<256x64xi32>
    %60 = arith.cmpi eq, %59, %2 : vector<256x64xi32>
    %61 = vector.extract_strided_slice %1 {offsets = [0, 6], sizes = [256, 1], strides = [1, 1]} : vector<256x8xf32> to vector<256x1xf32>
    %cst_9 = arith.constant 0.000000e+00 : f32
    %62 = vector.shape_cast %61 : vector<256x1xf32> to vector<256x1xf32>
    %63 = vector.broadcast %62 : vector<256x1xf32> to vector<256x64xf32>
    %64 = vector.broadcast %cst_9 : f32 to vector<256x64xf32>
    %65 = arith.select %60, %63, %64 : vector<256x64xi1>, vector<256x64xf32>
    %66 = arith.addf %57, %65 : vector<256x64xf32>
    %67 = vector.extract_strided_slice %0 {offsets = [0, 7], sizes = [256, 1], strides = [1, 1]} : vector<256x8xi32> to vector<256x1xi32>
    %68 = vector.broadcast %67 : vector<256x1xi32> to vector<256x64xi32>
    %69 = arith.cmpi eq, %68, %2 : vector<256x64xi32>
    %70 = vector.extract_strided_slice %1 {offsets = [0, 7], sizes = [256, 1], strides = [1, 1]} : vector<256x8xf32> to vector<256x1xf32>
    %cst_10 = arith.constant 0.000000e+00 : f32
    %71 = vector.shape_cast %70 : vector<256x1xf32> to vector<256x1xf32>
    %72 = vector.broadcast %71 : vector<256x1xf32> to vector<256x64xf32>
    %73 = vector.broadcast %cst_10 : f32 to vector<256x64xf32>
    %74 = arith.select %69, %72, %73 : vector<256x64xi1>, vector<256x64xf32>
    %75 = arith.addf %66, %74 : vector<256x64xf32>
    %cst_11 = arith.constant dense<0.000000e+00> : vector<256xf32>
    %76 = vector.multi_reduction <add>, %1, %cst_11 [1] : vector<256x8xf32> to vector<256xf32>
    %77 = vector.shape_cast %76 : vector<256xf32> to vector<256x1xf32>
    %cst_12 = arith.constant 1.000000e+00 : f32
    %78 = vector.broadcast %cst_12 : f32 to vector<256x1xf32>
    %79 = arith.maximumf %77, %78 : vector<256x1xf32>
    %cst_13 = arith.constant 1.000000e+00 : f32
    %80 = vector.broadcast %cst_13 : f32 to vector<256x1xf32>
    %81 = arith.divf %80, %79 : vector<256x1xf32>
    %82 = vector.broadcast %81 : vector<256x1xf32> to vector<256x64xf32>
    %83 = arith.mulf %75, %82 : vector<256x64xf32>
    %84 = arith.truncf %83 : vector<256x64xf32> to vector<256x64xbf16>
    %cst_14 = arith.constant 0.000000e+00 : f32
    %85 = vector.broadcast %cst_14 : f32 to vector<1x256xf32>
    %c0_15 = arith.constant 0 : index
    %c0_16 = arith.constant 0 : index
    %86 = vector.load %arg3[%c0_15, %c0_16] : memref<64x1024xbf16, #tpu.memory_space<vmem>>, vector<64x256xbf16>
    %cst_17 = arith.constant dense<0.000000e+00> : vector<256x256xf32>
    %87 = tpu.matmul %84, %86, %cst_17 {dimension_numbers = #tpu.dot_dimension_numbers<[1], [0], [0], [1], [0, 0, 1, 1], [], []>} : vector<256x64xbf16>, vector<64x256xbf16>, vector<256x256xf32> -> vector<256x256xf32>
    %c0_18 = arith.constant 0 : index
    %c0_19 = arith.constant 0 : index
    %88 = vector.load %arg4[%c0_18, %c0_19] : memref<1x1024xf32, #tpu.memory_space<vmem>>, vector<1x256xf32>
    %89 = vector.broadcast %88 : vector<1x256xf32> to vector<256x256xf32>
    %90 = arith.addf %87, %89 : vector<256x256xf32>
    %cst_20 = arith.constant 0.000000e+00 : f32
    %91 = vector.broadcast %cst_20 : f32 to vector<256x256xf32>
    %92 = arith.maximumf %90, %91 : vector<256x256xf32>
    %c0_21 = arith.constant 0 : index
    %c0_22 = arith.constant 0 : index
    %93 = vector.load %arg5[%c0_21, %c0_22] : memref<1x1024xbf16, #tpu.memory_space<vmem>>, vector<1x256xbf16>
    %94 = arith.truncf %92 : vector<256x256xf32> to vector<256x256xbf16>
    %cst_23 = arith.constant dense<0.000000e+00> : vector<1x256xf32>
    %95 = tpu.matmul %93, %94, %cst_23 {dimension_numbers = #tpu.dot_dimension_numbers<[1], [1], [0], [0], [0, 0, 1, 0], [], []>} : vector<1x256xbf16>, vector<256x256xbf16>, vector<1x256xf32> -> vector<1x256xf32>
    %96 = arith.addf %85, %95 : vector<1x256xf32>
    %c0_24 = arith.constant 0 : index
    %c256 = arith.constant 256 : index
    %97 = vector.load %arg3[%c0_24, %c256] : memref<64x1024xbf16, #tpu.memory_space<vmem>>, vector<64x256xbf16>
    %cst_25 = arith.constant dense<0.000000e+00> : vector<256x256xf32>
    %98 = tpu.matmul %84, %97, %cst_25 {dimension_numbers = #tpu.dot_dimension_numbers<[1], [0], [0], [1], [0, 0, 1, 1], [], []>} : vector<256x64xbf16>, vector<64x256xbf16>, vector<256x256xf32> -> vector<256x256xf32>
    %c0_26 = arith.constant 0 : index
    %c256_27 = arith.constant 256 : index
    %99 = vector.load %arg4[%c0_26, %c256_27] : memref<1x1024xf32, #tpu.memory_space<vmem>>, vector<1x256xf32>
    %100 = vector.broadcast %99 : vector<1x256xf32> to vector<256x256xf32>
    %101 = arith.addf %98, %100 : vector<256x256xf32>
    %cst_28 = arith.constant 0.000000e+00 : f32
    %102 = vector.broadcast %cst_28 : f32 to vector<256x256xf32>
    %103 = arith.maximumf %101, %102 : vector<256x256xf32>
    %c0_29 = arith.constant 0 : index
    %c256_30 = arith.constant 256 : index
    %104 = vector.load %arg5[%c0_29, %c256_30] : memref<1x1024xbf16, #tpu.memory_space<vmem>>, vector<1x256xbf16>
    %105 = arith.truncf %103 : vector<256x256xf32> to vector<256x256xbf16>
    %cst_31 = arith.constant dense<0.000000e+00> : vector<1x256xf32>
    %106 = tpu.matmul %104, %105, %cst_31 {dimension_numbers = #tpu.dot_dimension_numbers<[1], [1], [0], [0], [0, 0, 1, 0], [], []>} : vector<1x256xbf16>, vector<256x256xbf16>, vector<1x256xf32> -> vector<1x256xf32>
    %107 = arith.addf %96, %106 : vector<1x256xf32>
    %c0_32 = arith.constant 0 : index
    %c512 = arith.constant 512 : index
    %108 = vector.load %arg3[%c0_32, %c512] : memref<64x1024xbf16, #tpu.memory_space<vmem>>, vector<64x256xbf16>
    %cst_33 = arith.constant dense<0.000000e+00> : vector<256x256xf32>
    %109 = tpu.matmul %84, %108, %cst_33 {dimension_numbers = #tpu.dot_dimension_numbers<[1], [0], [0], [1], [0, 0, 1, 1], [], []>} : vector<256x64xbf16>, vector<64x256xbf16>, vector<256x256xf32> -> vector<256x256xf32>
    %c0_34 = arith.constant 0 : index
    %c512_35 = arith.constant 512 : index
    %110 = vector.load %arg4[%c0_34, %c512_35] : memref<1x1024xf32, #tpu.memory_space<vmem>>, vector<1x256xf32>
    %111 = vector.broadcast %110 : vector<1x256xf32> to vector<256x256xf32>
    %112 = arith.addf %109, %111 : vector<256x256xf32>
    %cst_36 = arith.constant 0.000000e+00 : f32
    %113 = vector.broadcast %cst_36 : f32 to vector<256x256xf32>
    %114 = arith.maximumf %112, %113 : vector<256x256xf32>
    %c0_37 = arith.constant 0 : index
    %c512_38 = arith.constant 512 : index
    %115 = vector.load %arg5[%c0_37, %c512_38] : memref<1x1024xbf16, #tpu.memory_space<vmem>>, vector<1x256xbf16>
    %116 = arith.truncf %114 : vector<256x256xf32> to vector<256x256xbf16>
    %cst_39 = arith.constant dense<0.000000e+00> : vector<1x256xf32>
    %117 = tpu.matmul %115, %116, %cst_39 {dimension_numbers = #tpu.dot_dimension_numbers<[1], [1], [0], [0], [0, 0, 1, 0], [], []>} : vector<1x256xbf16>, vector<256x256xbf16>, vector<1x256xf32> -> vector<1x256xf32>
    %118 = arith.addf %107, %117 : vector<1x256xf32>
    %c0_40 = arith.constant 0 : index
    %c768 = arith.constant 768 : index
    %119 = vector.load %arg3[%c0_40, %c768] : memref<64x1024xbf16, #tpu.memory_space<vmem>>, vector<64x256xbf16>
    %cst_41 = arith.constant dense<0.000000e+00> : vector<256x256xf32>
    %120 = tpu.matmul %84, %119, %cst_41 {dimension_numbers = #tpu.dot_dimension_numbers<[1], [0], [0], [1], [0, 0, 1, 1], [], []>} : vector<256x64xbf16>, vector<64x256xbf16>, vector<256x256xf32> -> vector<256x256xf32>
    %c0_42 = arith.constant 0 : index
    %c768_43 = arith.constant 768 : index
    %121 = vector.load %arg4[%c0_42, %c768_43] : memref<1x1024xf32, #tpu.memory_space<vmem>>, vector<1x256xf32>
    %122 = vector.broadcast %121 : vector<1x256xf32> to vector<256x256xf32>
    %123 = arith.addf %120, %122 : vector<256x256xf32>
    %cst_44 = arith.constant 0.000000e+00 : f32
    %124 = vector.broadcast %cst_44 : f32 to vector<256x256xf32>
    %125 = arith.maximumf %123, %124 : vector<256x256xf32>
    %c0_45 = arith.constant 0 : index
    %c768_46 = arith.constant 768 : index
    %126 = vector.load %arg5[%c0_45, %c768_46] : memref<1x1024xbf16, #tpu.memory_space<vmem>>, vector<1x256xbf16>
    %127 = arith.truncf %125 : vector<256x256xf32> to vector<256x256xbf16>
    %cst_47 = arith.constant dense<0.000000e+00> : vector<1x256xf32>
    %128 = tpu.matmul %126, %127, %cst_47 {dimension_numbers = #tpu.dot_dimension_numbers<[1], [1], [0], [0], [0, 0, 1, 0], [], []>} : vector<1x256xbf16>, vector<256x256xbf16>, vector<1x256xf32> -> vector<1x256xf32>
    %129 = arith.addf %118, %128 : vector<1x256xf32>
    %c0_48 = arith.constant 0 : index
    %c0_49 = arith.constant 0 : index
    %130 = memref.load %arg6[%c0_48, %c0_49] : memref<1x1xf32, #tpu.memory_space<smem>>
    %131 = vector.broadcast %130 : f32 to vector<1x256xf32>
    %132 = arith.addf %129, %131 : vector<1x256xf32>
    %c0_50 = arith.constant 0 : index
    %c0_51 = arith.constant 0 : index
    %133 = vector.load %arg7[%c0_50, %c0_51] : memref<1x256xf32, #tpu.memory_space<vmem>>, vector<1x256xf32>
    tpu.vector_store %arg7[%c0_50, %c0_51], %132 {strides = array<i32>} : memref<1x256xf32, #tpu.memory_space<vmem>>, vector<1x256xf32>,
    return
  }
  func.func @transform_0(%arg0: i32) -> (i32, i32) {
    %c0_i32 = arith.constant 0 : i32
    %c0_i32_0 = arith.constant 0 : i32
    return %arg0, %c0_i32 : i32, i32
  }
  func.func @transform_1(%arg0: i32) -> (i32, i32) {
    %c0_i32 = arith.constant 0 : i32
    %c0_i32_0 = arith.constant 0 : i32
    return %arg0, %c0_i32 : i32, i32
  }
  func.func @transform_2(%arg0: i32) -> (i32, i32) {
    %c0_i32 = arith.constant 0 : i32
    %c0_i32_0 = arith.constant 0 : i32
    %c0_i32_1 = arith.constant 0 : i32
    return %c0_i32, %c0_i32_0 : i32, i32
  }
  func.func @transform_3(%arg0: i32) -> (i32, i32) {
    %c0_i32 = arith.constant 0 : i32
    %c0_i32_0 = arith.constant 0 : i32
    %c0_i32_1 = arith.constant 0 : i32
    return %c0_i32, %c0_i32_0 : i32, i32
  }
  func.func @transform_4(%arg0: i32) -> (i32, i32) {
    %c0_i32 = arith.constant 0 : i32
    %c0_i32_0 = arith.constant 0 : i32
    %c0_i32_1 = arith.constant 0 : i32
    return %c0_i32, %c0_i32_0 : i32, i32
  }
  func.func @transform_5(%arg0: i32) -> (i32, i32) {
    %c0_i32 = arith.constant 0 : i32
    %c0_i32_0 = arith.constant 0 : i32
    %c0_i32_1 = arith.constant 0 : i32
    return %c0_i32, %c0_i32_0 : i32, i32
  }
  func.func @transform_6(%arg0: i32) -> (i32, i32) {
    %c0_i32 = arith.constant 0 : i32
    %c0_i32_0 = arith.constant 0 : i32
    return %c0_i32, %arg0 : i32, i32
  }
}

</mosaic_0001>

<bundles_post_ra>
// kernel: tpu_custom_call.1
= control target key start
LH: loop header
LB: loop body
LE: loop exit
PB: predicated region body
PF: predicated region fallthrough
CT: control target
= control target key end

     0   :  { %s11256_s0 = inlined_call_operand.vmem [shape: s32[512,8], index: 0, kind: input, shape index: {}]   ;;  %s11257_s1 = inlined_call_operand.vmem [shape: f32[512,8], index: 1, kind: input, shape index: {}]   ;;  %s11258_s2 = inlined_call_operand.vmem [shape: bf16[64,1024], index: 2, kind: input, shape index: {}]   ;;  %s11259_s3 = inlined_call_operand.vmem [shape: f32[1,1024], index: 3, kind: input, shape index: {}]   ;;  %s11260_s4 = inlined_call_operand.vmem [shape: bf16[1,1024], index: 4, kind: input, shape index: {}]   ;;  %s11261_s5 = inlined_call_operand.<no memory space> [shape: f32[1,1], index: 5, kind: input, shape index: {}]   ;;  %s11262_s6 = inlined_call_operand.hbm [shape: f32[1,512], index: 6, kind: output, shape index: {}]  }
   0x1   :  { %11 = sst [smem:[#allocation2]] %s11261_s5 }
   0x2   :  { %12 = vsyncpa [#allocation4], 0 }
   0x3   :  { %14 = vsyncpa [#allocation4 + $0x1], 0  ;;  %s5977_s23 = smov 0   ;;  %s5979_s24 = smov 0  }
   0x4   :  { %s5981_s25 = smov 0   ;;  %s5983_s26 = smov 0  }
   0x5 LB: > { %s5998_s5 = sadd.s32 4294967295, %s5929_s26   ;;  %s5295_s27 = sadd.s32 4294967294, %s5929_s26   ;;  %s5929_s26 = sphi %s5983_s26, %s12675_s26   ;;  %s5925_s25 = sphi %s5981_s25, %s12674_s25   ;;  %s5921_s24 = sphi %s5979_s24, %s12673_s24   ;;  %s5917_s23 = sphi %s5977_s23, %s12672_s23  }
   0x6   : > { %s6002_s28 = sadd.s32 1, %s5929_s26   ;;  %s163_s29 = sadd.s32 1, %s5925_s25 }
   0x7   : > { %s160_s30 = ssub.s32 %s5929_s26, %s6002_s28  ;;  %p173_p0 = scmp.ne.s32.totalorder %s5925_s25, %s5921_s24 }
   0x8   : > { %p161_p1 = scmp.eq.s32.totalorder %s160_s30, 0  ;;  %p174_p2 = scmp.eq.s32.totalorder %s5998_s5, 1 }
   0x9   : > { %p179_p3 = scmp.ne.s32.totalorder %s5921_s24, %s5917_s23  ;;  %p180_p4 = scmp.eq.s32.totalorder %s5295_s27, 1 }
   0xa   : > { %s6013_s7 = scalar_select %p161_p1, %s5925_s25, %s163_s29  }
   0xb   : > { %p6015_p5 = por %p174_p2, %p173_p0  ;;  %p6019_p6 = por %p180_p4, %p179_p3 }
   0xc   : > { %p5298_p7 = scmp.ge.s32.totalorder %s5929_s26, 1  ;;  %p228_p8 = scmp.lt.s32.totalorder %s5929_s26, 3 }
   0xe   : > { %p229_p9 = pnand %p5298_p7, %p228_p8 }
  0x10   : > { %232 = sbr.rel (%p229_p9) target bundleno = 3144 (0xc48), region = 44 }
  0x15   : > { %s5300_s10 = sshll.u32 %s5998_s5, 5  ;;  %v5931_v0 = vmov 0   ;;  %vm11381_vm0 = vcmask 64512   ;;  %s5887_s29 = scalar_lea.hbm %s11262_s6, 4 }
  0x16   : > { %5645 = vset.pattern.permute.xlu2 %v5931_v0  ;;  %5644 = vset.pattern.permute.xlu1 %v5931_v0  ;;  %p264_p10 = scmp.lt.s32.totalorder %s5300_s10, 63 }
  0x17   : > { %5643 = vset.pattern.permute.xlu0 %v5931_v0 }
  0x18   : > { %s12677_s10 = smov (!%p264_p10, %s5300_s10), 63 }
  0x19   : > { %s5301_s11 = sshll.u32 %s12677_s10, 3  ;;  %s5193_s10 = sld [smem:[#allocation2]] }
  0x1a   : > { %s6034_s14 = scalar_lea.vmem %s11256_s0, %s5301_s11  ;;  %s6161_s17 = scalar_lea.vmem %s11257_s1, %s5301_s11 }
  0x1b   : > { %v6037_v1 = vld [vmem:[%s6034_s14 + $0x20] sm:$0xff]  ;;  %v6040_v2 = vld [vmem:[%s6034_s14 + $0x10] sm:$0xff]  ;;  %v6049_v4 = vld [vmem:[%s6034_s14 + $0x28] sm:$0xff]  ;;  %s260_s11 = sand.u32 1, %s5921_s24  }
  0x1c   : > { %v6043_v3 = vld [vmem:[%s6034_s14] sm:$0xff]  ;;  %356 = vperm.xlu2 %5645, %v6037_v1   ;;  %350 = vperm.xlu1 %5644, %v6040_v2   ;;  %v6052_v5 = vld [vmem:[%s6034_s14 + $0x18] sm:$0xff]  ;;  %v6055_v6 = vld [vmem:[%s6034_s14 + $0x8] sm:$0xff] }
  0x1d   : > { %344 = vperm.xlu0 %5643, %v6043_v3   ;;  %11429 = vst [vmem:[#allocation6_spill] sm:$0xff] %v6055_v6  ;;  %v6061_v7 = vld [vmem:[%s6034_s14 + $0x40] sm:$0xff]  ;;  %v6064_v8 = vld [vmem:[%s6034_s14 + $0x38] sm:$0xff]  ;;  %v6067_v9 = vld [vmem:[%s6034_s14 + $0x30] sm:$0xff] }
  0x1e   : > { %v6073_v10 = vld [vmem:[%s6034_s14 + $0x58] sm:$0xff]  ;;  %v6076_v11 = vld [vmem:[%s6034_s14 + $0x50] sm:$0xff]  ;;  %v6079_v12 = vld [vmem:[%s6034_s14 + $0x48] sm:$0xff] }
  0x1f   : > { %v6085_v13 = vld [vmem:[%s6034_s14 + $0x70] sm:$0xff]  ;;  %v6088_v14 = vld [vmem:[%s6034_s14 + $0x68] sm:$0xff]  ;;  %v6091_v15 = vld [vmem:[%s6034_s14 + $0x60] sm:$0xff] }
  0x20   : > { %v6097_v16 = vld [vmem:[%s6034_s14 + $0x88] sm:$0xff]  ;;  %v6100_v17 = vld [vmem:[%s6034_s14 + $0x80] sm:$0xff]  ;;  %v6103_v18 = vld [vmem:[%s6034_s14 + $0x78] sm:$0xff] }
  0x21   : > { %v6109_v19 = vld [vmem:[%s6034_s14 + $0xa0] sm:$0xff]  ;;  %v6112_v20 = vld [vmem:[%s6034_s14 + $0x98] sm:$0xff]  ;;  %v6115_v21 = vld [vmem:[%s6034_s14 + $0x90] sm:$0xff] }
  0x22   : > { %v6121_v22 = vld [vmem:[%s6034_s14 + $0xb8] sm:$0xff]  ;;  %v6124_v23 = vld [vmem:[%s6034_s14 + $0xb0] sm:$0xff]  ;;  %v6127_v24 = vld [vmem:[%s6034_s14 + $0xa8] sm:$0xff] }
  0x23   : > { %v6133_v25 = vld [vmem:[%s6034_s14 + $0xd0] sm:$0xff]  ;;  %v6136_v26 = vld [vmem:[%s6034_s14 + $0xc8] sm:$0xff]  ;;  %v6139_v27 = vld [vmem:[%s6034_s14 + $0xc0] sm:$0xff] }
  0x24   : > { %359 = vperm.xlu2 %5645, %v6049_v4   ;;  %353 = vperm.xlu1 %5644, %v6052_v5   ;;  %v6145_v28 = vld [vmem:[%s6034_s14 + $0xe8] sm:$0xff]  ;;  %v6148_v29 = vld [vmem:[%s6034_s14 + $0xe0] sm:$0xff]  ;;  %v6151_v30 = vld [vmem:[%s6034_s14 + $0xd8] sm:$0xff] }
  0x25   : > { %347 = vperm.xlu0 %5643, %v6055_v6   ;;  %v6164_v31 = vld [vmem:[%s6161_s17] sm:$0xff]  ;;  %v6167_v32 = vld [vmem:[%s6034_s14 + $0xf8] sm:$0xff]  ;;  %v6170_v33 = vld [vmem:[%s6034_s14 + $0xf0] sm:$0xff] }
  0x26   : > { %v6176_v34 = vld [vmem:[%s6161_s17 + $0x18] sm:$0xff]  ;;  %v6179_v35 = vld [vmem:[%s6161_s17 + $0x10] sm:$0xff]  ;;  %v6182_v36 = vld [vmem:[%s6161_s17 + $0x8] sm:$0xff] }
  0x27   : > { %v6190_v38 = vld [vmem:[%s6161_s17 + $0x30] sm:$0xff]  ;;  %v6193_v39 = vld [vmem:[%s6161_s17 + $0x28] sm:$0xff]  ;;  %v6196_v40 = vld [vmem:[%s6161_s17 + $0x20] sm:$0xff] }
  0x28   : > { %v6204_v42 = vld [vmem:[%s6161_s17 + $0x48] sm:$0xff]  ;;  %v6207_v43 = vld [vmem:[%s6161_s17 + $0x40] sm:$0xff]  ;;  %v6210_v44 = vld [vmem:[%s6161_s17 + $0x38] sm:$0xff] }
  0x29   : > { %v6218_v46 = vld [vmem:[%s6161_s17 + $0x60] sm:$0xff]  ;;  %v6221_v47 = vld [vmem:[%s6161_s17 + $0x58] sm:$0xff]  ;;  %v6224_v48 = vld [vmem:[%s6161_s17 + $0x50] sm:$0xff] }
  0x2a   : > { %v6236_v52 = vld [vmem:[%s6161_s17 + $0x78] sm:$0xff]  ;;  %v6239_v53 = vld [vmem:[%s6161_s17 + $0x70] sm:$0xff]  ;;  %v6242_v54 = vld [vmem:[%s6161_s17 + $0x68] sm:$0xff] }
  0x2b   : > { %v6254_v58 = vld [vmem:[%s6161_s17 + $0x90] sm:$0xff]  ;;  %v6257_v59 = vld [vmem:[%s6161_s17 + $0x88] sm:$0xff]  ;;  %v6260_v60 = vld [vmem:[%s6161_s17 + $0x80] sm:$0xff] }
  0x2c   : > { %368 = vperm.xlu2 %5645, %v6061_v7   ;;  %365 = vperm.xlu1 %5644, %v6064_v8   ;;  %11439 = vst [vmem:[#allocation16_spill] sm:$0xff] %v6257_v59  ;;  %v6272_v0 = vld [vmem:[%s6161_s17 + $0xa8] sm:$0xff] }
  0x2d   : > { %362 = vperm.xlu0 %5643, %v6067_v9   ;;  %11443 = vst [vmem:[#allocation20_spill] sm:$0xff] %v6272_v0 }
  0x34   : > { %377 = vperm.xlu2 %5645, %v6073_v10   ;;  %374 = vperm.xlu1 %5644, %v6076_v11  }
  0x35   : > { %371 = vperm.xlu0 %5643, %v6079_v12  }
  0x3c   : > { %386 = vperm.xlu2 %5645, %v6085_v13   ;;  %383 = vperm.xlu1 %5644, %v6088_v14  }
  0x3d   : > { %380 = vperm.xlu0 %5643, %v6091_v15  }
  0x44   : > { %395 = vperm.xlu2 %5645, %v6097_v16   ;;  %392 = vperm.xlu1 %5644, %v6100_v17  }
  0x45   : > { %389 = vperm.xlu0 %5643, %v6103_v18  }
  0x4c   : > { %404 = vperm.xlu2 %5645, %v6109_v19   ;;  %401 = vperm.xlu1 %5644, %v6112_v20  }
  0x4d   : > { %398 = vperm.xlu0 %5643, %v6115_v21  }
  0x54   : > { %413 = vperm.xlu2 %5645, %v6121_v22   ;;  %410 = vperm.xlu1 %5644, %v6124_v23  }
  0x55   : > { %407 = vperm.xlu0 %5643, %v6127_v24  }
  0x5c   : > { %422 = vperm.xlu2 %5645, %v6133_v25   ;;  %419 = vperm.xlu1 %5644, %v6136_v26  }
  0x5d   : > { %416 = vperm.xlu0 %5643, %v6139_v27  }
  0x64   : > { %431 = vperm.xlu2 %5645, %v6145_v28   ;;  %428 = vperm.xlu1 %5644, %v6148_v29  }
  0x65   : > { %425 = vperm.xlu0 %5643, %v6151_v30  }
  0x6c   : > { %473 = vperm.xlu2 %5645, %v6164_v31   ;;  %437 = vperm.xlu1 %5644, %v6167_v32  }
  0x6d   : > { %434 = vperm.xlu0 %5643, %v6170_v33  }
  0x74   : > { %488 = vperm.xlu2 %5645, %v6176_v34   ;;  %483 = vperm.xlu1 %5644, %v6179_v35  }
  0x75   : > { %478 = vperm.xlu0 %5643, %v6182_v36  }
  0x76   : > { %v6187_v37 = vpop.permute.xlu2 %356 }
  0x77   : > { %11430 = vst [vmem:[#allocation7_spill] sm:$0xff] %v6187_v37  ;;  %v6296_v37 = vld [vmem:[%s6161_s17 + $0xb0] sm:$0xff] }
  0x78   : > { %11451 = vst [vmem:[#allocation28_spill] sm:$0xff] %v6296_v37 }
  0x7c   : > { %503 = vperm.xlu2 %5645, %v6190_v38   ;;  %498 = vperm.xlu1 %5644, %v6193_v39  }
  0x7d   : > { %493 = vperm.xlu0 %5643, %v6196_v40  }
  0x7e   : > { %v6201_v41 = vpop.permute.xlu2 %359 }
  0x7f   : > { %11431 = vst [vmem:[#allocation8_spill] sm:$0xff] %v6201_v41  ;;  %v6293_v41 = vld [vmem:[%s6161_s17 + $0xb8] sm:$0xff] }
  0x80   : > { %11450 = vst [vmem:[#allocation27_spill] sm:$0xff] %v6293_v41 }
  0x84   : > { %518 = vperm.xlu2 %5645, %v6204_v42   ;;  %513 = vperm.xlu1 %5644, %v6207_v43  }
  0x85   : > { %508 = vperm.xlu0 %5643, %v6210_v44  }
  0x86   : > { %v6215_v45 = vpop.permute.xlu2 %368 }
  0x87   : > { %11432 = vst [vmem:[#allocation9_spill] sm:$0xff] %v6215_v45  ;;  %v6290_v45 = vld [vmem:[%s6161_s17 + $0xc0] sm:$0xff] }
  0x88   : > { %11449 = vst [vmem:[#allocation26_spill] sm:$0xff] %v6290_v45 }
  0x8c   : > { %533 = vperm.xlu2 %5645, %v6218_v46   ;;  %528 = vperm.xlu1 %5644, %v6221_v47  }
  0x8d   : > { %523 = vperm.xlu0 %5643, %v6224_v48  }
  0x8e   : > { %v6229_v49 = vpop.permute.xlu2 %377  ;;  %v6231_v50 = vpop.permute.xlu1 %350 }
  0x8f   : > { %11433 = vst [vmem:[#allocation10_spill] sm:$0xff] %v6229_v49  ;;  %v6233_v51 = vpop.permute.xlu0 %344 }
  0x90   : > { %11434 = vst [vmem:[#allocation11_spill] sm:$0xff] %v6231_v50  ;;  %v6278_v50 = vld [vmem:[%s6161_s17 + $0x98] sm:$0xff] }
  0x91   : > { %11435 = vst [vmem:[#allocation12_spill] sm:$0xff] %v6233_v51  ;;  %v6311_v51 = vld [vmem:[%s6161_s17 + $0xd0] sm:$0xff] }
  0x92   : > { %11445 = vst [vmem:[#allocation22_spill] sm:$0xff] %v6278_v50 }
  0x93   : > { %11456 = vst [vmem:[#allocation33_spill] sm:$0xff] %v6311_v51 }
  0x94   : > { %548 = vperm.xlu2 %5645, %v6236_v52   ;;  %543 = vperm.xlu1 %5644, %v6239_v53  }
  0x95   : > { %538 = vperm.xlu0 %5643, %v6242_v54  }
  0x96   : > { %v6247_v55 = vpop.permute.xlu2 %386  ;;  %v6249_v56 = vpop.permute.xlu1 %353 }
  0x97   : > { %11436 = vst [vmem:[#allocation13_spill] sm:$0xff] %v6247_v55  ;;  %v6251_v57 = vpop.permute.xlu0 %347  ;;  %v6314_v55 = vld [vmem:[%s6161_s17 + $0xc8] sm:$0xff] }
  0x98   : > { %11437 = vst [vmem:[#allocation14_spill] sm:$0xff] %v6249_v56  ;;  %v6275_v56 = vld [vmem:[%s6161_s17 + $0xa0] sm:$0xff] }
  0x99   : > { %11438 = vst [vmem:[#allocation15_spill] sm:$0xff] %v6251_v57  ;;  %v6308_v57 = vld [vmem:[%s6161_s17 + $0xd8] sm:$0xff] }
  0x9a   : > { %11444 = vst [vmem:[#allocation21_spill] sm:$0xff] %v6275_v56 }
  0x9b   : > { %11455 = vst [vmem:[#allocation32_spill] sm:$0xff] %v6308_v57 }
  0x9c   : > { %563 = vperm.xlu2 %5645, %v6254_v58   ;;  %558 = vperm.xlu1 %5644, %v6257_v59   ;;  %11457 = vst [vmem:[#allocation34_spill] sm:$0xff] %v6314_v55 }
  0x9d   : > { %553 = vperm.xlu0 %5643, %v6260_v60  }
  0x9e   : > { %v6265_v61 = vpop.permute.xlu2 %395  ;;  %v6267_v62 = vpop.permute.xlu1 %365 }
  0x9f   : > { %11440 = vst [vmem:[#allocation17_spill] sm:$0xff] %v6265_v61  ;;  %v6269_v63 = vpop.permute.xlu0 %362 }
  0xa0   : > { %11441 = vst [vmem:[#allocation18_spill] sm:$0xff] %v6267_v62 }
  0xa1   : > { %11442 = vst [vmem:[#allocation19_spill] sm:$0xff] %v6269_v63 }
  0xa4   : > { %578 = vperm.xlu2 %5645, %v6272_v0   ;;  %573 = vperm.xlu1 %5644, %v6275_v56  }
  0xa5   : > { %568 = vperm.xlu0 %5643, %v6278_v50  }
  0xa6   : > { %v6283_v61 = vpop.permute.xlu2 %404  ;;  %v6285_v62 = vpop.permute.xlu1 %374 }
  0xa7   : > { %11446 = vst [vmem:[#allocation23_spill] sm:$0xff] %v6283_v61  ;;  %v6287_v63 = vpop.permute.xlu0 %371 }
  0xa8   : > { %11447 = vst [vmem:[#allocation24_spill] sm:$0xff] %v6285_v62 }
  0xa9   : > { %11448 = vst [vmem:[#allocation25_spill] sm:$0xff] %v6287_v63 }
  0xac   : > { %593 = vperm.xlu2 %5645, %v6290_v45   ;;  %588 = vperm.xlu1 %5644, %v6293_v41   ;;  %v6329_v45 = vld [vmem:[%s6161_s17 + $0xe8] sm:$0xff]  ;;  %v6332_v41 = vld [vmem:[%s6161_s17 + $0xe0] sm:$0xff] }
  0xad   : > { %583 = vperm.xlu0 %5643, %v6296_v37   ;;  %11462 = vst [vmem:[#allocation39_spill] sm:$0xff] %v6329_v45 }
  0xae   : > { %v6301_v61 = vpop.permute.xlu2 %413  ;;  %v6303_v49 = vpop.permute.xlu1 %383  ;;  %11463 = vst [vmem:[#allocation40_spill] sm:$0xff] %v6332_v41 }
  0xaf   : > { %11452 = vst [vmem:[#allocation29_spill] sm:$0xff] %v6301_v61  ;;  %v6305_v63 = vpop.permute.xlu0 %380 }
  0xb0   : > { %11453 = vst [vmem:[#allocation30_spill] sm:$0xff] %v6303_v49 }
  0xb1   : > { %11454 = vst [vmem:[#allocation31_spill] sm:$0xff] %v6305_v63  ;;  %v6326_v63 = vld [vmem:[%s6161_s17 + $0xf0] sm:$0xff] }
  0xb2   : > { %11461 = vst [vmem:[#allocation38_spill] sm:$0xff] %v6326_v63 }
  0xb4   : > { %608 = vperm.xlu2 %5645, %v6308_v57   ;;  %603 = vperm.xlu1 %5644, %v6311_v51  }
  0xb5   : > { %598 = vperm.xlu0 %5643, %v6314_v55  }
  0xb6   : > { %v6319_v62 = vpop.permute.xlu2 %422  ;;  %v6321_v61 = vpop.permute.xlu1 %392 }
  0xb7   : > { %11458 = vst [vmem:[#allocation35_spill] sm:$0xff] %v6319_v62  ;;  %v6323_v49 = vpop.permute.xlu0 %389 }
  0xb8   : > { %11459 = vst [vmem:[#allocation36_spill] sm:$0xff] %v6321_v61  ;;  %v6344_v61 = vld [vmem:[%s6161_s17 + $0xf8] sm:$0xff] }
  0xb9   : > { %11460 = vst [vmem:[#allocation37_spill] sm:$0xff] %v6323_v49  ;;  %v5932_v49 = vmov 1  }
  0xba   : > { %11467 = vst [vmem:[#allocation44_spill] sm:$0xff] %v6344_v61 }
  0xbc   : > { %623 = vperm.xlu2 %5645, %v6326_v63   ;;  %618 = vperm.xlu1 %5644, %v6329_v45  }
  0xbd   : > { %613 = vperm.xlu0 %5643, %v6332_v41  }
  0xbe   : > { %v6337_v57 = vpop.permute.xlu2 %431  ;;  %v6339_v51 = vpop.permute.xlu1 %401 }
  0xbf   : > { %11464 = vst [vmem:[#allocation41_spill] sm:$0xff] %v6337_v57  ;;  %v6341_v62 = vpop.permute.xlu0 %398 }
  0xc0   : > { %11465 = vst [vmem:[#allocation42_spill] sm:$0xff] %v6339_v51 }
  0xc1   : > { %11466 = vst [vmem:[#allocation43_spill] sm:$0xff] %v6341_v62 }
  0xc4   : > { %5647 = vset.pattern.permute.xlu2 %v5932_v49  ;;  %5646 = vset.pattern.permute.xlu1 %v5932_v49 }
  0xc5   : > { %628 = vperm.xlu0 %5643, %v6344_v61   ;;  %699 = vperm.xlu2 %5647, %v6055_v6  }
  0xc6   : > { %696 = vperm.xlu1 %5646, %v6043_v3   ;;  %v6349_v63 = vpop.permute.xlu2 %473  ;;  %v6351_v45 = vpop.permute.xlu1 %410 }
  0xc7   : > { %11468 = vst [vmem:[#allocation45_spill] sm:$0xff] %v6349_v63  ;;  %v6353_v57 = vpop.permute.xlu0 %407 }
  0xc8   : > { %11469 = vst [vmem:[#allocation46_spill] sm:$0xff] %v6351_v45 }
  0xc9   : > { %11470 = vst [vmem:[#allocation47_spill] sm:$0xff] %v6353_v57 }
  0xcd   : > { %5648 = vset.pattern.permute.xlu0 %v5932_v49  ;;  %708 = vperm.xlu2 %5647, %v6037_v1  }
  0xce   : > { %705 = vperm.xlu1 %5646, %v6052_v5   ;;  %702 = vperm.xlu0 %5648, %v6040_v2   ;;  %v6358_v62 = vpop.permute.xlu2 %488  ;;  %v6360_v51 = vpop.permute.xlu1 %419 }
  0xcf   : > { %11471 = vst [vmem:[#allocation48_spill] sm:$0xff] %v6358_v62  ;;  %v6362_v6 = vpop.permute.xlu0 %416 }
  0xd0   : > { %11472 = vst [vmem:[#allocation49_spill] sm:$0xff] %v6360_v51 }
  0xd1   : > { %11473 = vst [vmem:[#allocation50_spill] sm:$0xff] %v6362_v6 }
  0xd5   : > { %714 = vperm.xlu2 %5647, %v6067_v9  }
  0xd6   : > { %711 = vperm.xlu1 %5646, %v6049_v4   ;;  %717 = vperm.xlu0 %5648, %v6064_v8   ;;  %v6367_v57 = vpop.permute.xlu2 %503  ;;  %v6369_v49 = vpop.permute.xlu1 %428 }
  0xd7   : > { %11474 = vst [vmem:[#allocation51_spill] sm:$0xff] %v6367_v57  ;;  %v6371_v45 = vpop.permute.xlu0 %425 }
  0xd8   : > { %11475 = vst [vmem:[#allocation52_spill] sm:$0xff] %v6369_v49 }
  0xd9   : > { %11476 = vst [vmem:[#allocation53_spill] sm:$0xff] %v6371_v45 }
  0xdd   : > { %723 = vperm.xlu2 %5647, %v6079_v12  }
  0xde   : > { %720 = vperm.xlu1 %5646, %v6061_v7   ;;  %726 = vperm.xlu0 %5648, %v6076_v11   ;;  %v6376_v51 = vpop.permute.xlu2 %518  ;;  %v6378_v6 = vpop.permute.xlu1 %437 }
  0xdf   : > { %11477 = vst [vmem:[#allocation54_spill] sm:$0xff] %v6376_v51  ;;  %v6380_v62 = vpop.permute.xlu0 %434 }
  0xe0   : > { %11478 = vst [vmem:[#allocation55_spill] sm:$0xff] %v6378_v6 }
  0xe1   : > { %11479 = vst [vmem:[#allocation56_spill] sm:$0xff] %v6380_v62 }
  0xe5   : > { %732 = vperm.xlu2 %5647, %v6091_v15  }
  0xe6   : > { %729 = vperm.xlu1 %5646, %v6073_v10   ;;  %735 = vperm.xlu0 %5648, %v6088_v14   ;;  %v6385_v49 = vpop.permute.xlu2 %533  ;;  %v6387_v45 = vpop.permute.xlu1 %483 }
  0xe7   : > { %11480 = vst [vmem:[#allocation57_spill] sm:$0xff] %v6385_v49  ;;  %v6389_v57 = vpop.permute.xlu0 %478 }
  0xe8   : > { %11481 = vst [vmem:[#allocation58_spill] sm:$0xff] %v6387_v45 }
  0xe9   : > { %11482 = vst [vmem:[#allocation59_spill] sm:$0xff] %v6389_v57 }
  0xed   : > { %741 = vperm.xlu2 %5647, %v6103_v18  }
  0xee   : > { %738 = vperm.xlu1 %5646, %v6085_v13   ;;  %744 = vperm.xlu0 %5648, %v6100_v17   ;;  %v6394_v6 = vpop.permute.xlu2 %548  ;;  %v6396_v62 = vpop.permute.xlu1 %498 }
  0xef   : > { %11483 = vst [vmem:[#allocation60_spill] sm:$0xff] %v6394_v6  ;;  %v6398_v51 = vpop.permute.xlu0 %493 }
  0xf0   : > { %11484 = vst [vmem:[#allocation61_spill] sm:$0xff] %v6396_v62 }
  0xf1   : > { %11485 = vst [vmem:[#allocation62_spill] sm:$0xff] %v6398_v51 }
  0xf5   : > { %750 = vperm.xlu2 %5647, %v6115_v21  }
  0xf6   : > { %747 = vperm.xlu1 %5646, %v6097_v16   ;;  %753 = vperm.xlu0 %5648, %v6112_v20   ;;  %v6403_v45 = vpop.permute.xlu2 %563  ;;  %v6405_v49 = vpop.permute.xlu1 %513 }
  0xf7   : > { %11486 = vst [vmem:[#allocation63_spill] sm:$0xff] %v6403_v45  ;;  %v6407_v57 = vpop.permute.xlu0 %508 }
  0xf8   : > { %11487 = vst [vmem:[#allocation64_spill] sm:$0xff] %v6405_v49 }
  0xf9   : > { %11488 = vst [vmem:[#allocation65_spill] sm:$0xff] %v6407_v57 }
  0xfd   : > { %759 = vperm.xlu2 %5647, %v6127_v24  }
  0xfe   : > { %756 = vperm.xlu1 %5646, %v6109_v19   ;;  %762 = vperm.xlu0 %5648, %v6124_v23   ;;  %v6412_v62 = vpop.permute.xlu2 %578  ;;  %v6414_v51 = vpop.permute.xlu1 %528 }
  0xff   : > { %11489 = vst [vmem:[#allocation66_spill] sm:$0xff] %v6412_v62  ;;  %v6416_v6 = vpop.permute.xlu0 %523 }
 0x100   : > { %11490 = vst [vmem:[#allocation67_spill] sm:$0xff] %v6414_v51 }
 0x101   : > { %11491 = vst [vmem:[#allocation68_spill] sm:$0xff] %v6416_v6 }
 0x105   : > { %768 = vperm.xlu2 %5647, %v6139_v27  }
 0x106   : > { %765 = vperm.xlu1 %5646, %v6121_v22   ;;  %771 = vperm.xlu0 %5648, %v6136_v26   ;;  %v6421_v49 = vpop.permute.xlu2 %593  ;;  %v6423_v57 = vpop.permute.xlu1 %543 }
 0x107   : > { %11492 = vst [vmem:[#allocation69_spill] sm:$0xff] %v6421_v49  ;;  %v6425_v45 = vpop.permute.xlu0 %538 }
 0x108   : > { %11493 = vst [vmem:[#allocation70_spill] sm:$0xff] %v6423_v57 }
 0x109   : > { %11494 = vst [vmem:[#allocation71_spill] sm:$0xff] %v6425_v45 }
 0x10d   : > { %777 = vperm.xlu2 %5647, %v6151_v30  }
 0x10e   : > { %774 = vperm.xlu1 %5646, %v6133_v25   ;;  %780 = vperm.xlu0 %5648, %v6148_v29   ;;  %v6430_v62 = vpop.permute.xlu2 %608  ;;  %v6432_v51 = vpop.permute.xlu1 %558 }
 0x10f   : > { %11495 = vst [vmem:[#allocation72_spill] sm:$0xff] %v6430_v62  ;;  %v6434_v63 = vpop.permute.xlu0 %553 }
 0x110   : > { %11496 = vst [vmem:[#allocation73_spill] sm:$0xff] %v6432_v51 }
 0x111   : > { %11497 = vst [vmem:[#allocation74_spill] sm:$0xff] %v6434_v63 }
 0x115   : > { %786 = vperm.xlu2 %5647, %v6170_v33  }
 0x116   : > { %783 = vperm.xlu1 %5646, %v6145_v28   ;;  %789 = vperm.xlu0 %5648, %v6167_v32   ;;  %v6439_v49 = vpop.permute.xlu2 %623  ;;  %v6441_v45 = vpop.permute.xlu1 %573 }
 0x117   : > { %11498 = vst [vmem:[#allocation75_spill] sm:$0xff] %v6439_v49  ;;  %v6443_v57 = vpop.permute.xlu0 %568 }
 0x118   : > { %11499 = vst [vmem:[#allocation76_spill] sm:$0xff] %v6441_v45 }
 0x119   : > { %11500 = vst [vmem:[#allocation77_spill] sm:$0xff] %v6443_v57 }
 0x11d   : > { %828 = vperm.xlu2 %5647, %v6182_v36  }
 0x11e   : > { %824 = vperm.xlu1 %5646, %v6164_v31   ;;  %832 = vperm.xlu0 %5648, %v6179_v35   ;;  %v6448_v62 = vpop.permute.xlu1 %588 }
 0x11f   : > { %11501 = vst [vmem:[#allocation78_spill] sm:$0xff] %v6448_v62  ;;  %v6450_v63 = vpop.permute.xlu0 %583  ;;  %v6452_v51 = vpop.permute.xlu2 %699 }
 0x120   : > { %11502 = vst [vmem:[#allocation79_spill] sm:$0xff] %v6450_v63 }
 0x121   : > { %11503 = vst [vmem:[#allocation80_spill] sm:$0xff] %v6452_v51 }
 0x125   : > { %840 = vperm.xlu2 %5647, %v6196_v40  }
 0x126   : > { %836 = vperm.xlu1 %5646, %v6176_v34   ;;  %844 = vperm.xlu0 %5648, %v6193_v39   ;;  %v6457_v49 = vpop.permute.xlu1 %603 }
 0x127   : > { %11504 = vst [vmem:[#allocation81_spill] sm:$0xff] %v6457_v49  ;;  %v6459_v57 = vpop.permute.xlu0 %598  ;;  %v6461_v45 = vpop.permute.xlu2 %708 }
 0x128   : > { %11505 = vst [vmem:[#allocation82_spill] sm:$0xff] %v6459_v57 }
 0x129   : > { %11506 = vst [vmem:[#allocation83_spill] sm:$0xff] %v6461_v45 }
 0x12d   : > { %852 = vperm.xlu2 %5647, %v6210_v44  }
 0x12e   : > { %848 = vperm.xlu1 %5646, %v6190_v38   ;;  %856 = vperm.xlu0 %5648, %v6207_v43   ;;  %v6466_v62 = vpop.permute.xlu1 %618 }
 0x12f   : > { %11507 = vst [vmem:[#allocation84_spill] sm:$0xff] %v6466_v62  ;;  %v6468_v63 = vpop.permute.xlu0 %613  ;;  %v6470_v51 = vpop.permute.xlu2 %714 }
 0x130   : > { %11508 = vst [vmem:[#allocation85_spill] sm:$0xff] %v6468_v63 }
 0x131   : > { %11509 = vst [vmem:[#allocation86_spill] sm:$0xff] %v6470_v51 }
 0x135   : > { %864 = vperm.xlu2 %5647, %v6224_v48  }
 0x136   : > { %860 = vperm.xlu1 %5646, %v6204_v42   ;;  %868 = vperm.xlu0 %5648, %v6221_v47  }
 0x137   : > { %v6475_v49 = vpop.permute.xlu0 %628  ;;  %v6477_v57 = vpop.permute.xlu2 %723 }
 0x138   : > { %11510 = vst [vmem:[#allocation87_spill] sm:$0xff] %v6475_v49  ;;  %v6479_v45 = vpop.permute.xlu1 %696 }
 0x139   : > { %11511 = vst [vmem:[#allocation88_spill] sm:$0xff] %v6477_v57 }
 0x13a   : > { %11512 = vst [vmem:[#allocation89_spill] sm:$0xff] %v6479_v45 }
 0x13d   : > { %876 = vperm.xlu2 %5647, %v6242_v54  }
 0x13e   : > { %872 = vperm.xlu1 %5646, %v6218_v46   ;;  %880 = vperm.xlu0 %5648, %v6239_v53  }
 0x13f   : > { %v6484_v63 = vpop.permute.xlu2 %732 }
 0x140   : > { %11513 = vst [vmem:[#allocation90_spill] sm:$0xff] %v6484_v63  ;;  %v6486_v62 = vpop.permute.xlu1 %705  ;;  %v6488_v51 = vpop.permute.xlu0 %702 }
 0x141   : > { %11514 = vst [vmem:[#allocation91_spill] sm:$0xff] %v6486_v62 }
 0x142   : > { %11515 = vst [vmem:[#allocation92_spill] sm:$0xff] %v6488_v51 }
 0x145   : > { %888 = vperm.xlu2 %5647, %v6260_v60  }
 0x146   : > { %884 = vperm.xlu1 %5646, %v6236_v52   ;;  %892 = vperm.xlu0 %5648, %v6257_v59  }
 0x147   : > { %v6493_v49 = vpop.permute.xlu2 %741 }
 0x148   : > { %11516 = vst [vmem:[#allocation93_spill] sm:$0xff] %v6493_v49  ;;  %v6495_v57 = vpop.permute.xlu1 %711  ;;  %v6497_v45 = vpop.permute.xlu0 %717  ;;  %v11522_v49 = vld [vmem:[#allocation27_spill] sm:$0xff] }
 0x149   : > { %11517 = vst [vmem:[#allocation94_spill] sm:$0xff] %v6495_v57 }
 0x14a   : > { %11518 = vst [vmem:[#allocation95_spill] sm:$0xff] %v6497_v45 }
 0x14d   : > { %900 = vperm.xlu2 %5647, %v6278_v50   ;;  %v11526_v50 = vld [vmem:[#allocation26_spill] sm:$0xff] }
 0x14e   : > { %896 = vperm.xlu1 %5646, %v6254_v58   ;;  %904 = vperm.xlu0 %5648, %v6275_v56  }
 0x14f   : > { %v6502_v62 = vpop.permute.xlu2 %750 }
 0x150   : > { %11519 = vst [vmem:[#allocation96_spill] sm:$0xff] %v6502_v62  ;;  %v6504_v63 = vpop.permute.xlu1 %720  ;;  %v6506_v51 = vpop.permute.xlu0 %726  ;;  %v11527_v62 = vld [vmem:[#allocation33_spill] sm:$0xff] }
 0x151   : > { %11520 = vst [vmem:[#allocation97_spill] sm:$0xff] %v6504_v63 }
 0x152   : > { %11521 = vst [vmem:[#allocation98_spill] sm:$0xff] %v6506_v51 }
 0x155   : > { %912 = vperm.xlu2 %5647, %v6296_v37  }
 0x156   : > { %908 = vperm.xlu1 %5646, %v6272_v0   ;;  %916 = vperm.xlu0 %5648, %v11522_v49   ;;  %v11531_v49 = vld [vmem:[#allocation32_spill] sm:$0xff] }
 0x157   : > { %v6511_v57 = vpop.permute.xlu2 %759 }
 0x158   : > { %11523 = vst [vmem:[#allocation99_spill] sm:$0xff] %v6511_v57  ;;  %v6513_v45 = vpop.permute.xlu1 %729  ;;  %v6515_v6 = vpop.permute.xlu0 %735  ;;  %v11532_v57 = vld [vmem:[#allocation39_spill] sm:$0xff] }
 0x159   : > { %11524 = vst [vmem:[#allocation100_spill] sm:$0xff] %v6513_v45 }
 0x15a   : > { %11525 = vst [vmem:[#allocation101_spill] sm:$0xff] %v6515_v6 }
 0x15d   : > { %924 = vperm.xlu2 %5647, %v6314_v55  }
 0x15e   : > { %920 = vperm.xlu1 %5646, %v11526_v50   ;;  %928 = vperm.xlu0 %5648, %v11527_v62   ;;  %v11536_v62 = vld [vmem:[#allocation38_spill] sm:$0xff] }
 0x15f   : > { %v6520_v63 = vpop.permute.xlu2 %768 }
 0x160   : > { %11528 = vst [vmem:[#allocation102_spill] sm:$0xff] %v6520_v63  ;;  %v6522_v51 = vpop.permute.xlu1 %738  ;;  %v6524_v37 = vpop.permute.xlu0 %744  ;;  %v5933_v63 = vmov 2  }
 0x161   : > { %11529 = vst [vmem:[#allocation103_spill] sm:$0xff] %v6522_v51 }
 0x162   : > { %11530 = vst [vmem:[#allocation104_spill] sm:$0xff] %v6524_v37 }
 0x165   : > { %936 = vperm.xlu2 %5647, %v6332_v41  }
 0x166   : > { %932 = vperm.xlu1 %5646, %v11531_v49   ;;  %940 = vperm.xlu0 %5648, %v11532_v57  }
 0x167   : > { %v6529_v45 = vpop.permute.xlu2 %777 }
 0x168   : > { %11533 = vst [vmem:[#allocation39_spill] sm:$0xff] %v6529_v45  ;;  %v6531_v6 = vpop.permute.xlu1 %747  ;;  %v6533_v55 = vpop.permute.xlu0 %753  ;;  %v11540_v45 = vld [vmem:[#allocation6_spill] sm:$0xff] }
 0x169   : > { %11534 = vst [vmem:[#allocation105_spill] sm:$0xff] %v6531_v6 }
 0x16a   : > { %11535 = vst [vmem:[#allocation106_spill] sm:$0xff] %v6533_v55 }
 0x16d   : > { %948 = vperm.xlu2 %5647, %v6344_v61  }
 0x16e   : > { %944 = vperm.xlu1 %5646, %v11536_v62   ;;  %5649 = vset.pattern.permute.xlu0 %v5933_v63 }
 0x16f   : > { %1016 = vperm.xlu0 %5649, %v6043_v3   ;;  %v6538_v37 = vpop.permute.xlu2 %786 }
 0x170   : > { %11537 = vst [vmem:[#allocation38_spill] sm:$0xff] %v6538_v37  ;;  %v6540_v51 = vpop.permute.xlu1 %756  ;;  %v6542_v41 = vpop.permute.xlu0 %762 }
 0x171   : > { %11538 = vst [vmem:[#allocation107_spill] sm:$0xff] %v6540_v51 }
 0x172   : > { %11539 = vst [vmem:[#allocation108_spill] sm:$0xff] %v6542_v41 }
 0x175   : > { %5651 = vset.pattern.permute.xlu2 %v5933_v63 }
 0x176   : > { %5650 = vset.pattern.permute.xlu1 %v5933_v63  ;;  %1022 = vperm.xlu2 %5651, %v6040_v2  }
 0x177   : > { %1019 = vperm.xlu1 %5650, %v11540_v45   ;;  %1031 = vperm.xlu0 %5649, %v6049_v4   ;;  %v6547_v6 = vpop.permute.xlu2 %828 }
 0x178   : > { %11541 = vst [vmem:[#allocation6_spill] sm:$0xff] %v6547_v6  ;;  %v6549_v55 = vpop.permute.xlu1 %765  ;;  %v6551_v61 = vpop.permute.xlu0 %771 }
 0x179   : > { %11542 = vst [vmem:[#allocation109_spill] sm:$0xff] %v6549_v55 }
 0x17a   : > { %11543 = vst [vmem:[#allocation110_spill] sm:$0xff] %v6551_v61 }
 0x17e   : > { %1028 = vperm.xlu2 %5651, %v6037_v1  }
 0x17f   : > { %1025 = vperm.xlu1 %5650, %v6052_v5   ;;  %1040 = vperm.xlu0 %5649, %v6061_v7   ;;  %v6556_v37 = vpop.permute.xlu2 %840 }
 0x180   : > { %11544 = vst [vmem:[#allocation111_spill] sm:$0xff] %v6556_v37  ;;  %v6558_v63 = vpop.permute.xlu1 %774  ;;  %v6560_v51 = vpop.permute.xlu0 %780 }
 0x181   : > { %11545 = vst [vmem:[#allocation112_spill] sm:$0xff] %v6558_v63 }
 0x182   : > { %11546 = vst [vmem:[#allocation113_spill] sm:$0xff] %v6560_v51 }
 0x186   : > { %1037 = vperm.xlu2 %5651, %v6064_v8  }
 0x187   : > { %1034 = vperm.xlu1 %5650, %v6067_v9   ;;  %1049 = vperm.xlu0 %5649, %v6073_v10   ;;  %v6565_v55 = vpop.permute.xlu2 %852 }
 0x188   : > { %11547 = vst [vmem:[#allocation114_spill] sm:$0xff] %v6565_v55  ;;  %v6567_v61 = vpop.permute.xlu1 %783  ;;  %v6569_v41 = vpop.permute.xlu0 %789 }
 0x189   : > { %11548 = vst [vmem:[#allocation115_spill] sm:$0xff] %v6567_v61 }
 0x18a   : > { %11549 = vst [vmem:[#allocation116_spill] sm:$0xff] %v6569_v41 }
 0x18e   : > { %1046 = vperm.xlu2 %5651, %v6076_v11  }
 0x18f   : > { %1043 = vperm.xlu1 %5650, %v6079_v12   ;;  %1058 = vperm.xlu0 %5649, %v6085_v13   ;;  %v6574_v63 = vpop.permute.xlu2 %864 }
 0x190   : > { %11550 = vst [vmem:[#allocation117_spill] sm:$0xff] %v6574_v63  ;;  %v6576_v51 = vpop.permute.xlu1 %824  ;;  %v6578_v37 = vpop.permute.xlu0 %832  ;;  %v11594_v63 = vld [vmem:[#allocation27_spill] sm:$0xff] }
 0x191   : > { %11551 = vst [vmem:[#allocation118_spill] sm:$0xff] %v6576_v51 }
 0x192   : > { %11552 = vst [vmem:[#allocation119_spill] sm:$0xff] %v6578_v37 }
 0x196   : > { %1055 = vperm.xlu2 %5651, %v6088_v14  }
 0x197   : > { %1052 = vperm.xlu1 %5650, %v6091_v15   ;;  %1067 = vperm.xlu0 %5649, %v6097_v16   ;;  %v6583_v61 = vpop.permute.xlu2 %876 }
 0x198   : > { %11553 = vst [vmem:[#allocation120_spill] sm:$0xff] %v6583_v61  ;;  %v6585_v41 = vpop.permute.xlu1 %836  ;;  %v6587_v55 = vpop.permute.xlu0 %844 }
 0x199   : > { %11554 = vst [vmem:[#allocation121_spill] sm:$0xff] %v6585_v41 }
 0x19a   : > { %11555 = vst [vmem:[#allocation122_spill] sm:$0xff] %v6587_v55 }
 0x19e   : > { %1064 = vperm.xlu2 %5651, %v6100_v17  }
 0x19f   : > { %1061 = vperm.xlu1 %5650, %v6103_v18   ;;  %1076 = vperm.xlu0 %5649, %v6109_v19   ;;  %v6592_v6 = vpop.permute.xlu2 %888 }
 0x1a0   : > { %11556 = vst [vmem:[#allocation123_spill] sm:$0xff] %v6592_v6  ;;  %v6594_v37 = vpop.permute.xlu1 %848  ;;  %v6596_v51 = vpop.permute.xlu0 %856 }
 0x1a1   : > { %11557 = vst [vmem:[#allocation124_spill] sm:$0xff] %v6594_v37 }
 0x1a2   : > { %11558 = vst [vmem:[#allocation125_spill] sm:$0xff] %v6596_v51 }
 0x1a6   : > { %1073 = vperm.xlu2 %5651, %v6112_v20  }
 0x1a7   : > { %1070 = vperm.xlu1 %5650, %v6115_v21   ;;  %1085 = vperm.xlu0 %5649, %v6121_v22   ;;  %v6601_v41 = vpop.permute.xlu2 %900 }
 0x1a8   : > { %11559 = vst [vmem:[#allocation126_spill] sm:$0xff] %v6601_v41  ;;  %v6603_v55 = vpop.permute.xlu1 %860  ;;  %v6605_v61 = vpop.permute.xlu0 %868 }
 0x1a9   : > { %11560 = vst [vmem:[#allocation127_spill] sm:$0xff] %v6603_v55 }
 0x1aa   : > { %11561 = vst [vmem:[#allocation128_spill] sm:$0xff] %v6605_v61 }
 0x1ae   : > { %1082 = vperm.xlu2 %5651, %v6124_v23  }
 0x1af   : > { %1079 = vperm.xlu1 %5650, %v6127_v24   ;;  %1094 = vperm.xlu0 %5649, %v6133_v25   ;;  %v6610_v37 = vpop.permute.xlu2 %912 }
 0x1b0   : > { %11562 = vst [vmem:[#allocation129_spill] sm:$0xff] %v6610_v37  ;;  %v6612_v51 = vpop.permute.xlu1 %872  ;;  %v6614_v6 = vpop.permute.xlu0 %880 }
 0x1b1   : > { %11563 = vst [vmem:[#allocation130_spill] sm:$0xff] %v6612_v51 }
 0x1b2   : > { %11564 = vst [vmem:[#allocation131_spill] sm:$0xff] %v6614_v6 }
 0x1b6   : > { %1091 = vperm.xlu2 %5651, %v6136_v26  }
 0x1b7   : > { %1088 = vperm.xlu1 %5650, %v6139_v27   ;;  %1103 = vperm.xlu0 %5649, %v6145_v28   ;;  %v6623_v61 = vpop.permute.xlu2 %924 }
 0x1b8   : > { %v6619_v41 = vpop.permute.xlu1 %884  ;;  %v6621_v55 = vpop.permute.xlu0 %892  ;;  %11567 = vst [vmem:[#allocation134_spill] sm:$0xff] %v6623_v61 }
 0x1b9   : > { %11565 = vst [vmem:[#allocation132_spill] sm:$0xff] %v6619_v41 }
 0x1ba   : > { %11566 = vst [vmem:[#allocation133_spill] sm:$0xff] %v6621_v55 }
 0x1be   : > { %1100 = vperm.xlu2 %5651, %v6148_v29  }
 0x1bf   : > { %1097 = vperm.xlu1 %5650, %v6151_v30   ;;  %1144 = vperm.xlu0 %5649, %v6164_v31   ;;  %v6632_v6 = vpop.permute.xlu2 %936 }
 0x1c0   : > { %v6628_v37 = vpop.permute.xlu1 %896  ;;  %v6630_v51 = vpop.permute.xlu0 %904  ;;  %11570 = vst [vmem:[#allocation137_spill] sm:$0xff] %v6632_v6 }
 0x1c1   : > { %11568 = vst [vmem:[#allocation135_spill] sm:$0xff] %v6628_v37 }
 0x1c2   : > { %11569 = vst [vmem:[#allocation136_spill] sm:$0xff] %v6630_v51 }
 0x1c6   : > { %1109 = vperm.xlu2 %5651, %v6167_v32  }
 0x1c7   : > { %1106 = vperm.xlu1 %5650, %v6170_v33   ;;  %1156 = vperm.xlu0 %5649, %v6176_v34   ;;  %v6641_v41 = vpop.permute.xlu2 %948 }
 0x1c8   : > { %v6637_v55 = vpop.permute.xlu1 %908  ;;  %v6639_v61 = vpop.permute.xlu0 %916  ;;  %11573 = vst [vmem:[#allocation140_spill] sm:$0xff] %v6641_v41 }
 0x1c9   : > { %11571 = vst [vmem:[#allocation138_spill] sm:$0xff] %v6637_v55 }
 0x1ca   : > { %11572 = vst [vmem:[#allocation139_spill] sm:$0xff] %v6639_v61 }
 0x1ce   : > { %1152 = vperm.xlu2 %5651, %v6179_v35  }
 0x1cf   : > { %1148 = vperm.xlu1 %5650, %v6182_v36   ;;  %1168 = vperm.xlu0 %5649, %v6190_v38  }
 0x1d0   : > { %v6646_v51 = vpop.permute.xlu1 %920  ;;  %v6648_v6 = vpop.permute.xlu0 %928 }
 0x1d1   : > { %11574 = vst [vmem:[#allocation141_spill] sm:$0xff] %v6646_v51  ;;  %v6651_v37 = vpop.permute.xlu2 %1022 }
 0x1d2   : > { %11575 = vst [vmem:[#allocation142_spill] sm:$0xff] %v6648_v6 }
 0x1d3   : > { %11576 = vst [vmem:[#allocation143_spill] sm:$0xff] %v6651_v37 }
 0x1d6   : > { %1164 = vperm.xlu2 %5651, %v6193_v39  }
 0x1d7   : > { %1160 = vperm.xlu1 %5650, %v6196_v40   ;;  %1180 = vperm.xlu0 %5649, %v6204_v42  }
 0x1d8   : > { %v6655_v61 = vpop.permute.xlu1 %932  ;;  %v6657_v41 = vpop.permute.xlu0 %940 }
 0x1d9   : > { %11577 = vst [vmem:[#allocation144_spill] sm:$0xff] %v6655_v61  ;;  %v6666_v55 = vpop.permute.xlu2 %1028 }
 0x1da   : > { %11578 = vst [vmem:[#allocation145_spill] sm:$0xff] %v6657_v41 }
 0x1db   : > { %11581 = vst [vmem:[#allocation148_spill] sm:$0xff] %v6666_v55 }
 0x1de   : > { %1176 = vperm.xlu2 %5651, %v6207_v43  }
 0x1df   : > { %1172 = vperm.xlu1 %5650, %v6210_v44   ;;  %1192 = vperm.xlu0 %5649, %v6218_v46  }
 0x1e0   : > { %v6662_v51 = vpop.permute.xlu1 %944 }
 0x1e1   : > { %11579 = vst [vmem:[#allocation146_spill] sm:$0xff] %v6662_v51  ;;  %v6664_v6 = vpop.permute.xlu0 %1016  ;;  %v6675_v37 = vpop.permute.xlu2 %1037 }
 0x1e2   : > { %11580 = vst [vmem:[#allocation147_spill] sm:$0xff] %v6664_v6 }
 0x1e3   : > { %11584 = vst [vmem:[#allocation151_spill] sm:$0xff] %v6675_v37 }
 0x1e6   : > { %1188 = vperm.xlu2 %5651, %v6221_v47  }
 0x1e7   : > { %1184 = vperm.xlu1 %5650, %v6224_v48   ;;  %1204 = vperm.xlu0 %5649, %v6236_v52  }
 0x1e9   : > { %v6671_v61 = vpop.permute.xlu1 %1019  ;;  %v6673_v41 = vpop.permute.xlu0 %1031 }
 0x1ea   : > { %11582 = vst [vmem:[#allocation149_spill] sm:$0xff] %v6671_v61  ;;  %v6684_v6 = vpop.permute.xlu2 %1046  ;;  %v11590_v61 = vld [vmem:[#allocation22_spill] sm:$0xff] }
 0x1eb   : > { %11583 = vst [vmem:[#allocation150_spill] sm:$0xff] %v6673_v41 }
 0x1ec   : > { %11587 = vst [vmem:[#allocation154_spill] sm:$0xff] %v6684_v6 }
 0x1ee   : > { %1200 = vperm.xlu2 %5651, %v6239_v53  }
 0x1ef   : > { %1196 = vperm.xlu1 %5650, %v6242_v54   ;;  %1216 = vperm.xlu0 %5649, %v6254_v58  }
 0x1f1   : > { %v6680_v51 = vpop.permute.xlu1 %1025  ;;  %v6682_v55 = vpop.permute.xlu0 %1040 }
 0x1f2   : > { %11585 = vst [vmem:[#allocation152_spill] sm:$0xff] %v6680_v51  ;;  %v6696_v51 = vpop.permute.xlu2 %1055 }
 0x1f3   : > { %11586 = vst [vmem:[#allocation153_spill] sm:$0xff] %v6682_v55 }
 0x1f4   : > { %11591 = vst [vmem:[#allocation22_spill] sm:$0xff] %v6696_v51 }
 0x1f6   : > { %1212 = vperm.xlu2 %5651, %v6257_v59   ;;  %v11595_v59 = vld [vmem:[#allocation28_spill] sm:$0xff] }
 0x1f7   : > { %1208 = vperm.xlu1 %5650, %v6260_v60   ;;  %1228 = vperm.xlu0 %5649, %v6272_v0   ;;  %v11599_v0 = vld [vmem:[#allocation33_spill] sm:$0xff] }
 0x1f9   : > { %v6689_v41 = vpop.permute.xlu1 %1034  ;;  %v6691_v37 = vpop.permute.xlu0 %1049 }
 0x1fa   : > { %11588 = vst [vmem:[#allocation155_spill] sm:$0xff] %v6689_v41 }
 0x1fb   : > { %11589 = vst [vmem:[#allocation156_spill] sm:$0xff] %v6691_v37  ;;  %v6707_v37 = vpop.permute.xlu2 %1064 }
 0x1fc   : > { %11597 = vst [vmem:[#allocation28_spill] sm:$0xff] %v6707_v37 }
 0x1fe   : > { %1224 = vperm.xlu2 %5651, %v6275_v56  }
 0x1ff   : > { %1220 = vperm.xlu1 %5650, %v11590_v61   ;;  %1240 = vperm.xlu0 %5649, %v11526_v50   ;;  %v11600_v50 = vld [vmem:[#allocation34_spill] sm:$0xff] }
 0x201   : > { %v6698_v55 = vpop.permute.xlu1 %1043  ;;  %v6700_v6 = vpop.permute.xlu0 %1058 }
 0x202   : > { %11592 = vst [vmem:[#allocation157_spill] sm:$0xff] %v6698_v55 }
 0x203   : > { %11593 = vst [vmem:[#allocation158_spill] sm:$0xff] %v6700_v6  ;;  %v6718_v6 = vpop.permute.xlu2 %1073 }
 0x204   : > { %11603 = vst [vmem:[#allocation161_spill] sm:$0xff] %v6718_v6 }
 0x206   : > { %1236 = vperm.xlu2 %5651, %v11594_v63  }
 0x207   : > { %1232 = vperm.xlu1 %5650, %v11595_v59   ;;  %1252 = vperm.xlu0 %5649, %v11531_v49   ;;  %v11604_v49 = vld [vmem:[#allocation40_spill] sm:$0xff] }
 0x209   : > { %v6705_v41 = vpop.permute.xlu1 %1052  ;;  %v6709_v56 = vpop.permute.xlu0 %1067 }
 0x20a   : > { %11596 = vst [vmem:[#allocation27_spill] sm:$0xff] %v6705_v41  ;;  %v5934_v41 = vmov 3  }
 0x20b   : > { %11598 = vst [vmem:[#allocation159_spill] sm:$0xff] %v6709_v56 }
 0x20e   : > { %1248 = vperm.xlu2 %5651, %v11599_v0   ;;  %v6727_v0 = vpop.permute.xlu2 %1082 }
 0x20f   : > { %1244 = vperm.xlu1 %5650, %v11600_v50   ;;  %1264 = vperm.xlu0 %5649, %v11536_v62   ;;  %11607 = vst [vmem:[#allocation163_spill] sm:$0xff] %v6727_v0 }
 0x211   : > { %v6714_v55 = vpop.permute.xlu1 %1061  ;;  %v6716_v51 = vpop.permute.xlu0 %1076 }
 0x212   : > { %11601 = vst [vmem:[#allocation34_spill] sm:$0xff] %v6714_v55  ;;  %v11608_v55 = vld [vmem:[#allocation44_spill] sm:$0xff] }
 0x213   : > { %11602 = vst [vmem:[#allocation160_spill] sm:$0xff] %v6716_v51 }
 0x216   : > { %1260 = vperm.xlu2 %5651, %v11532_v57  }
 0x217   : > { %1256 = vperm.xlu1 %5650, %v11604_v49   ;;  %5653 = vset.pattern.permute.xlu0 %v5934_v41 }
 0x218   : > { %1339 = vperm.xlu0 %5653, %v11540_v45   ;;  %v6737_v45 = vpop.permute.xlu2 %1091 }
 0x219   : > { %v6723_v56 = vpop.permute.xlu1 %1070  ;;  %v6725_v37 = vpop.permute.xlu0 %1085  ;;  %11611 = vst [vmem:[#allocation165_spill] sm:$0xff] %v6737_v45 }
 0x21a   : > { %11605 = vst [vmem:[#allocation40_spill] sm:$0xff] %v6723_v56 }
 0x21b   : > { %11606 = vst [vmem:[#allocation162_spill] sm:$0xff] %v6725_v37 }
 0x21e   : > { %5652 = vset.pattern.permute.xlu2 %v5934_v41 }
 0x21f   : > { %1268 = vperm.xlu1 %5650, %v11608_v55   ;;  %1336 = vperm.xlu2 %5652, %v6043_v3  }
 0x220   : > { %1354 = vperm.xlu0 %5653, %v6067_v9   ;;  %v6750_v9 = vpop.permute.xlu2 %1100 }
 0x221   : > { %v6732_v6 = vpop.permute.xlu1 %1079  ;;  %v6734_v51 = vpop.permute.xlu0 %1094  ;;  %11615 = vst [vmem:[#allocation169_spill] sm:$0xff] %v6750_v9 }
 0x222   : > { %11609 = vst [vmem:[#allocation44_spill] sm:$0xff] %v6732_v6 }
 0x223   : > { %11610 = vst [vmem:[#allocation164_spill] sm:$0xff] %v6734_v51 }
 0x227   : > { %5654 = vset.pattern.permute.xlu1 %v5934_v41  ;;  %1345 = vperm.xlu2 %5652, %v6052_v5  }
 0x228   : > { %1342 = vperm.xlu1 %5654, %v6040_v2   ;;  %1363 = vperm.xlu0 %5653, %v6079_v12  }
 0x229   : > { %v6741_v37 = vpop.permute.xlu1 %1088  ;;  %v6743_v56 = vpop.permute.xlu0 %1103 }
 0x22a   : > { %11612 = vst [vmem:[#allocation166_spill] sm:$0xff] %v6741_v37 }
 0x22b   : > { %11613 = vst [vmem:[#allocation167_spill] sm:$0xff] %v6743_v56 }
 0x22f   : > { %1351 = vperm.xlu2 %5652, %v6049_v4   ;;  %v6761_v4 = vpop.permute.xlu2 %1109 }
 0x230   : > { %1348 = vperm.xlu1 %5654, %v6037_v1   ;;  %1372 = vperm.xlu0 %5653, %v6091_v15   ;;  %11619 = vst [vmem:[#allocation173_spill] sm:$0xff] %v6761_v4 }
 0x231   : > { %v6748_v3 = vpop.permute.xlu1 %1097  ;;  %v6752_v5 = vpop.permute.xlu0 %1144 }
 0x232   : > { %11614 = vst [vmem:[#allocation168_spill] sm:$0xff] %v6748_v3 }
 0x233   : > { %11616 = vst [vmem:[#allocation170_spill] sm:$0xff] %v6752_v5 }
 0x237   : > { %1360 = vperm.xlu2 %5652, %v6061_v7   ;;  %v6770_v7 = vpop.permute.xlu2 %1152 }
 0x238   : > { %1357 = vperm.xlu1 %5654, %v6064_v8   ;;  %1381 = vperm.xlu0 %5653, %v6103_v18   ;;  %11622 = vst [vmem:[#allocation176_spill] sm:$0xff] %v6770_v7 }
 0x239   : > { %v6757_v2 = vpop.permute.xlu0 %1156  ;;  %v6759_v12 = vpop.permute.xlu1 %1106 }
 0x23a   : > { %11617 = vst [vmem:[#allocation171_spill] sm:$0xff] %v6757_v2 }
 0x23b   : > { %11618 = vst [vmem:[#allocation172_spill] sm:$0xff] %v6759_v12 }
 0x23f   : > { %1369 = vperm.xlu2 %5652, %v6073_v10   ;;  %v6780_v10 = vpop.permute.xlu2 %1164 }
 0x240   : > { %1366 = vperm.xlu1 %5654, %v6076_v11   ;;  %1390 = vperm.xlu0 %5653, %v6115_v21   ;;  %11625 = vst [vmem:[#allocation179_spill] sm:$0xff] %v6780_v10 }
 0x241   : > { %v6766_v1 = vpop.permute.xlu0 %1168  ;;  %v6768_v15 = vpop.permute.xlu1 %1148 }
 0x242   : > { %11620 = vst [vmem:[#allocation174_spill] sm:$0xff] %v6766_v1 }
 0x243   : > { %11621 = vst [vmem:[#allocation175_spill] sm:$0xff] %v6768_v15  ;;  %v7296_v15 = vld [vmem:[%s6034_s14 + $0x90] sm:$0xff] }
 0x247   : > { %1378 = vperm.xlu2 %5652, %v6085_v13  }
 0x248   : > { %1375 = vperm.xlu1 %5654, %v6088_v14   ;;  %1399 = vperm.xlu0 %5653, %v6127_v24   ;;  %v6791_v14 = vpop.permute.xlu2 %1176 }
 0x249   : > { %v6775_v8 = vpop.permute.xlu0 %1180  ;;  %v6777_v18 = vpop.permute.xlu1 %1160  ;;  %11628 = vst [vmem:[#allocation182_spill] sm:$0xff] %v6791_v14  ;;  %v11738_v14 = vmov 7  }
 0x24a   : > { %11623 = vst [vmem:[#allocation177_spill] sm:$0xff] %v6775_v8  ;;  %v7210_v8 = vld [vmem:[%s6161_s17 + $0x80] sm:$0xff] }
 0x24b   : > { %11624 = vst [vmem:[#allocation178_spill] sm:$0xff] %v6777_v18 }
 0x24f   : > { %1387 = vperm.xlu2 %5652, %v6097_v16  }
 0x250   : > { %1384 = vperm.xlu1 %5654, %v6100_v17   ;;  %1408 = vperm.xlu0 %5653, %v6139_v27  }
 0x251   : > { %v6784_v11 = vpop.permute.xlu0 %1192  ;;  %v6789_v13 = vpop.permute.xlu1 %1172 }
 0x252   : > { %11626 = vst [vmem:[#allocation180_spill] sm:$0xff] %v6784_v11 }
 0x253   : > { %11627 = vst [vmem:[#allocation181_spill] sm:$0xff] %v6789_v13 }
 0x257   : > { %1396 = vperm.xlu2 %5652, %v6109_v19   ;;  %v6802_v19 = vpop.permute.xlu2 %1188 }
 0x258   : > { %1393 = vperm.xlu1 %5654, %v6112_v20   ;;  %1417 = vperm.xlu0 %5653, %v6151_v30   ;;  %11631 = vst [vmem:[#allocation185_spill] sm:$0xff] %v6802_v19 }
 0x259   : > { %v6793_v21 = vpop.permute.xlu0 %1204  ;;  %v6800_v17 = vpop.permute.xlu1 %1184 }
 0x25a   : > { %11629 = vst [vmem:[#allocation183_spill] sm:$0xff] %v6793_v21  ;;  %v7197_v21 = vld [vmem:[%s6161_s17 + $0x70] sm:$0xff] }
 0x25b   : > { %v2978_v11 = vsel %vm11381_vm0, %v7197_v21, 0.0 }
 0x25f   : > { %1405 = vperm.xlu2 %5652, %v6121_v22   ;;  %v6811_v22 = vpop.permute.xlu2 %1200 }
 0x260   : > { %1402 = vperm.xlu1 %5654, %v6124_v23   ;;  %1426 = vperm.xlu0 %5653, %v6170_v33  }
 0x261   : > { %v6798_v16 = vpop.permute.xlu0 %1216  ;;  %v6809_v24 = vpop.permute.xlu1 %1196 }
 0x262   : > { %11630 = vst [vmem:[#allocation184_spill] sm:$0xff] %v6798_v16  ;;  %v7039_v16 = vld [vmem:[%s6034_s14 + $0x40] sm:$0xff] }
 0x263   : > { %11633 = vst [vmem:[#allocation187_spill] sm:$0xff] %v6809_v24 }
 0x267   : > { %1414 = vperm.xlu2 %5652, %v6133_v25   ;;  %v6821_v25 = vpop.permute.xlu2 %1212 }
 0x268   : > { %1411 = vperm.xlu1 %5654, %v6136_v26   ;;  %1468 = vperm.xlu0 %5653, %v6182_v36   ;;  %11636 = vst [vmem:[#allocation190_spill] sm:$0xff] %v6821_v25  ;;  %v7059_v25 = vld [vmem:[%s6034_s14 + $0x10] sm:$0xff] }
 0x269   : > { %v6807_v20 = vpop.permute.xlu0 %1228  ;;  %v6818_v27 = vpop.permute.xlu1 %1208 }
 0x26a   : > { %11632 = vst [vmem:[#allocation186_spill] sm:$0xff] %v6807_v20 }
 0x26b   : > { %11635 = vst [vmem:[#allocation189_spill] sm:$0xff] %v6818_v27 }
 0x26f   : > { %1423 = vperm.xlu2 %5652, %v6145_v28  }
 0x270   : > { %1420 = vperm.xlu1 %5654, %v6148_v29   ;;  %1480 = vperm.xlu0 %5653, %v6196_v40   ;;  %v6832_v29 = vpop.permute.xlu2 %1224 }
 0x271   : > { %v6816_v23 = vpop.permute.xlu0 %1240  ;;  %v6830_v28 = vpop.permute.xlu1 %1220  ;;  %11639 = vst [vmem:[#allocation193_spill] sm:$0xff] %v6832_v29  ;;  %v11704_v29 = vmov 4  }
 0x272   : > { %11634 = vst [vmem:[#allocation188_spill] sm:$0xff] %v6816_v23 }
 0x273   : > { %11638 = vst [vmem:[#allocation192_spill] sm:$0xff] %v6830_v28  ;;  %v7043_v28 = vld [vmem:[%s6161_s17 + $0x68] sm:$0xff] }
 0x277   : > { %1464 = vperm.xlu2 %5652, %v6164_v31  }
 0x278   : > { %1429 = vperm.xlu1 %5654, %v6167_v32   ;;  %1492 = vperm.xlu0 %5653, %v6210_v44   ;;  %v6841_v33 = vpop.permute.xlu2 %1236 }
 0x279   : > { %v6825_v26 = vpop.permute.xlu0 %1252  ;;  %v6839_v32 = vpop.permute.xlu1 %1232  ;;  %11642 = vst [vmem:[#allocation196_spill] sm:$0xff] %v6841_v33 }
 0x27a   : > { %11637 = vst [vmem:[#allocation191_spill] sm:$0xff] %v6825_v26 }
 0x27b   : > { %11641 = vst [vmem:[#allocation195_spill] sm:$0xff] %v6839_v32 }
 0x27f   : > { %1476 = vperm.xlu2 %5652, %v6176_v34  }
 0x280   : > { %1472 = vperm.xlu1 %5654, %v6179_v35   ;;  %1504 = vperm.xlu0 %5653, %v6224_v48  }
 0x281   : > { %v6834_v30 = vpop.permute.xlu0 %1264  ;;  %v6848_v12 = vpop.permute.xlu1 %1244 }
 0x282   : > { %11640 = vst [vmem:[#allocation194_spill] sm:$0xff] %v6834_v30  ;;  %v6850_v30 = vpop.permute.xlu2 %1248 }
 0x283   : > { %11644 = vst [vmem:[#allocation198_spill] sm:$0xff] %v6848_v12 }
 0x284   : > { %11645 = vst [vmem:[#allocation199_spill] sm:$0xff] %v6850_v30  ;;  %v11650_v30 = vld [vmem:[#allocation16_spill] sm:$0xff] }
 0x287   : > { %1488 = vperm.xlu2 %5652, %v6190_v38  }
 0x288   : > { %1484 = vperm.xlu1 %5654, %v6193_v39   ;;  %1516 = vperm.xlu0 %5653, %v6242_v54  }
 0x289   : > { %v6857_v26 = vpop.permute.xlu1 %1256 }
 0x28a   : > { %v6843_v41 = vpop.permute.xlu0 %1339  ;;  %11647 = vst [vmem:[#allocation201_spill] sm:$0xff] %v6857_v26  ;;  %v6860_v3 = vpop.permute.xlu2 %1260 }
 0x28b   : > { %11643 = vst [vmem:[#allocation197_spill] sm:$0xff] %v6843_v41  ;;  %v7318_v41 = vld [vmem:[%s6034_s14 + $0xc0] sm:$0xff] }
 0x28c   : > { %11648 = vst [vmem:[#allocation202_spill] sm:$0xff] %v6860_v3  ;;  %v11655_v3 = vld [vmem:[#allocation21_spill] sm:$0xff] }
 0x28f   : > { %1500 = vperm.xlu2 %5652, %v6204_v42  }
 0x290   : > { %1496 = vperm.xlu1 %5654, %v6207_v43   ;;  %1528 = vperm.xlu0 %5653, %v6260_v60  }
 0x291   : > { %v6869_v9 = vpop.permute.xlu1 %1268 }
 0x292   : > { %v6852_v4 = vpop.permute.xlu0 %1354  ;;  %11651 = vst [vmem:[#allocation16_spill] sm:$0xff] %v6869_v9 }
 0x293   : > { %11646 = vst [vmem:[#allocation200_spill] sm:$0xff] %v6852_v4 }
 0x297   : > { %1512 = vperm.xlu2 %5652, %v6218_v46  }
 0x298   : > { %1508 = vperm.xlu1 %5654, %v6221_v47   ;;  %1540 = vperm.xlu0 %5653, %v11590_v61   ;;  %v6871_v61 = vpop.permute.xlu2 %1336 }
 0x299   : > { %11652 = vst [vmem:[#allocation204_spill] sm:$0xff] %v6871_v61  ;;  %v5815_v61 = vld [vmem:[%s6034_s14 + $0xf0] sm:$0xff] }
 0x29a   : > { %v6864_v60 = vpop.permute.xlu0 %1363 }
 0x29b   : > { %11649 = vst [vmem:[#allocation203_spill] sm:$0xff] %v6864_v60  ;;  %v7159_v60 = vld [vmem:[%s6161_s17 + $0x28] sm:$0xff] }
 0x29f   : > { %1524 = vperm.xlu2 %5652, %v6236_v52   ;;  %v11654_v52 = vld [vmem:[#allocation20_spill] sm:$0xff] }
 0x2a0   : > { %1520 = vperm.xlu1 %5654, %v6239_v53   ;;  %1552 = vperm.xlu0 %5653, %v11595_v59   ;;  %v6878_v53 = vpop.permute.xlu1 %1342  ;;  %v6880_v59 = vpop.permute.xlu2 %1345 }
 0x2a1   : > { %11656 = vst [vmem:[#allocation20_spill] sm:$0xff] %v6878_v53  ;;  %v7107_v53 = vld [vmem:[%s6034_s14 + $0x68] sm:$0xff] }
 0x2a2   : > { %v6873_v26 = vpop.permute.xlu0 %1372  ;;  %11657 = vst [vmem:[#allocation21_spill] sm:$0xff] %v6880_v59  ;;  %v7179_v59 = vld [vmem:[%s6161_s17 + $0x38] sm:$0xff] }
 0x2a3   : > { %11653 = vst [vmem:[#allocation205_spill] sm:$0xff] %v6873_v26  ;;  %v7140_v26 = vld [vmem:[%s6034_s14 + $0xb0] sm:$0xff] }
 0x2a7   : > { %1536 = vperm.xlu2 %5652, %v6254_v58  }
 0x2a8   : > { %1532 = vperm.xlu1 %5654, %v11650_v30   ;;  %1564 = vperm.xlu0 %5653, %v11600_v50   ;;  %v11659_v30 = vld [vmem:[#allocation26_spill] sm:$0xff]  ;;  %v6887_v50 = vpop.permute.xlu1 %1348  ;;  %v6889_v9 = vpop.permute.xlu2 %1351 }
 0x2a9   : > { %11660 = vst [vmem:[#allocation26_spill] sm:$0xff] %v6887_v50 }
 0x2aa   : > { %v6882_v58 = vpop.permute.xlu0 %1381  ;;  %11661 = vst [vmem:[#allocation207_spill] sm:$0xff] %v6889_v9  ;;  %v5795_v9 = vld [vmem:[%s6034_s14 + $0xe0] sm:$0xff] }
 0x2ab   : > { %11658 = vst [vmem:[#allocation206_spill] sm:$0xff] %v6882_v58 }
 0x2af   : > { %1548 = vperm.xlu2 %5652, %v11654_v52  }
 0x2b0   : > { %1544 = vperm.xlu1 %5654, %v11655_v3   ;;  %1576 = vperm.xlu0 %5653, %v11604_v49   ;;  %v11663_v3 = vld [vmem:[#allocation32_spill] sm:$0xff]  ;;  %v11664_v49 = vld [vmem:[#allocation33_spill] sm:$0xff]  ;;  %v6895_v56 = vpop.permute.xlu1 %1357  ;;  %v6898_v51 = vpop.permute.xlu2 %1360 }
 0x2b1   : > { %11665 = vst [vmem:[#allocation32_spill] sm:$0xff] %v6895_v56 }
 0x2b2   : > { %v6891_v52 = vpop.permute.xlu0 %1390  ;;  %11666 = vst [vmem:[#allocation33_spill] sm:$0xff] %v6898_v51  ;;  %v7073_v51 = vld [vmem:[%s6034_s14 + $0x70] sm:$0xff] }
 0x2b3   : > { %11662 = vst [vmem:[#allocation208_spill] sm:$0xff] %v6891_v52  ;;  %v2942_v52 = vsel %vm11381_vm0, %v6179_v35, 0.0  ;;  %v2945_v35 = vsel %vm11381_vm0, %v6176_v34, 0.0  ;;  %v2975_v34 = vsel %vm11381_vm0, %v6242_v54, 0.0  ;;  %v11334_v54 = vmov 5  }
 0x2b7   : > { %1560 = vperm.xlu2 %5652, %v11659_v30  }
 0x2b8   : > { %1556 = vperm.xlu1 %5654, %v11594_v63   ;;  %1588 = vperm.xlu0 %5653, %v11608_v55   ;;  %v6903_v55 = vpop.permute.xlu1 %1366  ;;  %v6905_v30 = vpop.permute.xlu2 %1369 }
 0x2b9   : > { %11668 = vst [vmem:[#allocation210_spill] sm:$0xff] %v6905_v30 }
 0x2ba   : > { %v6901_v63 = vpop.permute.xlu0 %1399 }
 0x2bb   : > { %11667 = vst [vmem:[#allocation209_spill] sm:$0xff] %v6901_v63 }
 0x2bf   : > { %1572 = vperm.xlu2 %5652, %v11663_v3  }
 0x2c0   : > { %1568 = vperm.xlu1 %5654, %v11664_v49   ;;  %v6909_v37 = vpop.permute.xlu1 %1375  ;;  %v6911_v3 = vpop.permute.xlu2 %1378 }
 0x2c1   : > { %11670 = vst [vmem:[#allocation212_spill] sm:$0xff] %v6909_v37  ;;  %v7097_v37 = vld [vmem:[%s6034_s14 + $0xa0] sm:$0xff] }
 0x2c2   : > { %v6907_v23 = vpop.permute.xlu0 %1408 }
 0x2c3   : > { %11669 = vst [vmem:[#allocation211_spill] sm:$0xff] %v6907_v23  ;;  %v2951_v23 = vsel %vm11381_vm0, %v6193_v39, 0.0  ;;  %v2948_v39 = vsel %vm11381_vm0, %v6196_v40, 0.0  ;;  %v2954_v40 = vsel %vm11381_vm0, %v6190_v38, 0.0  ;;  %v2969_v38 = vsel %vm11381_vm0, %v6221_v47, 0.0  ;;  %v6977_v47 = vld [vmem:[%s6161_s17] sm:$0xff] }
 0x2c7   : > { %1584 = vperm.xlu2 %5652, %v11536_v62   ;;  %v2936_v62 = vsel %vm11381_vm0, %v6164_v31, 0.0  ;;  %v2957_v31 = vsel %vm11381_vm0, %v6210_v44, 0.0 }
 0x2c8   : > { %1580 = vperm.xlu1 %5654, %v11532_v57   ;;  %v6917_v57 = vpop.permute.xlu1 %1384  ;;  %v6919_v33 = vpop.permute.xlu2 %1387 }
 0x2c9   : > { %11672 = vst [vmem:[#allocation214_spill] sm:$0xff] %v6917_v57 }
 0x2ca   : > { %v6913_v49 = vpop.permute.xlu0 %1417  ;;  %11673 = vst [vmem:[#allocation215_spill] sm:$0xff] %v6919_v33 }
 0x2cb   : > { %11671 = vst [vmem:[#allocation213_spill] sm:$0xff] %v6913_v49  ;;  %v2939_v49 = vsel %vm11381_vm0, %v6182_v36, 0.0  ;;  %v2963_v36 = vsel %vm11381_vm0, %v6204_v42, 0.0 }
 0x2cf   : > { %5656 = vset.pattern.permute.xlu2 %v11334_v54  ;;  %v6987_v54 = vld [vmem:[%s6161_s17 + $0x8] sm:$0xff] }
 0x2d0   : > { %v6927_v12 = vpop.permute.xlu1 %1393 }
 0x2d1   : > { %11675 = vst [vmem:[#allocation217_spill] sm:$0xff] %v6927_v12  ;;  %v7032_v12 = vld [vmem:[%s6161_s17 + $0x60] sm:$0xff] }
 0x2d2   : > { %v6921_v63 = vpop.permute.xlu0 %1426  ;;  %11698 = vst [vmem:[#allocation240_spill] sm:$0xff] %v7032_v12 }
 0x2d3   : > { %11674 = vst [vmem:[#allocation216_spill] sm:$0xff] %v6921_v63  ;;  %v6997_v63 = vld [vmem:[%s6034_s14] sm:$0xff] }
 0x2d8   : > { %v6944_v44 = vpop.permute.xlu1 %1402 }
 0x2d9   : > { %11678 = vst [vmem:[#allocation220_spill] sm:$0xff] %v6944_v44  ;;  %v7016_v44 = vld [vmem:[%s6161_s17 + $0x48] sm:$0xff] }
 0x2da   : > { %v6935_v33 = vpop.permute.xlu0 %1468  ;;  %11695 = vst [vmem:[#allocation237_spill] sm:$0xff] %v7016_v44 }
 0x2db   : > { %11677 = vst [vmem:[#allocation219_spill] sm:$0xff] %v6935_v33 }
 0x2e0   : > { %v6956_v42 = vpop.permute.xlu1 %1411 }
 0x2e1   : > { %11681 = vst [vmem:[#allocation223_spill] sm:$0xff] %v6956_v42  ;;  %v7020_v42 = vld [vmem:[%s6034_s14 + $0x8] sm:$0xff] }
 0x2e2   : > { %2937 = vadd.xlane.f32.xlu0 %v2936_v62  ;;  %v6933_v62 = vpop.permute.xlu2 %1396 }
 0x2e3   : > { %11676 = vst [vmem:[#allocation218_spill] sm:$0xff] %v6933_v62  ;;  %v7024_v62 = vld [vmem:[%s6034_s14 + $0x28] sm:$0xff] }
 0x2ea   : > { %2952 = vadd.xlane.f32.xlu0 %v2951_v23  ;;  %v11332_v23 = vmov 7  }
 0x2eb   : > { %5657 = vset.pattern.permute.xlu0 %v11332_v23 }
 0x2f0   : > { %2943 = vadd.xlane.f32.xlu2 %v2942_v52  ;;  %v6946_v52 = vpop.permute.xlu2 %1405 }
 0x2f1   : > { %11679 = vst [vmem:[#allocation221_spill] sm:$0xff] %v6946_v52 }
 0x2f2   : > { %2940 = vadd.xlane.f32.xlu1 %v2939_v49  ;;  %2958 = vadd.xlane.f32.xlu0 %v2957_v31  ;;  %v6948_v49 = vpop.permute.xlu0 %1480  ;;  %v2960_v31 = vsel %vm11381_vm0, %v6207_v43, 0.0  ;;  %v2966_v43 = vsel %vm11381_vm0, %v6224_v48, 0.0 }
 0x2f3   : > { %11680 = vst [vmem:[#allocation222_spill] sm:$0xff] %v6948_v49  ;;  %v5788_v49 = vld [vmem:[%s6034_s14 + $0xd0] sm:$0xff] }
 0x2f8   : > { %2949 = vadd.xlane.f32.xlu2 %v2948_v39  ;;  %v11336_v39 = vmov 4  }
 0x2f9   : > { %5655 = vset.pattern.permute.xlu1 %v11336_v39 }
 0x2fa   : > { %2946 = vadd.xlane.f32.xlu1 %v2945_v35  ;;  %2964 = vadd.xlane.f32.xlu0 %v2963_v36  ;;  %v6959_v35 = vpop.permute.xlu2 %1414  ;;  %v6961_v36 = vpop.permute.xlu0 %1492 }
 0x2fb   : > { %11682 = vst [vmem:[#allocation224_spill] sm:$0xff] %v6959_v35 }
 0x2fc   : > { %11683 = vst [vmem:[#allocation225_spill] sm:$0xff] %v6961_v36 }
 0x300   : > { %2955 = vadd.xlane.f32.xlu2 %v2954_v40  ;;  %v6968_v40 = vpop.permute.xlu1 %1420 }
 0x301   : > { %11684 = vst [vmem:[#allocation226_spill] sm:$0xff] %v6968_v40 }
 0x302   : > { %2961 = vadd.xlane.f32.xlu1 %v2960_v31  ;;  %2976 = vadd.xlane.f32.xlu0 %v2975_v34  ;;  %v2972_v31 = vsel %vm11381_vm0, %v6218_v46, 0.0  ;;  %v6972_v34 = vpop.permute.xlu2 %1423  ;;  %v6974_v23 = vpop.permute.xlu0 %1504 }
 0x303   : > { %11685 = vst [vmem:[#allocation227_spill] sm:$0xff] %v6972_v34  ;;  %v7008_v34 = vld [vmem:[%s6034_s14 + $0x18] sm:$0xff] }
 0x308   : > { %2970 = vadd.xlane.f32.xlu2 %v2969_v38  ;;  %v6980_v48 = vpop.permute.xlu1 %1429 }
 0x309   : > { %11686 = vst [vmem:[#allocation228_spill] sm:$0xff] %v6980_v48  ;;  %v7001_v48 = vld [vmem:[%s6161_s17 + $0x40] sm:$0xff] }
 0x30a   : > { %2967 = vadd.xlane.f32.xlu1 %v2966_v43  ;;  %v6982_v38 = vpop.permute.xlu2 %1464  ;;  %v6984_v43 = vpop.permute.xlu0 %1516 }
 0x30b   : > { %11687 = vst [vmem:[#allocation229_spill] sm:$0xff] %v6982_v38 }
 0x30c   : > { %11688 = vst [vmem:[#allocation230_spill] sm:$0xff] %v6984_v43  ;;  %v7077_v43 = vld [vmem:[%s6034_s14 + $0x38] sm:$0xff] }
 0x310   : > { %2973 = vadd.xlane.f32.xlu2 %v2972_v31  ;;  %v6990_v46 = vpop.permute.xlu1 %1472 }
 0x311   : > { %11689 = vst [vmem:[#allocation231_spill] sm:$0xff] %v6990_v46  ;;  %v7084_v46 = vld [vmem:[%s6034_s14 + $0x88] sm:$0xff] }
 0x312   : > { %v6992_v31 = vpop.permute.xlu2 %1476  ;;  %v6994_v39 = vpop.permute.xlu0 %1528 }
 0x313   : > { %11690 = vst [vmem:[#allocation232_spill] sm:$0xff] %v6992_v31 }
 0x314   : > { %11691 = vst [vmem:[#allocation233_spill] sm:$0xff] %v6994_v39  ;;  %v7063_v39 = vld [vmem:[%s6161_s17 + $0x10] sm:$0xff] }
 0x316   : > { %2744 = vperm.xlu0 %5657, %v6977_v47  }
 0x318   : > { %v7005_v40 = vpop.permute.xlu1 %1484 }
 0x319   : > { %11692 = vst [vmem:[#allocation234_spill] sm:$0xff] %v7005_v40 }
 0x31a   : > { %v7011_v35 = vpop.permute.xlu2 %1488  ;;  %v7013_v52 = vpop.permute.xlu0 %1540 }
 0x31b   : > { %11693 = vst [vmem:[#allocation235_spill] sm:$0xff] %v7011_v35  ;;  %v7128_v35 = vld [vmem:[%s6034_s14 + $0x98] sm:$0xff] }
 0x31c   : > { %11694 = vst [vmem:[#allocation236_spill] sm:$0xff] %v7013_v52 }
 0x31e   : > { %2748 = vperm.xlu0 %5657, %v6987_v54  }
 0x320   : > { %v7027_v32 = vpop.permute.xlu1 %1496 }
 0x321   : > { %11696 = vst [vmem:[#allocation238_spill] sm:$0xff] %v7027_v32 }
 0x322   : > { %v7029_v20 = vpop.permute.xlu2 %1500  ;;  %v7035_v52 = vpop.permute.xlu0 %1552 }
 0x323   : > { %1656 = vperm.xlu1 %5655, %v6997_v63   ;;  %11697 = vst [vmem:[#allocation239_spill] sm:$0xff] %v7029_v20 }
 0x324   : > { %11699 = vst [vmem:[#allocation241_spill] sm:$0xff] %v7035_v52  ;;  %v7054_v52 = vld [vmem:[%s6034_s14 + $0x58] sm:$0xff] }
 0x325   : > { %11703 = vst [vmem:[#allocation245_spill] sm:$0xff] %v7054_v52 }
 0x326   : > { %2776 = vperm.xlu0 %5657, %v7001_v48  }
 0x328   : > { %1976 = vperm.xlu2 %5656, %v6997_v63   ;;  %v7046_v6 = vpop.permute.xlu1 %1508 }
 0x329   : > { %11700 = vst [vmem:[#allocation242_spill] sm:$0xff] %v7046_v6 }
 0x32a   : > { %v7048_v45 = vpop.permute.xlu2 %1512  ;;  %v7051_v0 = vpop.permute.xlu0 %1564 }
 0x32b   : > { %1665 = vperm.xlu1 %5655, %v7008_v34   ;;  %11701 = vst [vmem:[#allocation243_spill] sm:$0xff] %v7048_v45  ;;  %v7092_v45 = vld [vmem:[%s6034_s14 + $0x50] sm:$0xff] }
 0x32c   : > { %11702 = vst [vmem:[#allocation244_spill] sm:$0xff] %v7051_v0 }
 0x32e   : > { %2780 = vperm.xlu0 %5657, %v7016_v44  }
 0x330   : > { %1979 = vperm.xlu2 %5656, %v7020_v42   ;;  %v7066_v57 = vpop.permute.xlu1 %1520 }
 0x332   : > { %v7068_v0 = vpop.permute.xlu2 %1524  ;;  %v7070_v32 = vpop.permute.xlu0 %1576 }
 0x333   : > { %1671 = vperm.xlu1 %5655, %v7024_v62   ;;  %11705 = vst [vmem:[#allocation246_spill] sm:$0xff] %v7068_v0 }
 0x334   : > { %11706 = vst [vmem:[#allocation247_spill] sm:$0xff] %v7070_v32 }
 0x336   : > { %2792 = vperm.xlu0 %5657, %v7032_v12  }
 0x338   : > { %2104 = vperm.xlu2 %5656, %v6977_v47   ;;  %v7081_v40 = vpop.permute.xlu1 %1532 }
 0x339   : > { %11707 = vst [vmem:[#allocation248_spill] sm:$0xff] %v7081_v40 }
 0x33a   : > { %v7087_v0 = vpop.permute.xlu2 %1536  ;;  %v7089_v32 = vpop.permute.xlu0 %1588 }
 0x33b   : > { %1680 = vperm.xlu1 %5655, %v7039_v16   ;;  %11708 = vst [vmem:[#allocation249_spill] sm:$0xff] %v7087_v0 }
 0x33c   : > { %11709 = vst [vmem:[#allocation250_spill] sm:$0xff] %v7089_v32  ;;  %v7112_v32 = vld [vmem:[%s6034_s14 + $0xb8] sm:$0xff] }
 0x33e   : > { %2796 = vperm.xlu0 %5657, %v7043_v28  }
 0x340   : > { %2108 = vperm.xlu2 %5656, %v6987_v54   ;;  %v7100_v40 = vpop.permute.xlu1 %1544 }
 0x341   : > { %11710 = vst [vmem:[#allocation251_spill] sm:$0xff] %v7100_v40  ;;  %v7118_v40 = vld [vmem:[%s6034_s14 + $0x80] sm:$0xff] }
 0x342   : > { %v7104_v0 = vpop.permute.xlu2 %1548 }
 0x343   : > { %1689 = vperm.xlu1 %5655, %v7054_v52   ;;  %11712 = vst [vmem:[#allocation253_spill] sm:$0xff] %v7104_v0 }
 0x346   : > { %5659 = vset.pattern.permute.xlu0 %v11704_v29 }
 0x347   : > { %1662 = vperm.xlu0 %5659, %v7059_v25  }
 0x348   : > { %2112 = vperm.xlu2 %5656, %v7063_v39   ;;  %v7115_v36 = vpop.permute.xlu1 %1556 }
 0x349   : > { %11713 = vst [vmem:[#allocation254_spill] sm:$0xff] %v7115_v36 }
 0x34a   : > { %v7123_v0 = vpop.permute.xlu2 %1560 }
 0x34b   : > { %1698 = vperm.xlu1 %5655, %v7073_v51   ;;  %11715 = vst [vmem:[#allocation256_spill] sm:$0xff] %v7123_v0  ;;  %v5790_v0 = vld [vmem:[%s6034_s14 + $0xe8] sm:$0xff] }
 0x34f   : > { %1677 = vperm.xlu0 %5659, %v7077_v43  }
 0x350   : > { %1991 = vperm.xlu2 %5656, %v7024_v62   ;;  %v7132_v36 = vpop.permute.xlu1 %1568 }
 0x351   : > { %11716 = vst [vmem:[#allocation257_spill] sm:$0xff] %v7132_v36  ;;  %v7149_v36 = vld [vmem:[%s6161_s17 + $0x20] sm:$0xff] }
 0x352   : > { %v7136_v56 = vpop.permute.xlu2 %1572 }
 0x353   : > { %1707 = vperm.xlu1 %5655, %v7084_v46   ;;  %11718 = vst [vmem:[#allocation259_spill] sm:$0xff] %v7136_v56  ;;  %v5793_v56 = vld [vmem:[%s6034_s14 + $0xc8] sm:$0xff] }
 0x355   : > { %v7102_v58 = vpop.xlane.xlu0 %2937 }
 0x356   : > { %11711 = vst [vmem:[#allocation252_spill] sm:$0xff] %v7102_v58 }
 0x357   : > { %1686 = vperm.xlu0 %5659, %v7092_v45  }
 0x358   : > { %1997 = vperm.xlu2 %5656, %v7077_v43  }
 0x35b   : > { %1716 = vperm.xlu1 %5655, %v7097_v37  }
 0x35d   : > { %v7121_v20 = vpop.xlane.xlu0 %2952 }
 0x35e   : > { %11714 = vst [vmem:[#allocation255_spill] sm:$0xff] %v7121_v20 }
 0x35f   : > { %1695 = vperm.xlu0 %5659, %v7107_v53  }
 0x360   : > { %2000 = vperm.xlu2 %5656, %v7039_v16  }
 0x363   : > { %1725 = vperm.xlu1 %5655, %v7112_v32  }
 0x365   : > { %v7134_v31 = vpop.xlane.xlu0 %2958 }
 0x366   : > { %11717 = vst [vmem:[#allocation258_spill] sm:$0xff] %v7134_v31  ;;  %v7152_v31 = vpop.permute.xlu2 %1584 }
 0x367   : > { %1704 = vperm.xlu0 %5659, %v7118_v40   ;;  %11721 = vst [vmem:[#allocation262_spill] sm:$0xff] %v7152_v31  ;;  %v7168_v31 = vld [vmem:[%s6161_s17 + $0x30] sm:$0xff] }
 0x368   : > { %2136 = vperm.xlu2 %5656, %v7001_v48  }
 0x36b   : > { %1734 = vperm.xlu1 %5655, %v5788_v49   ;;  %v7144_v49 = vpop.permute.xlu1 %1580 }
 0x36c   : > { %11719 = vst [vmem:[#allocation260_spill] sm:$0xff] %v7144_v49 }
 0x36d   : > { %v7146_v50 = vpop.xlane.xlu0 %2964 }
 0x36e   : > { %11720 = vst [vmem:[#allocation261_spill] sm:$0xff] %v7146_v50  ;;  %v7162_v49 = vpop.xlane.xlu2 %2943 }
 0x36f   : > { %1713 = vperm.xlu0 %5659, %v7128_v35   ;;  %11723 = vst [vmem:[#allocation264_spill] sm:$0xff] %v7162_v49 }
 0x370   : > { %2009 = vperm.xlu2 %5656, %v7054_v52  }
 0x373   : > { %1743 = vperm.xlu1 %5655, %v5790_v0   ;;  %v7156_v0 = vpop.xlane.xlu1 %2940 }
 0x374   : > { %11722 = vst [vmem:[#allocation263_spill] sm:$0xff] %v7156_v0 }
 0x375   : > { %v7164_v50 = vpop.xlane.xlu0 %2976 }
 0x376   : > { %11724 = vst [vmem:[#allocation265_spill] sm:$0xff] %v7164_v50  ;;  %v7173_v4 = vpop.xlane.xlu2 %2949 }
 0x377   : > { %1722 = vperm.xlu0 %5659, %v7140_v26   ;;  %11726 = vst [vmem:[#allocation267_spill] sm:$0xff] %v7173_v4  ;;  %v7193_v4 = vld [vmem:[%s6161_s17 + $0x58] sm:$0xff] }
 0x378   : > { %2015 = vperm.xlu2 %5656, %v7107_v53  }
 0x37b   : > { %1800 = vperm.xlu1 %5655, %v7149_v36  }
 0x37e   : > { %v7188_v27 = vpop.xlane.xlu2 %2955 }
 0x37f   : > { %1731 = vperm.xlu0 %5659, %v5793_v56   ;;  %v7171_v56 = vpop.xlane.xlu1 %2946  ;;  %11729 = vst [vmem:[#allocation270_spill] sm:$0xff] %v7188_v27 }
 0x380   : > { %5658 = vset.pattern.permute.xlu2 %v11704_v29  ;;  %11725 = vst [vmem:[#allocation266_spill] sm:$0xff] %v7171_v56  ;;  %v11741_v56 = vmov 5  }
 0x383   : > { %1804 = vperm.xlu1 %5655, %v7159_v60  }
 0x386   : > { %v7204_v13 = vpop.xlane.xlu2 %2970 }
 0x387   : > { %1740 = vperm.xlu0 %5659, %v5795_v9   ;;  %v7182_v50 = vpop.xlane.xlu1 %2961  ;;  %v7185_v9 = vld [vmem:[%s6161_s17 + $0x50] sm:$0xff]  ;;  %11732 = vst [vmem:[#allocation273_spill] sm:$0xff] %v7204_v13  ;;  %v7256_v13 = vld [vmem:[%s6034_s14 + $0x48] sm:$0xff] }
 0x388   : > { %v7175_v20 = vpop.permute.xlu0 %2744  ;;  %11728 = vst [vmem:[#allocation269_spill] sm:$0xff] %v7182_v50 }
 0x389   : > { %11727 = vst [vmem:[#allocation268_spill] sm:$0xff] %v7175_v20  ;;  %v7269_v20 = vld [vmem:[%s6161_s17 + $0x90] sm:$0xff] }
 0x38b   : > { %1808 = vperm.xlu1 %5655, %v7168_v31  }
 0x38e   : > { %v7216_v1 = vpop.xlane.xlu2 %2973 }
 0x38f   : > { %1792 = vperm.xlu0 %5659, %v7063_v39   ;;  %v7202_v50 = vpop.xlane.xlu1 %2967  ;;  %11735 = vst [vmem:[#allocation276_spill] sm:$0xff] %v7216_v1 }
 0x390   : > { %v7190_v24 = vpop.permute.xlu0 %2748  ;;  %11731 = vst [vmem:[#allocation272_spill] sm:$0xff] %v7202_v50 }
 0x391   : > { %11730 = vst [vmem:[#allocation271_spill] sm:$0xff] %v7190_v24 }
 0x393   : > { %1812 = vperm.xlu1 %5655, %v7179_v59  }
 0x396   : > { %v7227_v10 = vpop.permute.xlu2 %1976 }
 0x397   : > { %1824 = vperm.xlu0 %5659, %v7185_v9   ;;  %v7213_v18 = vpop.permute.xlu1 %1656  ;;  %11739 = vst [vmem:[#allocation279_spill] sm:$0xff] %v7227_v10 }
 0x398   : > { %v7206_v27 = vpop.permute.xlu0 %2776  ;;  %11734 = vst [vmem:[#allocation275_spill] sm:$0xff] %v7213_v18 }
 0x399   : > { %11733 = vst [vmem:[#allocation274_spill] sm:$0xff] %v7206_v27 }
 0x39b   : > { %1828 = vperm.xlu1 %5655, %v7193_v4  }
 0x39f   : > { %1840 = vperm.xlu0 %5659, %v7197_v21   ;;  %v7224_v27 = vpop.permute.xlu1 %1665 }
 0x3a0   : > { %v7218_v2 = vpop.permute.xlu0 %2780  ;;  %11737 = vst [vmem:[#allocation278_spill] sm:$0xff] %v7224_v27  ;;  %v7240_v27 = vld [vmem:[%s6034_s14 + $0x20] sm:$0xff] }
 0x3a1   : > { %2979 = vadd.xlane.f32.xlu2 %v2978_v11  ;;  %11736 = vst [vmem:[#allocation277_spill] sm:$0xff] %v7218_v2  ;;  %v7221_v11 = vld [vmem:[%s6161_s17 + $0x88] sm:$0xff]  ;;  %v7235_v2 = vpop.permute.xlu2 %1979 }
 0x3a2   : > { %11743 = vst [vmem:[#allocation282_spill] sm:$0xff] %v7235_v2 }
 0x3a3   : > { %1832 = vperm.xlu1 %5655, %v7032_v12   ;;  %v2984_v12 = vsel %vm11381_vm0, %v7210_v8, 0.0 }
 0x3a7   : > { %1848 = vperm.xlu0 %5659, %v7210_v8   ;;  %v7233_v1 = vpop.permute.xlu1 %1671 }
 0x3a8   : > { %v7229_v49 = vpop.permute.xlu0 %2792  ;;  %11742 = vst [vmem:[#allocation281_spill] sm:$0xff] %v7233_v1 }
 0x3a9   : > { %11740 = vst [vmem:[#allocation280_spill] sm:$0xff] %v7229_v49  ;;  %v7246_v49 = vld [vmem:[%s6034_s14 + $0x30] sm:$0xff]  ;;  %v7249_v30 = vpop.permute.xlu2 %2104 }
 0x3aa   : > { %11746 = vst [vmem:[#allocation285_spill] sm:$0xff] %v7249_v30  ;;  %v2987_v30 = vsel %vm11381_vm0, %v7221_v11, 0.0 }
 0x3ab   : > { %1836 = vperm.xlu1 %5655, %v7043_v28  }
 0x3af   : > { %1852 = vperm.xlu0 %5659, %v7221_v11   ;;  %v7243_v6 = vpop.permute.xlu1 %1680 }
 0x3b0   : > { %v7237_v7 = vpop.permute.xlu0 %2796  ;;  %11745 = vst [vmem:[#allocation284_spill] sm:$0xff] %v7243_v6 }
 0x3b1   : > { %11744 = vst [vmem:[#allocation283_spill] sm:$0xff] %v7237_v7  ;;  %v7260_v7 = vld [vmem:[%s6161_s17 + $0x78] sm:$0xff]  ;;  %v7264_v50 = vpop.permute.xlu2 %2108 }
 0x3b2   : > { %11749 = vst [vmem:[#allocation288_spill] sm:$0xff] %v7260_v7  ;;  %v2981_v6 = vsel %vm11381_vm0, %v7260_v7, 0.0 }
 0x3b3   : > { %5661 = vset.pattern.permute.xlu1 %v11738_v14  ;;  %11750 = vst [vmem:[#allocation289_spill] sm:$0xff] %v7264_v50  ;;  %v7286_v50 = vld [vmem:[%s6034_s14 + $0x78] sm:$0xff] }
 0x3b7   : > { %5662 = vset.pattern.permute.xlu0 %v11741_v56  ;;  %v7253_v1 = vpop.permute.xlu1 %1689 }
 0x3b8   : > { %11748 = vst [vmem:[#allocation287_spill] sm:$0xff] %v7253_v1  ;;  %v7274_v1 = vld [vmem:[%s6034_s14 + $0x60] sm:$0xff] }
 0x3b9   : > { %1659 = vperm.xlu2 %5658, %v7020_v42   ;;  %v7251_v19 = vpop.permute.xlu0 %1662 }
 0x3ba   : > { %11747 = vst [vmem:[#allocation286_spill] sm:$0xff] %v7251_v19  ;;  %v2990_v19 = vsel %vm11381_vm0, %v7269_v20, 0.0 }
 0x3bf   : > { %v7279_v2 = vpop.permute.xlu1 %1698 }
 0x3c1   : > { %1668 = vperm.xlu2 %5658, %v7240_v27   ;;  %v7266_v24 = vpop.permute.xlu0 %1677 }
 0x3c2   : > { %11751 = vst [vmem:[#allocation290_spill] sm:$0xff] %v7266_v24 }
 0x3c9   : > { %1674 = vperm.xlu2 %5658, %v7246_v49   ;;  %v7283_v24 = vpop.permute.xlu0 %1686 }
 0x3d1   : > { %1683 = vperm.xlu2 %5658, %v7256_v13   ;;  %v7293_v33 = vpop.permute.xlu0 %1695 }
 0x3d2   : > { %11755 = vst [vmem:[#allocation294_spill] sm:$0xff] %v7293_v33 }
 0x3d5   : > { %2982 = vadd.xlane.f32.xlu1 %v2981_v6  ;;  %v7281_v6 = vpop.permute.xlu2 %2112 }
 0x3d6   : > { %11752 = vst [vmem:[#allocation291_spill] sm:$0xff] %v7281_v6  ;;  %v7303_v6 = vld [vmem:[%s6034_s14 + $0xa8] sm:$0xff] }
 0x3d9   : > { %2991 = vadd.xlane.f32.xlu0 %v2990_v19  ;;  %1692 = vperm.xlu2 %5658, %v7274_v1   ;;  %v7289_v19 = vpop.permute.xlu1 %1707 }
 0x3da   : > { %11753 = vst [vmem:[#allocation292_spill] sm:$0xff] %v7289_v19  ;;  %v7308_v19 = vpop.permute.xlu0 %1704 }
 0x3db   : > { %11758 = vst [vmem:[#allocation297_spill] sm:$0xff] %v7308_v19  ;;  %v5814_v19 = vld [vmem:[%s6034_s14 + $0xd8] sm:$0xff] }
 0x3dd   : > { %2988 = vadd.xlane.f32.xlu1 %v2987_v30  ;;  %v7291_v10 = vpop.permute.xlu2 %1991 }
 0x3de   : > { %11754 = vst [vmem:[#allocation293_spill] sm:$0xff] %v7291_v10  ;;  %v7311_v10 = vld [vmem:[%s6161_s17 + $0x18] sm:$0xff] }
 0x3e1   : > { %1701 = vperm.xlu2 %5658, %v7286_v50   ;;  %v7300_v30 = vpop.permute.xlu1 %1716 }
 0x3e2   : > { %11756 = vst [vmem:[#allocation295_spill] sm:$0xff] %v7300_v30  ;;  %v7323_v38 = vpop.permute.xlu0 %1713 }
 0x3e3   : > { %11761 = vst [vmem:[#allocation300_spill] sm:$0xff] %v7323_v38 }
 0x3e5   : > { %v7306_v18 = vpop.permute.xlu2 %1997 }
 0x3e6   : > { %11757 = vst [vmem:[#allocation296_spill] sm:$0xff] %v7306_v18 }
 0x3e9   : > { %1710 = vperm.xlu2 %5658, %v7296_v15   ;;  %v7315_v33 = vpop.permute.xlu1 %1725 }
 0x3ea   : > { %11759 = vst [vmem:[#allocation298_spill] sm:$0xff] %v7315_v33  ;;  %v7334_v33 = vpop.permute.xlu0 %1722 }
 0x3eb   : > { %11764 = vst [vmem:[#allocation303_spill] sm:$0xff] %v7334_v33 }
 0x3ed   : > { %1985 = vperm.xlu0 %5662, %v7008_v34   ;;  %v7321_v30 = vpop.permute.xlu2 %2000 }
 0x3ee   : > { %11760 = vst [vmem:[#allocation299_spill] sm:$0xff] %v7321_v30 }
 0x3f1   : > { %1719 = vperm.xlu2 %5658, %v7303_v6   ;;  %v7328_v18 = vpop.permute.xlu1 %1734 }
 0x3f2   : > { %11762 = vst [vmem:[#allocation301_spill] sm:$0xff] %v7328_v18 }
 0x3f5   : > { %2116 = vperm.xlu0 %5662, %v7311_v10   ;;  %v7331_v5 = vpop.permute.xlu2 %2136 }
 0x3f6   : > { %2619 = vperm.xlu1 %5661, %v7020_v42   ;;  %11763 = vst [vmem:[#allocation302_spill] sm:$0xff] %v7331_v5 }
 0x3f9   : > { %1728 = vperm.xlu2 %5658, %v7318_v41   ;;  %v7337_v30 = vpop.permute.xlu1 %1743 }
 0x3fa   : > { %11765 = vst [vmem:[#allocation304_spill] sm:$0xff] %v7337_v30 }
 0x3fd   : > { %2120 = vperm.xlu0 %5662, %v7149_v36   ;;  %v7341_v38 = vpop.permute.xlu2 %2009 }
 0x3fe   : > { %2625 = vperm.xlu1 %5661, %v7008_v34   ;;  %11766 = vst [vmem:[#allocation305_spill] sm:$0xff] %v7341_v38 }
 0x401   : > { %1737 = vperm.xlu2 %5658, %v5814_v19   ;;  %v7343_v19 = vpop.permute.xlu0 %1731  ;;  %v7348_v18 = vpop.permute.xlu1 %1800 }
 0x402   : > { %11767 = vst [vmem:[#allocation306_spill] sm:$0xff] %v7343_v19 }
 0x403   : > { %11768 = vst [vmem:[#allocation307_spill] sm:$0xff] %v7348_v18 }
 0x405   : > { %2128 = vperm.xlu0 %5662, %v7168_v31  }
 0x406   : > { %2752 = vperm.xlu1 %5661, %v7063_v39  }
 0x409   : > { %1746 = vperm.xlu2 %5658, %v5815_v61   ;;  %v7351_v61 = vpop.permute.xlu2 %2015  ;;  %v7353_v30 = vpop.permute.xlu0 %1740 }
 0x40a   : > { %11769 = vst [vmem:[#allocation308_spill] sm:$0xff] %v7351_v61  ;;  %v7357_v33 = vpop.permute.xlu1 %1804 }
 0x40b   : > { %11770 = vst [vmem:[#allocation309_spill] sm:$0xff] %v7353_v30 }
 0x40c   : > { %11771 = vst [vmem:[#allocation310_spill] sm:$0xff] %v7357_v33 }
 0x40d   : > { %2140 = vperm.xlu0 %5662, %v7016_v44  }
 0x40e   : > { %2756 = vperm.xlu1 %5661, %v7311_v10  }
 0x411   : > { %1784 = vperm.xlu2 %5658, %v6977_v47   ;;  %v7362_v5 = vpop.permute.xlu0 %1792 }
 0x412   : > { %11773 = vst [vmem:[#allocation312_spill] sm:$0xff] %v7362_v5  ;;  %v7367_v61 = vpop.permute.xlu1 %1808 }
 0x413   : > { %11774 = vst [vmem:[#allocation313_spill] sm:$0xff] %v7367_v61 }
 0x414   : > { %v7360_v19 = vpop.xlane.xlu2 %2979 }
 0x415   : > { %2006 = vperm.xlu0 %5662, %v7092_v45   ;;  %11772 = vst [vmem:[#allocation311_spill] sm:$0xff] %v7360_v19 }
 0x416   : > { %2631 = vperm.xlu1 %5661, %v7024_v62  }
 0x419   : > { %1788 = vperm.xlu2 %5658, %v6987_v54   ;;  %v7373_v33 = vpop.permute.xlu0 %1824 }
 0x41a   : > { %v7376_v19 = vpop.permute.xlu1 %1812 }
 0x41b   : > { %11776 = vst [vmem:[#allocation315_spill] sm:$0xff] %v7376_v19 }
 0x41c   : > { %v7369_v30 = vpop.permute.xlu2 %1659 }
 0x41d   : > { %2144 = vperm.xlu0 %5662, %v7185_v9   ;;  %11775 = vst [vmem:[#allocation314_spill] sm:$0xff] %v7369_v30 }
 0x41e   : > { %2760 = vperm.xlu1 %5661, %v7149_v36  }
 0x421   : > { %1796 = vperm.xlu2 %5658, %v7311_v10   ;;  %v7382_v5 = vpop.permute.xlu0 %1840 }
 0x422   : > { %v7387_v61 = vpop.permute.xlu1 %1828 }
 0x423   : > { %11778 = vst [vmem:[#allocation317_spill] sm:$0xff] %v7387_v61 }
 0x424   : > { %v7379_v18 = vpop.permute.xlu2 %1668 }
 0x425   : > { %2148 = vperm.xlu0 %5662, %v7193_v4   ;;  %11777 = vst [vmem:[#allocation316_spill] sm:$0xff] %v7379_v18 }
 0x426   : > { %2764 = vperm.xlu1 %5661, %v7159_v60  }
 0x429   : > { %1816 = vperm.xlu2 %5658, %v7001_v48   ;;  %v7393_v19 = vpop.permute.xlu0 %1848 }
 0x42a   : > { %11780 = vst [vmem:[#allocation319_spill] sm:$0xff] %v7393_v19  ;;  %v7397_v18 = vpop.permute.xlu1 %1832 }
 0x42b   : > { %11781 = vst [vmem:[#allocation320_spill] sm:$0xff] %v7397_v18 }
 0x42c   : > { %v7389_v38 = vpop.permute.xlu2 %1674 }
 0x42d   : > { %2156 = vperm.xlu0 %5662, %v7043_v28   ;;  %11779 = vst [vmem:[#allocation318_spill] sm:$0xff] %v7389_v38 }
 0x42e   : > { %2634 = vperm.xlu1 %5661, %v7246_v49  }
 0x431   : > { %1820 = vperm.xlu2 %5658, %v7016_v44   ;;  %v7402_v58 = vpop.permute.xlu0 %1852 }
 0x432   : > { %11783 = vst [vmem:[#allocation322_spill] sm:$0xff] %v7402_v58  ;;  %v7406_v38 = vpop.permute.xlu1 %1836 }
 0x433   : > { %11784 = vst [vmem:[#allocation323_spill] sm:$0xff] %v7406_v38  ;;  %v11364_v38 = vlaneseq }
 0x434   : > { %v7399_v30 = vpop.permute.xlu2 %1683 }
 0x435   : > { %2018 = vperm.xlu0 %5662, %v7073_v51   ;;  %11782 = vst [vmem:[#allocation321_spill] sm:$0xff] %v7399_v30  ;;  %v11361_v30 = vmov 6   ;;  %v7422_v0 = vand.u32 127, %v11364_v38 }
 0x436   : > { %2640 = vperm.xlu1 %5661, %v7039_v16  }
 0x437   : > { %vm1441_vm5 = vcmp.eq.s32.totalorder %v6903_v55, %v7422_v0  ;;  %vm1761_vm6 = vcmp.eq.s32.totalorder %v7283_v24, %v7422_v0  ;;  %vm1445_vm11 = vcmp.eq.s32.totalorder %v6911_v3, %v7422_v0  ;;  %vm1765_vm12 = vcmp.eq.s32.totalorder %v7279_v2, %v7422_v0 }
 0x439   : > { %1844 = vperm.xlu2 %5658, %v7260_v7  }
 0x43c   : > { %v7408_v61 = vpop.permute.xlu2 %1692 }
 0x43d   : > { %2160 = vperm.xlu0 %5662, %v7197_v21   ;;  %11785 = vst [vmem:[#allocation324_spill] sm:$0xff] %v7408_v61 }
 0x43e   : > { %2649 = vperm.xlu1 %5661, %v7054_v52   ;;  %v11803_v52 = vld [vmem:[#allocation24_spill] sm:$0xff] }
 0x43f   : > { %vm449_vm3 = vcmp.eq.s32.totalorder %v11803_v52, %v7422_v0 }
 0x441   : > { %5660 = vset.pattern.permute.xlu2 %v11741_v56 }
 0x442   : > { %2164 = vperm.xlu2 %5660, %v7260_v7  }
 0x444   : > { %v7417_v58 = vpop.permute.xlu2 %1701 }
 0x445   : > { %2024 = vperm.xlu0 %5662, %v7118_v40   ;;  %11788 = vst [vmem:[#allocation327_spill] sm:$0xff] %v7417_v58 }
 0x446   : > { %2784 = vperm.xlu1 %5661, %v7185_v9  }
 0x448   : > { %v7414_v18 = vpop.xlane.xlu1 %2982 }
 0x449   : > { %11787 = vst [vmem:[#allocation326_spill] sm:$0xff] %v7414_v18 }
 0x44a   : > { %5666 = vset.pattern.permute.xlu2 %v11738_v14 }
 0x44c   : > { %v7411_v19 = vpop.xlane.xlu0 %2991  ;;  %v7429_v58 = vpop.permute.xlu2 %1710 }
 0x44d   : > { %2172 = vperm.xlu0 %5662, %v7221_v11   ;;  %11786 = vst [vmem:[#allocation325_spill] sm:$0xff] %v7411_v19 }
 0x44e   : > { %2788 = vperm.xlu1 %5661, %v7193_v4   ;;  %11790 = vst [vmem:[#allocation329_spill] sm:$0xff] %v7429_v58 }
 0x450   : > { %v7424_v19 = vpop.xlane.xlu1 %2988 }
 0x451   : > { %11789 = vst [vmem:[#allocation328_spill] sm:$0xff] %v7424_v19 }
 0x455   : > { %2033 = vperm.xlu0 %5662, %v7128_v35  }
 0x456   : > { %2655 = vperm.xlu1 %5661, %v7107_v53  }
 0x45d   : > { %5664 = vset.pattern.permute.xlu0 %v11361_v30 }
 0x45e   : > { %2658 = vperm.xlu1 %5661, %v7073_v51   ;;  %2296 = vperm.xlu0 %5664, %v6997_v63  }
 0x45f   : > { %v1986_v61 = vpop.permute.xlu0 %1985 }
 0x460   : > { %vm2074_vm1 = vcmp.eq.s32.totalorder %v1986_v61, %v7422_v0  ;;  %v7441_v61 = vld [vmem:[%s6161_s17 + $0x98] sm:$0xff] }
 0x466   : > { %2804 = vperm.xlu1 %5661, %v7260_v7   ;;  %2432 = vperm.xlu0 %5664, %v7063_v39   ;;  %v2993_v39 = vsel %vm11381_vm0, %v7441_v61, 0.0  ;;  %v7445_v7 = vpop.permute.xlu2 %1719 }
 0x467   : > { %v2117_v30 = vpop.permute.xlu0 %2116  ;;  %11794 = vst [vmem:[#allocation333_spill] sm:$0xff] %v7445_v7 }
 0x468   : > { %v7431_v18 = vsel %vm2074_vm1, %v2117_v30, 0.0  ;;  %v7435_v38 = vpop.permute.xlu1 %2619 }
 0x469   : > { %11791 = vst [vmem:[#allocation330_spill] sm:$0xff] %v7431_v18 }
 0x46a   : > { %11792 = vst [vmem:[#allocation331_spill] sm:$0xff] %v7435_v38 }
 0x46b   : > { %2985 = vadd.xlane.f32.xlu2 %v2984_v12  ;;  %v7453_v12 = vld [vmem:[%s6161_s17 + $0xa8] sm:$0xff] }
 0x46e   : > { %2667 = vperm.xlu1 %5661, %v7084_v46   ;;  %v2999_v46 = vsel %vm11381_vm0, %v7453_v12, 0.0 }
 0x46f   : > { %v7438_v19 = vpop.permute.xlu0 %2120 }
 0x470   : > { %11793 = vst [vmem:[#allocation332_spill] sm:$0xff] %v7438_v19  ;;  %v7448_v30 = vpop.permute.xlu1 %2625  ;;  %v7457_v19 = vpop.permute.xlu2 %1728 }
 0x471   : > { %11795 = vst [vmem:[#allocation334_spill] sm:$0xff] %v7448_v30  ;;  %v11801_v30 = vld [vmem:[#allocation117_spill] sm:$0xff] }
 0x472   : > { %11797 = vst [vmem:[#allocation336_spill] sm:$0xff] %v7457_v19 }
 0x473   : > { %2994 = vadd.xlane.f32.xlu2 %v2993_v39  ;;  %v11800_v39 = vld [vmem:[#allocation98_spill] sm:$0xff] }
 0x474   : > { %vm801_vm2 = vcmp.eq.s32.totalorder %v11800_v39, %v7422_v0 }
 0x475   : > { %v961_v38 = vsel %vm801_vm2, %v11801_v30, 0.0  ;;  %v1601_v30 = vsel %vm1441_vm5, %v6974_v23, 0.0 }
 0x476   : > { %2808 = vperm.xlu1 %5661, %v7210_v8  }
 0x477   : > { %v7450_v58 = vpop.permute.xlu0 %2128 }
 0x478   : > { %11796 = vst [vmem:[#allocation335_spill] sm:$0xff] %v7450_v58  ;;  %v7462_v7 = vpop.permute.xlu1 %2752  ;;  %v7467_v58 = vpop.permute.xlu2 %1737 }
 0x479   : > { %11799 = vst [vmem:[#allocation338_spill] sm:$0xff] %v7462_v7 }
 0x47a   : > { %11802 = vst [vmem:[#allocation98_spill] sm:$0xff] %v7467_v58 }
 0x47b   : > { %3000 = vadd.xlane.f32.xlu2 %v2999_v46  ;;  %v11804_v46 = vld [vmem:[#allocation154_spill] sm:$0xff] }
 0x47c   : > { %vm1121_vm4 = vcmp.eq.s32.totalorder %v11804_v46, %v7422_v0  ;;  %v1921_v46 = vsel %vm1761_vm6, %v7373_v33, 0.0 }
 0x47d   : > { %v1281_v39 = vsel %vm1121_vm4, %v6800_v17, 0.0 }
 0x47e   : > { %2812 = vperm.xlu1 %5661, %v7221_v11  }
 0x47f   : > { %v7460_v18 = vpop.permute.xlu0 %2140 }
 0x480   : > { %11798 = vst [vmem:[#allocation337_spill] sm:$0xff] %v7460_v18  ;;  %v11805_v18 = vld [vmem:[#allocation68_spill] sm:$0xff]  ;;  %v7482_v58 = vpop.permute.xlu1 %2756  ;;  %v7492_v55 = vpop.permute.xlu2 %1746 }
 0x481   : > { %v641_v7 = vsel %vm449_vm3, %v11805_v18, 0.0  ;;  %11806 = vst [vmem:[#allocation117_spill] sm:$0xff] %v7482_v58  ;;  %v7487_v18 = vld [vmem:[%s6161_s17 + $0xa0] sm:$0xff] }
 0x482   : > { %v993_v44 = vadd.f32 %v961_v38, %v641_v7  ;;  %v2996_v7 = vsel %vm11381_vm0, %v7487_v18, 0.0  ;;  %11807 = vst [vmem:[#allocation24_spill] sm:$0xff] %v7492_v55  ;;  %v7500_v38 = vld [vmem:[%s6161_s17 + $0xb8] sm:$0xff]  ;;  %v11815_v55 = vld [vmem:[#allocation13_spill] sm:$0xff] }
 0x483   : > { %vm453_vm10 = vcmp.eq.s32.totalorder %v11815_v55, %v7422_v0  ;;  %v1925_v55 = vsel %vm1765_vm12, %v7382_v5, 0.0 }
 0x484   : > { %v1313_v52 = vadd.f32 %v1281_v39, %v993_v44 }
 0x486   : > { %5663 = vset.pattern.permute.xlu1 %v11704_v29  ;;  %v1633_v56 = vadd.f32 %v1601_v30, %v1313_v52  ;;  %v7512_v30 = vld [vmem:[%s6161_s17 + $0xc8] sm:$0xff] }
 0x487   : > { %1856 = vperm.xlu1 %5663, %v7269_v20   ;;  %v2007_v19 = vpop.permute.xlu0 %2006 }
 0x488   : > { %vm2081_vm7 = vcmp.eq.s32.totalorder %v2007_v19, %v7422_v0  ;;  %v1953_v17 = vadd.f32 %v1921_v46, %v1633_v56  ;;  %v7497_v33 = vpop.permute.xlu1 %2631  ;;  %v3005_v19 = vsel %vm11381_vm0, %v7500_v38, 0.0  ;;  %v7508_v39 = vpop.permute.xlu2 %1784 }
 0x489   : > { %11809 = vst [vmem:[#allocation68_spill] sm:$0xff] %v7497_v33 }
 0x48f   : > { %1860 = vperm.xlu1 %5663, %v7441_v61   ;;  %v2145_v24 = vpop.permute.xlu0 %2144 }
 0x490   : > { %v2241_v23 = vsel %vm2081_vm7, %v2145_v24, 0.0  ;;  %2997 = vadd.xlane.f32.xlu0 %v2996_v7  ;;  %v7516_v52 = vpop.permute.xlu1 %2760  ;;  %v7522_v7 = vpop.permute.xlu2 %1788  ;;  %v11813_v24 = vld [vmem:[#allocation158_spill] sm:$0xff] }
 0x491   : > { %v7494_v44 = vadd.f32 %v2241_v23, %v1953_v17  ;;  %11810 = vst [vmem:[#allocation339_spill] sm:$0xff] %v7516_v52  ;;  %v11812_v17 = vld [vmem:[#allocation103_spill] sm:$0xff]  ;;  %vm1125_vm9 = vcmp.eq.s32.totalorder %v11813_v24, %v7422_v0  ;;  %v1605_v24 = vsel %vm1445_vm11, %v7066_v57, 0.0 }
 0x492   : > { %vm805_vm8 = vcmp.eq.s32.totalorder %v11812_v17, %v7422_v0  ;;  %v11814_v23 = vld [vmem:[#allocation131_spill] sm:$0xff] }
 0x493   : > { %11808 = vst [vmem:[#allocation154_spill] sm:$0xff] %v7494_v44  ;;  %2616 = vperm.xlu2 %5666, %v6997_v63   ;;  %v3011_v63 = vsel %vm11381_vm0, %v7512_v30, 0.0 }
 0x497   : > { %5665 = vset.pattern.permute.xlu1 %v11738_v14  ;;  %v7505_v56 = vpop.permute.xlu0 %2148 }
 0x498   : > { %2673 = vperm.xlu1 %5665, %v7128_v35   ;;  %3006 = vadd.xlane.f32.xlu0 %v3005_v19  ;;  %v965_v19 = vsel %vm805_vm8, %v11814_v23, 0.0  ;;  %v7536_v17 = vpop.permute.xlu1 %2764 }
 0x49b   : > { %2622 = vperm.xlu2 %5666, %v7059_v25  }
 0x49f   : > { %v7518_v46 = vpop.permute.xlu0 %2156 }
 0x4a0   : > { %11811 = vst [vmem:[#allocation340_spill] sm:$0xff] %v7518_v46  ;;  %2816 = vperm.xlu1 %5665, %v7269_v20   ;;  %3012 = vadd.xlane.f32.xlu0 %v3011_v63  ;;  %v11816_v46 = vld [vmem:[#allocation70_spill] sm:$0xff]  ;;  %v1285_v63 = vsel %vm1125_vm9, %v6811_v22, 0.0  ;;  %v7544_v22 = vpop.permute.xlu2 %1796 }
 0x4a1   : > { %v645_v33 = vsel %vm453_vm10, %v11816_v46, 0.0 }
 0x4a2   : > { %v997_v58 = vadd.f32 %v965_v19, %v645_v33 }
 0x4a3   : > { %2628 = vperm.xlu2 %5666, %v7240_v27  }
 0x4a4   : > { %v1317_v44 = vadd.f32 %v1285_v63, %v997_v58  ;;  %v7550_v58 = vpop.permute.xlu1 %2634 }
 0x4a5   : > { %11818 = vst [vmem:[#allocation158_spill] sm:$0xff] %v7550_v58 }
 0x4a6   : > { %v1637_v46 = vadd.f32 %v1605_v24, %v1317_v44  ;;  %v11821_v44 = vmov 6  }
 0x4a7   : > { %v2019_v52 = vpop.permute.xlu0 %2018 }
 0x4a8   : > { %2820 = vperm.xlu1 %5665, %v7441_v61   ;;  %vm2085_vm13 = vcmp.eq.s32.totalorder %v2019_v52, %v7422_v0  ;;  %v1957_v33 = vadd.f32 %v1925_v55, %v1637_v46  ;;  %v7554_v5 = vpop.permute.xlu2 %1816  ;;  %v7588_v55 = vld [vmem:[%s6161_s17 + $0xc0] sm:$0xff] }
 0x4ab   : > { %2637 = vperm.xlu2 %5666, %v7077_v43  }
 0x4ac   : > { %v7559_v2 = vpop.permute.xlu1 %2640 }
 0x4ad   : > { %11819 = vst [vmem:[#allocation131_spill] sm:$0xff] %v7559_v2  ;;  %v11894_v2 = vld [vmem:[#allocation275_spill] sm:$0xff] }
 0x4ae   : > { %vm1751_vm8 = vcmp.eq.s32.totalorder %v11894_v2, %v7422_v0  ;;  %v11898_v2 = vld [vmem:[#allocation219_spill] sm:$0xff] }
 0x4af   : > { %v2161_v23 = vpop.permute.xlu0 %2160 }
 0x4b0   : > { %v2245_v3 = vsel %vm2085_vm13, %v2161_v23, 0.0  ;;  %5667 = vset.pattern.permute.xlu1 %v11704_v29  ;;  %v7562_v57 = vpop.permute.xlu2 %1820 }
 0x4b1   : > { %v7547_v19 = vadd.f32 %v2245_v3, %v1957_v33  ;;  %1864 = vperm.xlu1 %5667, %v7487_v18   ;;  %11820 = vst [vmem:[#allocation13_spill] sm:$0xff] %v7562_v57 }
 0x4b3   : > { %11817 = vst [vmem:[#allocation103_spill] sm:$0xff] %v7547_v19  ;;  %2768 = vperm.xlu2 %5666, %v7168_v31  }
 0x4b4   : > { %2448 = vperm.xlu0 %5664, %v7168_v31   ;;  %v7567_v31 = vpop.permute.xlu1 %2649 }
 0x4b9   : > { %1868 = vperm.xlu1 %5667, %v7453_v12  }
 0x4bb   : > { %2772 = vperm.xlu2 %5666, %v7179_v59  }
 0x4bc   : > { %2464 = vperm.xlu0 %5664, %v7185_v9   ;;  %v7571_v9 = vpop.permute.xlu2 %1844  ;;  %v7574_v52 = vpop.permute.xlu1 %2784 }
 0x4bd   : > { %11822 = vst [vmem:[#allocation70_spill] sm:$0xff] %v7571_v9 }
 0x4c1   : > { %5668 = vset.pattern.permute.xlu1 %v11738_v14 }
 0x4c2   : > { %2676 = vperm.xlu1 %5668, %v7097_v37  }
 0x4c3   : > { %2643 = vperm.xlu2 %5666, %v7256_v13  }
 0x4c4   : > { %2338 = vperm.xlu0 %5664, %v7073_v51   ;;  %v7578_v63 = vpop.permute.xlu2 %2164  ;;  %v7580_v51 = vpop.permute.xlu1 %2788 }
 0x4c5   : > { %11823 = vst [vmem:[#allocation341_spill] sm:$0xff] %v7578_v63 }
 0x4ca   : > { %5669 = vset.pattern.permute.xlu1 %v11821_v44 }
 0x4cb   : > { %2646 = vperm.xlu2 %5666, %v7092_v45  }
 0x4cc   : > { %2344 = vperm.xlu0 %5664, %v7118_v40   ;;  %v7591_v46 = vpop.permute.xlu1 %2655 }
 0x4cd   : > { %11825 = vst [vmem:[#allocation343_spill] sm:$0xff] %v7591_v46  ;;  %v11889_v46 = vld [vmem:[#allocation59_spill] sm:$0xff] }
 0x4d3   : > { %2652 = vperm.xlu2 %5666, %v7274_v1  }
 0x4d4   : > { %2492 = vperm.xlu0 %5664, %v7221_v11   ;;  %v7596_v11 = vld [vmem:[%s6161_s17 + $0xb0] sm:$0xff]  ;;  %v7605_v3 = vpop.permute.xlu1 %2658 }
 0x4d5   : > { %v3002_v23 = vsel %vm11381_vm0, %v7596_v11, 0.0  ;;  %11828 = vst [vmem:[#allocation346_spill] sm:$0xff] %v7605_v3 }
 0x4db   : > { %2800 = vperm.xlu2 %5666, %v7197_v21  }
 0x4dc   : > { %2504 = vperm.xlu0 %5664, %v7487_v18  }
 0x4de   : > { %v7584_v24 = vpop.xlane.xlu2 %2985 }
 0x4df   : > { %11824 = vst [vmem:[#allocation342_spill] sm:$0xff] %v7584_v24 }
 0x4e3   : > { %2664 = vperm.xlu2 %5666, %v7118_v40  }
 0x4e4   : > { %2520 = vperm.xlu0 %5664, %v7588_v55  }
 0x4e6   : > { %v7593_v33 = vpop.xlane.xlu2 %2994 }
 0x4e7   : > { %11826 = vst [vmem:[#allocation344_spill] sm:$0xff] %v7593_v33  ;;  %v7610_v33 = vpop.permute.xlu1 %2804 }
 0x4e8   : > { %11829 = vst [vmem:[#allocation347_spill] sm:$0xff] %v7610_v33 }
 0x4eb   : > { %2670 = vperm.xlu2 %5666, %v7296_v15  }
 0x4ec   : > { %3003 = vadd.xlane.f32.xlu1 %v3002_v23  ;;  %5675 = vset.pattern.permute.xlu0 %v11738_v14 }
 0x4ed   : > { %2661 = vperm.xlu0 %5675, %v7286_v50  }
 0x4ee   : > { %v7603_v40 = vpop.xlane.xlu2 %3000 }
 0x4ef   : > { %11827 = vst [vmem:[#allocation345_spill] sm:$0xff] %v7603_v40  ;;  %v7615_v19 = vpop.permute.xlu1 %2667 }
 0x4f0   : > { %11830 = vst [vmem:[#allocation348_spill] sm:$0xff] %v7615_v19 }
 0x4f3   : > { %2679 = vperm.xlu2 %5666, %v7303_v6  }
 0x4f6   : > { %v7608_v24 = vpop.permute.xlu2 %2616 }
 0x4f7   : > { %v7623_v40 = vpop.permute.xlu1 %2808 }
 0x4f8   : > { %11831 = vst [vmem:[#allocation349_spill] sm:$0xff] %v7623_v40 }
 0x4fb   : > { %2824 = vperm.xlu2 %5666, %v7487_v18  }
 0x4fe   : > { %v7613_v63 = vpop.permute.xlu2 %2622 }
 0x4ff   : > { %v7632_v3 = vpop.permute.xlu1 %2812 }
 0x500   : > { %11834 = vst [vmem:[#allocation352_spill] sm:$0xff] %v7632_v3 }
 0x503   : > { %2828 = vperm.xlu2 %5666, %v7453_v12  }
 0x505   : > { %2299 = vperm.xlu1 %5669, %v7020_v42  }
 0x506   : > { %v7619_v23 = vpop.permute.xlu2 %2628 }
 0x507   : > { %v7639_v40 = vpop.permute.xlu1 %1856 }
 0x508   : > { %11836 = vst [vmem:[#allocation354_spill] sm:$0xff] %v7639_v40 }
 0x50b   : > { %5670 = vset.pattern.permute.xlu2 %v11704_v29 }
 0x50c   : > { %1872 = vperm.xlu2 %5670, %v7596_v11  }
 0x50d   : > { %2302 = vperm.xlu1 %5669, %v7059_v25  }
 0x50e   : > { %v7626_v33 = vpop.permute.xlu2 %2637 }
 0x50f   : > { %11832 = vst [vmem:[#allocation350_spill] sm:$0xff] %v7626_v33 }
 0x514   : > { %1876 = vperm.xlu2 %5670, %v7500_v38  }
 0x515   : > { %2436 = vperm.xlu1 %5669, %v7311_v10   ;;  %v7645_v10 = vpop.permute.xlu1 %1860 }
 0x516   : > { %v7630_v19 = vpop.permute.xlu2 %2768  ;;  %11838 = vst [vmem:[#allocation356_spill] sm:$0xff] %v7645_v10  ;;  %v11869_v10 = vld [vmem:[#allocation240_spill] sm:$0xff] }
 0x517   : > { %11833 = vst [vmem:[#allocation351_spill] sm:$0xff] %v7630_v19 }
 0x51c   : > { %5672 = vset.pattern.permute.xlu2 %v11738_v14 }
 0x51d   : > { %2308 = vperm.xlu1 %5669, %v7240_v27   ;;  %2685 = vperm.xlu2 %5672, %v7112_v32   ;;  %v7651_v27 = vpop.permute.xlu1 %2673 }
 0x51e   : > { %v7637_v42 = vpop.permute.xlu2 %2772  ;;  %11839 = vst [vmem:[#allocation357_spill] sm:$0xff] %v7651_v27 }
 0x51f   : > { %11835 = vst [vmem:[#allocation353_spill] sm:$0xff] %v7637_v42 }
 0x525   : > { %2311 = vperm.xlu1 %5669, %v7024_v62   ;;  %2832 = vperm.xlu2 %5672, %v7596_v11  }
 0x526   : > { %v7643_v25 = vpop.permute.xlu2 %2643 }
 0x527   : > { %11837 = vst [vmem:[#allocation355_spill] sm:$0xff] %v7643_v25  ;;  %v11891_v25 = vld [vmem:[#allocation229_spill] sm:$0xff] }
 0x52d   : > { %2444 = vperm.xlu1 %5669, %v7159_v60   ;;  %2836 = vperm.xlu2 %5672, %v7500_v38   ;;  %v7662_v60 = vpop.permute.xlu1 %2816 }
 0x52e   : > { %v7649_v3 = vpop.permute.xlu2 %2646  ;;  %11842 = vst [vmem:[#allocation360_spill] sm:$0xff] %v7662_v60 }
 0x535   : > { %2314 = vperm.xlu1 %5669, %v7246_v49   ;;  %5674 = vset.pattern.permute.xlu2 %v11704_v29  ;;  %v7669_v49 = vpop.permute.xlu1 %2820 }
 0x536   : > { %1880 = vperm.xlu2 %5674, %v7588_v55   ;;  %v7656_v32 = vpop.permute.xlu2 %2652  ;;  %11844 = vst [vmem:[#allocation362_spill] sm:$0xff] %v7669_v49 }
 0x537   : > { %11840 = vst [vmem:[#allocation358_spill] sm:$0xff] %v7656_v32 }
 0x53d   : > { %2317 = vperm.xlu1 %5669, %v7077_v43  }
 0x53e   : > { %1884 = vperm.xlu2 %5674, %v7512_v30   ;;  %v7660_v62 = vpop.permute.xlu2 %2800  ;;  %v7675_v30 = vpop.permute.xlu1 %1864 }
 0x53f   : > { %11841 = vst [vmem:[#allocation359_spill] sm:$0xff] %v7660_v62  ;;  %v11874_v62 = vld [vmem:[#allocation252_spill] sm:$0xff] }
 0x540   : > { %11846 = vst [vmem:[#allocation364_spill] sm:$0xff] %v7675_v30  ;;  %v7850_v9 = vmax.f32 %v11874_v62, 1.0  ;;  %v5564_v62 = vld [vmem:[%s11258_s2 + $0x4] sm:$0xf] }
 0x542   : > { %vm3069_vm13 = vweird.f32 %v7850_v9 }
 0x545   : > { %2456 = vperm.xlu1 %5669, %v7001_v48  }
 0x546   : > { %5677 = vset.pattern.permute.xlu2 %v11738_v14  ;;  %v7666_v27 = vpop.permute.xlu2 %2664  ;;  %v7680_v60 = vpop.permute.xlu1 %1868 }
 0x547   : > { %11843 = vst [vmem:[#allocation361_spill] sm:$0xff] %v7666_v27  ;;  %2688 = vperm.xlu2 %5677, %v7318_v41  }
 0x548   : > { %11848 = vst [vmem:[#allocation366_spill] sm:$0xff] %v7680_v60 }
 0x54d   : > { %2326 = vperm.xlu1 %5669, %v7092_v45  }
 0x54e   : > { %v7672_v43 = vpop.permute.xlu2 %2670  ;;  %v7688_v45 = vpop.permute.xlu1 %2676 }
 0x54f   : > { %11845 = vst [vmem:[#allocation363_spill] sm:$0xff] %v7672_v43  ;;  %5679 = vset.pattern.permute.xlu2 %v11821_v44  ;;  %v7692_v43 = vld [vmem:[%s6161_s17 + $0xd0] sm:$0xff] }
 0x550   : > { %11851 = vst [vmem:[#allocation369_spill] sm:$0xff] %v7688_v45 }
 0x555   : > { %2468 = vperm.xlu1 %5669, %v7193_v4   ;;  %v3014_v4 = vsel %vm11381_vm0, %v7692_v43, 0.0 }
 0x556   : > { %v7678_v48 = vpop.permute.xlu2 %2679 }
 0x557   : > { %11847 = vst [vmem:[#allocation365_spill] sm:$0xff] %v7678_v48 }
 0x55d   : > { %2332 = vperm.xlu1 %5669, %v7274_v1  }
 0x55e   : > { %v7683_v27 = vpop.permute.xlu2 %2824 }
 0x55f   : > { %11849 = vst [vmem:[#allocation367_spill] sm:$0xff] %v7683_v27  ;;  %v7698_v60 = vpop.xlane.xlu1 %3003 }
 0x560   : > { %11853 = vst [vmem:[#allocation371_spill] sm:$0xff] %v7698_v60 }
 0x565   : > { %2335 = vperm.xlu1 %5669, %v7107_v53  }
 0x566   : > { %v7686_v49 = vpop.permute.xlu2 %2828 }
 0x567   : > { %11850 = vst [vmem:[#allocation368_spill] sm:$0xff] %v7686_v49 }
 0x56d   : > { %2476 = vperm.xlu1 %5669, %v7043_v28  }
 0x56e   : > { %v7696_v48 = vpop.permute.xlu2 %1872 }
 0x56f   : > { %11852 = vst [vmem:[#allocation370_spill] sm:$0xff] %v7696_v48  ;;  %v11866_v48 = vld [vmem:[#allocation245_spill] sm:$0xff] }
 0x570   : > { %3015 = vadd.xlane.f32.xlu2 %v3014_v4 }
 0x575   : > { %2480 = vperm.xlu1 %5669, %v7197_v21   ;;  %v7716_v21 = vpop.permute.xlu0 %2024 }
 0x576   : > { %v7701_v1 = vpop.permute.xlu2 %1876  ;;  %11856 = vst [vmem:[#allocation374_spill] sm:$0xff] %v7716_v21 }
 0x577   : > { %11854 = vst [vmem:[#allocation372_spill] sm:$0xff] %v7701_v1  ;;  %v7703_v53 = vpop.permute.xlu1 %2299 }
 0x57d   : > { %2488 = vperm.xlu1 %5669, %v7210_v8  }
 0x57e   : > { %v2686_v49 = vpop.permute.xlu2 %2685 }
 0x57f   : > { %v7706_v28 = vpop.permute.xlu1 %2302  ;;  %vm2734_vm14 = vcmp.eq.s32.totalorder %v2686_v49, %v7422_v0 }
 0x585   : > { %2350 = vperm.xlu1 %5669, %v7296_v15  }
 0x586   : > { %v7709_v40 = vpop.permute.xlu2 %2832 }
 0x587   : > { %11855 = vst [vmem:[#allocation373_spill] sm:$0xff] %v7709_v40  ;;  %v7711_v27 = vpop.permute.xlu1 %2436  ;;  %v7726_v40 = vpop.permute.xlu0 %2172 }
 0x588   : > { %2424 = vperm.xlu2 %5679, %v6977_v47   ;;  %11858 = vst [vmem:[#allocation376_spill] sm:$0xff] %v7726_v40 }
 0x58d   : > { %2353 = vperm.xlu1 %5669, %v7128_v35  }
 0x58e   : > { %v2837_v4 = vpop.permute.xlu2 %2836 }
 0x58f   : > { %v7718_v1 = vsel %vm2734_vm14, %v2837_v4, 0.0  ;;  %v7720_v8 = vpop.permute.xlu1 %2308  ;;  %v7733_v47 = vpop.permute.xlu0 %2033  ;;  %v11864_v4 = vld [vmem:[#allocation237_spill] sm:$0xff] }
 0x590   : > { %11857 = vst [vmem:[#allocation375_spill] sm:$0xff] %v7718_v1  ;;  %2428 = vperm.xlu2 %5679, %v6987_v54  }
 0x591   : > { %11859 = vst [vmem:[#allocation377_spill] sm:$0xff] %v7733_v47 }
 0x595   : > { %2500 = vperm.xlu1 %5669, %v7441_v61  }
 0x596   : > { %v7758_v1 = vpop.permute.xlu2 %1880 }
 0x597   : > { %v7724_v15 = vpop.permute.xlu1 %2311  ;;  %v7739_v54 = vpop.permute.xlu0 %2296  ;;  %11865 = vst [vmem:[#allocation237_spill] sm:$0xff] %v7758_v1  ;;  %v5332_v1 = vld [vmem:[%s11258_s2 + $0xe0] sm:$0xf0] }
 0x598   : > { %2305 = vperm.xlu2 %5679, %v7008_v34   ;;  %v11862_v34 = vmov 5   ;;  %vm2391_vm11 = vcmp.eq.s32.totalorder %v7739_v54, %v7422_v0 }
 0x59d   : > { %2356 = vperm.xlu1 %5669, %v7097_v37  }
 0x59e   : > { %v7792_v21 = vpop.permute.xlu2 %1884 }
 0x59f   : > { %v7730_v35 = vpop.permute.xlu1 %2444  ;;  %v7746_v37 = vpop.permute.xlu0 %2432  ;;  %11870 = vst [vmem:[#allocation240_spill] sm:$0xff] %v7792_v21  ;;  %v5314_v21 = vld [vmem:[%s11258_s2 + $0x40] sm:$0xf] }
 0x5a0   : > { %2440 = vperm.xlu2 %5679, %v7149_v36  }
 0x5a5   : > { %2359 = vperm.xlu1 %5669, %v7303_v6  }
 0x5a7   : > { %v7736_v49 = vpop.permute.xlu1 %2314  ;;  %v7755_v6 = vpop.xlane.xlu0 %2997 }
 0x5a8   : > { %2452 = vperm.xlu2 %5679, %v7179_v59   ;;  %11863 = vst [vmem:[#allocation380_spill] sm:$0xff] %v7755_v6 }
 0x5ad   : > { %2512 = vperm.xlu1 %5669, %v7596_v11  }
 0x5af   : > { %v7742_v61 = vpop.permute.xlu1 %2317  ;;  %v7763_v60 = vpop.xlane.xlu0 %3006 }
 0x5b0   : > { %11860 = vst [vmem:[#allocation378_spill] sm:$0xff] %v7742_v61  ;;  %2320 = vperm.xlu2 %5679, %v7039_v16  }
 0x5b1   : > { %11867 = vst [vmem:[#allocation245_spill] sm:$0xff] %v7763_v60  ;;  %v5579_v60 = vld [vmem:[%s11258_s2 + $0xe4] sm:$0xf0] }
 0x5b5   : > { %5671 = vset.pattern.permute.xlu1 %v11738_v14 }
 0x5b6   : > { %2682 = vperm.xlu1 %5671, %v7140_v26   ;;  %v5571_v26 = vld [vmem:[%s11258_s2 + $0xdc] sm:$0xf0] }
 0x5b7   : > { %v7749_v36 = vpop.permute.xlu1 %2456 }
 0x5b8   : > { %11861 = vst [vmem:[#allocation379_spill] sm:$0xff] %v7749_v36  ;;  %2323 = vperm.xlu2 %5679, %v7256_v13   ;;  %v5330_v13 = vld [vmem:[%s11258_s2 + $0xc0] sm:$0xf] }
 0x5b9   : > { %v5331_v40 = vor.u32 %v5571_v26, %v5330_v13  ;;  %v5578_v13 = vld [vmem:[%s11258_s2 + $0xcc] sm:$0xf] }
 0x5ba   : > { %v5396_v26 = vld [vmem:[%s11258_s2 + $0xe8] sm:$0xf0] }
 0x5bb   : > { %3699 = vmatpush.bf16.msra.mxu0 %v5331_v40  ;;  %v5399_v6 = vor.u32 %v5578_v13, %v5396_v26  ;;  %v5324_v40 = vld [vmem:[%s11258_s2 + $0xa0] sm:$0xf0]  ;;  %v5576_v26 = vld [vmem:[%s11258_s2 + $0x8c] sm:$0xf] }
 0x5bd   : > { %4117 = vmatpush.bf16.msra.mxu3 %v5399_v6  ;;  %v5388_v6 = vld [vmem:[%s11258_s2 + $0xa8] sm:$0xf0] }
 0x5be   : > { %5673 = vset.pattern.permute.xlu1 %v11862_v34 }
 0x5bf   : > { %v7753_v59 = vpop.permute.xlu1 %2326 }
 0x5c0   : > { %2460 = vperm.xlu2 %5679, %v11864_v4   ;;  %v5570_v4 = vld [vmem:[%s11258_s2 + $0xc4] sm:$0xf] }
 0x5c1   : > { %v5335_v30 = vor.u32 %v5570_v4, %v5332_v1  ;;  %v5569_v1 = vld [vmem:[%s11258_s2 + $0x9c] sm:$0xf0]  ;;  %v5568_v4 = vld [vmem:[%s11258_s2 + $0x84] sm:$0xf] }
 0x5c3   : > { %3788 = vmatpush.bf16.msra.mxu1 %v5335_v30  ;;  %v5386_v30 = vld [vmem:[%s11258_s2 + $0x88] sm:$0xf] }
 0x5c7   : > { %v7760_v16 = vpop.permute.xlu1 %2468 }
 0x5c8   : > { %2329 = vperm.xlu2 %5679, %v11866_v48   ;;  %v5394_v48 = vld [vmem:[%s11258_s2 + $0xc8] sm:$0xf] }
 0x5c9   : > { %v5395_v47 = vor.u32 %v5579_v60, %v5394_v48  ;;  %v5322_v60 = vld [vmem:[%s11258_s2 + $0x80] sm:$0xf]  ;;  %v5327_v48 = vor.u32 %v5568_v4, %v5324_v40  ;;  %v5566_v40 = vld [vmem:[%s11258_s2 + $0x44] sm:$0xf] }
 0x5ca   : > { %v5567_v4 = vld [vmem:[%s11258_s2 + $0x5c] sm:$0xf0] }
 0x5cb   : > { %4028 = vmatpush.bf16.msra.mxu2 %v5395_v47  ;;  %v5577_v47 = vld [vmem:[%s11258_s2 + $0xa4] sm:$0xf0]  ;;  %3789 = vmatpush.bf16.msra.mxu1 %v5327_v48 }
 0x5cc   : > { %v5387_v13 = vor.u32 %v5577_v47, %v5386_v30  ;;  %v5315_v30 = vor.u32 %v5567_v4, %v5314_v21  ;;  %v5378_v47 = vld [vmem:[%s11258_s2 + $0x48] sm:$0xf]  ;;  %v5574_v21 = vld [vmem:[%s11258_s2 + $0x4c] sm:$0xf] }
 0x5cd   : > { %v5575_v48 = vld [vmem:[%s11258_s2 + $0x64] sm:$0xf0]  ;;  %v5380_v4 = vld [vmem:[%s11258_s2 + $0x68] sm:$0xf0] }
 0x5cf   : > { %v7783_v45 = vpop.permute.xlu1 %2332  ;;  %4029 = vmatpush.bf16.msra.mxu2 %v5387_v13  ;;  %v11872_v13 = vld [vmem:[#allocation263_spill] sm:$0xff] }
 0x5d0   : > { %11868 = vst [vmem:[#allocation381_spill] sm:$0xff] %v7783_v45  ;;  %2472 = vperm.xlu2 %5679, %v11869_v10   ;;  %v5323_v10 = vor.u32 %v5569_v1, %v5322_v60  ;;  %v7818_v60 = vpop.xlane.xlu0 %3012  ;;  %v5391_v1 = vor.u32 %v5576_v26, %v5388_v6  ;;  %v7839_v26 = vmax.f32 %v11872_v13, 1.0  ;;  %v5383_v13 = vor.u32 %v5574_v21, %v5380_v4  ;;  %v7853_v45 = vpop.permute.xlu2 %2688  ;;  %v5572_v21 = vld [vmem:[%s11258_s2 + $0xc] sm:$0xf] }
 0x5d1   : > { %11871 = vst [vmem:[#allocation382_spill] sm:$0xff] %v7818_v60  ;;  %v5372_v4 = vld [vmem:[%s11258_s2 + $0x28] sm:$0xf0] }
 0x5d2   : > { %3700 = vmatpush.bf16.msra.mxu0 %v5323_v10  ;;  %4118 = vmatpush.bf16.msra.mxu3 %v5391_v1  ;;  %v5316_v10 = vld [vmem:[%s11258_s2 + $0x60] sm:$0xf0]  ;;  %v5379_v1 = vor.u32 %v5575_v48, %v5378_v47  ;;  %11875 = vst [vmem:[#allocation252_spill] sm:$0xff] %v7853_v45  ;;  %v5573_v47 = vld [vmem:[%s11258_s2 + $0x24] sm:$0xf0]  ;;  %5702 = vrcp.f32 %v7839_v26  ;;  %v11888_v45 = vld [vmem:[#allocation170_spill] sm:$0xff] }
 0x5d3   : > { %v5319_v60 = vor.u32 %v5566_v40, %v5316_v10  ;;  %v5306_v40 = vld [vmem:[%s11258_s2] sm:$0xf]  ;;  %5704 = vrcp.f32 %v7850_v9 }
 0x5d4   : > { %4030 = vmatpush.bf16.msra.mxu2 %v5379_v1  ;;  %v5565_v10 = vld [vmem:[%s11258_s2 + $0x1c] sm:$0xf0] }
 0x5d5   : > { %3790 = vmatpush.bf16.msra.mxu1 %v5319_v60  ;;  %v5370_v60 = vld [vmem:[%s11258_s2 + $0x8] sm:$0xf] }
 0x5d6   : > { %3701 = vmatpush.bf16.msra.mxu0 %v5315_v30  ;;  %4119 = vmatpush.bf16.msra.mxu3 %v5383_v13  ;;  %v5308_v30 = vld [vmem:[%s11258_s2 + $0x20] sm:$0xf0]  ;;  %v5371_v1 = vor.u32 %v5573_v47, %v5370_v60  ;;  %v5375_v13 = vor.u32 %v5572_v21, %v5372_v4  ;;  %v11879_v47 = vld [vmem:[#allocation12_spill] sm:$0xff]  ;;  %v11883_v4 = vld [vmem:[#allocation15_spill] sm:$0xff] }
 0x5d7   : > { %v7841_v6 = vpop.permute.xlu1 %2335  ;;  %v5311_v48 = vor.u32 %v5564_v62, %v5308_v30  ;;  %v11878_v30 = vld [vmem:[#allocation288_spill] sm:$0xff]  ;;  %vm439_vm15 = vcmp.eq.s32.totalorder %v11879_v47, %v7422_v0  ;;  %vm440_vm3 = vcmp.eq.s32.totalorder %v11883_v4, %v7422_v0  ;;  %v11887_v47 = vld [vmem:[#allocation45_spill] sm:$0xff] }
 0x5d8   : > { %11873 = vst [vmem:[#allocation263_spill] sm:$0xff] %v7841_v6  ;;  %2341 = vperm.xlu2 %5679, %v7286_v50   ;;  %v5307_v50 = vor.u32 %v5565_v10, %v5306_v40  ;;  %v3008_v40 = vsel %vm11381_vm0, %v7588_v55, 0.0  ;;  %4031 = vmatpush.bf16.msra.mxu2 %v5371_v1  ;;  %v7883_v10 = vpop.permute.xlu0 %2448  ;;  %v7888_v60 = vpop.eup %5702  ;;  %v11881_v55 = vld [vmem:[#allocation147_spill] sm:$0xff]  ;;  %v11882_v1 = vld [vmem:[#allocation118_spill] sm:$0xff] }
 0x5d9   : > { %3791 = vmatpush.bf16.msra.mxu1 %v5311_v48  ;;  %11876 = vst [vmem:[#allocation383_spill] sm:$0xff] %v7883_v10  ;;  %vm1111_vm2 = vcmp.eq.s32.totalorder %v11881_v55, %v7422_v0  ;;  %v7896_v48 = vpop.eup %5704  ;;  %v3080_v55 = vmul.f32 %v7888_v60, %v7839_v26  ;;  %v12020_v10 = vld [vmem:[#allocation148_spill] sm:$0xff] }
 0x5da   : > { %3702 = vmatpush.bf16.msra.mxu0 %v5307_v50  ;;  %4120 = vmatpush.bf16.msra.mxu3 %v5375_v13  ;;  %v11880_v50 = vld [vmem:[#allocation89_spill] sm:$0xff]  ;;  %v11884_v13 = vld [vmem:[#allocation80_spill] sm:$0xff]  ;;  %v1271_v32 = vsel %vm1111_vm2, %v11888_v45, 0.0  ;;  %v3065_v4 = vmul.f32 %v7896_v48, %v7850_v9  ;;  %vm3070_vm14 = vweird.f32 %v7896_v48 }
 0x5db   : > { %vm791_vm1 = vcmp.eq.s32.totalorder %v11880_v50, %v7422_v0  ;;  %vm792_vm4 = vcmp.eq.s32.totalorder %v11884_v13, %v7422_v0  ;;  %v631_v50 = vsel %vm439_vm15, %v11887_v47, 0.0  ;;  %v11890_v13 = vld [vmem:[#allocation6_spill] sm:$0xff]  ;;  %v11893_v45 = vld [vmem:[#allocation197_spill] sm:$0xff]  ;;  %v3081_v42 = vsub.f32 1.0, %v3080_v55  ;;  %vm7963_vm2 = vmor %vm3069_vm13, %vm3070_vm14 }
 0x5dc   : > { %v951_v21 = vsel %vm791_vm1, %v11882_v1, 0.0  ;;  %v952_v6 = vsel %vm792_vm4, %v11890_v13, 0.0  ;;  %vm1432_vm7 = vcmp.eq.s32.totalorder %v11893_v45, %v7422_v0  ;;  %v11897_v45 = vld [vmem:[#allocation314_spill] sm:$0xff]  ;;  %vm3085_vm15 = vweird.f32 %v7888_v60 }
 0x5dd   : > { %v983_v1 = vadd.f32 %v951_v21, %v631_v50  ;;  %v11896_v50 = vld [vmem:[#allocation175_spill] sm:$0xff]  ;;  %vm1752_vm9 = vcmp.eq.s32.totalorder %v11897_v45, %v7422_v0  ;;  %v1592_v57 = vsel %vm1432_vm7, %v11898_v2, 0.0  ;;  %vm2711_vm1 = vcmp.eq.s32.totalorder %v7608_v24, %v7422_v0 }
 0x5de   : > { %v1912_v19 = vsel %vm1752_vm9, %v7522_v7, 0.0  ;;  %v3075_v7 = vand.u32 2147483648, %v7850_v9  ;;  %v3090_v24 = vand.u32 2147483648, %v7839_v26  ;;  %vm11380_vm9 = vcmask 523264  }
 0x5df   : > { %v7885_v62 = vpop.permute.xlu1 %2476  ;;  %v1303_v47 = vadd.f32 %v1271_v32, %v983_v1  ;;  %v3066_v1 = vsub.f32 1.0, %v3065_v4 }
 0x5e0   : > { %11877 = vst [vmem:[#allocation384_spill] sm:$0xff] %v7885_v62  ;;  %3009 = vadd.xlane.f32.xlu1 %v3008_v40  ;;  %2484 = vperm.xlu2 %5679, %v11878_v30   ;;  %v11885_v40 = vld [vmem:[#allocation204_spill] sm:$0xff]  ;;  %v632_v62 = vsel %vm440_vm3, %v11889_v46, 0.0  ;;  %v1911_v46 = vsel %vm1751_vm8, %v7508_v39, 0.0  ;;  %v7926_v13 = vpop.permute.xlu0 %2464  ;;  %vm3084_vm3 = vweird.f32 %v7839_v26 }
 0x5e1   : > { %vm1431_vm5 = vcmp.eq.s32.totalorder %v11885_v40, %v7422_v0  ;;  %v984_v32 = vadd.f32 %v952_v6, %v632_v62  ;;  %v3082_v6 = vmul.f32 %v7888_v60, %v3081_v42  ;;  %v3067_v4 = vmul.f32 %v7896_v48, %v3066_v1 }
 0x5e2   : > { %v1591_v40 = vsel %vm1431_vm5, %v11891_v25, 0.0  ;;  %v7929_v25 = vld [vmem:[%s6034_s14 + $0x88] sm:$0xff]  ;;  %vm2392_vm5 = vcmp.eq.s32.totalorder %v7703_v53, %v7422_v0 }
 0x5e3   : > { %v7905_v30 = vpop.xlane.xlu2 %3015 }
 0x5e4   : > { %11886 = vst [vmem:[#allocation288_spill] sm:$0xff] %v7905_v30  ;;  %v11892_v30 = vld [vmem:[#allocation149_spill] sm:$0xff] }
 0x5e5   : > { %vm1112_vm6 = vcmp.eq.s32.totalorder %v11892_v30, %v7422_v0  ;;  %v1623_v30 = vadd.f32 %v1591_v40, %v1303_v47  ;;  %v11900_v40 = vld [vmem:[#allocation282_spill] sm:$0xff]  ;;  %v11901_v47 = vld [vmem:[#allocation285_spill] sm:$0xff] }
 0x5e6   : > { %v1272_v36 = vsel %vm1112_vm6, %v11896_v50, 0.0  ;;  %v11899_v50 = vld [vmem:[#allocation279_spill] sm:$0xff]  ;;  %vm2072_vm12 = vcmp.eq.s32.totalorder %v11900_v40, %v7422_v0  ;;  %vm7973_vm6 = vmor %vm3084_vm3, %vm3085_vm15  ;;  %v3076_v40 = vor.u32 1.1754944e-38, %v3075_v7 }
 0x5e7   : > { %v7922_v21 = vpop.permute.xlu1 %2480  ;;  %vm2071_vm10 = vcmp.eq.s32.totalorder %v11899_v50, %v7422_v0  ;;  %v1943_v55 = vadd.f32 %v1911_v46, %v1623_v30  ;;  %v11903_v46 = vld [vmem:[#allocation289_spill] sm:$0xff]  ;;  %v11907_v50 = vld [vmem:[#allocation331_spill] sm:$0xff] }
 0x5e8   : > { %11895 = vst [vmem:[#allocation12_spill] sm:$0xff] %v7922_v21  ;;  %2347 = vperm.xlu2 %5679, %v7929_v25   ;;  %v1304_v21 = vadd.f32 %v1272_v36, %v984_v32  ;;  %v2231_v36 = vsel %vm2071_vm10, %v11901_v47, 0.0  ;;  %v2232_v30 = vsel %vm2072_vm12, %v11903_v46, 0.0  ;;  %v7961_v1 = vpop.permute.xlu0 %2338  ;;  %vm2712_vm4 = vcmp.eq.s32.totalorder %v11907_v50, %v7422_v0 }
 0x5e9   : > { %v2263_v2 = vadd.f32 %v2231_v36, %v1943_v55  ;;  %11904 = vst [vmem:[#allocation147_spill] sm:$0xff] %v7961_v1 }
 0x5ea   : > { %v1624_v62 = vadd.f32 %v1592_v57, %v1304_v21  ;;  %v3083_v57 = vadd.f32 %v7888_v60, %v3082_v6  ;;  %v3073_v21 = vand.u32 2147483647, %v7850_v9  ;;  %v3088_v6 = vand.u32 2147483647, %v7839_v26 }
 0x5eb   : > { %v2425_v39 = vpop.permute.xlu2 %2424 }
 0x5ec   : > { %v2551_v32 = vsel %vm2391_vm11, %v2425_v39, 0.0  ;;  %v1944_v45 = vadd.f32 %v1912_v19, %v1624_v62  ;;  %v3068_v19 = vadd.f32 %v7896_v48, %v3067_v4  ;;  %v11910_v62 = vld [vmem:[#allocation268_spill] sm:$0xff]  ;;  %v3087_v36 = vsel %vm7973_vm6, %v7888_v60, %v3083_v57 }
 0x5ed   : > { %v2583_v42 = vadd.f32 %v2551_v32, %v2263_v2  ;;  %v2871_v4 = vsel %vm2711_vm1, %v11910_v62, 0.0  ;;  %vm3074_vm7 = vcmp.eq.f32.partialorder %v3073_v21, 8.507059e+37  ;;  %v11911_v2 = vld [vmem:[#allocation271_spill] sm:$0xff]  ;;  %vm3089_vm8 = vcmp.eq.f32.partialorder %v3088_v6, 8.507059e+37 }
 0x5ee   : > { %v2264_v9 = vadd.f32 %v2232_v30, %v1944_v45  ;;  %v3072_v53 = vsel %vm7963_vm2, %v7896_v48, %v3068_v19  ;;  %v2872_v46 = vsel %vm2712_vm4, %v11911_v2, 0.0  ;;  %v3091_v30 = vor.u32 1.1754944e-38, %v3090_v24  ;;  %v5827_v24 = vld [vmem:[%s6034_s14 + $0x20] sm:$0xff]  ;;  %v5828_v39 = vld [vmem:[%s6161_s17 + $0xd8] sm:$0xff] }
 0x5ef   : > { %v7947_v54 = vpop.permute.xlu1 %2488  ;;  %v2903_v32 = vadd.f32 %v2871_v4, %v2583_v42  ;;  %v3077_v7 = vsel %vm3074_vm7, %v3076_v40, %v3072_v53  ;;  %v5825_v42 = vld [vmem:[%s6034_s14 + $0x10] sm:$0xff]  ;;  %v3017_v6 = vsel %vm11381_vm0, %v5828_v39, 0.0  ;;  %v8020_v40 = vld [vmem:[%s6034_s14 + $0xb8] sm:$0xff]  ;;  %vm2401_vm1 = vcmp.eq.s32.totalorder %v7753_v59, %v7422_v0 }
 0x5f0   : > { %11902 = vst [vmem:[#allocation89_spill] sm:$0xff] %v7947_v54  ;;  %2496 = vperm.xlu2 %5679, %v7269_v20   ;;  %v7994_v21 = vpop.permute.xlu0 %2344  ;;  %v8007_v20 = vld [vmem:[%s6034_s14 + $0xb0] sm:$0xff]  ;;  %3018 = vadd.xlane.f32.xlu0 %v3017_v6 }
 0x5f1   : > { %v3544_v60 = vmul.f32 %v3077_v7, %v2903_v32  ;;  %11914 = vst [vmem:[#allocation80_spill] sm:$0xff] %v7994_v21  ;;  %v8027_v32 = vld [vmem:[%s6161_s17 + $0xe8] sm:$0xff] }
 0x5f2   : > { %11916 = vst [vmem:[#allocation45_spill] sm:$0xff] %v8007_v20  ;;  %v3023_v53 = vsel %vm11381_vm0, %v8027_v32, 0.0  ;;  %v11930_v21 = vld [vmem:[#allocation210_spill] sm:$0xff] }
 0x5f3   : > { %v2429_v55 = vpop.permute.xlu2 %2428  ;;  %vm1442_vm15 = vcmp.eq.s32.totalorder %v11930_v21, %v7422_v0  ;;  %v2561_v21 = vsel %vm2401_vm1, %v7926_v13, 0.0 }
 0x5f4   : > { %v2552_v47 = vsel %vm2392_vm5, %v2429_v55, 0.0  ;;  %v3092_v55 = vsel %vm3089_vm8, %v3091_v30, %v3087_v36  ;;  %v11921_v30 = vld [vmem:[#allocation273_spill] sm:$0xff]  ;;  %vm2721_vm8 = vcmp.eq.s32.totalorder %v7649_v3, %v7422_v0 }
 0x5f5   : > { %v2584_v45 = vadd.f32 %v2552_v47, %v2264_v9  ;;  %v5830_v47 = vld [vmem:[%s6161_s17 + $0x28] sm:$0xff] }
 0x5f7   : > { %v2904_v26 = vadd.f32 %v2872_v46, %v2584_v45  ;;  %v7986_v50 = vpop.permute.xlu1 %2350  ;;  %v11920_v45 = vld [vmem:[#allocation272_spill] sm:$0xff] }
 0x5f8   : > { %11912 = vst [vmem:[#allocation118_spill] sm:$0xff] %v7986_v50  ;;  %2508 = vperm.xlu2 %5679, %v7453_v12   ;;  %v8015_v62 = vpop.permute.xlu0 %2492  ;;  %3024 = vadd.xlane.f32.xlu0 %v3023_v53  ;;  %v8032_v2 = vmax.f32 %v11920_v45, 1.0  ;;  %v11924_v53 = vld [vmem:[#allocation100_spill] sm:$0xff]  ;;  %v11928_v50 = vld [vmem:[#allocation67_spill] sm:$0xff] }
 0x5f9   : > { %v3545_v57 = vmul.f32 %v3092_v55, %v2904_v26  ;;  %1982 = vperm.xlu1 %5673, %v5825_v42   ;;  %11917 = vst [vmem:[#allocation170_spill] sm:$0xff] %v8015_v62  ;;  %v8035_v26 = vmax.f32 %v11921_v30, 1.0  ;;  %vm802_vm11 = vcmp.eq.s32.totalorder %v11924_v53, %v7422_v0  ;;  %v11925_v45 = vld [vmem:[#allocation128_spill] sm:$0xff] }
 0x5fa   : > { %5706 = vrcp.f32 %v8032_v2  ;;  %v8071_v62 = vld [vmem:[%s6161_s17 + $0xe0] sm:$0xff]  ;;  %vm3219_vm7 = vweird.f32 %v8032_v2  ;;  %v3225_v3 = vand.u32 2147483648, %v8032_v2 }
 0x5fb   : > { %v7990_v48 = vpack.c.bf16 %v3545_v57, %v3544_v60  ;;  %v7992_v19 = vpop.permute.xlu2 %2305  ;;  %v5832_v60 = vld [vmem:[%s6034_s14 + $0x30] sm:$0xff]  ;;  %5708 = vrcp.f32 %v8035_v26  ;;  %vm3234_vm3 = vweird.f32 %v8035_v26 }
 0x5fd   : > { %11913 = vst [vmem:[#allocation15_spill] sm:$0xff] %v7990_v48  ;;  %5336 = vmatmul.msk.bf16.vlgmr.msra.gmra.mxu0 %vm11380_vm9, %v7990_v48  ;;  %5352 = vmatmul.msk.bf16.vlgmr.msra.gmra.mxu1 %vm11380_vm9, %v7990_v48 }
 0x5fe   : > { %5400 = vmatmul.msk.bf16.vlgmr.msra.gmra.mxu2 %vm11380_vm9, %v7990_v48  ;;  %5416 = vmatmul.msk.bf16.vlgmr.msra.gmra.mxu3 %vm11380_vm9, %v7990_v48  ;;  %v5835_v48 = vld [vmem:[%s6034_s14 + $0x48] sm:$0xff] }
 0x5ff   : > { %v8004_v12 = vpop.permute.xlu1 %2353 }
 0x600   : > { %11915 = vst [vmem:[#allocation204_spill] sm:$0xff] %v8004_v12  ;;  %2362 = vperm.xlu2 %5679, %v8007_v20   ;;  %v2505_v7 = vpop.permute.xlu0 %2504  ;;  %v8047_v42 = vpop.eup %5706 }
 0x601   : > { %1988 = vperm.xlu1 %5673, %v5827_v24   ;;  %v5833_v24 = vld [vmem:[%s6161_s17 + $0x38] sm:$0xff]  ;;  %v8050_v39 = vpop.eup %5708  ;;  %v3215_v6 = vmul.f32 %v8047_v42, %v8032_v2  ;;  %vm3220_vm6 = vweird.f32 %v8047_v42 }
 0x602   : > { %vm3235_vm4 = vweird.f32 %v8050_v39 }
 0x603   : > { %v8011_v9 = vpop.permute.xlu2 %2440  ;;  %v3216_v30 = vsub.f32 1.0, %v3215_v6  ;;  %v11929_v6 = vld [vmem:[#allocation185_spill] sm:$0xff] }
 0x607   : > { %v8017_v4 = vpop.permute.xlu1 %2500 }
 0x608   : > { %11918 = vst [vmem:[#allocation59_spill] sm:$0xff] %v8017_v4  ;;  %2365 = vperm.xlu2 %5679, %v8020_v40   ;;  %v11967_v4 = vld [vmem:[#allocation58_spill] sm:$0xff] }
 0x609   : > { %2124 = vperm.xlu1 %5673, %v5830_v47   ;;  %v3230_v47 = vmul.f32 %v8050_v39, %v8035_v26 }
 0x60b   : > { %v8024_v36 = vpop.permute.xlu2 %2452 }
 0x60c   : > { %11919 = vst [vmem:[#allocation6_spill] sm:$0xff] %v8024_v36  ;;  %2856 = vperm.xlu0 %5675, %v8071_v62  }
 0x60f   : > { %v2357_v46 = vpop.permute.xlu1 %2356 }
 0x610   : > { %vm2411_vm10 = vcmp.eq.s32.totalorder %v2357_v46, %v7422_v0  ;;  %2516 = vperm.xlu2 %5679, %v7500_v38   ;;  %v11926_v46 = vld [vmem:[#allocation156_spill] sm:$0xff] }
 0x611   : > { %v8039_v55 = vsel %vm2411_vm10, %v2505_v7, 0.0  ;;  %1994 = vperm.xlu1 %5673, %v5832_v60   ;;  %vm1122_vm12 = vcmp.eq.s32.totalorder %v11926_v46, %v7422_v0  ;;  %v8062_v7 = vld [vmem:[%s6034_s14 + $0xc8] sm:$0xff]  ;;  %vm8107_vm10 = vmor %vm3234_vm3, %vm3235_vm4 }
 0x612   : > { %11922 = vst [vmem:[#allocation229_spill] sm:$0xff] %v8039_v55  ;;  %v11927_v60 = vld [vmem:[#allocation10_spill] sm:$0xff]  ;;  %v1282_v46 = vsel %vm1122_vm12, %v11929_v6, 0.0 }
 0x613   : > { %v8043_v57 = vpop.permute.xlu2 %2320  ;;  %vm450_vm13 = vcmp.eq.s32.totalorder %v11927_v60, %v7422_v0  ;;  %v3217_v60 = vmul.f32 %v8047_v42, %v3216_v30 }
 0x614   : > { %11923 = vst [vmem:[#allocation149_spill] sm:$0xff] %v8043_v57  ;;  %v642_v53 = vsel %vm450_vm13, %v11928_v50, 0.0  ;;  %2860 = vperm.xlu0 %5675, %v8027_v32   ;;  %vm2722_vm13 = vcmp.eq.s32.totalorder %v7567_v31, %v7422_v0 }
 0x615   : > { %v3218_v30 = vadd.f32 %v8047_v42, %v3217_v60 }
 0x618   : > { %2368 = vperm.xlu2 %5679, %v7318_v41   ;;  %v962_v41 = vsel %vm802_vm11, %v11925_v45, 0.0  ;;  %vm8113_vm11 = vmor %vm3219_vm7, %vm3220_vm6 }
 0x619   : > { %2132 = vperm.xlu1 %5673, %v5833_v24   ;;  %v3231_v24 = vsub.f32 1.0, %v3230_v47  ;;  %v994_v45 = vadd.f32 %v962_v41, %v642_v53  ;;  %v11933_v41 = vld [vmem:[#allocation287_spill] sm:$0xff]  ;;  %v11934_v53 = vld [vmem:[#allocation317_spill] sm:$0xff] }
 0x61a   : > { %vm1762_vm2 = vcmp.eq.s32.totalorder %v11933_v41, %v7422_v0 }
 0x61b   : > { %v2324_v38 = vpop.permute.xlu2 %2323  ;;  %v3232_v47 = vmul.f32 %v8050_v39, %v3231_v24  ;;  %v1314_v55 = vadd.f32 %v1282_v46, %v994_v45  ;;  %v1922_v6 = vsel %vm1762_vm2, %v11934_v53, 0.0  ;;  %v5837_v45 = vld [vmem:[%s6034_s14 + $0x60] sm:$0xff]  ;;  %v3240_v46 = vand.u32 2147483648, %v8035_v26 }
 0x61c   : > { %vm2400_vm14 = vcmp.eq.s32.totalorder %v2324_v38, %v7422_v0  ;;  %5691 = vset.pattern.permute.xlu0 %v11704_v29 }
 0x61d   : > { %v3233_v13 = vadd.f32 %v8050_v39, %v3232_v47  ;;  %v11944_v47 = vld [vmem:[#allocation7_spill] sm:$0xff] }
 0x61e   : > { %vm443_vm1 = vcmp.eq.s32.totalorder %v11944_v47, %v7422_v0 }
 0x620   : > { %2371 = vperm.xlu2 %5679, %v8062_v7  }
 0x621   : > { %2003 = vperm.xlu1 %5673, %v5835_v48   ;;  %v11932_v48 = vld [vmem:[#allocation242_spill] sm:$0xff] }
 0x622   : > { %v1602_v50 = vsel %vm1442_vm15, %v11932_v48, 0.0  ;;  %v11936_v48 = vld [vmem:[#allocation154_spill] sm:$0xff] }
 0x623   : > { %v2461_v54 = vpop.permute.xlu2 %2460  ;;  %v1634_v59 = vadd.f32 %v1602_v50, %v1314_v55  ;;  %v2593_v60 = vadd.f32 %v2561_v21, %v11936_v48  ;;  %v3238_v50 = vand.u32 2147483647, %v8035_v26  ;;  %v3223_v21 = vand.u32 2147483647, %v8032_v2 }
 0x624   : > { %v8080_v38 = vsel %vm2400_vm14, %v2461_v54, 0.0  ;;  %v11935_v54 = vld [vmem:[#allocation305_spill] sm:$0xff]  ;;  %v2881_v26 = vsel %vm2721_vm8, %v7574_v52, 0.0  ;;  %v2882_v2 = vsel %vm2722_vm13, %v7580_v51, 0.0  ;;  %v8141_v51 = vld [vmem:[%s6034_s14 + $0xf8] sm:$0xff] }
 0x625   : > { %11931 = vst [vmem:[#allocation197_spill] sm:$0xff] %v8080_v38  ;;  %vm2082_vm5 = vcmp.eq.s32.totalorder %v11935_v54, %v7422_v0  ;;  %v1954_v55 = vadd.f32 %v1922_v6, %v1634_v59  ;;  %v3222_v6 = vsel %vm8113_vm11, %v8047_v42, %v3218_v30  ;;  %v3237_v59 = vsel %vm8107_vm10, %v8050_v39, %v3233_v13  ;;  %v12013_v38 = vld [vmem:[#allocation123_spill] sm:$0xff] }
 0x626   : > { %v2242_v24 = vsel %vm2082_vm5, %v7505_v56, 0.0  ;;  %v3241_v54 = vor.u32 1.1754944e-38, %v3240_v46  ;;  %vm3239_vm14 = vcmp.eq.f32.partialorder %v3238_v50, 8.507059e+37  ;;  %v3226_v30 = vor.u32 1.1754944e-38, %v3225_v3  ;;  %v5838_v46 = vld [vmem:[%s6161_s17 + $0x60] sm:$0xff]  ;;  %1749 = vperm.xlu0 %5691, %v8141_v51   ;;  %v5841_v56 = vld [vmem:[%s6034_s14 + $0x78] sm:$0xff] }
 0x627   : > { %v2274_v53 = vadd.f32 %v2242_v24, %v1954_v55  ;;  %v2913_v24 = vadd.f32 %v2881_v26, %v2593_v60  ;;  %vm3224_vm15 = vcmp.eq.f32.partialorder %v3223_v21, 8.507059e+37  ;;  %v11945_v3 = vld [vmem:[#allocation8_spill] sm:$0xff]  ;;  %v11949_v21 = vld [vmem:[#allocation17_spill] sm:$0xff]  ;;  %v11951_v26 = vld [vmem:[#allocation19_spill] sm:$0xff] }
 0x628   : > { %2528 = vperm.xlu2 %5679, %v7692_v43   ;;  %v3227_v39 = vsel %vm3224_vm15, %v3226_v30, %v3222_v6  ;;  %v3242_v13 = vsel %vm3239_vm14, %v3241_v54, %v3237_v59  ;;  %vm444_vm2 = vcmp.eq.s32.totalorder %v11945_v3, %v7422_v0  ;;  %v11948_v6 = vld [vmem:[#allocation14_spill] sm:$0xff]  ;;  %vm445_vm8 = vcmp.eq.s32.totalorder %v11951_v26, %v7422_v0  ;;  %v11952_v59 = vld [vmem:[#allocation23_spill] sm:$0xff]  ;;  %v11953_v54 = vld [vmem:[#allocation25_spill] sm:$0xff] }
 0x629   : > { %2012 = vperm.xlu1 %5673, %v5837_v45   ;;  %v3554_v31 = vmul.f32 %v3227_v39, %v2913_v24  ;;  %vm442_vm5 = vcmp.eq.s32.totalorder %v11948_v6, %v7422_v0  ;;  %vm448_vm11 = vcmp.eq.s32.totalorder %v11953_v54, %v7422_v0  ;;  %v11955_v24 = vld [vmem:[#allocation31_spill] sm:$0xff]  ;;  %v11958_v30 = vld [vmem:[#allocation42_spill] sm:$0xff]  ;;  %v5842_v39 = vld [vmem:[%s6161_s17 + $0x80] sm:$0xff] }
 0x62a   : > { %vm451_vm13 = vcmp.eq.s32.totalorder %v11955_v24, %v7422_v0  ;;  %v11964_v54 = vld [vmem:[#allocation51_spill] sm:$0xff]  ;;  %v11965_v24 = vld [vmem:[#allocation54_spill] sm:$0xff]  ;;  %v11968_v6 = vld [vmem:[#allocation60_spill] sm:$0xff] }
 0x62b   : > { %v2330_v41 = vpop.permute.xlu2 %2329  ;;  %v11975_v3 = vld [vmem:[#allocation65_spill] sm:$0xff] }
 0x62c   : > { %vm2402_vm12 = vcmp.eq.s32.totalorder %v2330_v41, %v7422_v0  ;;  %v11946_v41 = vld [vmem:[#allocation9_spill] sm:$0xff] }
 0x62d   : > { %v2562_v45 = vsel %vm2402_vm12, %v7760_v16, 0.0  ;;  %v8134_v16 = vld [vmem:[%s6034_s14 + $0xd0] sm:$0xff]  ;;  %vm447_vm3 = vcmp.eq.s32.totalorder %v11946_v41, %v7422_v0 }
 0x62e   : > { %v2594_v42 = vadd.f32 %v2562_v45, %v2274_v53  ;;  %11941 = vst [vmem:[#allocation275_spill] sm:$0xff] %v8134_v16  ;;  %5692 = vset.pattern.permute.xlu0 %v11862_v34  ;;  %v11947_v53 = vld [vmem:[#allocation11_spill] sm:$0xff]  ;;  %v11954_v45 = vld [vmem:[#allocation30_spill] sm:$0xff] }
 0x62f   : > { %2184 = vperm.xlu0 %5692, %v7487_v18   ;;  %vm441_vm4 = vcmp.eq.s32.totalorder %v11947_v53, %v7422_v0  ;;  %v11950_v18 = vld [vmem:[#allocation18_spill] sm:$0xff]  ;;  %v11974_v53 = vld [vmem:[#allocation64_spill] sm:$0xff] }
 0x630   : > { %v2914_v52 = vadd.f32 %v2882_v2, %v2594_v42  ;;  %5682 = vset.pattern.permute.xlu2 %v11738_v14  ;;  %vm446_vm7 = vcmp.eq.s32.totalorder %v11950_v18, %v7422_v0  ;;  %v11956_v42 = vld [vmem:[#allocation36_spill] sm:$0xff]  ;;  %v11957_v2 = vld [vmem:[#allocation37_spill] sm:$0xff]  ;;  %v633_v12 = vsel %vm441_vm4, %v11967_v4, 0.0  ;;  %vm11989_vm4 = vcmp.eq.s32.totalorder %v11958_v30, %v7422_v0  ;;  %v11996_v30 = vld [vmem:[#allocation95_spill] sm:$0xff] }
 0x631   : > { %2152 = vperm.xlu1 %5673, %v5838_v46   ;;  %2694 = vperm.xlu2 %5682, %v8134_v16   ;;  %vm455_vm14 = vcmp.eq.s32.totalorder %v11956_v42, %v7422_v0  ;;  %vm454_vm15 = vcmp.eq.s32.totalorder %v11957_v2, %v7422_v0  ;;  %v11961_v46 = vld [vmem:[#allocation47_spill] sm:$0xff]  ;;  %v640_v2 = vsel %vm448_vm11, %v11965_v24, 0.0  ;;  %v11970_v16 = vld [vmem:[#allocation62_spill] sm:$0xff] }
 0x632   : > { %v3555_v55 = vmul.f32 %v3242_v13, %v2914_v52  ;;  %v11959_v52 = vld [vmem:[#allocation43_spill] sm:$0xff]  ;;  %v11960_v13 = vld [vmem:[#allocation46_spill] sm:$0xff]  ;;  %vm460_vm12 = vcmp.eq.s32.totalorder %v11961_v46, %v7422_v0  ;;  %v635_v26 = vsel %vm443_vm1, %v11970_v16, 0.0  ;;  %v638_v16 = vsel %vm446_vm7, %v11975_v3, 0.0  ;;  %v11985_v46 = vld [vmem:[#allocation76_spill] sm:$0xff] }
 0x633   : > { %v8138_v48 = vpop.permute.xlu2 %2472  ;;  %vm457_vm0 = vcmp.eq.s32.totalorder %v11959_v52, %v7422_v0  ;;  %vm461_vm6 = vcmp.eq.s32.totalorder %v11960_v13, %v7422_v0  ;;  %v11972_v24 = vld [vmem:[#allocation63_spill] sm:$0xff]  ;;  %v11993_v42 = vld [vmem:[#allocation82_spill] sm:$0xff]  ;;  %vm798_vm7 = vcmp.eq.s32.totalorder %v11996_v30, %v7422_v0 }
 0x634   : > { %11942 = vst [vmem:[#allocation175_spill] sm:$0xff] %v8138_v48  ;;  %v8144_v60 = vpack.c.bf16 %v3555_v55, %v3554_v31  ;;  %v11962_v31 = vld [vmem:[#allocation48_spill] sm:$0xff]  ;;  %v11969_v48 = vld [vmem:[#allocation61_spill] sm:$0xff]  ;;  %v8220_v4 = vsel %vm457_vm0, %v11972_v24, 0.0  ;;  %v11979_v52 = vld [vmem:[#allocation71_spill] sm:$0xff]  ;;  %vm11980_vm0 = vcmp.eq.s32.totalorder %v11954_v45, %v7422_v0 }
 0x635   : > { %v634_v55 = vsel %vm442_vm5, %v11962_v31, 0.0  ;;  %v646_v31 = vsel %vm454_vm15, %v11968_v6, 0.0  ;;  %v636_v1 = vsel %vm444_vm2, %v11969_v48, 0.0  ;;  %11973 = vst [vmem:[#allocation279_spill] sm:$0xff] %v8220_v4  ;;  %v639_v48 = vsel %vm447_vm3, %v11974_v53, 0.0  ;;  %v11984_v6 = vld [vmem:[#allocation74_spill] sm:$0xff] }
 0x636   : > { %11943 = vst [vmem:[#allocation314_spill] sm:$0xff] %v8144_v60  ;;  %v644_v41 = vsel %vm11980_vm0, %v11979_v52, 0.0  ;;  %vm11982_vm2 = vcmp.eq.s32.totalorder %v11949_v21, %v7422_v0  ;;  %v647_v24 = vsel %vm455_vm14, %v11984_v6, 0.0  ;;  %vm11986_vm3 = vcmp.eq.s32.totalorder %v11952_v59, %v7422_v0  ;;  %v11988_v45 = vld [vmem:[#allocation77_spill] sm:$0xff]  ;;  %v11991_v21 = vld [vmem:[#allocation79_spill] sm:$0xff]  ;;  %v8276_v59 = vpop.permute.xlu1 %2359  ;;  %v11995_v52 = vld [vmem:[#allocation92_spill] sm:$0xff] }
 0x637   : > { %2192 = vperm.xlu0 %5692, %v7596_v11   ;;  %v11977_v11 = vld [vmem:[#allocation66_spill] sm:$0xff]  ;;  %v8256_v53 = vsel %vm11986_vm3, %v11985_v46, 0.0  ;;  %v8262_v3 = vsel %vm11989_vm4, %v11988_v45, 0.0  ;;  %vm793_vm5 = vcmp.eq.s32.totalorder %v11995_v52, %v7422_v0  ;;  %v11998_v13 = vld [vmem:[#allocation111_spill] sm:$0xff]  ;;  %v12015_v52 = vld [vmem:[#allocation125_spill] sm:$0xff]  ;;  %vm1115_vm0 = vcmp.eq.s32.totalorder %v12020_v10, %v7422_v0 }
 0x638   : > { %v8236_v47 = vsel %vm460_vm12, %v11977_v11, 0.0  ;;  %11987 = vst [vmem:[#allocation289_spill] sm:$0xff] %v8256_v53  ;;  %v11999_v46 = vld [vmem:[#allocation86_spill] sm:$0xff]  ;;  %v12003_v30 = vld [vmem:[#allocation91_spill] sm:$0xff] }
 0x639   : > { %2021 = vperm.xlu1 %5673, %v5841_v56   ;;  %5684 = vset.pattern.permute.xlu2 %v11862_v34  ;;  %v11963_v56 = vld [vmem:[#allocation49_spill] sm:$0xff]  ;;  %11978 = vst [vmem:[#allocation282_spill] sm:$0xff] %v8236_v47  ;;  %v12001_v45 = vld [vmem:[#allocation90_spill] sm:$0xff]  ;;  %vm794_vm12 = vcmp.eq.s32.totalorder %v12003_v30, %v7422_v0 }
 0x63a   : > { %vm464_vm9 = vcmp.eq.s32.totalorder %v11963_v56, %v7422_v0  ;;  %11990 = vst [vmem:[#allocation331_spill] sm:$0xff] %v8262_v3  ;;  %v12000_v56 = vld [vmem:[#allocation88_spill] sm:$0xff]  ;;  %v12006_v47 = vld [vmem:[#allocation97_spill] sm:$0xff]  ;;  %v12007_v4 = vld [vmem:[#allocation114_spill] sm:$0xff] }
 0x63b   : > { %v2342_v50 = vpop.permute.xlu2 %2341  ;;  %v8274_v11 = vsel %vm464_vm9, %v11993_v42, 0.0  ;;  %vm800_vm9 = vcmp.eq.s32.totalorder %v12000_v56, %v7422_v0  ;;  %v5843_v42 = vld [vmem:[%s6034_s14 + $0x90] sm:$0xff]  ;;  %vm799_vm15 = vcmp.eq.s32.totalorder %v12006_v47, %v7422_v0  ;;  %v12011_v3 = vld [vmem:[#allocation121_spill] sm:$0xff]  ;;  %v12014_v47 = vld [vmem:[#allocation124_spill] sm:$0xff] }
 0x63c   : > { %vm2406_vm10 = vcmp.eq.s32.totalorder %v2342_v50, %v7422_v0  ;;  %v637_v50 = vsel %vm445_vm8, %v11964_v54, 0.0  ;;  %11994 = vst [vmem:[#allocation271_spill] sm:$0xff] %v8274_v11  ;;  %v12009_v11 = vld [vmem:[#allocation120_spill] sm:$0xff]  ;;  %v12012_v34 = vld [vmem:[#allocation122_spill] sm:$0xff] }
 0x641   : > { %2168 = vperm.xlu1 %5673, %v5842_v39   ;;  %v11966_v39 = vld [vmem:[#allocation57_spill] sm:$0xff] }
 0x642   : > { %v643_v29 = vsel %vm451_vm13, %v11966_v39, 0.0  ;;  %v11981_v39 = vld [vmem:[#allocation73_spill] sm:$0xff] }
 0x643   : > { %v2485_v60 = vpop.permute.xlu2 %2484  ;;  %v8246_v18 = vsel %vm11982_vm2, %v11981_v39, 0.0  ;;  %v11997_v39 = vld [vmem:[#allocation101_spill] sm:$0xff] }
 0x644   : > { %v8213_v54 = vsel %vm2406_vm10, %v2485_v60, 0.0  ;;  %v11976_v60 = vld [vmem:[#allocation83_spill] sm:$0xff]  ;;  %11983 = vst [vmem:[#allocation285_spill] sm:$0xff] %v8246_v18  ;;  %vm804_vm8 = vcmp.eq.s32.totalorder %v11997_v39, %v7422_v0  ;;  %vm803_vm10 = vcmp.eq.s32.totalorder %v12001_v45, %v7422_v0  ;;  %v12004_v39 = vld [vmem:[#allocation93_spill] sm:$0xff]  ;;  %v958_v18 = vsel %vm798_vm7, %v12007_v4, 0.0 }
 0x645   : > { %11971 = vst [vmem:[#allocation219_spill] sm:$0xff] %v8213_v54  ;;  %vm795_vm1 = vcmp.eq.s32.totalorder %v11976_v60, %v7422_v0  ;;  %v8268_v60 = vsel %vm461_vm6, %v11991_v21, 0.0  ;;  %vm797_vm6 = vcmp.eq.s32.totalorder %v11999_v46, %v7422_v0  ;;  %v12002_v21 = vld [vmem:[#allocation104_spill] sm:$0xff]  ;;  %vm806_vm13 = vcmp.eq.s32.totalorder %v12004_v39, %v7422_v0  ;;  %v8320_v4 = vld [vmem:[%s6161_s17 + $0xc8] sm:$0xff] }
 0x646   : > { %11992 = vst [vmem:[#allocation268_spill] sm:$0xff] %v8268_v60  ;;  %v955_v6 = vsel %vm795_vm1, %v11998_v13, 0.0  ;;  %vm807_vm11 = vcmp.eq.s32.totalorder %v12002_v21, %v7422_v0  ;;  %v12005_v13 = vld [vmem:[#allocation94_spill] sm:$0xff]  ;;  %v12008_v21 = vld [vmem:[#allocation119_spill] sm:$0xff]  ;;  %v964_v30 = vsel %vm804_vm8, %v12009_v11, 0.0  ;;  %v954_v54 = vsel %vm794_vm12, %v12011_v3, 0.0  ;;  %2204 = vperm.xlu0 %5692, %v8320_v4  }
 0x647   : > { %vm796_vm14 = vcmp.eq.s32.totalorder %v12005_v13, %v7422_v0  ;;  %v8302_v53 = vadd.f32 %v955_v6, %v635_v26  ;;  %v967_v57 = vsel %vm807_vm11, %v12013_v38, 0.0  ;;  %v957_v26 = vsel %vm797_vm6, %v12014_v47, 0.0  ;;  %v12016_v11 = vld [vmem:[#allocation127_spill] sm:$0xff]  ;;  %v12018_v38 = vld [vmem:[#allocation132_spill] sm:$0xff]  ;;  %v12021_v39 = vld [vmem:[#allocation150_spill] sm:$0xff] }
 0x648   : > { %v956_v13 = vsel %vm796_vm14, %v12012_v34, 0.0  ;;  %v959_v6 = vsel %vm799_vm15, %v12015_v52, 0.0  ;;  %v960_v3 = vsel %vm800_vm9, %v12016_v11, 0.0  ;;  %v966_v46 = vsel %vm806_vm13, %v12018_v38, 0.0  ;;  %v12019_v52 = vld [vmem:[#allocation143_spill] sm:$0xff]  ;;  %v12036_v38 = vld [vmem:[#allocation182_spill] sm:$0xff] }
 0x649   : > { %2030 = vperm.xlu1 %5673, %v5843_v42   ;;  %v953_v42 = vsel %vm793_vm5, %v12008_v21, 0.0  ;;  %v12017_v21 = vld [vmem:[#allocation130_spill] sm:$0xff]  ;;  %v990_v47 = vadd.f32 %v958_v18, %v638_v16  ;;  %v996_v36 = vadd.f32 %v964_v30, %v644_v41  ;;  %vm1113_vm1 = vcmp.eq.s32.totalorder %v12019_v52, %v7422_v0  ;;  %v12037_v52 = vld [vmem:[#allocation171_spill] sm:$0xff] }
 0x64a   : > { %v963_v34 = vsel %vm803_vm10, %v12017_v21, 0.0  ;;  %v986_v61 = vadd.f32 %v954_v54, %v634_v55  ;;  %v988_v56 = vadd.f32 %v956_v13, %v636_v1  ;;  %v999_v11 = vadd.f32 %v967_v57, %v647_v24  ;;  %v12023_v41 = vld [vmem:[#allocation266_spill] sm:$0xff]  ;;  %v5845_v1 = vld [vmem:[%s6161_s17 + $0x98] sm:$0xff]  ;;  %v12026_v55 = vld [vmem:[#allocation153_spill] sm:$0xff] }
 0x64b   : > { %v8310_v60 = vpop.permute.xlu2 %2347  ;;  %v989_v33 = vadd.f32 %v957_v26, %v637_v50  ;;  %v991_v58 = vadd.f32 %v959_v6, %v639_v48  ;;  %v992_v20 = vadd.f32 %v960_v3, %v640_v2  ;;  %v995_v45 = vadd.f32 %v963_v34, %v643_v29  ;;  %v12024_v57 = vld [vmem:[#allocation151_spill] sm:$0xff]  ;;  %v12025_v29 = vld [vmem:[#allocation22_spill] sm:$0xff]  ;;  %v12027_v50 = vld [vmem:[#allocation264_spill] sm:$0xff] }
 0x64c   : > { %12010 = vst [vmem:[#allocation272_spill] sm:$0xff] %v8310_v60  ;;  %v985_v60 = vadd.f32 %v953_v42, %v633_v12  ;;  %v998_v21 = vadd.f32 %v966_v46, %v646_v31  ;;  %vm1116_vm2 = vcmp.eq.s32.totalorder %v12021_v39, %v7422_v0  ;;  %v12022_v12 = vld [vmem:[#allocation176_spill] sm:$0xff]  ;;  %v8344_v18 = vmax.f32 %v12023_v41, 1.0  ;;  %v8346_v42 = vpop.permute.xlu1 %2512  ;;  %v12030_v48 = vld [vmem:[#allocation155_spill] sm:$0xff]  ;;  %v12031_v24 = vld [vmem:[#allocation157_spill] sm:$0xff] }
 0x64d   : > { %v1273_v16 = vsel %vm1113_vm1, %v12022_v12, 0.0  ;;  %vm1118_vm3 = vcmp.eq.s32.totalorder %v12024_v57, %v7422_v0  ;;  %vm1124_vm4 = vcmp.eq.s32.totalorder %v12025_v29, %v7422_v0  ;;  %vm1119_vm5 = vcmp.eq.s32.totalorder %v12026_v55, %v7422_v0  ;;  %v12028_v31 = vld [vmem:[#allocation152_spill] sm:$0xff]  ;;  %v12033_v13 = vld [vmem:[#allocation27_spill] sm:$0xff]  ;;  %v12034_v26 = vld [vmem:[#allocation34_spill] sm:$0xff] }
 0x64e   : > { %v8356_v2 = vmax.f32 %v12027_v50, 1.0  ;;  %vm1114_vm7 = vcmp.eq.s32.totalorder %v12028_v31, %v7422_v0  ;;  %v12029_v54 = vld [vmem:[#allocation28_spill] sm:$0xff]  ;;  %vm1117_vm6 = vcmp.eq.s32.totalorder %v12030_v48, %v7422_v0  ;;  %vm1120_vm9 = vcmp.eq.s32.totalorder %v12031_v24, %v7422_v0  ;;  %v12035_v3 = vld [vmem:[#allocation179_spill] sm:$0xff]  ;;  %2208 = vperm.xlu0 %5692, %v7692_v43   ;;  %v12038_v41 = vld [vmem:[#allocation174_spill] sm:$0xff] }
 0x64f   : > { %vm1127_vm8 = vcmp.eq.s32.totalorder %v12029_v54, %v7422_v0  ;;  %vm1123_vm10 = vcmp.eq.s32.totalorder %v12033_v13, %v7422_v0  ;;  %vm1126_vm11 = vcmp.eq.s32.totalorder %v12034_v26, %v7422_v0  ;;  %v8372_v6 = vadd.f32 %v1273_v16, %v985_v60  ;;  %v12039_v55 = vld [vmem:[#allocation178_spill] sm:$0xff]  ;;  %v12040_v16 = vld [vmem:[#allocation177_spill] sm:$0xff]  ;;  %v12042_v48 = vld [vmem:[#allocation180_spill] sm:$0xff] }
 0x650   : > { %v1276_v34 = vsel %vm1116_vm2, %v12035_v3, 0.0  ;;  %v1279_v46 = vsel %vm1119_vm5, %v12036_v38, 0.0  ;;  %v1274_v12 = vsel %vm1114_vm7, %v12037_v52, 0.0  ;;  %5710 = vrcp.f32 %v8344_v18  ;;  %v12041_v39 = vld [vmem:[#allocation181_spill] sm:$0xff]  ;;  %v12043_v13 = vld [vmem:[#allocation183_spill] sm:$0xff] }
 0x651   : > { %2180 = vperm.xlu1 %5673, %v5845_v1   ;;  %v1277_v1 = vsel %vm1117_vm6, %v12038_v41, 0.0  ;;  %v1275_v60 = vsel %vm1115_vm0, %v12039_v55, 0.0  ;;  %v1280_v50 = vsel %vm1120_vm9, %v12040_v16, 0.0  ;;  %v1278_v43 = vsel %vm1118_vm3, %v12041_v39, 0.0  ;;  %v12045_v41 = vld [vmem:[#allocation187_spill] sm:$0xff]  ;;  %v12046_v16 = vld [vmem:[#allocation189_spill] sm:$0xff] }
 0x652   : > { %5712 = vrcp.f32 %v8356_v2  ;;  %v8393_v31 = vadd.f32 %v1276_v34, %v988_v56  ;;  %v1283_v24 = vsel %vm1123_vm10, %v12042_v48, 0.0  ;;  %v1286_v26 = vsel %vm1126_vm11, %v12043_v13, 0.0  ;;  %v5846_v48 = vld [vmem:[%s6034_s14 + $0xa0] sm:$0xff]  ;;  %v12051_v54 = vld [vmem:[#allocation267_spill] sm:$0xff] }
 0x653   : > { %v8366_v30 = vpop.permute.xlu2 %2496  ;;  %vm12044_vm12 = vcmask 64512   ;;  %v8399_v3 = vadd.f32 %v1279_v46, %v991_v58  ;;  %v1306_v38 = vadd.f32 %v1274_v12, %v986_v61  ;;  %v1309_v52 = vadd.f32 %v1277_v1, %v989_v33  ;;  %v12047_v33 = vld [vmem:[#allocation21_spill] sm:$0xff]  ;;  %v12048_v61 = vld [vmem:[#allocation255_spill] sm:$0xff] }
 0x654   : > { %12032 = vst [vmem:[#allocation273_spill] sm:$0xff] %v8366_v30  ;;  %v3020_v10 = vsel %vm12044_vm12, %v8071_v62, 0.0  ;;  %v1284_v57 = vsel %vm1124_vm4, %v12045_v41, 0.0  ;;  %v1307_v55 = vadd.f32 %v1275_v60, %v8302_v53  ;;  %v1312_v56 = vadd.f32 %v1280_v50, %v992_v20  ;;  %v12054_v60 = vld [vmem:[#allocation207_spill] sm:$0xff]  ;;  %v12062_v41 = vld [vmem:[#allocation222_spill] sm:$0xff] }
 0x655   : > { %v1310_v34 = vadd.f32 %v1278_v43, %v990_v47  ;;  %v1287_v39 = vsel %vm1127_vm8, %v12046_v16, 0.0  ;;  %v1315_v58 = vadd.f32 %v1283_v24, %v995_v45  ;;  %v8411_v62 = vadd.f32 %v1286_v26, %v998_v21  ;;  %v12050_v47 = vld [vmem:[#allocation200_spill] sm:$0xff]  ;;  %v8429_v45 = vpop.permute.xlu1 %2682  ;;  %v12057_v43 = vld [vmem:[#allocation26_spill] sm:$0xff]  ;;  %v12061_v26 = vld [vmem:[#allocation235_spill] sm:$0xff] }
 0x656   : > { %vm1434_vm13 = vcmp.eq.s32.totalorder %v12047_v33, %v7422_v0  ;;  %v8416_v29 = vmax.f32 %v12048_v61, 1.0  ;;  %v8418_v53 = vpop.eup %5710  ;;  %v8420_v20 = vadd.f32 %v1284_v57, %v996_v36  ;;  %vm1437_vm14 = vcmp.eq.s32.totalorder %v12050_v47, %v7422_v0  ;;  %12052 = vst [vmem:[#allocation128_spill] sm:$0xff] %v8429_v45  ;;  %v12055_v36 = vld [vmem:[#allocation203_spill] sm:$0xff]  ;;  %2220 = vperm.xlu0 %5692, %v8027_v32   ;;  %v12059_v24 = vld [vmem:[#allocation32_spill] sm:$0xff]  ;;  %v12064_v61 = vld [vmem:[#allocation225_spill] sm:$0xff] }
 0x657   : > { %v8425_v46 = vmax.f32 %v12051_v54, 1.0  ;;  %vm2412_vm15 = vcmp.eq.s32.totalorder %v8276_v59, %v7422_v0  ;;  %v8433_v1 = vadd.f32 %v1287_v39, %v999_v11  ;;  %vm1436_vm1 = vcmp.eq.s32.totalorder %v12054_v60, %v7422_v0  ;;  %v12058_v59 = vld [vmem:[#allocation205_spill] sm:$0xff]  ;;  %v12060_v11 = vld [vmem:[#allocation232_spill] sm:$0xff]  ;;  %v12063_v39 = vld [vmem:[#allocation239_spill] sm:$0xff] }
 0x658   : > { %12049 = vst [vmem:[#allocation100_spill] sm:$0xff] %v8420_v20  ;;  %v8431_v12 = vpop.eup %5712  ;;  %vm1440_vm0 = vcmp.eq.s32.totalorder %v12055_v36, %v7422_v0  ;;  %vm1435_vm2 = vcmp.eq.s32.totalorder %v12057_v43, %v7422_v0  ;;  %vm1443_vm3 = vcmp.eq.s32.totalorder %v12058_v59, %v7422_v0  ;;  %vm1438_vm4 = vcmp.eq.s32.totalorder %v12059_v24, %v7422_v0  ;;  %v12065_v33 = vld [vmem:[#allocation20_spill] sm:$0xff]  ;;  %v12068_v43 = vld [vmem:[#allocation243_spill] sm:$0xff]  ;;  %v12070_v30 = vld [vmem:[#allocation278_spill] sm:$0xff] }
 0x659   : > { %2036 = vperm.xlu1 %5673, %v5846_v48   ;;  %12053 = vst [vmem:[#allocation156_spill] sm:$0xff] %v8433_v1  ;;  %v1594_v13 = vsel %vm1434_vm13, %v12060_v11, 0.0  ;;  %v1595_v57 = vsel %vm1435_vm2, %v12062_v41, 0.0  ;;  %5714 = vrcp.f32 %v8416_v29  ;;  %v3110_v16 = vmul.f32 %v8418_v53, %v8344_v18  ;;  %v12067_v36 = vld [vmem:[#allocation212_spill] sm:$0xff]  ;;  %v12069_v41 = vld [vmem:[#allocation231_spill] sm:$0xff] }
 0x65a   : > { %3021 = vadd.xlane.f32.xlu2 %v3020_v10  ;;  %v1597_v10 = vsel %vm1437_vm14, %v12061_v26, 0.0  ;;  %v1600_v48 = vsel %vm1440_vm0, %v12063_v39, 0.0  ;;  %v1598_v47 = vsel %vm1438_vm4, %v12064_v61, 0.0  ;;  %v3095_v54 = vmul.f32 %v8431_v12, %v8356_v2  ;;  %v5847_v61 = vld [vmem:[%s6161_s17 + $0xa8] sm:$0xff] }
 0x65b   : > { %v2509_v21 = vpop.permute.xlu2 %2508  ;;  %5716 = vrcp.f32 %v8425_v46  ;;  %vm1433_vm5 = vcmp.eq.s32.totalorder %v12065_v33, %v7422_v0  ;;  %vm1444_vm8 = vcmp.eq.s32.totalorder %v12067_v36, %v7422_v0  ;;  %v1603_v59 = vsel %vm1443_vm3, %v12068_v43, 0.0 }
 0x65c   : > { %v8439_v50 = vsel %vm2412_vm15, %v2509_v21, 0.0  ;;  %v12066_v21 = vld [vmem:[#allocation206_spill] sm:$0xff]  ;;  %v1626_v24 = vadd.f32 %v1594_v13, %v1306_v38  ;;  %v8469_v11 = vadd.f32 %v1597_v10, %v1309_v52  ;;  %v8471_v26 = vadd.f32 %v1595_v57, %v1307_v55 }
 0x65d   : > { %12056 = vst [vmem:[#allocation10_spill] sm:$0xff] %v8439_v50  ;;  %vm1446_vm7 = vcmp.eq.s32.totalorder %v12066_v21, %v7422_v0  ;;  %v1593_v39 = vsel %vm1433_vm5, %v12069_v41, 0.0  ;;  %v8475_v45 = vadd.f32 %v1600_v48, %v1312_v56  ;;  %v8477_v33 = vadd.f32 %v1598_v47, %v1310_v34  ;;  %v12072_v38 = vld [vmem:[#allocation258_spill] sm:$0xff]  ;;  %v8487_v10 = vpop.xlane.xlu1 %3009 }
 0x65e   : > { %v3111_v50 = vsub.f32 1.0, %v3110_v16  ;;  %vm1754_vm6 = vcmp.eq.s32.totalorder %v12070_v30, %v7422_v0  ;;  %v8481_v1 = vadd.f32 %v1603_v59, %v1315_v58  ;;  %v8484_v52 = vmax.f32 %v12072_v38, 1.0  ;;  %12073 = vst [vmem:[#allocation185_spill] sm:$0xff] %v8487_v10  ;;  %v12074_v34 = vld [vmem:[#allocation234_spill] sm:$0xff]  ;;  %v12075_v58 = vld [vmem:[#allocation261_spill] sm:$0xff] }
 0x65f   : > { %v3096_v55 = vsub.f32 1.0, %v3095_v54  ;;  %v1914_v13 = vsel %vm1754_vm6, %v7544_v22, 0.0  ;;  %v8489_v43 = vpop.eup %5714  ;;  %v1625_v56 = vadd.f32 %v1593_v39, %v8372_v6  ;;  %v1596_v30 = vsel %vm1436_vm1, %v12074_v34, 0.0  ;;  %v8501_v48 = vld [vmem:[%s6034_s14 + $0xf0] sm:$0xff]  ;;  %v12093_v10 = vld [vmem:[#allocation117_spill] sm:$0xff] }
 0x660   : > { %12071 = vst [vmem:[#allocation67_spill] sm:$0xff] %v8481_v1  ;;  %v8497_v16 = vmax.f32 %v12075_v58, 1.0  ;;  %2066 = vperm.xlu0 %5692, %v8501_v48   ;;  %v12076_v47 = vld [vmem:[#allocation246_spill] sm:$0xff]  ;;  %v1946_v38 = vadd.f32 %v1914_v13, %v1626_v24  ;;  %vm2394_vm11 = vcmp.eq.s32.totalorder %v7992_v19, %v7422_v0  ;;  %v3112_v21 = vmul.f32 %v8418_v53, %v3111_v50  ;;  %v12083_v50 = vld [vmem:[#allocation269_spill] sm:$0xff] }
 0x661   : > { %2188 = vperm.xlu1 %5673, %v5847_v61   ;;  %v8504_v22 = vpop.eup %5716  ;;  %v8510_v6 = vsel %vm1446_vm7, %v12076_v47, 0.0  ;;  %v12077_v54 = vld [vmem:[#allocation230_spill] sm:$0xff]  ;;  %5718 = vrcp.f32 %v8484_v52  ;;  %v3097_v36 = vmul.f32 %v8431_v12, %v3096_v55  ;;  %vm3099_vm12 = vweird.f32 %v8356_v2  ;;  %v12084_v55 = vld [vmem:[#allocation312_spill] sm:$0xff] }
 0x662   : > { %v8516_v60 = vsel %vm1444_vm8, %v12077_v54, 0.0  ;;  %v12079_v59 = vld [vmem:[#allocation270_spill] sm:$0xff]  ;;  %v8539_v24 = vmul.f32 %v8489_v43, %v8416_v29  ;;  %v3105_v19 = vand.u32 2147483648, %v8356_v2  ;;  %5720 = vrcp.f32 %v8497_v16 }
 0x663   : > { %v2363_v57 = vpop.permute.xlu2 %2362  ;;  %12078 = vst [vmem:[#allocation210_spill] sm:$0xff] %v8516_v60  ;;  %v8519_v41 = vmax.f32 %v12079_v59, 1.0  ;;  %v12081_v61 = vld [vmem:[#allocation286_spill] sm:$0xff]  ;;  %v8546_v13 = vmax.f32 %v12083_v50, 1.0  ;;  %vm3115_vm14 = vweird.f32 %v8418_v53  ;;  %v3113_v54 = vadd.f32 %v8418_v53, %v3112_v21 }
 0x664   : > { %vm2413_vm9 = vcmp.eq.s32.totalorder %v2363_v57, %v7422_v0  ;;  %vm1753_vm10 = vcmp.eq.s32.totalorder %v12081_v61, %v7422_v0  ;;  %v8530_v57 = vadd.f32 %v1596_v30, %v8393_v31  ;;  %v3125_v31 = vmul.f32 %v8504_v22, %v8425_v46  ;;  %v12085_v58 = vld [vmem:[#allocation330_spill] sm:$0xff] }
 0x665   : > { %v8522_v39 = vsel %vm2413_vm9, %v8346_v42, 0.0  ;;  %v12082_v42 = vld [vmem:[#allocation33_spill] sm:$0xff]  ;;  %v1913_v34 = vsel %vm1753_vm10, %v12084_v55, 0.0  ;;  %v2554_v30 = vsel %vm2394_vm11, %v7711_v27, 0.0  ;;  %5722 = vrcp.f32 %v8519_v41 }
 0x666   : > { %12080 = vst [vmem:[#allocation242_spill] sm:$0xff] %v8522_v39  ;;  %vm1439_vm13 = vcmp.eq.s32.totalorder %v12082_v42, %v7422_v0  ;;  %v2266_v47 = vadd.f32 %v12085_v58, %v1946_v38  ;;  %vm3100_vm15 = vweird.f32 %v8431_v12  ;;  %vm3114_vm1 = vweird.f32 %v8344_v18  ;;  %v12095_v38 = vld [vmem:[#allocation338_spill] sm:$0xff] }
 0x667   : > { %v3118_v59 = vand.u32 2147483647, %v8344_v18  ;;  %v3098_v61 = vadd.f32 %v8431_v12, %v3097_v36  ;;  %v3103_v27 = vand.u32 2147483647, %v8356_v2  ;;  %v1945_v39 = vadd.f32 %v1913_v34, %v1625_v56  ;;  %vm8564_vm2 = vmor %vm3114_vm1, %vm3115_vm14  ;;  %v8570_v21 = vpop.eup %5718  ;;  %v12092_v2 = vld [vmem:[#allocation316_spill] sm:$0xff] }
 0x668   : > { %vm2393_vm0 = vcmp.eq.s32.totalorder %v7706_v28, %v7422_v0  ;;  %2069 = vperm.xlu0 %5692, %v8141_v51   ;;  %5724 = vrcp.f32 %v8546_v13  ;;  %v3126_v36 = vsub.f32 1.0, %v3125_v31  ;;  %v3120_v56 = vand.u32 2147483648, %v8344_v18  ;;  %vm8578_vm4 = vmor %vm3099_vm12, %vm3100_vm15 }
 0x669   : > { %2045 = vperm.xlu1 %5673, %v8020_v40   ;;  %v2586_v40 = vadd.f32 %v2554_v30, %v2266_v47  ;;  %v12090_v30 = vld [vmem:[#allocation291_spill] sm:$0xff]  ;;  %v8583_v47 = vpop.eup %5720  ;;  %vm2713_vm7 = vcmp.eq.s32.totalorder %v7613_v63, %v7422_v0  ;;  %v3117_v18 = vsel %vm8564_vm2, %v8418_v53, %v3113_v54  ;;  %vm1755_vm8 = vcmp.eq.s32.totalorder %v12092_v2, %v7422_v0 }
 0x66a   : > { %v3106_v60 = vor.u32 1.1754944e-38, %v3105_v19  ;;  %v3102_v63 = vsel %vm8578_vm4, %v8431_v12, %v3098_v61  ;;  %vm3104_vm6 = vcmp.eq.f32.partialorder %v3103_v27, 8.507059e+37  ;;  %v3141_v54 = vsub.f32 1.0, %v8539_v24  ;;  %v12096_v19 = vld [vmem:[#allocation307_spill] sm:$0xff] }
 0x66b   : > { %v1983_v50 = vpop.permute.xlu1 %1982  ;;  %v2366_v55 = vpop.permute.xlu2 %2365  ;;  %v2873_v28 = vsel %vm2713_vm7, %v12095_v38, 0.0  ;;  %vm3119_vm9 = vcmp.eq.f32.partialorder %v3118_v59, 8.507059e+37  ;;  %vm3129_vm12 = vweird.f32 %v8425_v46  ;;  %vm3130_vm14 = vweird.f32 %v8504_v22  ;;  %v12116_v38 = vld [vmem:[#allocation313_spill] sm:$0xff] }
 0x66c   : > { %vm2073_vm3 = vcmp.eq.s32.totalorder %v1983_v50, %v7422_v0  ;;  %v12091_v50 = vld [vmem:[#allocation334_spill] sm:$0xff]  ;;  %v3107_v27 = vsel %vm3104_vm6, %v3106_v60, %v3102_v63  ;;  %vm2414_vm10 = vcmp.eq.s32.totalorder %v2366_v55, %v7422_v0  ;;  %v12097_v60 = vld [vmem:[#allocation332_spill] sm:$0xff]  ;;  %vm12101_vm15 = vcmask 523264   ;;  %vm8660_vm2 = vmor %vm3129_vm12, %vm3130_vm14 }
 0x66d   : > { %v2233_v58 = vsel %vm2073_vm3, %v12090_v30, 0.0  ;;  %vm2714_vm5 = vcmp.eq.s32.totalorder %v12091_v50, %v7422_v0  ;;  %v2553_v30 = vsel %vm2393_vm0, %v7746_v37, 0.0  ;;  %v8599_v50 = vpop.eup %5722  ;;  %v3121_v37 = vor.u32 1.1754944e-38, %v3120_v56  ;;  %vm12102_vm1 = vmmov %vm12101_vm15 }
 0x66e   : > { %v2265_v31 = vadd.f32 %v2233_v58, %v1945_v39  ;;  %v2874_v1 = vsel %vm2714_vm5, %v12093_v10, 0.0  ;;  %v12094_v39 = vld [vmem:[#allocation238_spill] sm:$0xff]  ;;  %v8614_v61 = vpop.eup %5724  ;;  %v8618_v42 = vmul.f32 %v8599_v50, %v8519_v41  ;;  %vm2395_vm0 = vcmp.eq.s32.totalorder %v7720_v8, %v7422_v0  ;;  %vm12105_vm3 = vmmov %vm12102_vm1 }
 0x66f   : > { %v2906_v20 = vadd.f32 %v2874_v1, %v2586_v40  ;;  %v1599_v10 = vsel %vm1439_vm13, %v12094_v39, 0.0  ;;  %v3127_v1 = vmul.f32 %v8504_v22, %v3126_v36  ;;  %v1915_v40 = vsel %vm1755_vm8, %v12096_v19, 0.0  ;;  %vm12106_vm4 = vmmov %vm12102_vm1 }
 0x670   : > { %v2585_v53 = vadd.f32 %v2553_v30, %v2265_v31  ;;  %v3122_v24 = vsel %vm3119_vm9, %v3121_v37, %v3117_v18  ;;  %5694 = vset.pattern.permute.xlu0 %v11821_v44  ;;  %v3142_v31 = vmul.f32 %v8489_v43, %v3141_v54  ;;  %v1947_v18 = vadd.f32 %v1915_v40, %v8471_v26  ;;  %v12100_v26 = vld [vmem:[#allocation310_spill] sm:$0xff] }
 0x671   : > { %2051 = vperm.xlu1 %5673, %v8062_v7   ;;  %v3547_v58 = vmul.f32 %v3122_v24, %v2906_v20  ;;  %2540 = vperm.xlu0 %5694, %v8027_v32   ;;  %v12098_v20 = vld [vmem:[#allocation281_spill] sm:$0xff]  ;;  %v3135_v30 = vand.u32 2147483648, %v8425_v46  ;;  %v3185_v32 = vmul.f32 %v8614_v61, %v8546_v13  ;;  %v8648_v39 = vmul.f32 %v8583_v47, %v8497_v16 }
 0x672   : > { %v2905_v12 = vadd.f32 %v2873_v28, %v2585_v53  ;;  %2027 = vperm.xlu2 %5684, %v7929_v25   ;;  %v8626_v25 = vadd.f32 %v1599_v10, %v8399_v3  ;;  %vm1756_vm13 = vcmp.eq.s32.totalorder %v12098_v20, %v7422_v0  ;;  %v8640_v3 = vmul.f32 %v8570_v21, %v8484_v52 }
 0x673   : > { %v1989_v56 = vpop.permute.xlu1 %1988  ;;  %v2517_v34 = vpop.permute.xlu2 %2516  ;;  %v1916_v63 = vsel %vm1756_vm13, %v12100_v26, 0.0  ;;  %v3156_v10 = vsub.f32 1.0, %v8618_v42  ;;  %v3128_v54 = vadd.f32 %v8504_v22, %v3127_v1  ;;  %v3133_v28 = vand.u32 2147483647, %v8425_v46  ;;  %v5849_v1 = vld [vmem:[%s6161_s17 + $0x90] sm:$0xff]  ;;  %v12107_v46 = vld [vmem:[#allocation293_spill] sm:$0xff] }
 0x674   : > { %v3546_v36 = vmul.f32 %v3107_v27, %v2905_v12  ;;  %vm2075_vm11 = vcmp.eq.s32.totalorder %v1989_v56, %v7422_v0  ;;  %v8622_v59 = vsel %vm2414_vm10, %v2517_v34, 0.0  ;;  %vm3144_vm5 = vweird.f32 %v8416_v29  ;;  %v12115_v26 = vld [vmem:[#allocation265_spill] sm:$0xff] }
 0x675   : > { %v2235_v2 = vsel %vm2075_vm11, %v12097_v60, 0.0  ;;  %vm3145_vm7 = vweird.f32 %v8489_v43  ;;  %v1948_v8 = vadd.f32 %v1916_v63, %v8530_v57  ;;  %v2555_v37 = vsel %vm2395_vm0, %v8011_v9, 0.0 }
 0x676   : > { %v8635_v55 = vpack.c.bf16 %v3547_v58, %v3546_v36  ;;  %v2267_v53 = vadd.f32 %v2235_v2, %v1947_v18  ;;  %vm2076_vm8 = vcmp.eq.s32.totalorder %v12107_v46, %v7422_v0  ;;  %v3150_v19 = vand.u32 2147483648, %v8416_v29  ;;  %vm8690_vm9 = vmor %vm3144_vm5, %vm3145_vm7  ;;  %v12110_v58 = vld [vmem:[#allocation318_spill] sm:$0xff] }
 0x677   : > { %vm2715_vm6 = vcmp.eq.s32.totalorder %v7619_v23, %v7422_v0  ;;  %v3143_v57 = vadd.f32 %v8489_v43, %v3142_v31  ;;  %v3148_v9 = vand.u32 2147483647, %v8416_v29  ;;  %v3186_v42 = vsub.f32 1.0, %v3185_v32  ;;  %v12113_v31 = vld [vmem:[#allocation68_spill] sm:$0xff]  ;;  %v12114_v29 = vld [vmem:[#allocation339_spill] sm:$0xff] }
 0x678   : > { %12099 = vst [vmem:[#allocation287_spill] sm:$0xff] %v8635_v55  ;;  %5337 = vmatmul.msk.bf16.gmra.mxu0 %vm12101_vm15, %v8635_v55  ;;  %5353 = vmatmul.msk.bf16.gmra.mxu1 %vm12102_vm1, %v8635_v55  ;;  %v2587_v40 = vadd.f32 %v2555_v37, %v2267_v53  ;;  %v3132_v24 = vsel %vm8660_vm2, %v8504_v22, %v3128_v54  ;;  %v3136_v27 = vor.u32 1.1754944e-38, %v3135_v30  ;;  %vm8698_vm12 = vcmp.eq.f32.partialorder %v3133_v28, 8.507059e+37 }
 0x679   : > { %5401 = vmatmul.msk.bf16.gmra.mxu2 %vm12105_vm3, %v8635_v55  ;;  %5417 = vmatmul.msk.bf16.gmra.mxu3 %vm12106_vm4, %v8635_v55  ;;  %vm1757_vm10 = vcmp.eq.s32.totalorder %v12110_v58, %v7422_v0  ;;  %vm2396_vm11 = vcmp.eq.s32.totalorder %v7724_v15, %v7422_v0  ;;  %vm2716_vm13 = vcmp.eq.s32.totalorder %v12113_v31, %v7422_v0  ;;  %v2875_v18 = vsel %vm2715_vm6, %v12114_v29, 0.0  ;;  %v12124_v31 = vld [vmem:[#allocation284_spill] sm:$0xff]  ;;  %v12125_v29 = vld [vmem:[#allocation299_spill] sm:$0xff] }
 0x67a   : > { %5676 = vset.pattern.permute.xlu1 %v11821_v44  ;;  %2176 = vperm.xlu2 %5684, %v5849_v1   ;;  %v2556_v60 = vsel %vm2396_vm11, %v7730_v35, 0.0  ;;  %v3151_v2 = vor.u32 1.1754944e-38, %v3150_v19  ;;  %v2907_v15 = vadd.f32 %v2875_v18, %v2587_v40  ;;  %v3147_v30 = vsel %vm8690_vm9, %v8489_v43, %v3143_v57  ;;  %v12118_v40 = vld [vmem:[#allocation290_spill] sm:$0xff] }
 0x67b   : > { %2524 = vperm.xlu1 %5676, %v8320_v4   ;;  %v2125_v12 = vpop.permute.xlu1 %2124  ;;  %2386 = vperm.xlu0 %5694, %v8501_v48   ;;  %vm3149_vm14 = vcmp.eq.f32.partialorder %v3148_v9, 8.507059e+37  ;;  %v3171_v48 = vsub.f32 1.0, %v8640_v3  ;;  %v8715_v63 = vmax.f32 %v12115_v26, 1.0  ;;  %v3157_v53 = vmul.f32 %v8599_v50, %v3156_v10  ;;  %v12135_v26 = vld [vmem:[#allocation311_spill] sm:$0xff] }
 0x67c   : > { %v2236_v56 = vsel %vm2076_vm8, %v2125_v12, 0.0  ;;  %v2876_v23 = vsel %vm2716_vm13, %v7536_v17, 0.0  ;;  %v3201_v35 = vsub.f32 1.0, %v8648_v39  ;;  %vm3159_vm15 = vweird.f32 %v8519_v41  ;;  %v12117_v39 = vld [vmem:[#allocation276_spill] sm:$0xff] }
 0x67d   : > { %v2268_v22 = vadd.f32 %v2236_v56, %v1948_v8  ;;  %v3187_v32 = vmul.f32 %v8614_v61, %v3186_v42  ;;  %v1917_v43 = vsel %vm1757_vm10, %v12116_v38, 0.0  ;;  %v3137_v3 = vsel %vm8698_vm12, %v3136_v27, %v3132_v24  ;;  %v5850_v8 = vld [vmem:[%s6034_s14 + $0xa8] sm:$0xff]  ;;  %v12122_v27 = vld [vmem:[#allocation335_spill] sm:$0xff] }
 0x67e   : > { %v3152_v28 = vsel %vm3149_vm14, %v3151_v2, %v3147_v30  ;;  %vm3160_vm1 = vweird.f32 %v8599_v50  ;;  %v3210_v17 = vand.u32 2147483648, %v8497_v16  ;;  %v8732_v10 = vmax.f32 %v12117_v39, 1.0  ;;  %v12134_v30 = vld [vmem:[#allocation296_spill] sm:$0xff]  ;;  %v12137_v38 = vld [vmem:[#allocation326_spill] sm:$0xff]  ;;  %v12145_v42 = vld [vmem:[#allocation149_spill] sm:$0xff] }
 0x67f   : > { %v2588_v20 = vadd.f32 %v2556_v60, %v2268_v22  ;;  %v3548_v37 = vmul.f32 %v3137_v3, %v2907_v15  ;;  %v3165_v19 = vand.u32 2147483648, %v8519_v41  ;;  %vm1758_vm0 = vcmp.eq.s32.totalorder %v12118_v40, %v7422_v0  ;;  %vm8748_vm3 = vmor %vm3159_vm15, %vm3160_vm1  ;;  %v12143_v40 = vld [vmem:[#allocation351_spill] sm:$0xff] }
 0x680   : > { %v8740_v12 = vadd.f32 %v8599_v50, %v3157_v53  ;;  %v1949_v57 = vadd.f32 %v1917_v43, %v8469_v11  ;;  %v3163_v24 = vand.u32 2147483647, %v8519_v41  ;;  %v8757_v34 = vmul.f32 %v8583_v47, %v3201_v35  ;;  %v8760_v11 = vpop.permute.xlu0 %2520  ;;  %v12123_v41 = vld [vmem:[#allocation315_spill] sm:$0xff] }
 0x681   : > { %v2908_v54 = vadd.f32 %v2876_v23, %v2588_v20  ;;  %5726 = vrcp.f32 %v8715_v63  ;;  %v8763_v58 = vadd.f32 %v8614_v61, %v3187_v32  ;;  %v1918_v36 = vsel %vm1758_vm0, %v12123_v41, 0.0  ;;  %v12133_v20 = vld [vmem:[#allocation45_spill] sm:$0xff] }
 0x682   : > { %2039 = vperm.xlu2 %5684, %v5850_v8   ;;  %5728 = vrcp.f32 %v8732_v10  ;;  %vm2397_vm4 = vcmp.eq.s32.totalorder %v7736_v49, %v7422_v0  ;;  %vm1759_vm5 = vcmp.eq.s32.totalorder %v12124_v31, %v7422_v0  ;;  %vm2079_vm7 = vcmp.eq.s32.totalorder %v12125_v29, %v7422_v0  ;;  %v12147_v31 = vld [vmem:[#allocation13_spill] sm:$0xff] }
 0x683   : > { %v3549_v1 = vmul.f32 %v3152_v28, %v2908_v54  ;;  %5678 = vset.pattern.permute.xlu1 %v11738_v14  ;;  %v1995_v46 = vpop.permute.xlu1 %1994  ;;  %5700 = vset.pattern.permute.xlu0 %v11738_v14  ;;  %v3166_v18 = vor.u32 1.1754944e-38, %v3165_v19  ;;  %vm12126_vm8 = vcmask 523264   ;;  %v1919_v60 = vsel %vm1759_vm5, %v7554_v5, 0.0  ;;  %v12136_v54 = vld [vmem:[#allocation321_spill] sm:$0xff] }
 0x684   : > { %2691 = vperm.xlu1 %5678, %v8062_v7   ;;  %vm2077_vm2 = vcmp.eq.s32.totalorder %v1995_v46, %v7422_v0  ;;  %v3172_v7 = vmul.f32 %v8570_v21, %v3171_v48  ;;  %2709 = vperm.xlu0 %5700, %v8141_v51   ;;  %v3162_v51 = vsel %vm8748_vm3, %v8599_v50, %v8740_v12  ;;  %vm12127_vm6 = vmmov %vm12126_vm8  ;;  %vm3190_vm9 = vweird.f32 %v8614_v61  ;;  %v12132_v50 = vld [vmem:[#allocation383_spill] sm:$0xff]  ;;  %v8822_v28 = vld [vmem:[%s6161_s17 + $0xc0] sm:$0xff] }
 0x685   : > { %v8744_v9 = vpack.c.bf16 %v3549_v1, %v3548_v37  ;;  %v2237_v56 = vsel %vm2077_vm2, %v12122_v27, 0.0  ;;  %vm8787_vm10 = vcmp.eq.f32.partialorder %v3163_v24, 8.507059e+37  ;;  %vm12130_vm11 = vmmov %vm12127_vm6  ;;  %vm3174_vm13 = vweird.f32 %v8484_v52  ;;  %v12140_v1 = vld [vmem:[#allocation158_spill] sm:$0xff] }
 0x686   : > { %v2269_v22 = vadd.f32 %v2237_v56, %v1949_v57  ;;  %vm12131_vm12 = vmmov %vm12127_vm6  ;;  %vm3175_vm14 = vweird.f32 %v8570_v21  ;;  %vm3204_vm15 = vweird.f32 %v8497_v16  ;;  %v1950_v5 = vadd.f32 %v1918_v36, %v8477_v33  ;;  %v12142_v46 = vld [vmem:[#allocation378_spill] sm:$0xff] }
 0x687   : > { %12119 = vst [vmem:[#allocation317_spill] sm:$0xff] %v8744_v9  ;;  %v2557_v15 = vsel %vm2397_vm4, %v12132_v50, 0.0  ;;  %vm2078_vm1 = vcmp.eq.s32.totalorder %v12134_v30, %v7422_v0  ;;  %v3180_v48 = vand.u32 2147483648, %v8484_v52  ;;  %v8808_v53 = vmax.f32 %v12135_v26, 1.0  ;;  %v8813_v49 = vpop.eup %5726  ;;  %vm8829_vm3 = vmor %vm3174_vm13, %vm3175_vm14  ;;  %v12144_v57 = vld [vmem:[#allocation6_spill] sm:$0xff] }
 0x688   : > { %5338 = vmatmul.msk.bf16.gmra.mxu0 %vm12126_vm8, %v8744_v9  ;;  %5354 = vmatmul.msk.bf16.gmra.mxu1 %vm12127_vm6, %v8744_v9  ;;  %vm3189_vm0 = vweird.f32 %v8546_v13  ;;  %v2589_v23 = vadd.f32 %v2557_v15, %v2269_v22  ;;  %v3173_v33 = vadd.f32 %v8570_v21, %v3172_v7  ;;  %v3178_v32 = vand.u32 2147483647, %v8484_v52  ;;  %v8833_v37 = vpop.eup %5728  ;;  %v12146_v36 = vld [vmem:[#allocation302_spill] sm:$0xff]  ;;  %v8859_v15 = vpop.permute.xlu0 %2661 }
 0x689   : > { %5402 = vmatmul.msk.bf16.gmra.mxu2 %vm12130_vm11, %v8744_v9  ;;  %5418 = vmatmul.msk.bf16.gmra.mxu3 %vm12131_vm12, %v8744_v9  ;;  %vm1760_vm2 = vcmp.eq.s32.totalorder %v12136_v54, %v7422_v0  ;;  %v8818_v43 = vmax.f32 %v12137_v38, 1.0  ;;  %v1951_v3 = vadd.f32 %v1919_v60, %v8626_v25  ;;  %vm2717_vm4 = vcmp.eq.s32.totalorder %v12140_v1, %v7422_v0  ;;  %v12141_v25 = vld [vmem:[#allocation350_spill] sm:$0xff] }
 0x68a   : > { %2042 = vperm.xlu2 %5684, %v12133_v20   ;;  %vm2718_vm5 = vcmp.eq.s32.totalorder %v12141_v25, %v7422_v0  ;;  %vm2398_vm8 = vcmp.eq.s32.totalorder %v12142_v46, %v7422_v0  ;;  %v2877_v12 = vsel %vm2717_vm4, %v12143_v40, 0.0  ;;  %vm2399_vm6 = vcmp.eq.s32.totalorder %v12145_v42, %v7422_v0  ;;  %v12150_v20 = vld [vmem:[#allocation379_spill] sm:$0xff]  ;;  %v12155_v25 = vld [vmem:[#allocation337_spill] sm:$0xff]  ;;  %v12160_v42 = vld [vmem:[#allocation274_spill] sm:$0xff] }
 0x68b   : > { %v2133_v35 = vpop.permute.xlu1 %2132  ;;  %v2558_v52 = vsel %vm2398_vm8, %v12144_v57, 0.0  ;;  %v3181_v24 = vor.u32 1.1754944e-38, %v3180_v48  ;;  %v2909_v27 = vadd.f32 %v2877_v12, %v2589_v23  ;;  %v3177_v7 = vsel %vm8829_vm3, %v8570_v21, %v3173_v33  ;;  %v12149_v21 = vld [vmem:[#allocation214_spill] sm:$0xff] }
 0x68c   : > { %2840 = vperm.xlu1 %5678, %v8822_v28   ;;  %v2238_v8 = vsel %vm2078_vm1, %v2133_v35, 0.0  ;;  %vm3179_vm11 = vcmp.eq.f32.partialorder %v3178_v32, 8.507059e+37  ;;  %v3245_v41 = vmul.f32 %v8833_v37, %v8732_v10  ;;  %v2239_v22 = vsel %vm2079_vm7, %v12146_v36, 0.0  ;;  %v5852_v35 = vld [vmem:[%s6161_s17 + $0xb8] sm:$0xff]  ;;  %v12161_v36 = vld [vmem:[#allocation197_spill] sm:$0xff] }
 0x68d   : > { %v2270_v19 = vadd.f32 %v2238_v8, %v1950_v5  ;;  %v1920_v60 = vsel %vm1760_vm2, %v12147_v31, 0.0  ;;  %v12148_v5 = vld [vmem:[#allocation353_spill] sm:$0xff]  ;;  %vm1447_vm12 = vcmp.eq.s32.totalorder %v12149_v21, %v7422_v0  ;;  %5730 = vrcp.f32 %v8808_v53  ;;  %v12151_v32 = vld [vmem:[#allocation131_spill] sm:$0xff]  ;;  %v12167_v31 = vld [vmem:[#allocation210_spill] sm:$0xff] }
 0x68e   : > { %v2878_v50 = vsel %vm2718_vm5, %v12148_v5, 0.0  ;;  %v2559_v30 = vsel %vm2399_vm6, %v12150_v20, 0.0  ;;  %v3167_v29 = vsel %vm8787_vm10, %v3166_v18, %v3162_v51  ;;  %5732 = vrcp.f32 %v8818_v43  ;;  %vm8877_vm10 = vmor %vm3189_vm0, %vm3190_vm9  ;;  %v12171_v20 = vld [vmem:[#allocation233_spill] sm:$0xff]  ;;  %v12173_v21 = vld [vmem:[#allocation324_spill] sm:$0xff] }
 0x68f   : > { %v2590_v56 = vadd.f32 %v2558_v52, %v2270_v19  ;;  %v2271_v26 = vadd.f32 %v2239_v22, %v1951_v3  ;;  %v3182_v23 = vsel %vm3179_vm11, %v3181_v24, %v3177_v7  ;;  %vm3205_vm7 = vweird.f32 %v8583_v47  ;;  %v12158_v19 = vld [vmem:[#allocation355_spill] sm:$0xff]  ;;  %v12159_v52 = vld [vmem:[#allocation294_spill] sm:$0xff]  ;;  %v12166_v22 = vld [vmem:[#allocation100_spill] sm:$0xff] }
 0x690   : > { %v1952_v33 = vadd.f32 %v1920_v60, %v8475_v45  ;;  %vm2719_vm13 = vcmp.eq.s32.totalorder %v12151_v32, %v7422_v0  ;;  %v3550_v54 = vmul.f32 %v3167_v29, %v2909_v27  ;;  %v3203_v45 = vadd.f32 %v8583_v47, %v8757_v34  ;;  %vm8895_vm9 = vmor %vm3204_vm15, %vm3205_vm7  ;;  %v5853_v29 = vld [vmem:[%s6034_s14 + $0xc0] sm:$0xff] }
 0x691   : > { %v2910_v48 = vadd.f32 %v2878_v50, %v2590_v56  ;;  %v2591_v39 = vadd.f32 %v2559_v30, %v2271_v26  ;;  %v3208_v18 = vand.u32 2147483647, %v8497_v16  ;;  %v3193_v2 = vand.u32 2147483647, %v8546_v13  ;;  %v8931_v16 = vpop.xlane.xlu0 %3018  ;;  %v12172_v26 = vld [vmem:[#allocation323_spill] sm:$0xff]  ;;  %v12175_v51 = vld [vmem:[#allocation156_spill] sm:$0xff] }
 0x692   : > { %2196 = vperm.xlu2 %5684, %v5852_v35   ;;  %v3195_v3 = vand.u32 2147483648, %v8546_v13  ;;  %v3260_v34 = vmul.f32 %v8813_v49, %v8715_v63  ;;  %vm2720_vm1 = vcmp.eq.s32.totalorder %v12158_v19, %v7422_v0  ;;  %v3192_v13 = vsel %vm8877_vm10, %v8614_v61, %v8763_v58 }
 0x693   : > { %v3551_v38 = vmul.f32 %v3182_v23, %v2910_v48  ;;  %v2004_v8 = vpop.permute.xlu1 %2003  ;;  %v8907_v12 = vpop.eup %5730  ;;  %v3246_v57 = vsub.f32 1.0, %v3245_v41  ;;  %vm1764_vm15 = vcmp.eq.s32.totalorder %v12159_v52, %v7422_v0  ;;  %v2879_v24 = vsel %vm2719_vm13, %v12160_v42, 0.0 }
 0x694   : > { %2844 = vperm.xlu1 %5678, %v8320_v4   ;;  %vm2080_vm14 = vcmp.eq.s32.totalorder %v2004_v8, %v7422_v0  ;;  %v3211_v27 = vor.u32 1.1754944e-38, %v3210_v17  ;;  %v8917_v56 = vpop.eup %5732  ;;  %v2911_v7 = vadd.f32 %v2879_v24, %v2591_v39  ;;  %v3207_v58 = vsel %vm8895_vm9, %v8583_v47, %v3203_v45  ;;  %v12168_v47 = vld [vmem:[#allocation277_spill] sm:$0xff]  ;;  %v12182_v24 = vld [vmem:[#allocation384_spill] sm:$0xff] }
 0x695   : > { %v8888_v1 = vpack.c.bf16 %v3551_v38, %v3550_v54  ;;  %v2240_v46 = vsel %vm2080_vm14, %v12155_v25, 0.0  ;;  %vm8923_vm0 = vcmp.eq.f32.partialorder %v3208_v18, 8.507059e+37  ;;  %vm12164_vm2 = vcmask 523264  }
 0x696   : > { %v2272_v40 = vadd.f32 %v2240_v46, %v1952_v33  ;;  %vm12165_vm3 = vmmov %vm12164_vm2  ;;  %v8935_v17 = vadd.f32 %v8510_v6, %v8411_v62  ;;  %v1636_v60 = vadd.f32 %v12167_v31, %v12166_v22  ;;  %v2880_v5 = vsel %vm2720_vm1, %v12168_v47, 0.0  ;;  %v12178_v46 = vld [vmem:[#allocation340_spill] sm:$0xff]  ;;  %v12185_v22 = vld [vmem:[#allocation343_spill] sm:$0xff] }
 0x697   : > { %12154 = vst [vmem:[#allocation305_spill] sm:$0xff] %v8888_v1  ;;  %v3196_v50 = vor.u32 1.1754944e-38, %v3195_v3  ;;  %vm12169_vm4 = vmmov %vm12164_vm2  ;;  %v1607_v62 = vsel %vm1447_vm12, %v12171_v20, 0.0  ;;  %v3261_v6 = vsub.f32 1.0, %v3260_v34  ;;  %vm3194_vm8 = vcmp.eq.f32.partialorder %v3193_v2, 8.507059e+37  ;;  %v12176_v2 = vld [vmem:[#allocation308_spill] sm:$0xff] }
 0x698   : > { %v2592_v61 = vadd.f32 %v12161_v36, %v2272_v40  ;;  %5339 = vmatmul.msk.bf16.gmra.mxu0 %vm12164_vm2, %v8888_v1  ;;  %5355 = vmatmul.msk.bf16.gmra.mxu1 %vm12165_vm3, %v8888_v1  ;;  %vm12170_vm5 = vmmov %vm12164_vm2  ;;  %v3247_v48 = vmul.f32 %v8833_v37, %v3246_v57  ;;  %v1924_v23 = vsel %vm1764_vm15, %v12172_v26, 0.0  ;;  %v3212_v33 = vsel %vm8923_vm0, %v3211_v27, %v3207_v58  ;;  %v12177_v3 = vld [vmem:[#allocation275_spill] sm:$0xff] }
 0x699   : > { %5403 = vmatmul.msk.bf16.gmra.mxu2 %vm12169_vm4, %v8888_v1  ;;  %5419 = vmatmul.msk.bf16.gmra.mxu3 %vm12170_vm5, %v8888_v1  ;;  %v3197_v35 = vsel %vm3194_vm8, %v3196_v50, %v3192_v13  ;;  %vm1763_vm6 = vcmp.eq.s32.totalorder %v12173_v21, %v7422_v0  ;;  %v3290_v54 = vmul.f32 %v8917_v56, %v8818_v43  ;;  %v12174_v39 = vmov 5   ;;  %v12180_v13 = vld [vmem:[#allocation320_spill] sm:$0xff]  ;;  %v12181_v57 = vld [vmem:[#allocation263_spill] sm:$0xff]  ;;  %v12308_v1 = vld [vmem:[#allocation229_spill] sm:$0xff] }
 0x69a   : > { %v2912_v30 = vadd.f32 %v2880_v5, %v2592_v61  ;;  %2048 = vperm.xlu2 %5684, %v5853_v29   ;;  %v3552_v38 = vmul.f32 %v3197_v35, %v2911_v7  ;;  %v8965_v45 = vadd.f32 %v1607_v62, %v12175_v51  ;;  %v3275_v18 = vmul.f32 %v8907_v12, %v8808_v53  ;;  %v12186_v47 = vld [vmem:[#allocation67_spill] sm:$0xff]  ;;  %v8996_v5 = vpop.xlane.xlu0 %3024 }
 0x69b   : > { %v2013_v32 = vpop.permute.xlu1 %2012  ;;  %vm2084_vm11 = vcmp.eq.s32.totalorder %v12176_v2, %v7422_v0  ;;  %v3255_v25 = vand.u32 2147483648, %v8732_v10  ;;  %vm3249_vm12 = vweird.f32 %v8732_v10  ;;  %vm3250_vm7 = vweird.f32 %v8833_v37  ;;  %v12194_v21 = vld [vmem:[#allocation283_spill] sm:$0xff] }
 0x69c   : > { %v3553_v8 = vmul.f32 %v3212_v33, %v2912_v30  ;;  %5680 = vset.pattern.permute.xlu1 %v12174_v39  ;;  %v2244_v4 = vsel %vm2084_vm11, %v12178_v46, 0.0  ;;  %v1956_v19 = vadd.f32 %v1924_v23, %v1636_v60  ;;  %v1923_v40 = vsel %vm1763_vm6, %v12180_v13, 0.0  ;;  %vm8987_vm9 = vmor %vm3249_vm12, %vm3250_vm7  ;;  %v12191_v23 = vld [vmem:[#allocation358_spill] sm:$0xff]  ;;  %v12196_v51 = vld [vmem:[#allocation175_spill] sm:$0xff]  ;;  %v9040_v46 = vpop.permute.xlu2 %2368 }
 0x69d   : > { %2054 = vperm.xlu1 %5680, %v12177_v3   ;;  %vm2404_vm13 = vcmp.eq.s32.totalorder %v12181_v57, %v7422_v0  ;;  %v3262_v52 = vmul.f32 %v8813_v49, %v3261_v6  ;;  %v3291_v42 = vsub.f32 1.0, %v3290_v54  ;;  %v3248_v7 = vadd.f32 %v8833_v37, %v3247_v48  ;;  %v12200_v13 = vld [vmem:[#allocation327_spill] sm:$0xff] }
 0x69e   : > { %v8974_v34 = vpack.c.bf16 %v3553_v8, %v3552_v38  ;;  %v2564_v27 = vsel %vm2404_vm13, %v12182_v24, 0.0  ;;  %v3253_v36 = vand.u32 2147483647, %v8732_v10  ;;  %v3276_v61 = vsub.f32 1.0, %v3275_v18  ;;  %v12195_v38 = vld [vmem:[#allocation147_spill] sm:$0xff] }
 0x69f   : > { %v2276_v58 = vadd.f32 %v2244_v4, %v1956_v19  ;;  %vm3264_vm10 = vweird.f32 %v8715_v63  ;;  %vm3265_vm14 = vweird.f32 %v8813_v49  ;;  %vm2724_vm1 = vcmp.eq.s32.totalorder %v12185_v22, %v7422_v0  ;;  %v12199_v19 = vld [vmem:[#allocation297_spill] sm:$0xff]  ;;  %v12213_v48 = vld [vmem:[#allocation107_spill] sm:$0xff] }
 0x6a0   : > { %12179 = vst [vmem:[#allocation154_spill] sm:$0xff] %v8974_v34  ;;  %v3270_v31 = vand.u32 2147483648, %v8715_v63  ;;  %v3256_v60 = vor.u32 1.1754944e-38, %v3255_v25  ;;  %v1955_v10 = vadd.f32 %v1923_v40, %v12186_v47  ;;  %v3263_v20 = vadd.f32 %v8813_v49, %v3262_v52  ;;  %vm9004_vm0 = vmor %vm3264_vm10, %vm3265_vm14  ;;  %v12201_v40 = vld [vmem:[#allocation280_spill] sm:$0xff]  ;;  %v12225_v25 = vld [vmem:[#allocation359_spill] sm:$0xff] }
 0x6a1   : > { %v2596_v50 = vadd.f32 %v2564_v27, %v2276_v58  ;;  %v3268_v62 = vand.u32 2147483647, %v8715_v63  ;;  %vm2083_vm15 = vcmp.eq.s32.totalorder %v2013_v32, %v7422_v0  ;;  %v3292_v30 = vmul.f32 %v8917_v56, %v3291_v42  ;;  %v12192_v63 = vld [vmem:[#allocation381_spill] sm:$0xff]  ;;  %v9021_v32 = vld [vmem:[%s6161_s17 + $0xd8] sm:$0xff]  ;;  %v12205_v42 = vld [vmem:[#allocation70_spill] sm:$0xff] }
 0x6a2   : > { %2200 = vperm.xlu2 %5684, %v8822_v28   ;;  %v3252_v29 = vsel %vm8987_vm9, %v8833_v37, %v3248_v7  ;;  %vm9011_vm2 = vcmp.eq.f32.partialorder %v3253_v36, 8.507059e+37  ;;  %vm2723_vm3 = vcmp.eq.s32.totalorder %v12191_v23, %v7422_v0  ;;  %v3277_v35 = vmul.f32 %v8907_v12, %v3276_v61  ;;  %v12193_v37 = vld [vmem:[#allocation106_spill] sm:$0xff]  ;;  %v12204_v52 = vld [vmem:[#allocation108_spill] sm:$0xff]  ;;  %v12211_v28 = vld [vmem:[#allocation103_spill] sm:$0xff] }
 0x6a3   : > { %v2153_v6 = vpop.permute.xlu1 %2152  ;;  %vm2403_vm4 = vcmp.eq.s32.totalorder %v12192_v63, %v7422_v0  ;;  %vm810_vm5 = vcmp.eq.s32.totalorder %v12193_v37, %v7422_v0  ;;  %v2884_v54 = vsel %vm2724_vm1, %v12194_v21, 0.0  ;;  %vm2405_vm8 = vcmp.eq.s32.totalorder %v12195_v38, %v7422_v0  ;;  %v12206_v27 = vld [vmem:[#allocation12_spill] sm:$0xff]  ;;  %v12219_v21 = vld [vmem:[#allocation109_spill] sm:$0xff]  ;;  %v12233_v37 = vld [vmem:[#allocation374_spill] sm:$0xff] }
 0x6a4   : > { %v2243_v26 = vsel %vm2083_vm15, %v2153_v6, 0.0  ;;  %v3271_v8 = vor.u32 1.1754944e-38, %v3270_v31  ;;  %v2563_v18 = vsel %vm2403_vm4, %v12196_v51, 0.0  ;;  %v2916_v2 = vadd.f32 %v2884_v54, %v2596_v50  ;;  %v9073_v58 = vld [vmem:[%s6034_s14 + $0xd8] sm:$0xff]  ;;  %v12220_v54 = vld [vmem:[#allocation346_spill] sm:$0xff] }
 0x6a5   : > { %v2275_v33 = vadd.f32 %v2243_v26, %v1955_v10  ;;  %2212 = vperm.xlu1 %5680, %v9021_v32   ;;  %v3267_v3 = vsel %vm9004_vm0, %v8813_v49, %v3263_v20  ;;  %vm9036_vm6 = vcmp.eq.f32.partialorder %v3268_v62, 8.507059e+37  ;;  %vm1767_vm11 = vcmp.eq.s32.totalorder %v12199_v19, %v7422_v0  ;;  %v12209_v50 = vld [vmem:[#allocation96_spill] sm:$0xff]  ;;  %v12210_v20 = vld [vmem:[#allocation105_spill] sm:$0xff]  ;;  %v5856_v51 = vld [vmem:[%s6034_s14 + $0xd0] sm:$0xff] }
 0x6a6   : > { %vm1766_vm12 = vcmp.eq.s32.totalorder %v12200_v13, %v7422_v0  ;;  %v2883_v57 = vsel %vm2723_vm3, %v12201_v40, 0.0  ;;  %v3257_v49 = vsel %vm9011_vm2, %v3256_v60, %v3252_v29  ;;  %vm12202_vm7 = vcmask 523264  }
 0x6a7   : > { %v2595_v4 = vadd.f32 %v2563_v18, %v2275_v33  ;;  %vm12203_vm13 = vmmov %vm12202_vm7  ;;  %vm813_vm10 = vcmp.eq.s32.totalorder %v12204_v52, %v7422_v0  ;;  %v1926_v24 = vsel %vm1766_vm12, %v12205_v42, 0.0  ;;  %v2565_v7 = vsel %vm2405_vm8, %v12206_v27, 0.0  ;;  %v12218_v33 = vld [vmem:[#allocation99_spill] sm:$0xff]  ;;  %v12223_v18 = vld [vmem:[#allocation29_spill] sm:$0xff] }
 0x6a8   : > { %5340 = vmatmul.msk.bf16.gmra.mxu0 %vm12202_vm7, %v8974_v34  ;;  %5356 = vmatmul.msk.bf16.gmra.mxu1 %vm12203_vm13, %v8974_v34  ;;  %vm12207_vm14 = vmmov %vm12202_vm7  ;;  %vm3295_vm1 = vweird.f32 %v8917_v56  ;;  %v3272_v61 = vsel %vm9036_vm6, %v3271_v8, %v3267_v3  ;;  %vm3279_vm15 = vweird.f32 %v8808_v53  ;;  %vm3280_vm0 = vweird.f32 %v8907_v12  ;;  %v12228_v42 = vld [vmem:[#allocation219_spill] sm:$0xff]  ;;  %v12230_v27 = vld [vmem:[#allocation126_spill] sm:$0xff] }
 0x6a9   : > { %v2915_v36 = vadd.f32 %v2883_v57, %v2595_v4  ;;  %5404 = vmatmul.msk.bf16.gmra.mxu2 %vm12207_vm14, %v8974_v34  ;;  %vm12208_vm9 = vmmov %vm12202_vm7  ;;  %v3293_v41 = vadd.f32 %v8917_v56, %v3292_v30  ;;  %v3557_v22 = vmul.f32 %v3272_v61, %v2916_v2  ;;  %v3278_v31 = vadd.f32 %v8907_v12, %v3277_v35  ;;  %v9087_v30 = vpop.permute.xlu0 %2856  ;;  %v12217_v35 = vld [vmem:[#allocation341_spill] sm:$0xff]  ;;  %v12224_v2 = vld [vmem:[#allocation319_spill] sm:$0xff] }
 0x6aa   : > { %5420 = vmatmul.msk.bf16.gmra.mxu3 %vm12208_vm9, %v8974_v34  ;;  %2057 = vperm.xlu2 %5684, %v9073_v58   ;;  %v3285_v60 = vand.u32 2147483648, %v8808_v53  ;;  %vm809_vm2 = vcmp.eq.s32.totalorder %v12209_v50, %v7422_v0  ;;  %vm808_vm3 = vcmp.eq.s32.totalorder %v12210_v20, %v7422_v0  ;;  %v1958_v62 = vadd.f32 %v1926_v24, %v8935_v17  ;;  %vm9097_vm12 = vmor %vm3279_vm15, %vm3280_vm0  ;;  %v12229_v24 = vld [vmem:[#allocation110_spill] sm:$0xff] }
 0x6ab   : > { %v3556_v47 = vmul.f32 %v3257_v49, %v2915_v36  ;;  %v2022_v10 = vpop.permute.xlu1 %2021  ;;  %v3283_v6 = vand.u32 2147483647, %v8808_v53  ;;  %v2597_v29 = vadd.f32 %v2565_v7, %v12211_v28  ;;  %12212 = vst [vmem:[#allocation7_spill] sm:$0xff] %v9087_v30  ;;  %vm811_vm8 = vcmp.eq.s32.totalorder %v12213_v48, %v7422_v0  ;;  %v9149_v36 = vpop.permute.xlu2 %2371  ;;  %v12235_v28 = vld [vmem:[#allocation129_spill] sm:$0xff]  ;;  %v12243_v50 = vld [vmem:[#allocation138_spill] sm:$0xff] }
 0x6ac   : > { %vm2086_vm4 = vcmp.eq.s32.totalorder %v2022_v10, %v7422_v0  ;;  %vm3294_vm6 = vweird.f32 %v8818_v43  ;;  %v3300_v26 = vand.u32 2147483648, %v8818_v43  ;;  %vm812_vm7 = vcmp.eq.s32.totalorder %v12218_v33, %v7422_v0  ;;  %v12234_v10 = vld [vmem:[#allocation380_spill] sm:$0xff]  ;;  %v12237_v53 = vld [vmem:[#allocation133_spill] sm:$0xff]  ;;  %v12246_v57 = vld [vmem:[#allocation78_spill] sm:$0xff] }
 0x6ad   : > { %v9101_v23 = vpack.c.bf16 %v3557_v22, %v3556_v47  ;;  %v2246_v63 = vsel %vm2086_vm4, %v12217_v35, 0.0  ;;  %5681 = vset.pattern.permute.xlu1 %v11821_v44  ;;  %vm814_vm13 = vcmp.eq.s32.totalorder %v12219_v21, %v7422_v0  ;;  %vm2725_vm14 = vcmp.eq.s32.totalorder %v12220_v54, %v7422_v0  ;;  %vm9115_vm15 = vmor %vm3294_vm6, %vm3295_vm1  ;;  %v12232_v22 = vld [vmem:[#allocation328_spill] sm:$0xff]  ;;  %v9156_v47 = vld [vmem:[%s6034_s14 + $0xe8] sm:$0xff] }
 0x6ae   : > { %vm2726_vm9 = vcmp.eq.s32.totalorder %v8859_v15, %v7422_v0  ;;  %v3298_v38 = vand.u32 2147483647, %v8818_v43  ;;  %v2278_v8 = vadd.f32 %v2246_v63, %v1958_v62  ;;  %2374 = vperm.xlu1 %5681, %v5856_v51   ;;  %vm462_vm0 = vcmp.eq.s32.totalorder %v12223_v18, %v7422_v0  ;;  %v12236_v63 = vld [vmem:[#allocation134_spill] sm:$0xff]  ;;  %v12253_v21 = vld [vmem:[#allocation285_spill] sm:$0xff] }
 0x6af   : > { %12216 = vst [vmem:[#allocation8_spill] sm:$0xff] %v9101_v23  ;;  %v1927_v3 = vsel %vm1767_vm11, %v12224_v2, 0.0  ;;  %v2885_v4 = vsel %vm2725_vm14, %v12225_v25, 0.0  ;;  %v3286_v13 = vor.u32 1.1754944e-38, %v3285_v60  ;;  %v3297_v40 = vsel %vm9115_vm15, %v8917_v56, %v3293_v41  ;;  %v12231_v56 = vld [vmem:[#allocation347_spill] sm:$0xff]  ;;  %v12239_v2 = vld [vmem:[#allocation136_spill] sm:$0xff] }
 0x6b0   : > { %v3282_v43 = vsel %vm9097_vm12, %v8907_v12, %v3278_v31  ;;  %vm9134_vm1 = vcmp.eq.f32.partialorder %v3283_v6, 8.507059e+37  ;;  %v2917_v49 = vadd.f32 %v2885_v4, %v2597_v29  ;;  %v2598_v19 = vadd.f32 %v12228_v42, %v2278_v8  ;;  %v12238_v8 = vld [vmem:[#allocation135_spill] sm:$0xff] }
 0x6b1   : > { %vm816_vm11 = vcmp.eq.s32.totalorder %v12229_v24, %v7422_v0  ;;  %v970_v7 = vsel %vm810_vm5, %v12230_v27, 0.0  ;;  %v2886_v12 = vsel %vm2726_vm9, %v12231_v56, 0.0  ;;  %v3301_v61 = vor.u32 1.1754944e-38, %v3300_v26  ;;  %v12240_v25 = vld [vmem:[#allocation159_spill] sm:$0xff]  ;;  %v9194_v20 = vpop.permute.xlu0 %2860  ;;  %v12248_v24 = vld [vmem:[#allocation268_spill] sm:$0xff] }
 0x6b2   : > { %v1959_v41 = vadd.f32 %v1927_v3, %v8965_v45  ;;  %v9153_v31 = vmax.f32 %v12232_v22, 1.0  ;;  %vm3299_vm4 = vcmp.eq.f32.partialorder %v3298_v38, 8.507059e+37  ;;  %v2918_v60 = vadd.f32 %v2886_v12, %v2598_v19  ;;  %2063 = vperm.xlu2 %5684, %v9156_v47   ;;  %12242 = vst [vmem:[#allocation11_spill] sm:$0xff] %v9194_v20  ;;  %v12247_v42 = vld [vmem:[#allocation331_spill] sm:$0xff]  ;;  %v12250_v12 = vld [vmem:[#allocation314_spill] sm:$0xff] }
 0x6b3   : > { %vm2087_vm5 = vcmp.eq.s32.totalorder %v12233_v37, %v7422_v0  ;;  %v9162_v15 = vmax.f32 %v12234_v10, 1.0  ;;  %v3287_v62 = vsel %vm9134_vm1, %v3286_v13, %v3282_v43  ;;  %v3302_v6 = vsel %vm3299_vm4, %v3301_v61, %v3297_v40  ;;  %v2169_v45 = vpop.permute.xlu1 %2168  ;;  %v12244_v40 = vld [vmem:[#allocation139_spill] sm:$0xff]  ;;  %v12245_v43 = vld [vmem:[#allocation160_spill] sm:$0xff]  ;;  %v12256_v37 = vld [vmem:[#allocation190_spill] sm:$0xff] }
 0x6b4   : > { %v973_v29 = vsel %vm813_vm10, %v12235_v28, 0.0  ;;  %v3558_v26 = vmul.f32 %v3287_v62, %v2917_v49  ;;  %v3559_v17 = vmul.f32 %v3302_v6, %v2918_v60  ;;  %v2247_v35 = vsel %vm2087_vm5, %v2169_v45, 0.0  ;;  %v12249_v27 = vld [vmem:[#allocation271_spill] sm:$0xff]  ;;  %v12255_v60 = vld [vmem:[#allocation289_spill] sm:$0xff]  ;;  %v12259_v10 = vld [vmem:[#allocation282_spill] sm:$0xff] }
 0x6b5   : > { %v976_v54 = vsel %vm816_vm11, %v12236_v63, 0.0  ;;  %v968_v38 = vsel %vm808_vm3, %v12237_v53, 0.0  ;;  %v969_v51 = vsel %vm809_vm2, %v12238_v8, 0.0  ;;  %v9182_v52 = vadd.f32 %v2247_v35, %v1959_v41  ;;  %v12254_v41 = vld [vmem:[#allocation279_spill] sm:$0xff]  ;;  %v12260_v45 = vld [vmem:[#allocation193_spill] sm:$0xff]  ;;  %v9248_v53 = vpop.permute.xlu2 %2528 }
 0x6b6   : > { %v971_v3 = vsel %vm811_vm8, %v12239_v2, 0.0  ;;  %vm1128_vm10 = vcmp.eq.s32.totalorder %v12240_v25, %v7422_v0  ;;  %5734 = vrcp.f32 %v9153_v31  ;;  %v9191_v4 = vpack.c.bf16 %v3559_v17, %v3558_v26  ;;  %2377 = vperm.xlu1 %5681, %v9073_v58   ;;  %v12262_v17 = vld [vmem:[#allocation161_spill] sm:$0xff]  ;;  %v12263_v35 = vld [vmem:[#allocation163_spill] sm:$0xff]  ;;  %12266 = vst [vmem:[#allocation14_spill] sm:$0xff] %v9248_v53  ;;  %v12267_v2 = vld [vmem:[#allocation44_spill] sm:$0xff] }
 0x6b7   : > { %v972_v13 = vsel %vm812_vm7, %v12243_v50, 0.0  ;;  %v974_v48 = vsel %vm814_vm13, %v12244_v40, 0.0  ;;  %vm1131_vm2 = vcmp.eq.s32.totalorder %v12245_v43, %v7422_v0  ;;  %5736 = vrcp.f32 %v9162_v15  ;;  %v12264_v63 = vld [vmem:[#allocation165_spill] sm:$0xff]  ;;  %v12268_v25 = vld [vmem:[#allocation192_spill] sm:$0xff]  ;;  %v9406_v34 = vld [vmem:[%s6161_s17 + $0xd0] sm:$0xff] }
 0x6b8   : > { %12241 = vst [vmem:[#allocation9_spill] sm:$0xff] %v9191_v4  ;;  %v654_v49 = vsel %vm462_vm0, %v12246_v57, 0.0  ;;  %v1002_v19 = vadd.f32 %v970_v7, %v12247_v42  ;;  %v1005_v33 = vadd.f32 %v973_v29, %v12248_v24  ;;  %v1008_v56 = vadd.f32 %v976_v54, %v12249_v27  ;;  %v12261_v29 = vld [vmem:[#allocation342_spill] sm:$0xff]  ;;  %v12265_v54 = vld [vmem:[#allocation40_spill] sm:$0xff]  ;;  %v12271_v42 = vld [vmem:[#allocation217_spill] sm:$0xff] }
 0x6b9   : > { %vm12251_vm3 = vcmask 523264   ;;  %v1000_v61 = vadd.f32 %v968_v38, %v12253_v21  ;;  %v1001_v22 = vadd.f32 %v969_v51, %v12254_v41  ;;  %v1003_v18 = vadd.f32 %v971_v3, %v12255_v60  ;;  %v9253_v8 = vld [vmem:[%s6161_s17 + $0xe0] sm:$0xff]  ;;  %v12273_v27 = vld [vmem:[#allocation186_spill] sm:$0xff]  ;;  %v12274_v41 = vld [vmem:[#allocation195_spill] sm:$0xff] }
 0x6ba   : > { %5341 = vmatmul.msk.bf16.gmra.mxu0 %vm12251_vm3, %v12250_v12  ;;  %vm12252_vm8 = vmmov %vm12251_vm3  ;;  %v1288_v7 = vsel %vm1128_vm10, %v12256_v37, 0.0  ;;  %v1004_v62 = vadd.f32 %v972_v13, %v12259_v10  ;;  %v9230_v6 = vadd.f32 %v974_v48, %v654_v49  ;;  %v1291_v28 = vsel %vm1131_vm2, %v12260_v45, 0.0  ;;  %5687 = vset.pattern.permute.xlu2 %v11821_v44  ;;  %v12269_v13 = vld [vmem:[#allocation325_spill] sm:$0xff]  ;;  %v12270_v57 = vld [vmem:[#allocation184_spill] sm:$0xff] }
 0x6bb   : > { %5357 = vmatmul.msk.bf16.gmra.mxu1 %vm12252_vm8, %v12250_v12  ;;  %vm12257_vm6 = vmmov %vm12251_vm3  ;;  %v9237_v26 = vmax.f32 %v12261_v29, 1.0  ;;  %vm1130_vm7 = vcmp.eq.s32.totalorder %v12262_v17, %v7422_v0  ;;  %vm1133_vm13 = vcmp.eq.s32.totalorder %v12263_v35, %v7422_v0  ;;  %vm1136_vm14 = vcmp.eq.s32.totalorder %v12264_v63, %v7422_v0  ;;  %v9250_v38 = vpop.permute.xlu1 %2030  ;;  %2536 = vperm.xlu2 %5687, %v9253_v8   ;;  %v12272_v24 = vld [vmem:[#allocation300_spill] sm:$0xff] }
 0x6bc   : > { %5405 = vmatmul.msk.bf16.gmra.mxu2 %vm12257_vm6, %v12250_v12  ;;  %vm12258_vm12 = vmmov %vm12251_vm3  ;;  %vm1129_vm9 = vcmp.eq.s32.totalorder %v12265_v54, %v7422_v0  ;;  %v9256_v51 = vpop.eup %5734  ;;  %vm1132_vm15 = vcmp.eq.s32.totalorder %v12267_v2, %v7422_v0  ;;  %v1320_v3 = vadd.f32 %v1288_v7, %v1000_v61  ;;  %v1290_v50 = vsel %vm1130_vm7, %v12268_v25, 0.0  ;;  %v12275_v60 = vld [vmem:[#allocation236_spill] sm:$0xff]  ;;  %v12276_v7 = vld [vmem:[#allocation198_spill] sm:$0xff]  ;;  %v9294_v2 = vpop.permute.xlu0 %1749 }
 0x6bd   : > { %5421 = vmatmul.msk.bf16.gmra.mxu3 %vm12258_vm12, %v12250_v12  ;;  %v9262_v40 = vmax.f32 %v12269_v13, 1.0  ;;  %v9264_v48 = vpop.eup %5736  ;;  %v1323_v43 = vadd.f32 %v1291_v28, %v1003_v18  ;;  %v1289_v49 = vsel %vm1129_vm9, %v12270_v57, 0.0  ;;  %vm1450_vm0 = vcmp.eq.s32.totalorder %v12271_v42, %v7422_v0  ;;  %v12277_v45 = vld [vmem:[#allocation208_spill] sm:$0xff]  ;;  %12280 = vst [vmem:[#allocation17_spill] sm:$0xff] %v9294_v2  ;;  %v12281_v42 = vld [vmem:[#allocation215_spill] sm:$0xff]  ;;  %vm12295_vm7 = vmmov %vm12258_vm12 }
 0x6be   : > { %vm1770_vm1 = vcmp.eq.s32.totalorder %v12272_v24, %v7422_v0  ;;  %v1292_v21 = vsel %vm1132_vm15, %v12273_v27, 0.0  ;;  %v1293_v61 = vsel %vm1133_vm13, %v12274_v41, 0.0  ;;  %v1610_v37 = vsel %vm1450_vm0, %v12275_v60, 0.0  ;;  %2532 = vperm.xlu1 %5681, %v9021_v32   ;;  %v12278_v29 = vld [vmem:[#allocation344_spill] sm:$0xff]  ;;  %v12282_v24 = vld [vmem:[#allocation218_spill] sm:$0xff]  ;;  %v12283_v27 = vld [vmem:[#allocation249_spill] sm:$0xff] }
 0x6bf   : > { %5738 = vrcp.f32 %v9237_v26  ;;  %v1322_v18 = vadd.f32 %v1290_v50, %v1002_v19  ;;  %v1296_v10 = vsel %vm1136_vm14, %v12276_v7, 0.0  ;;  %vm1449_vm11 = vcmp.eq.s32.totalorder %v12277_v45, %v7422_v0  ;;  %v12279_v35 = vld [vmem:[#allocation356_spill] sm:$0xff]  ;;  %vm12297_vm13 = vmmov %vm12295_vm7 }
 0x6c0   : > { %v3320_v28 = vmul.f32 %v9256_v51, %v9153_v31  ;;  %5740 = vrcp.f32 %v9262_v40  ;;  %v9289_v17 = vmax.f32 %v12278_v29, 1.0  ;;  %v1930_v54 = vsel %vm1770_vm1, %v12279_v35, 0.0  ;;  %v12284_v60 = vld [vmem:[#allocation248_spill] sm:$0xff]  ;;  %vm12298_vm14 = vmmov %vm12295_vm7 }
 0x6c1   : > { %v3365_v19 = vmul.f32 %v9264_v48, %v9162_v15  ;;  %v1321_v63 = vadd.f32 %v1289_v49, %v1001_v22  ;;  %v9296_v25 = vadd.f32 %v1292_v21, %v1004_v62  ;;  %v9298_v50 = vadd.f32 %v1293_v61, %v1005_v33  ;;  %v12285_v22 = vld [vmem:[#allocation377_spill] sm:$0xff]  ;;  %v12289_v29 = vld [vmem:[#allocation204_spill] sm:$0xff] }
 0x6c2   : > { %v1642_v13 = vadd.f32 %v1610_v37, %v1322_v18  ;;  %v9300_v57 = vadd.f32 %v1296_v10, %v1008_v56  ;;  %vm1448_vm4 = vcmp.eq.s32.totalorder %v12281_v42, %v7422_v0  ;;  %vm1451_vm5 = vcmp.eq.s32.totalorder %v12282_v24, %v7422_v0  ;;  %v9311_v56 = vpop.permute.xlu2 %2694  ;;  %v12286_v21 = vld [vmem:[#allocation345_spill] sm:$0xff]  ;;  %v12290_v42 = vld [vmem:[#allocation251_spill] sm:$0xff] }
 0x6c3   : > { %v1609_v41 = vsel %vm1449_vm11, %v12283_v27, 0.0  ;;  %v1608_v7 = vsel %vm1448_vm4, %v12284_v60, 0.0  ;;  %v3321_v45 = vsub.f32 1.0, %v3320_v28  ;;  %vm2090_vm10 = vcmp.eq.s32.totalorder %v12285_v22, %v7422_v0  ;;  %v2181_v33 = vpop.permute.xlu1 %2180  ;;  %5689 = vset.pattern.permute.xlu2 %v11738_v14  ;;  %v12287_v10 = vld [vmem:[#allocation209_spill] sm:$0xff]  ;;  %v12288_v28 = vld [vmem:[#allocation292_spill] sm:$0xff]  ;;  %v12291_v27 = vld [vmem:[#allocation322_spill] sm:$0xff] }
 0x6c4   : > { %v1962_v62 = vadd.f32 %v1930_v54, %v1642_v13  ;;  %5742 = vrcp.f32 %v9289_v17  ;;  %v9317_v61 = vmax.f32 %v12286_v21, 1.0  ;;  %v3366_v37 = vsub.f32 1.0, %v3365_v19  ;;  %2703 = vperm.xlu2 %5689, %v9156_v47   ;;  %v12292_v22 = vld [vmem:[#allocation59_spill] sm:$0xff] }
 0x6c5   : > { %v9313_v49 = vpop.eup %5738  ;;  %v2250_v18 = vsel %vm2090_vm10, %v2181_v33, 0.0  ;;  %vm1452_vm2 = vcmp.eq.s32.totalorder %v12287_v10, %v7422_v0  ;;  %vm1768_vm3 = vcmp.eq.s32.totalorder %v12288_v28, %v7422_v0  ;;  %vm2410_vm8 = vcmp.eq.s32.totalorder %v12289_v29, %v7422_v0  ;;  %v12294_v24 = vld [vmem:[#allocation295_spill] sm:$0xff] }
 0x6c6   : > { %v2282_v35 = vadd.f32 %v2250_v18, %v1962_v62  ;;  %v9326_v54 = vpop.eup %5740  ;;  %v9328_v13 = vadd.f32 %v1609_v41, %v1321_v63  ;;  %v1611_v19 = vsel %vm1451_vm5, %v12290_v42, 0.0  ;;  %v1928_v60 = vsel %vm1768_vm3, %v12291_v27, 0.0  ;;  %5683 = vset.pattern.permute.xlu1 %v11738_v14  ;;  %v12293_v63 = vld [vmem:[#allocation253_spill] sm:$0xff] }
 0x6c7   : > { %v2570_v33 = vsel %vm2410_vm8, %v12292_v22, 0.0  ;;  %v1640_v21 = vadd.f32 %v1608_v7, %v1320_v3  ;;  %v3322_v10 = vmul.f32 %v9256_v51, %v3321_v45  ;;  %v3305_v62 = vmul.f32 %v9313_v49, %v9237_v26  ;;  %2697 = vperm.xlu1 %5683, %v9073_v58   ;;  %v12296_v45 = vld [vmem:[#allocation364_spill] sm:$0xff] }
 0x6c8   : > { %v9340_v18 = vadd.f32 %v2570_v33, %v2282_v35  ;;  %v9344_v41 = vsel %vm1452_vm2, %v12293_v63, 0.0  ;;  %vm1771_vm6 = vcmp.eq.s32.totalorder %v12294_v24, %v7422_v0  ;;  %5744 = vrcp.f32 %v9317_v61 }
 0x6c9   : > { %v3367_v28 = vmul.f32 %v9264_v48, %v3366_v37  ;;  %v1643_v3 = vadd.f32 %v1611_v19, %v1323_v43  ;;  %v9354_v7 = vadd.f32 %v1928_v60, %v1640_v21  ;;  %v3335_v58 = vmul.f32 %v9326_v54, %v9262_v40  ;;  %v2185_v43 = vpop.permute.xlu0 %2184 }
 0x6ca   : > { %5342 = vmatmul.msk.bf16.gmra.mxu0 %vm12258_vm12, %v9101_v23  ;;  %v1931_v29 = vsel %vm1771_vm6, %v12296_v45, 0.0  ;;  %v9363_v37 = vpop.eup %5742  ;;  %v3330_v35 = vand.u32 2147483648, %v9153_v31  ;;  %vm3369_vm9 = vweird.f32 %v9162_v15  ;;  %vm3370_vm15 = vweird.f32 %v9264_v48 }
 0x6cb   : > { %5358 = vmatmul.msk.bf16.gmra.mxu1 %vm12295_vm7, %v9101_v23  ;;  %v3328_v42 = vand.u32 2147483647, %v9153_v31  ;;  %v3306_v19 = vsub.f32 1.0, %v3305_v62  ;;  %v3375_v27 = vand.u32 2147483648, %v9162_v15  ;;  %v2037_v60 = vpop.permute.xlu1 %2036  ;;  %v3323_v22 = vadd.f32 %v9256_v51, %v3322_v10  ;;  %vm9383_vm4 = vmor %vm3369_vm9, %vm3370_vm15 }
 0x6cc   : > { %5406 = vmatmul.msk.bf16.gmra.mxu2 %vm12297_vm13, %v9101_v23  ;;  %vm3325_vm0 = vweird.f32 %v9256_v51  ;;  %v1963_v33 = vadd.f32 %v1931_v29, %v1643_v3  ;;  %vm2091_vm1 = vcmp.eq.s32.totalorder %v2037_v60, %v7422_v0  ;;  %v3368_v21 = vadd.f32 %v9264_v48, %v3367_v28  ;;  %v12302_v60 = vld [vmem:[#allocation329_spill] sm:$0xff] }
 0x6cd   : > { %5422 = vmatmul.msk.bf16.gmra.mxu3 %vm12298_vm14, %v9101_v23  ;;  %v3373_v63 = vand.u32 2147483647, %v9162_v15  ;;  %v12299_v24 = vmov 4   ;;  %vm3324_vm11 = vweird.f32 %v9153_v31  ;;  %v3336_v62 = vsub.f32 1.0, %v3335_v58  ;;  %v9387_v3 = vpop.xlane.xlu2 %3021  ;;  %v12307_v31 = vld [vmem:[#allocation369_spill] sm:$0xff]  ;;  %v12309_v23 = vld [vmem:[#allocation367_spill] sm:$0xff] }
 0x6ce   : > { %5693 = vset.pattern.permute.xlu2 %v12299_v24  ;;  %v3350_v45 = vmul.f32 %v9363_v37, %v9289_v17  ;;  %v2251_v28 = vsel %vm2091_vm1, %v2185_v43, 0.0  ;;  %v9389_v29 = vpop.eup %5744  ;;  %vm1769_vm5 = vcmp.eq.s32.totalorder %v12302_v60, %v7422_v0  ;;  %vm9396_vm10 = vmor %vm3324_vm11, %vm3325_vm0  ;;  %vm9400_vm2 = vcmp.eq.f32.partialorder %v3328_v42, 8.507059e+37 }
 0x6cf   : > { %v2283_v58 = vadd.f32 %v2251_v28, %v1963_v33  ;;  %v3307_v43 = vmul.f32 %v9313_v49, %v3306_v19  ;;  %v3376_v12 = vor.u32 1.1754944e-38, %v3375_v27  ;;  %2848 = vperm.xlu1 %5683, %v9406_v34   ;;  %v3327_v33 = vsel %vm9396_vm10, %v9256_v51, %v3323_v22 }
 0x6d0   : > { %v3331_v28 = vor.u32 1.1754944e-38, %v3330_v35  ;;  %vm2731_vm3 = vcmp.eq.s32.totalorder %v12307_v31, %v7422_v0  ;;  %v3372_v42 = vsel %vm9383_vm4, %v9264_v48, %v3368_v21  ;;  %vm3374_vm8 = vcmp.eq.f32.partialorder %v3373_v63, 8.507059e+37  ;;  %v12310_v35 = vld [vmem:[#allocation80_spill] sm:$0xff]  ;;  %v12313_v31 = vld [vmem:[#allocation354_spill] sm:$0xff] }
 0x6d1   : > { %v2603_v19 = vadd.f32 %v12308_v1, %v2283_v58  ;;  %v9419_v27 = vmul.f32 %v9326_v54, %v3336_v62  ;;  %v3351_v9 = vsub.f32 1.0, %v3350_v45  ;;  %v3380_v55 = vmul.f32 %v9389_v29, %v9317_v61  ;;  %v12311_v1 = vld [vmem:[#allocation348_spill] sm:$0xff] }
 0x6d2   : > { %v2891_v51 = vsel %vm2731_vm3, %v12309_v23, 0.0  ;;  %vm2407_vm6 = vcmp.eq.s32.totalorder %v12310_v35, %v7422_v0  ;;  %vm3309_vm12 = vweird.f32 %v9237_v26  ;;  %vm3310_vm7 = vweird.f32 %v9313_v49  ;;  %v12312_v45 = vld [vmem:[#allocation352_spill] sm:$0xff]  ;;  %v12319_v35 = vld [vmem:[#allocation245_spill] sm:$0xff] }
 0x6d3   : > { %v2923_v48 = vadd.f32 %v2891_v51, %v2603_v19  ;;  %vm3339_vm13 = vweird.f32 %v9262_v40  ;;  %vm2728_vm14 = vcmp.eq.s32.totalorder %v12311_v1, %v7422_v0  ;;  %v3315_v22 = vand.u32 2147483648, %v9237_v26  ;;  %v9432_v63 = vpop.permute.xlu1 %2188  ;;  %vm9453_vm9 = vmor %vm3309_vm12, %vm3310_vm7 }
 0x6d4   : > { %v3377_v21 = vsel %vm3374_vm8, %v3376_v12, %v3372_v42  ;;  %v3332_v62 = vsel %vm9400_vm2, %v3331_v28, %v3327_v33  ;;  %v2888_v10 = vsel %vm2728_vm14, %v12312_v45, 0.0  ;;  %v1929_v58 = vsel %vm1769_vm5, %v12313_v31, 0.0  ;;  %v12314_v12 = vld [vmem:[#allocation89_spill] sm:$0xff]  ;;  %v12320_v45 = vld [vmem:[#allocation376_spill] sm:$0xff] }
 0x6d5   : > { %v3308_v19 = vadd.f32 %v9313_v49, %v3307_v43  ;;  %v9442_v23 = vmul.f32 %v3377_v21, %v2923_v48  ;;  %v3352_v51 = vmul.f32 %v9363_v37, %v3351_v9  ;;  %v3381_v1 = vsub.f32 1.0, %v3380_v55  ;;  %v2028_v43 = vpop.permute.xlu2 %2027  ;;  %v12317_v28 = vld [vmem:[#allocation361_spill] sm:$0xff]  ;;  %v12318_v55 = vld [vmem:[#allocation272_spill] sm:$0xff] }
 0x6d6   : > { %v2567_v15 = vsel %vm2407_vm6, %v12314_v12, 0.0  ;;  %v3313_v60 = vand.u32 2147483647, %v9237_v26  ;;  %vm2727_vm15 = vcmp.eq.s32.totalorder %v12317_v28, %v7422_v0  ;;  %vm2408_vm0 = vcmp.eq.s32.totalorder %v12318_v55, %v7422_v0  ;;  %v12330_v28 = vld [vmem:[#allocation220_spill] sm:$0xff] }
 0x6d7   : > { %v2599_v9 = vadd.f32 %v2567_v15, %v9182_v52  ;;  %vm2088_vm1 = vcmp.eq.s32.totalorder %v2028_v43, %v7422_v0  ;;  %v1961_v42 = vadd.f32 %v1929_v58, %v9328_v13  ;;  %v9466_v48 = vmax.f32 %v12319_v35, 1.0  ;;  %2852 = vperm.xlu1 %5683, %v9021_v32   ;;  %v12323_v13 = vld [vmem:[#allocation223_spill] sm:$0xff]  ;;  %v12324_v32 = vld [vmem:[#allocation349_spill] sm:$0xff] }
 0x6d8   : > { %v3316_v21 = vor.u32 1.1754944e-38, %v3315_v22  ;;  %v2248_v31 = vsel %vm2088_vm1, %v12320_v45, 0.0  ;;  %v3312_v26 = vsel %vm9453_vm9, %v9313_v49, %v3308_v19  ;;  %vm3354_vm11 = vweird.f32 %v9289_v17  ;;  %v12325_v22 = vld [vmem:[#allocation170_spill] sm:$0xff]  ;;  %v12335_v45 = vld [vmem:[#allocation371_spill] sm:$0xff] }
 0x6d9   : > { %vm3355_vm4 = vweird.f32 %v9363_v37  ;;  %v2280_v52 = vadd.f32 %v2248_v31, %v9354_v7  ;;  %vm12321_vm5 = vcmask 523264   ;;  %vm1456_vm2 = vcmp.eq.s32.totalorder %v12323_v13, %v7422_v0 }
 0x6da   : > { %5343 = vmatmul.msk.bf16.gmra.mxu0 %vm12321_vm5, %v9191_v4  ;;  %vm12322_vm10 = vmmov %vm12321_vm5  ;;  %v2887_v49 = vsel %vm2727_vm15, %v12324_v32, 0.0  ;;  %v2568_v58 = vsel %vm2408_vm0, %v12325_v22, 0.0  ;;  %vm9490_vm3 = vcmp.eq.f32.partialorder %v3313_v60, 8.507059e+37  ;;  %v3360_v19 = vand.u32 2147483648, %v9289_v17  ;;  %v12331_v60 = vld [vmem:[#allocation357_spill] sm:$0xff]  ;;  %v9526_v22 = vpop.permute.xlu0 %2192 }
 0x6db   : > { %5359 = vmatmul.msk.bf16.gmra.mxu1 %vm12322_vm10, %v9191_v4  ;;  %vm12328_vm8 = vmmov %vm12321_vm5  ;;  %v3382_v12 = vmul.f32 %v9389_v29, %v3381_v1  ;;  %v2919_v15 = vadd.f32 %v2887_v49, %v2599_v9  ;;  %v3353_v33 = vadd.f32 %v9363_v37, %v3352_v51  ;;  %v2600_v43 = vadd.f32 %v2568_v58, %v2280_v52  ;;  %v9515_v51 = vpop.permute.xlu1 %2045  ;;  %v12334_v9 = vld [vmem:[#allocation362_spill] sm:$0xff] }
 0x6dc   : > { %5407 = vmatmul.msk.bf16.gmra.mxu2 %vm12328_vm8, %v9191_v4  ;;  %vm12329_vm6 = vmmov %vm12321_vm5  ;;  %vm1453_vm12 = vcmp.eq.s32.totalorder %v12330_v28, %v7422_v0  ;;  %vm2730_vm7 = vcmp.eq.s32.totalorder %v12331_v60, %v7422_v0  ;;  %5746 = vrcp.f32 %v9466_v48  ;;  %v3358_v1 = vand.u32 2147483647, %v9289_v17 }
 0x6dd   : > { %5423 = vmatmul.msk.bf16.gmra.mxu3 %vm12329_vm6, %v9191_v4  ;;  %vm9510_vm14 = vmor %vm3354_vm11, %vm3355_vm4  ;;  %vm3340_vm9 = vweird.f32 %v9326_v54  ;;  %v2890_v35 = vsel %vm2730_vm7, %v12334_v9, 0.0  ;;  %v9520_v31 = vmax.f32 %v12335_v45, 1.0  ;;  %v3317_v52 = vsel %vm9490_vm3, %v3316_v21, %v3312_v26  ;;  %v2177_v17 = vpop.permute.xlu2 %2176  ;;  %v12339_v26 = vld [vmem:[#allocation118_spill] sm:$0xff]  ;;  %v9558_v45 = vld [vmem:[%s6034_s14 + $0xe0] sm:$0xff] }
 0x6de   : > { %v2920_v32 = vadd.f32 %v2888_v10, %v2600_v43  ;;  %vm2089_vm15 = vcmp.eq.s32.totalorder %v9250_v38, %v7422_v0  ;;  %v3361_v49 = vor.u32 1.1754944e-38, %v3360_v19  ;;  %v3338_v58 = vadd.f32 %v9326_v54, %v9419_v27  ;;  %vm9538_vm0 = vmor %vm3339_vm13, %vm3340_vm9  ;;  %v12338_v27 = vld [vmem:[#allocation363_spill] sm:$0xff] }
 0x6df   : > { %v3343_v60 = vand.u32 2147483647, %v9262_v40  ;;  %v3560_v9 = vmul.f32 %v3317_v52, %v2919_v15  ;;  %v3357_v7 = vsel %vm9510_vm14, %v9363_v37, %v3353_v33  ;;  %v2249_v10 = vsel %vm2089_vm15, %v2177_v17, 0.0  ;;  %5685 = vset.pattern.permute.xlu1 %v12174_v39 }
 0x6e0   : > { %v3561_v21 = vmul.f32 %v3332_v62, %v2920_v32  ;;  %vm2729_vm1 = vcmp.eq.s32.totalorder %v12338_v27, %v7422_v0  ;;  %vm2409_vm11 = vcmp.eq.s32.totalorder %v12339_v26, %v7422_v0  ;;  %vm9546_vm4 = vcmp.eq.f32.partialorder %v3358_v1, 8.507059e+37  ;;  %v12342_v62 = vld [vmem:[#allocation273_spill] sm:$0xff]  ;;  %2060 = vperm.xlu1 %5685, %v9558_v45  }
 0x6e1   : > { %v2281_v37 = vadd.f32 %v2249_v10, %v1961_v42  ;;  %5748 = vrcp.f32 %v9520_v31  ;;  %v2569_v15 = vsel %vm2409_vm11, %v12342_v62, 0.0  ;;  %v12344_v43 = vand.u32 2147483648, %v9262_v40  ;;  %v12347_v10 = vld [vmem:[#allocation360_spill] sm:$0xff] }
 0x6e2   : > { %v9553_v33 = vpack.c.bf16 %v3561_v21, %v3560_v9  ;;  %v9561_v1 = vpop.eup %5746  ;;  %v2922_v52 = vadd.f32 %v2890_v35, %v9340_v18  ;;  %v3342_v32 = vsel %vm9538_vm0, %v9326_v54, %v3338_v58  ;;  %vm3344_vm13 = vcmp.eq.f32.partialorder %v3343_v60, 8.507059e+37  ;;  %v12345_v9 = vld [vmem:[#allocation244_spill] sm:$0xff]  ;;  %v12346_v21 = vld [vmem:[#allocation333_spill] sm:$0xff]  ;;  %v12348_v54 = vld [vmem:[#allocation366_spill] sm:$0xff] }
 0x6e3   : > { %v3346_v55 = vor.u32 1.1754944e-38, %v12344_v43  ;;  %v2601_v42 = vadd.f32 %v2569_v15, %v2281_v37  ;;  %v1644_v17 = vadd.f32 %v9344_v41, %v9296_v25  ;;  %v1616_v40 = vsel %vm1456_vm2, %v12345_v9, 0.0  ;;  %v2052_v60 = vpop.permute.xlu1 %2051  ;;  %v12349_v25 = vld [vmem:[#allocation162_spill] sm:$0xff]  ;;  %v12350_v41 = vld [vmem:[#allocation241_spill] sm:$0xff] }
 0x6e4   : > { %12343 = vst [vmem:[#allocation18_spill] sm:$0xff] %v9553_v33  ;;  %vm1772_vm5 = vcmp.eq.s32.totalorder %v12346_v21, %v7422_v0  ;;  %v2889_v18 = vsel %vm2729_vm1, %v12347_v10, 0.0  ;;  %vm3384_vm10 = vweird.f32 %v9317_v61  ;;  %vm3385_vm3 = vweird.f32 %v9389_v29  ;;  %v12351_v10 = vld [vmem:[#allocation382_spill] sm:$0xff] }
 0x6e5   : > { %v1932_v35 = vsel %vm1772_vm5, %v12348_v54, 0.0  ;;  %v2921_v58 = vadd.f32 %v2889_v18, %v2601_v42  ;;  %vm1134_vm8 = vcmp.eq.s32.totalorder %v12349_v25, %v7422_v0  ;;  %v1613_v13 = vsel %vm1453_vm12, %v12350_v41, 0.0  ;;  %v2040_v42 = vpop.permute.xlu2 %2039  ;;  %vm9603_vm2 = vmor %vm3384_vm10, %vm3385_vm3  ;;  %v9637_v41 = vpop.f32.mrf.mxu2  ;;  %v12372_v54 = vld [vmem:[#allocation128_spill] sm:$0xff]  ;;  %v12374_v25 = vld [vmem:[#allocation254_spill] sm:$0xff] }
 0x6e6   : > { %v3390_v38 = vand.u32 2147483648, %v9317_v61  ;;  %v3362_v27 = vsel %vm9546_vm4, %v3361_v49, %v3357_v7  ;;  %v3347_v26 = vsel %vm3344_vm13, %v3346_v55, %v3342_v32  ;;  %v3383_v15 = vadd.f32 %v9389_v29, %v3382_v12  ;;  %v12354_v12 = vld [vmem:[#allocation306_spill] sm:$0xff] }
 0x6e7   : > { %v3563_v37 = vmul.f32 %v3362_v27, %v2922_v52  ;;  %v3562_v62 = vmul.f32 %v3347_v26, %v2921_v58  ;;  %v3388_v43 = vand.u32 2147483647, %v9317_v61  ;;  %v9593_v9 = vpop.eup %5748  ;;  %v1648_v21 = vadd.f32 %v1616_v40, %v9300_v57  ;;  %v2205_v57 = vpop.permute.xlu0 %2204  ;;  %v12356_v61 = vld [vmem:[#allocation303_spill] sm:$0xff]  ;;  %v12357_v52 = vld [vmem:[#allocation240_spill] sm:$0xff]  ;;  %v12363_v58 = vld [vmem:[#allocation365_spill] sm:$0xff] }
 0x6e8   : > { %v9597_v28 = vmax.f32 %v12351_v10, 1.0  ;;  %v1964_v18 = vadd.f32 %v1932_v35, %v1644_v17  ;;  %vm2092_vm6 = vcmp.eq.s32.totalorder %v2040_v42, %v7422_v0  ;;  %vm1776_vm12 = vcmp.eq.s32.totalorder %v12354_v12, %v7422_v0  ;;  %2216 = vperm.xlu1 %5685, %v9253_v8   ;;  %v9639_v27 = vpop.f32.mrf.mxu3  ;;  %v12364_v26 = vld [vmem:[#allocation10_spill] sm:$0xff]  ;;  %v12369_v12 = vld [vmem:[#allocation185_spill] sm:$0xff] }
 0x6e9   : > { %v9610_v7 = vpack.c.bf16 %v3563_v37, %v3562_v62  ;;  %vm2096_vm7 = vcmp.eq.s32.totalorder %v2052_v60, %v7422_v0  ;;  %v2252_v19 = vsel %vm2092_vm6, %v9432_v63, 0.0  ;;  %v3410_v55 = vmul.f32 %v9561_v1, %v9466_v48  ;;  %v12368_v10 = vld [vmem:[#allocation370_spill] sm:$0xff] }
 0x6ea   : > { %vm1773_vm14 = vcmp.eq.s32.totalorder %v12356_v61, %v7422_v0  ;;  %v1936_v32 = vsel %vm1776_vm12, %v12357_v52, 0.0  ;;  %v2284_v17 = vadd.f32 %v2252_v19, %v1964_v18  ;;  %vm12358_vm9 = vcmask 523264  }
 0x6eb   : > { %12355 = vst [vmem:[#allocation19_spill] sm:$0xff] %v9610_v7  ;;  %5344 = vmatmul.msk.bf16.gmra.mxu0 %vm12358_vm9, %v9553_v33  ;;  %v3395_v40 = vmul.f32 %v9593_v9, %v9520_v31  ;;  %v3387_v63 = vsel %vm9603_vm2, %v9389_v29, %v3383_v15  ;;  %vm9627_vm15 = vcmp.eq.f32.partialorder %v3388_v43, 8.507059e+37  ;;  %v3391_v35 = vor.u32 1.1754944e-38, %v3390_v38  ;;  %vm12361_vm0 = vmmov %vm12358_vm9  ;;  %v9647_v38 = vld [vmem:[%s6161_s17 + $0xf8] sm:$0xff] }
 0x6ec   : > { %5360 = vmatmul.msk.bf16.gmra.mxu1 %vm12361_vm0, %v9553_v33  ;;  %vm12362_vm1 = vmmov %vm12361_vm0  ;;  %vm2732_vm11 = vcmp.eq.s32.totalorder %v12363_v58, %v7422_v0  ;;  %v2256_v29 = vsel %vm2096_vm7, %v2205_v57, 0.0  ;;  %v2604_v37 = vadd.f32 %v12364_v26, %v2284_v17  ;;  %vm12366_vm13 = vcmask 64512   ;;  %v12367_v43 = vld [vmem:[#allocation368_spill] sm:$0xff]  ;;  %v12371_v26 = vld [vmem:[#allocation221_spill] sm:$0xff] }
 0x6ed   : > { %5408 = vmatmul.msk.bf16.gmra.mxu2 %vm12362_vm1, %v9553_v33  ;;  %vm12365_vm4 = vmmov %vm12361_vm0  ;;  %v3029_v62 = vsel %vm12366_vm13, %v9647_v38, 0.0  ;;  %v1645_v15 = vadd.f32 %v1613_v13, %v9298_v50  ;;  %v2892_v42 = vsel %vm2732_vm11, %v12367_v43, 0.0  ;;  %v1933_v60 = vsel %vm1773_vm14, %v12368_v10, 0.0  ;;  %v2525_v17 = vpop.permute.xlu1 %2524  ;;  %v2043_v61 = vpop.permute.xlu2 %2042 }
 0x6ee   : > { %5424 = vmatmul.msk.bf16.gmra.mxu3 %vm12365_vm4, %v9553_v33  ;;  %v1968_v18 = vadd.f32 %v1936_v32, %v1648_v21  ;;  %v3411_v49 = vsub.f32 1.0, %v3410_v55  ;;  %5750 = vrcp.f32 %v9597_v28  ;;  %v9659_v57 = vmax.f32 %v12369_v12, 1.0  ;;  %3030 = vadd.xlane.f32.xlu2 %v3029_v62  ;;  %v12370_v32 = vld [vmem:[#allocation196_spill] sm:$0xff]  ;;  %v12378_v12 = vld [vmem:[#allocation373_spill] sm:$0xff]  ;;  %vm12384_vm4 = vmmov %vm12362_vm1 }
 0x6ef   : > { %v2924_v19 = vadd.f32 %v2892_v42, %v2604_v37  ;;  %v3396_v52 = vsub.f32 1.0, %v3395_v40  ;;  %vm2416_vm5 = vcmp.eq.s32.totalorder %v9149_v36, %v7422_v0  ;;  %v3392_v13 = vsel %vm9627_vm15, %v3391_v35, %v3387_v63  ;;  %v12375_v42 = vld [vmem:[#allocation298_spill] sm:$0xff] }
 0x6f0   : > { %v2288_v50 = vadd.f32 %v2256_v29, %v1968_v18  ;;  %v1965_v58 = vadd.f32 %v1933_v60, %v1645_v15  ;;  %v2576_v55 = vsel %vm2416_vm5, %v2525_v17, 0.0  ;;  %vm2093_vm10 = vcmp.eq.s32.totalorder %v2043_v61, %v7422_v0  ;;  %5686 = vset.pattern.permute.xlu1 %v11821_v44  ;;  %v12377_v60 = vld [vmem:[#allocation372_spill] sm:$0xff]  ;;  %vm12385_vm5 = vmmov %vm12362_vm1 }
 0x6f1   : > { %v3565_v21 = vmul.f32 %v3392_v13, %v2924_v19  ;;  %v1294_v40 = vsel %vm1134_vm8, %v12370_v32, 0.0  ;;  %vm1454_vm3 = vcmp.eq.s32.totalorder %v12371_v26, %v7422_v0  ;;  %v2253_v63 = vsel %vm2093_vm10, %v9526_v22, 0.0  ;;  %2380 = vperm.xlu1 %5686, %v9558_v45   ;;  %v9697_v13 = vpop.f32.mrf.mxu3  ;;  %vm12386_vm10 = vmmov %vm12362_vm1 }
 0x6f2   : > { %v9672_v36 = vadd.f32 %v2576_v55, %v2288_v50  ;;  %vm2733_vm2 = vcmp.eq.s32.totalorder %v12372_v54, %v7422_v0  ;;  %5752 = vrcp.f32 %v9659_v57  ;;  %v2285_v29 = vadd.f32 %v2253_v63, %v1965_v58 }
 0x6f3   : > { %v9679_v35 = vpack.c.bf16 %v3565_v21, %v9442_v23  ;;  %v1614_v37 = vsel %vm1454_vm3, %v12374_v25, 0.0  ;;  %v3397_v62 = vmul.f32 %v9593_v9, %v3396_v52  ;;  %v1326_v22 = vadd.f32 %v1294_v40, %v9230_v6  ;;  %v12376_v23 = vld [vmem:[#allocation242_spill] sm:$0xff]  ;;  %v9695_v52 = vpop.f32.mrf.mxu2 }
 0x6f4   : > { %v9685_v15 = vpop.eup %5750  ;;  %v3412_v43 = vmul.f32 %v9561_v1, %v3411_v49  ;;  %vm1774_vm8 = vcmp.eq.s32.totalorder %v12375_v42, %v7422_v0  ;;  %v2605_v10 = vadd.f32 %v12376_v23, %v2285_v29  ;;  %v2893_v19 = vsel %vm2733_vm2, %v12378_v12, 0.0  ;;  %v12381_v25 = vld [vmem:[#allocation50_spill] sm:$0xff]  ;;  %v12391_v12 = vld [vmem:[#allocation375_spill] sm:$0xff] }
 0x6f5   : > { %12373 = vst [vmem:[#allocation23_spill] sm:$0xff] %v9679_v35  ;;  %v1934_v18 = vsel %vm1774_vm8, %v12377_v60, 0.0  ;;  %v1646_v50 = vadd.f32 %v1614_v37, %v1326_v22  ;;  %vm3414_vm6 = vweird.f32 %v9466_v48  ;;  %vm3415_vm12 = vweird.f32 %v9561_v1  ;;  %v2197_v32 = vpop.permute.xlu2 %2196  ;;  %v12389_v60 = vld [vmem:[#allocation141_spill] sm:$0xff] }
 0x6f6   : > { %v2925_v17 = vadd.f32 %v2893_v19, %v2605_v10  ;;  %v3420_v6 = vand.u32 2147483648, %v9466_v48  ;;  %v3440_v49 = vmul.f32 %v9685_v15, %v9597_v28  ;;  %v3398_v61 = vadd.f32 %v9593_v9, %v3397_v62  ;;  %v9709_v55 = vpop.permute.xlu1 %2691  ;;  %vm9716_vm9 = vmor %vm3414_vm6, %vm3415_vm12 }
 0x6f7   : > { %vm3400_vm7 = vweird.f32 %v9593_v9  ;;  %v1966_v21 = vadd.f32 %v1934_v18, %v1646_v50  ;;  %vm2094_vm14 = vcmp.eq.s32.totalorder %v9515_v51, %v7422_v0  ;;  %v3413_v40 = vadd.f32 %v9561_v1, %v3412_v43 }
 0x6f8   : > { %v9705_v58 = vpop.eup %5752  ;;  %v3418_v26 = vand.u32 2147483647, %v9466_v48  ;;  %v3405_v63 = vand.u32 2147483648, %v9520_v31  ;;  %v2254_v54 = vsel %vm2094_vm14, %v2197_v32, 0.0  ;;  %vm463_vm15 = vcmp.eq.s32.totalorder %v12381_v25, %v7422_v0  ;;  %v12394_v48 = vld [vmem:[#allocation256_spill] sm:$0xff] }
 0x6f9   : > { %vm3399_vm0 = vweird.f32 %v9520_v31  ;;  %v3403_v51 = vand.u32 2147483647, %v9520_v31  ;;  %v2286_v37 = vadd.f32 %v2254_v54, %v1966_v21  ;;  %v3441_v62 = vsub.f32 1.0, %v3440_v49  ;;  %2383 = vperm.xlu1 %5686, %v9156_v47   ;;  %v12387_v47 = vld [vmem:[#allocation69_spill] sm:$0xff]  ;;  %v12392_v49 = vld [vmem:[#allocation211_spill] sm:$0xff] }
 0x6fa   : > { %v3425_v22 = vmul.f32 %v9705_v58, %v9659_v57  ;;  %vm9730_vm11 = vmor %vm3399_vm0, %vm3400_vm7  ;;  %v3421_v43 = vor.u32 1.1754944e-38, %v3420_v6  ;;  %v3417_v23 = vsel %vm9716_vm9, %v9561_v1, %v3413_v40  ;;  %vm3419_vm13 = vcmp.eq.f32.partialorder %v3418_v26, 8.507059e+37  ;;  %v12390_v1 = vld [vmem:[#allocation166_spill] sm:$0xff]  ;;  %v12393_v40 = vld [vmem:[#allocation188_spill] sm:$0xff] }
 0x6fb   : > { %5345 = vmatmul.msk.bf16.gmra.mxu0 %vm12362_vm1, %v9610_v7  ;;  %v3402_v31 = vsel %vm9730_vm11, %v9593_v9, %v3398_v61  ;;  %v2606_v42 = vadd.f32 %v8622_v59, %v2286_v37  ;;  %v655_v10 = vsel %vm463_vm15, %v12387_v47, 0.0  ;;  %v12388_v9 = vld [vmem:[#allocation102_spill] sm:$0xff]  ;;  %v3406_v59 = vor.u32 1.1754944e-38, %v3405_v63 }
 0x6fc   : > { %5361 = vmatmul.msk.bf16.gmra.mxu1 %vm12384_vm4, %v9610_v7  ;;  %vm815_vm3 = vcmp.eq.s32.totalorder %v12388_v9, %v7422_v0  ;;  %vm1135_vm2 = vcmp.eq.s32.totalorder %v12390_v1, %v7422_v0  ;;  %vm3404_vm8 = vcmp.eq.f32.partialorder %v3403_v51, 8.507059e+37  ;;  %v9758_v50 = vpop.f32.mrf.mxu2  ;;  %v9760_v6 = vpop.f32.mrf.mxu3  ;;  %vm1455_vm6 = vcmp.eq.s32.totalorder %v12392_v49, %v7422_v0 }
 0x6fd   : > { %5409 = vmatmul.msk.bf16.gmra.mxu2 %vm12385_vm5, %v9610_v7  ;;  %v975_v18 = vsel %vm815_vm3, %v12389_v60, 0.0  ;;  %v2926_v19 = vadd.f32 %v12391_v12, %v2606_v42  ;;  %v3426_v61 = vsub.f32 1.0, %v3425_v22  ;;  %v3407_v21 = vsel %vm3404_vm8, %v3406_v59, %v3402_v31  ;;  %v2049_v25 = vpop.permute.xlu2 %2048  ;;  %v9780_v60 = vpop.f32.mrf.mxu0 }
 0x6fe   : > { %5425 = vmatmul.msk.bf16.gmra.mxu3 %vm12386_vm10, %v9610_v7  ;;  %v3422_v32 = vsel %vm3419_vm13, %v3421_v43, %v3417_v23  ;;  %v1295_v26 = vsel %vm1135_vm2, %v12393_v40, 0.0  ;;  %v3566_v63 = vmul.f32 %v3407_v21, %v2925_v17  ;;  %v2841_v29 = vpop.permute.xlu1 %2840  ;;  %v3442_v51 = vmul.f32 %v9685_v15, %v3441_v62  ;;  %v12396_v43 = vld [vmem:[#allocation336_spill] sm:$0xff]  ;;  %v12397_v62 = vld [vmem:[#allocation237_spill] sm:$0xff]  ;;  %12398 = vst [vmem:[#allocation30_spill] sm:$0xff] %v9780_v60  ;;  %vm12405_vm2 = vmmov %vm12385_vm5 }
 0x6ff   : > { %v3567_v54 = vmul.f32 %v3422_v32, %v2926_v19  ;;  %v1007_v37 = vadd.f32 %v975_v18, %v655_v10  ;;  %v1615_v42 = vsel %vm1455_vm6, %v12394_v48, 0.0  ;;  %vm3444_vm12 = vweird.f32 %v9597_v28  ;;  %v9782_v18 = vpop.f32.mrf.mxu1  ;;  %vm12406_vm8 = vmmov %vm12405_vm2 }
 0x700   : > { %vm3445_vm7 = vweird.f32 %v9685_v15  ;;  %vm1775_vm14 = vcmp.eq.s32.totalorder %v12396_v43, %v7422_v0  ;;  %v3427_v17 = vmul.f32 %v9705_v58, %v3426_v61  ;;  %v3450_v31 = vand.u32 2147483648, %v9597_v28  ;;  %12399 = vst [vmem:[#allocation31_spill] sm:$0xff] %v9782_v18  ;;  %vm12407_vm6 = vmmov %vm12405_vm2 }
 0x701   : > { %v9767_v47 = vpack.c.bf16 %v3567_v54, %v3566_v63  ;;  %v1327_v22 = vadd.f32 %v1295_v26, %v1007_v37  ;;  %5688 = vset.pattern.permute.xlu1 %v11738_v14  ;;  %v1935_v23 = vsel %vm1775_vm14, %v12397_v62, 0.0  ;;  %v3443_v10 = vadd.f32 %v9685_v15, %v3442_v51  ;;  %vm9784_vm9 = vmor %vm3444_vm12, %vm3445_vm7 }
 0x702   : > { %2700 = vperm.xlu1 %5688, %v9558_v45   ;;  %v3448_v9 = vand.u32 2147483647, %v9597_v28  ;;  %vm2095_vm15 = vcmp.eq.s32.totalorder %v2049_v25, %v7422_v0  ;;  %v3451_v49 = vor.u32 1.1754944e-38, %v3450_v31  ;;  %v3428_v61 = vadd.f32 %v9705_v58, %v3427_v17  ;;  %vm12414_vm7 = vmmov %vm12405_vm2 }
 0x703   : > { %12395 = vst [vmem:[#allocation25_spill] sm:$0xff] %v9767_v47  ;;  %v1647_v59 = vadd.f32 %v1615_v42, %v1327_v22  ;;  %vm3430_vm0 = vweird.f32 %v9705_v58  ;;  %vm2415_vm1 = vcmp.eq.s32.totalorder %v9040_v46, %v7422_v0  ;;  %vm2736_vm11 = vcmp.eq.s32.totalorder %v9709_v55, %v7422_v0  ;;  %vm12415_vm14 = vmmov %vm12405_vm2 }
 0x704   : > { %v9789_v12 = vpop.f32.mrf.mxu2  ;;  %v9791_v19 = vpop.f32.mrf.mxu3  ;;  %v3447_v21 = vsel %vm9784_vm9, %v9685_v15, %v3443_v10  ;;  %vm3449_vm4 = vcmp.eq.f32.partialorder %v3448_v9, 8.507059e+37  ;;  %v3435_v40 = vand.u32 2147483648, %v9659_v57  ;;  %vm3429_vm13 = vweird.f32 %v9659_v57  ;;  %v12402_v15 = vld [vmem:[#allocation252_spill] sm:$0xff]  ;;  %vm12416_vm9 = vmmov %vm12405_vm2 }
 0x705   : > { %v1967_v45 = vadd.f32 %v1935_v23, %v1647_v59  ;;  %v2201_v32 = vpop.permute.xlu2 %2200  ;;  %v3433_v55 = vand.u32 2147483647, %v9659_v57  ;;  %vm2735_vm10 = vcmp.eq.s32.totalorder %v12402_v15, %v7422_v0  ;;  %v2575_v51 = vsel %vm2415_vm1, %v8760_v11, 0.0  ;;  %vm9816_vm3 = vmor %vm3429_vm13, %vm3430_vm0  ;;  %v9834_v31 = vpop.f32.mrf.mxu0 }
 0x706   : > { %1908 = vperm.xlu2 %5693, %v9647_v38   ;;  %v2845_v28 = vpop.permute.xlu1 %2844  ;;  %v2255_v63 = vsel %vm2095_vm15, %v2201_v32, 0.0  ;;  %v3452_v37 = vsel %vm3449_vm4, %v3451_v49, %v3447_v21  ;;  %v3432_v48 = vsel %vm9816_vm3, %v9705_v58, %v3428_v61  ;;  %v2895_v11 = vsel %vm2735_vm10, %v2841_v29, 0.0  ;;  %12408 = vst [vmem:[#allocation36_spill] sm:$0xff] %v9834_v31  ;;  %v9856_v49 = vld [vmem:[%s6161_s17 + $0xf0] sm:$0xff]  ;;  %vm12417_vm15 = vmmov %vm12405_vm2 }
 0x707   : > { %v2896_v26 = vsel %vm2736_vm11, %v2845_v28, 0.0  ;;  %v2287_v54 = vadd.f32 %v2255_v63, %v1967_v45  ;;  %v3436_v42 = vor.u32 1.1754944e-38, %v3435_v40  ;;  %vm3434_vm12 = vcmp.eq.f32.partialorder %v3433_v55, 8.507059e+37  ;;  %v9836_v58 = vpop.f32.mrf.mxu1  ;;  %vm12420_vm0 = vmmov %vm12405_vm2 }
 0x708   : > { %v2928_v46 = vadd.f32 %v2896_v26, %v9672_v36  ;;  %12409 = vst [vmem:[#allocation37_spill] sm:$0xff] %v9836_v58  ;;  %v5863_v26 = vld [vmem:[%s6034_s14 + $0xf0] sm:$0xff]  ;;  %vm12423_vm1 = vmmov %vm12420_vm0  ;;  %vm12424_vm11 = vcmask 64512   ;;  %vm2737_vm10 = vcmp.eq.s32.totalorder %v9311_v56, %v7422_v0  ;;  %v5864_v56 = vld [vmem:[%s6161_s17 + $0xd8] sm:$0xff] }
 0x709   : > { %v2607_v57 = vadd.f32 %v2575_v51, %v2287_v54  ;;  %v3437_v62 = vsel %vm3434_vm12, %v3436_v42, %v3432_v48  ;;  %v3026_v51 = vsel %vm12424_vm11, %v9856_v49, 0.0  ;;  %vm12425_vm4 = vmmov %vm12420_vm0 }
 0x70a   : > { %v3569_v36 = vmul.f32 %v3452_v37, %v2928_v46  ;;  %5690 = vset.pattern.permute.xlu1 %v12299_v24  ;;  %vm12426_vm13 = vmmov %vm12420_vm0 }
 0x70b   : > { %5346 = vmatmul.msk.bf16.gmra.mxu0 %vm12385_vm5, %v9679_v35  ;;  %v2927_v22 = vadd.f32 %v2895_v11, %v2607_v57 }
 0x70c   : > { %5362 = vmatmul.msk.bf16.gmra.mxu1 %vm12405_vm2, %v9679_v35  ;;  %v9830_v43 = vpop.f32.mrf.mxu2  ;;  %v9832_v17 = vpop.f32.mrf.mxu3 }
 0x70d   : > { %5410 = vmatmul.msk.bf16.gmra.mxu2 %vm12406_vm8, %v9679_v35  ;;  %v3568_v23 = vmul.f32 %v3437_v62, %v2927_v22  ;;  %v9848_v59 = vpop.f32.mrf.mxu0 }
 0x70e   : > { %5426 = vmatmul.msk.bf16.gmra.mxu3 %vm12407_vm6, %v9679_v35  ;;  %5696 = vset.pattern.permute.xlu2 %v12174_v39  ;;  %12411 = vst [vmem:[#allocation43_spill] sm:$0xff] %v9848_v59 }
 0x70f   : > { %2228 = vperm.xlu2 %5696, %v9647_v38   ;;  %v9840_v29 = vpop.permute.xlu1 %2054  ;;  %v9842_v24 = vpack.c.bf16 %v3569_v36, %v3568_v23  ;;  %v9850_v1 = vpop.f32.mrf.mxu1 }
 0x710   : > { %12412 = vst [vmem:[#allocation46_spill] sm:$0xff] %v9850_v1 }
 0x711   : > { %12410 = vst [vmem:[#allocation42_spill] sm:$0xff] %v9842_v24 }
 0x714   : > { %v9844_v10 = vpop.f32.mrf.mxu2  ;;  %v9846_v9 = vpop.f32.mrf.mxu3 }
 0x715   : > { %v9871_v21 = vpop.f32.mrf.mxu0 }
 0x716   : > { %12418 = vst [vmem:[#allocation48_spill] sm:$0xff] %v9871_v21  ;;  %v5865_v21 = vld [vmem:[%s6161_s17 + $0xe8] sm:$0xff]  ;;  %s5561_s17 = sshll.u32 %s5998_s5, 1  ;;  %s5209_s5 = scalar_lea.sflag [#allocation4], %s260_s11 }
 0x717   : > { %5698 = vset.pattern.permute.xlu2 %v11821_v44  ;;  %v9853_v45 = vpop.permute.xlu1 %2212  ;;  %v9873_v32 = vpop.f32.mrf.mxu1  ;;  %s5219_s15 = scalar_lea.hbm %s11262_s6, %s5561_s17 }
 0x718   : > { %12413 = vst [vmem:[#allocation47_spill] sm:$0xff] %v9853_v45  ;;  %2544 = vperm.xlu2 %5698, %v9856_v49   ;;  %s5223_s19 = sshll.u32 %s5219_s15, 4  ;;  %s5224_s19 = int_to_ptr.hbm [resolvable:$true] %s5223_s19 }
 0x719   : > { %12419 = vst [vmem:[#allocation49_spill] sm:$0xff] %v9873_v32  ;;  %s5881_s20 = sshra.s32 %s5224_s19, 4  ;;  %s5882_s20 = int_to_ptr.hbm [resolvable:$true] %s5881_s20 }
 0x71a   : > { %s5883_s21 = scalar_lea.hbm %s5882_s20, 2  ;;  %p5888_p0 = scmp.lt.s32.totalorder %s5882_s20, %s11262_s6 }
 0x71b   : > { %5347 = vmatmul.msk.bf16.gmra.mxu0 %vm12414_vm7, %v9767_v47  ;;  %p5884_p11 = scmp.ne.s32.totalorder %s5882_s20, %s5883_s21  ;;  %p5889_p1 = scmp.lt.s32.totalorder %s5887_s29, %s5883_s21 }
 0x71c   : > { %5363 = vmatmul.msk.bf16.gmra.mxu1 %vm12415_vm14, %v9767_v47  ;;  %v9867_v61 = vpop.f32.mrf.mxu2  ;;  %v9869_v28 = vpop.f32.mrf.mxu3 }
 0x71d   : > { %5411 = vmatmul.msk.bf16.gmra.mxu2 %vm12416_vm9, %v9767_v47  ;;  %v9886_v55 = vpop.f32.mrf.mxu0  ;;  %p5885_p12 = pnand %p5884_p11, %p6015_p5  ;;  %p5890_p2 = por %p5889_p1, %p5888_p0 }
 0x71e   : > { %5427 = vmatmul.msk.bf16.gmra.mxu3 %vm12417_vm15, %v9767_v47  ;;  %12421 = vst [vmem:[#allocation51_spill] sm:$0xff] %v9886_v55 }
 0x71f   : > { %v9888_v15 = vpop.f32.mrf.mxu1  ;;  %p5886_p13 = pneg %p5885_p12 }
 0x720   : > { %5699 = vset.pattern.permute.xlu2 %v11738_v14  ;;  %v9876_v40 = vpop.permute.xlu1 %2374  ;;  %12422 = vst [vmem:[#allocation54_spill] sm:$0xff] %v9888_v15 }
 0x721   : > { %2706 = vperm.xlu2 %5699, %v5863_v26   ;;  %p5891_p3 = pnand %p5890_p2, %p5886_p13 }
 0x724   : > { %v9879_v63 = vpop.f32.mrf.mxu2  ;;  %v9881_v46 = vpop.f32.mrf.mxu3 }
 0x725   : > { %v9905_v48 = vpop.f32.mrf.mxu0 }
 0x726   : > { %12428 = vst [vmem:[#allocation58_spill] sm:$0xff] %v9905_v48 }
 0x727   : > { %v9907_v11 = vpop.f32.mrf.mxu1 }
 0x728   : > { %v2378_v54 = vpop.permute.xlu1 %2377  ;;  %12429 = vst [vmem:[#allocation60_spill] sm:$0xff] %v9907_v11 }
 0x729   : > { %2868 = vperm.xlu2 %5699, %v9647_v38   ;;  %vm2418_vm5 = vcmp.eq.s32.totalorder %v2378_v54, %v7422_v0 }
 0x72b   : > { %5348 = vmatmul.msk.bf16.gmra.mxu0 %vm12420_vm0, %v9842_v24 }
 0x72c   : > { %5364 = vmatmul.msk.bf16.gmra.mxu1 %vm12423_vm1, %v9842_v24  ;;  %3027 = vadd.xlane.f32.xlu1 %v3026_v51  ;;  %v9898_v37 = vpop.f32.mrf.mxu2 }
 0x72d   : > { %5412 = vmatmul.msk.bf16.gmra.mxu2 %vm12425_vm4, %v9842_v24  ;;  %v9900_v25 = vpop.f32.mrf.mxu3  ;;  %v9917_v51 = vpop.f32.mrf.mxu0 }
 0x72e   : > { %5428 = vmatmul.msk.bf16.gmra.mxu3 %vm12426_vm13, %v9842_v24  ;;  %12430 = vst [vmem:[#allocation61_spill] sm:$0xff] %v9917_v51 }
 0x72f   : > { %v9919_v54 = vpop.f32.mrf.mxu1 }
 0x730   : > { %v2533_v36 = vpop.permute.xlu1 %2532  ;;  %12431 = vst [vmem:[#allocation62_spill] sm:$0xff] %v9919_v54 }
 0x731   : > { %v9903_v57 = vsel %vm2418_vm5, %v2533_v36, 0.0 }
 0x732   : > { %12427 = vst [vmem:[#allocation57_spill] sm:$0xff] %v9903_v57 }
 0x734   : > { %v9909_v42 = vpop.f32.mrf.mxu2 }
 0x735   : > { %v9911_v22 = vpop.f32.mrf.mxu3  ;;  %v9926_v7 = vpop.f32.mrf.mxu0 }
 0x737   : > { %v9928_v33 = vpop.f32.mrf.mxu1 }
 0x738   : > { %12433 = vst [vmem:[#allocation64_spill] sm:$0xff] %v9928_v33 }
 0x739   : > { %v2698_v62 = vpop.permute.xlu1 %2697 }
 0x73a   : > { %vm2738_vm3 = vcmp.eq.s32.totalorder %v2698_v62, %v7422_v0 }
 0x73f   : > { %v9913_v23 = vpop.f32.mrf.mxu2  ;;  %v9936_v60 = vpop.f32.mrf.mxu1 }
 0x740   : > { %v9915_v26 = vpop.f32.mrf.mxu3 }
 0x741   : > { %v2849_v36 = vpop.permute.xlu1 %2848 }
 0x742   : > { %v9923_v24 = vsel %vm2737_vm10, %v2849_v36, 0.0  ;;  %v9934_v36 = vpop.f32.mrf.mxu0 }
 0x743   : > { %12432 = vst [vmem:[#allocation63_spill] sm:$0xff] %v9923_v24 }
 0x745   : > { %1888 = vperm.xlu1 %5690, %v9406_v34  }
 0x747   : > { %v4060_v47 = vpop.f32.mrf.mxu2 }
 0x748   : > { %v4149_v35 = vpop.f32.mrf.mxu3 }
 0x749   : > { %v2853_v4 = vpop.permute.xlu1 %2852 }
 0x74a   : > { %v9931_v2 = vsel %vm2738_vm3, %v2853_v4, 0.0  ;;  %v9940_v1 = vpop.f32.mrf.mxu0  ;;  %v9942_v4 = vpop.f32.mrf.mxu1 }
 0x74b   : > { %12434 = vst [vmem:[#allocation65_spill] sm:$0xff] %v9931_v2  ;;  %v3978_v2 = vld [vmem:[%s11259_s3 + $0x2] sm:$0x3] }
 0x74c   : > { %v9950_v57 = vperm.slane %v3978_v2, 0 }
 0x74d   : > { %1892 = vperm.xlu1 %5690, %v5864_v56  }
 0x74f   : > { %v4063_v20 = vpop.f32.mrf.mxu2 }
 0x750   : > { %v4152_v18 = vpop.f32.mrf.mxu3  ;;  %v4064_v51 = vadd.f32 %v4063_v20, %v9950_v57 }
 0x752   : > { %v2061_v58 = vpop.permute.xlu1 %2060 }
 0x753   : > { %vm2099_vm2 = vcmp.eq.s32.totalorder %v2061_v58, %v7422_v0 }
 0x755   : > { %1896 = vperm.xlu1 %5690, %v9253_v8   ;;  %v9952_v8 = vperm.slane %v3978_v2, 1 }
 0x757   : > { %v4065_v34 = vpop.f32.mrf.mxu2  ;;  %v4153_v33 = vadd.f32 %v4152_v18, %v9952_v8  ;;  %v4150_v20 = vadd.f32 %v4149_v35, %v9952_v8  ;;  %v4056_v35 = vadd.f32 %v9909_v42, %v9950_v57 }
 0x758   : > { %v4154_v30 = vpop.f32.mrf.mxu3 }
 0x75a   : > { %v2217_v62 = vpop.permute.xlu1 %2216 }
 0x75b   : > { %v9944_v59 = vsel %vm2099_vm2, %v2217_v62, 0.0  ;;  %v9956_v62 = vpop.f32.mrf.mxu0 }
 0x75c   : > { %12435 = vst [vmem:[#allocation83_spill] sm:$0xff] %v9944_v59  ;;  %v9958_v59 = vpop.f32.mrf.mxu1 }
 0x75d   : > { %1900 = vperm.xlu1 %5690, %v5865_v21  }
 0x75f   : > { %v4068_v32 = vpop.f32.mrf.mxu2 }
 0x760   : > { %v4157_v56 = vpop.f32.mrf.mxu3  ;;  %v4069_v58 = vadd.f32 %v4068_v32, %v9950_v57  ;;  %v4066_v32 = vadd.f32 %v4065_v34, %v9950_v57  ;;  %v4225_v34 = vmax.f32 %v4150_v20, 0.0 }
 0x761   : > { %v4158_v15 = vadd.f32 %v4157_v56, %v9952_v8  ;;  %v4155_v56 = vadd.f32 %v4154_v30, %v9952_v8  ;;  %v4226_v30 = vmax.f32 %v4064_v51, 0.0 }
 0x762   : > { %v4230_v11 = vmax.f32 %v4069_v58, 0.0  ;;  %v5866_v58 = vld [vmem:[%s6034_s14 + $0xf8] sm:$0xff]  ;;  %s5299_s14 = sshll.u32 %s260_s11, 1 }
 0x763   : > { %v4231_v48 = vmax.f32 %v4158_v15, 0.0  ;;  %v9969_v15 = vpop.f32.mrf.mxu0  ;;  %s262_s16 = scalar_lea.vmem [#allocation3], %s5299_s14 }
 0x764   : > { %s5221_s18 = sshll.u32 %s262_s16, 4  ;;  %s5222_s18 = int_to_ptr.vmem [resolvable:$true] %s5221_s18 }
 0x765   : > { %1904 = vperm.xlu1 %5690, %v9856_v49  }
 0x767   : > { %v4070_v55 = vpop.f32.mrf.mxu2 }
 0x768   : > { %v4159_v31 = vpop.f32.mrf.mxu3  ;;  %v4071_v21 = vadd.f32 %v4070_v55, %v9950_v57  ;;  %v4228_v55 = vmax.f32 %v4066_v32, 0.0  ;;  %v4054_v32 = vadd.f32 %v9898_v37, %v9950_v57  ;;  %v4049_v37 = vadd.f32 %v9867_v61, %v9950_v57 }
 0x769   : > { %v4160_v45 = vadd.f32 %v4159_v31, %v9952_v8  ;;  %v4229_v31 = vmax.f32 %v4155_v56, 0.0  ;;  %v4220_v56 = vmax.f32 %v4056_v35, 0.0  ;;  %v4046_v61 = vadd.f32 %v9844_v10, %v9950_v57 }
 0x76a   : > { %v4232_v2 = vmax.f32 %v4071_v21, 0.0  ;;  %v4279_v18 = vpack.c.bf16 %v4228_v55, %v4226_v30  ;;  %v4218_v42 = vmax.f32 %v4054_v32, 0.0  ;;  %v4140_v30 = vadd.f32 %v9881_v46, %v9952_v8  ;;  %v3600_v32 = vld [vmem:[%s11259_s3] sm:$0x3] }
 0x76b   : > { %v4233_v24 = vmax.f32 %v4160_v45, 0.0  ;;  %v9971_v45 = vpop.f32.mrf.mxu1  ;;  %v4041_v10 = vadd.f32 %v9789_v12, %v9950_v57 }
 0x76c   : > { %v4281_v53 = vpack.c.bf16 %v4232_v2, %v4230_v11  ;;  %v4227_v11 = vmax.f32 %v4153_v33, 0.0 }
 0x76d   : > { %v4282_v54 = vpack.c.bf16 %v4233_v24, %v4231_v48  ;;  %5695 = vset.pattern.permute.xlu1 %v12174_v39  ;;  %v4061_v24 = vadd.f32 %v4060_v47, %v9950_v57  ;;  %v4059_v48 = vadd.f32 %v9913_v23, %v9950_v57  ;;  %v4148_v39 = vadd.f32 %v9915_v26, %v9952_v8  ;;  %v9985_v23 = vpop.f32.mrf.mxu0 }
 0x76e   : > { %4305 = vmatpush.bf16.xpose.msrb.mxu0 %v4281_v53  ;;  %2224 = vperm.xlu1 %5695, %v9856_v49   ;;  %v4280_v53 = vpack.c.bf16 %v4229_v31, %v4227_v11  ;;  %v4145_v47 = vadd.f32 %v9911_v22, %v9952_v8  ;;  %v4051_v22 = vadd.f32 %v9879_v63, %v9950_v57  ;;  %v4214_v63 = vmax.f32 %v4049_v37, 0.0 }
 0x76f   : > { %4318 = vmatpush.bf16.xpose.msrb.mxu1 %v4282_v54  ;;  %v4224_v54 = vmax.f32 %v4061_v24, 0.0  ;;  %v4222_v51 = vmax.f32 %v4059_v48, 0.0  ;;  %v4223_v33 = vmax.f32 %v4148_v39, 0.0  ;;  %v4275_v11 = vpack.c.bf16 %v4220_v56, %v4218_v42 }
 0x770   : > { %v4221_v55 = vmax.f32 %v4145_v47, 0.0  ;;  %v4208_v12 = vmax.f32 %v4041_v10, 0.0 }
 0x771   : > { %v4277_v26 = vpack.c.bf16 %v4224_v54, %v4222_v51  ;;  %v4278_v2 = vpack.c.bf16 %v4225_v34, %v4223_v33  ;;  %v4044_v54 = vadd.f32 %v9830_v43, %v9950_v57  ;;  %v4133_v34 = vadd.f32 %v9832_v17, %v9952_v8 }
 0x772   : > { %v4212_v51 = vmax.f32 %v4046_v61, 0.0  ;;  %v4039_v43 = vadd.f32 %v9758_v50, %v9950_v57  ;;  %v4128_v17 = vadd.f32 %v9760_v6, %v9952_v8  ;;  %v10031_v50 = vperm.slane %v3600_v32, 1 }
 0x773   : > { %v9987_v21 = vpop.f32.mrf.mxu1  ;;  %v4211_v35 = vmax.f32 %v4133_v34, 0.0  ;;  %v4036_v6 = vadd.f32 %v9695_v52, %v9950_v57 }
 0x774   : > { %v4206_v56 = vmax.f32 %v4039_v43, 0.0 }
 0x775   : > { %v10002_v20 = vpop.f32.mrf.mxu0 }
 0x776   : > { %4306 = vmatpush.bf16.xpose.msrb.mxu0 %v4279_v18  ;;  %5697 = vset.pattern.permute.xlu1 %v11821_v44  ;;  %v4143_v44 = vadd.f32 %v9900_v25, %v9952_v8  ;;  %v4138_v25 = vadd.f32 %v9869_v28, %v9952_v8  ;;  %v4135_v28 = vadd.f32 %v9846_v9, %v9952_v8 }
 0x777   : > { %4319 = vmatpush.bf16.xpose.msrb.mxu1 %v4280_v53  ;;  %2389 = vperm.xlu1 %5697, %v5866_v58   ;;  %v4217_v53 = vmax.f32 %v4140_v30, 0.0  ;;  %v4210_v58 = vmax.f32 %v4044_v54, 0.0  ;;  %v4130_v9 = vadd.f32 %v9791_v19, %v9952_v8  ;;  %v4207_v19 = vmax.f32 %v4128_v17, 0.0  ;;  %v12440_v17 = vld [vmem:[#allocation41_spill] sm:$0xff] }
 0x778   : > { %v4219_v31 = vmax.f32 %v4143_v44, 0.0  ;;  %v4215_v48 = vmax.f32 %v4138_v25, 0.0  ;;  %v4269_v30 = vpack.c.bf16 %v4208_v12, %v4206_v56  ;;  %vm468_vm7 = vcmp.eq.s32.totalorder %v12440_v17, %v7422_v0  ;;  %v12443_v56 = vld [vmem:[#allocation72_spill] sm:$0xff] }
 0x779   : > { %v4271_v47 = vpack.c.bf16 %v4212_v51, %v4210_v58  ;;  %v4209_v44 = vmax.f32 %v4130_v9, 0.0 }
 0x77a   : > { %v4276_v24 = vpack.c.bf16 %v4221_v55, %v4219_v31  ;;  %v4274_v39 = vpack.c.bf16 %v4217_v53, %v4215_v48  ;;  %v10029_v31 = vperm.slane %v3600_v32, 0  ;;  %v4034_v53 = vadd.f32 %v9637_v41, %v9950_v57  ;;  %v12441_v32 = vld [vmem:[#allocation137_spill] sm:$0xff] }
 0x77b   : > { %v10004_v18 = vpop.f32.mrf.mxu1  ;;  %v4204_v48 = vmax.f32 %v4036_v6, 0.0  ;;  %v12445_v6 = vld [vmem:[#allocation84_spill] sm:$0xff] }
 0x77c   : > { %v4202_v41 = vmax.f32 %v4034_v53, 0.0  ;;  %v3826_v10 = vadd.f32 %v10004_v18, %v10031_v50  ;;  %v3824_v18 = vadd.f32 %v9987_v21, %v10031_v50 }
 0x77d   : > { %v3739_v33 = vpop.f32.mrf.mxu0 }
 0x77e   : > { %4307 = vmatpush.bf16.xpose.msrb.mxu0 %v4277_v26  ;;  %v3740_v52 = vadd.f32 %v3739_v33, %v10029_v31  ;;  %v12438_v33 = vld [vmem:[#allocation113_spill] sm:$0xff] }
 0x77f   : > { %4320 = vmatpush.bf16.xpose.msrb.mxu1 %v4278_v2  ;;  %2548 = vperm.xlu1 %5697, %v9647_v38   ;;  %v4216_v38 = vmax.f32 %v4051_v22, 0.0  ;;  %v10024_v2 = vpop.permute.xlu1 %2380  ;;  %v4125_v22 = vadd.f32 %v9697_v13, %v9952_v8  ;;  %vm819_vm6 = vcmp.eq.s32.totalorder %v12438_v33, %v7422_v0 }
 0x780   : > { %v3901_v51 = vmax.f32 %v3740_v52, 0.0  ;;  %v979_v12 = vsel %vm819_vm6, %v12441_v32, 0.0 }
 0x781   : > { %v4273_v46 = vpack.c.bf16 %v4216_v38, %v4214_v63  ;;  %v4123_v63 = vadd.f32 %v9639_v27, %v9952_v8  ;;  %v4205_v61 = vmax.f32 %v4125_v22, 0.0  ;;  %v660_v22 = vsel %vm468_vm7, %v12445_v6, 0.0  ;;  %v12460_v6 = vld [vmem:[#allocation201_spill] sm:$0xff] }
 0x782   : > { %vm2097_vm7 = vcmp.eq.s32.totalorder %v9840_v29, %v7422_v0 }
 0x783   : > { %v4203_v34 = vmax.f32 %v4123_v63, 0.0 }
 0x785   : > { %v3741_v55 = vpop.f32.mrf.mxu0  ;;  %v4268_v58 = vpack.c.bf16 %v4205_v61, %v4203_v34 }
 0x786   : > { %4308 = vmatpush.bf16.xpose.msrb.mxu0 %v4275_v11  ;;  %v4270_v11 = vpack.c.bf16 %v4209_v44, %v4207_v19  ;;  %v3742_v25 = vadd.f32 %v3741_v55, %v10029_v31  ;;  %v12442_v44 = vld [vmem:[#allocation52_spill] sm:$0xff]  ;;  %v12444_v55 = vld [vmem:[#allocation81_spill] sm:$0xff] }
 0x787   : > { %4321 = vmatpush.bf16.xpose.msrb.mxu1 %v4276_v24  ;;  %5701 = vset.pattern.permute.xlu1 %v11738_v14  ;;  %v4213_v14 = vmax.f32 %v4135_v28, 0.0  ;;  %v12436_v24 = vld [vmem:[#allocation288_spill] sm:$0xff]  ;;  %v10048_v28 = vpop.permute.xlu1 %2383  ;;  %vm467_vm14 = vcmp.eq.s32.totalorder %v12442_v44, %v7422_v0 }
 0x788   : > { %2864 = vperm.xlu1 %5701, %v9856_v49   ;;  %v3828_v49 = vpop.f32.mrf.mxu1  ;;  %v10038_v37 = vmax.f32 %v12436_v24, 1.0  ;;  %v3900_v24 = vmax.f32 %v3826_v10, 0.0 }
 0x789   : > { %v4272_v26 = vpack.c.bf16 %v4213_v14, %v4211_v35  ;;  %v3829_v13 = vadd.f32 %v3828_v49, %v10031_v50  ;;  %v12437_v14 = vld [vmem:[#allocation53_spill] sm:$0xff]  ;;  %v4267_v49 = vpack.c.bf16 %v4204_v48, %v4202_v41  ;;  %v3737_v35 = vadd.f32 %v10002_v20, %v10029_v31  ;;  %v12451_v41 = vld [vmem:[#allocation142_spill] sm:$0xff] }
 0x78a   : > { %5754 = vrcp.f32 %v10038_v37  ;;  %vm466_vm8 = vcmp.eq.s32.totalorder %v12437_v14, %v7422_v0  ;;  %v3735_v20 = vadd.f32 %v9985_v23, %v10029_v31  ;;  %v12447_v23 = vld [vmem:[#allocation39_spill] sm:$0xff]  ;;  %v10094_v48 = vmax.f32 %v8931_v16, 1.0  ;;  %v12453_v14 = vld [vmem:[#allocation145_spill] sm:$0xff] }
 0x78b   : > { %v3902_v27 = vmax.f32 %v3829_v13, 0.0  ;;  %v658_v19 = vsel %vm466_vm8, %v12443_v56, 0.0  ;;  %vm818_vm9 = vcmp.eq.s32.totalorder %v12447_v23, %v7422_v0  ;;  %v3899_v21 = vmax.f32 %v3737_v35, 0.0  ;;  %v12450_v13 = vld [vmem:[#allocation164_spill] sm:$0xff]  ;;  %v12459_v56 = vld [vmem:[#allocation191_spill] sm:$0xff] }
 0x78c   : > { %vm1137_vm1 = vcmp.eq.s32.totalorder %v12450_v13, %v7422_v0  ;;  %v3821_v16 = vadd.f32 %v9971_v45, %v10031_v50  ;;  %5756 = vrcp.f32 %v10094_v48  ;;  %v3819_v45 = vadd.f32 %v9958_v59, %v10031_v50 }
 0x78d   : > { %vm3459_vm10 = vweird.f32 %v10038_v37 }
 0x78e   : > { %4309 = vmatpush.bf16.xpose.msrb.mxu0 %v4273_v46  ;;  %v10051_v46 = vpop.permute.xlu2 %2057 }
 0x78f   : > { %4322 = vmatpush.bf16.xpose.msrb.mxu1 %v4274_v39  ;;  %v3903_v39 = vmax.f32 %v3742_v25, 0.0  ;;  %v12448_v25 = vld [vmem:[#allocation112_spill] sm:$0xff]  ;;  %v10089_v52 = vpop.permute.xlu1 %2700 }
 0x790   : > { %v3830_v42 = vpop.f32.mrf.mxu1  ;;  %v10063_v43 = vpop.eup %5754  ;;  %vm817_vm15 = vcmp.eq.s32.totalorder %v12448_v25, %v7422_v0  ;;  %v3896_v25 = vmax.f32 %v3821_v16, 0.0  ;;  %v12464_v16 = vld [vmem:[#allocation257_spill] sm:$0xff] }
 0x791   : > { %v3831_v38 = vadd.f32 %v3830_v42, %v10031_v50  ;;  %v3952_v9 = vpack.c.bf16 %v3903_v39, %v3901_v51  ;;  %v3455_v63 = vmul.f32 %v10063_v43, %v10038_v37  ;;  %v3897_v39 = vmax.f32 %v3735_v20, 0.0  ;;  %v12452_v51 = vld [vmem:[#allocation144_spill] sm:$0xff] }
 0x792   : > { %v977_v34 = vsel %vm817_vm15, %v12451_v41, 0.0  ;;  %vm3460_vm3 = vweird.f32 %v10063_v43  ;;  %vm2417_vm15 = vcmp.eq.s32.totalorder %v9876_v40, %v7422_v0 }
 0x793   : > { %v3904_v54 = vmax.f32 %v3831_v38, 0.0  ;;  %v12449_v38 = vld [vmem:[#allocation115_spill] sm:$0xff]  ;;  %v3950_v35 = vpack.c.bf16 %v3899_v21, %v3897_v39  ;;  %v3456_v32 = vsub.f32 1.0, %v3455_v63  ;;  %v12461_v21 = vld [vmem:[#allocation213_spill] sm:$0xff]  ;;  %v10126_v63 = vmax.f32 %v9387_v3, 1.0  ;;  %vm10152_vm8 = vmor %vm3459_vm10, %vm3460_vm3 }
 0x794   : > { %vm820_vm0 = vcmp.eq.s32.totalorder %v12449_v38, %v7422_v0  ;;  %vm1458_vm5 = vcmp.eq.s32.totalorder %v12461_v21, %v7422_v0 }
 0x795   : > { %v980_v33 = vsel %vm820_vm0, %v12453_v14, 0.0  ;;  %v3457_v59 = vmul.f32 %v10063_v43, %v3456_v32  ;;  %5758 = vrcp.f32 %v10126_v63  ;;  %vm3489_vm3 = vweird.f32 %v10126_v63 }
 0x796   : > { %4310 = vmatpush.bf16.xpose.msrb.mxu0 %v4271_v47  ;;  %v3953_v47 = vpack.c.bf16 %v3904_v54, %v3902_v27  ;;  %v10096_v61 = vpop.permute.xlu2 %2063  ;;  %v3898_v54 = vmax.f32 %v3824_v18, 0.0  ;;  %v978_v27 = vsel %vm818_vm9, %v12452_v51, 0.0  ;;  %v1012_v44 = vadd.f32 %v980_v33, %v660_v22  ;;  %v10138_v51 = vpop.eup %5756 }
 0x797   : > { %4323 = vmatpush.bf16.xpose.msrb.mxu1 %v4272_v26  ;;  %v12439_v26 = vld [vmem:[#allocation35_spill] sm:$0xff]  ;;  %v1010_v23 = vadd.f32 %v978_v27, %v658_v19  ;;  %v3894_v19 = vmax.f32 %v3819_v45, 0.0  ;;  %v3727_v27 = vadd.f32 %v9940_v1, %v10029_v31  ;;  %v3463_v1 = vand.u32 2147483647, %v10038_v37 }
 0x798   : > { %vm465_vm12 = vcmp.eq.s32.totalorder %v12439_v26, %v7422_v0  ;;  %v3951_v10 = vpack.c.bf16 %v3900_v24, %v3898_v54  ;;  %v12457_v26 = vld [vmem:[#allocation199_spill] sm:$0xff]  ;;  %v3470_v32 = vmul.f32 %v10138_v51, %v10094_v48 }
 0x799   : > { %v657_v42 = vsel %vm465_vm12, %v12444_v55, 0.0  ;;  %v1297_v17 = vsel %vm1137_vm1, %v12457_v26, 0.0  ;;  %v12462_v54 = vld [vmem:[#allocation259_spill] sm:$0xff]  ;;  %v3949_v33 = vpack.c.bf16 %v3896_v25, %v3894_v19  ;;  %v12468_v26 = vld [vmem:[#allocation226_spill] sm:$0xff]  ;;  %vm10177_vm9 = vcmp.eq.f32.partialorder %v3463_v1, 8.507059e+37  ;;  %v12474_v19 = vld [vmem:[#allocation260_spill] sm:$0xff] }
 0x79a   : > { %v1009_v18 = vadd.f32 %v977_v34, %v657_v42  ;;  %v1618_v41 = vsel %vm1458_vm5, %v12462_v54, 0.0  ;;  %v10136_v34 = vmax.f32 %v8996_v5, 1.0  ;;  %v3458_v5 = vadd.f32 %v10063_v43, %v3457_v59  ;;  %v12475_v54 = vld [vmem:[#allocation98_spill] sm:$0xff] }
 0x79b   : > { %vm1459_vm12 = vcmp.eq.s32.totalorder %v12468_v26, %v7422_v0  ;;  %v10181_v29 = vpop.eup %5758  ;;  %vm1778_vm0 = vcmp.eq.s32.totalorder %v12475_v54, %v7422_v0  ;;  %vm3474_vm1 = vweird.f32 %v10094_v48 }
 0x79c   : > { %v1329_v38 = vadd.f32 %v1297_v17, %v1009_v18  ;;  %5760 = vrcp.f32 %v10136_v34  ;;  %v3462_v45 = vsel %vm10152_vm8, %v10063_v43, %v3458_v5  ;;  %v12472_v43 = vld [vmem:[#allocation64_spill] sm:$0xff] }
 0x79d   : > { %v3811_v25 = vadd.f32 %v12472_v43, %v10031_v50 }
 0x79e   : > { %4311 = vmatpush.bf16.xpose.msrb.mxu0 %v4269_v30  ;;  %v12446_v30 = vld [vmem:[#allocation85_spill] sm:$0xff]  ;;  %v10140_v3 = vpop.permute.xlu2 %2536 }
 0x79f   : > { %4324 = vmatpush.bf16.xpose.msrb.mxu1 %v4270_v11  ;;  %v659_v11 = vsel %vm467_vm14, %v12446_v30, 0.0  ;;  %v10128_v42 = vpop.xlane.xlu1 %3027  ;;  %v3888_v26 = vmax.f32 %v3811_v25, 0.0 }
 0x7a0   : > { %v1011_v53 = vadd.f32 %v979_v12, %v659_v11  ;;  %v12458_v12 = vld [vmem:[#allocation202_spill] sm:$0xff]  ;;  %v2209_v11 = vpop.permute.xlu0 %2208 }
 0x7a6   : > { %4312 = vmatpush.bf16.xpose.msrb.mxu0 %v4267_v49  ;;  %v12454_v49 = vld [vmem:[#allocation167_spill] sm:$0xff]  ;;  %v10208_v5 = vpop.permute.xlu2 %2703 }
 0x7a7   : > { %4325 = vmatpush.bf16.xpose.msrb.mxu1 %v4268_v58  ;;  %vm1140_vm11 = vcmp.eq.s32.totalorder %v12454_v49, %v7422_v0  ;;  %v3732_v58 = vadd.f32 %v9969_v15, %v10029_v31  ;;  %v3730_v15 = vadd.f32 %v9956_v62, %v10029_v31  ;;  %v12463_v49 = vld [vmem:[#allocation224_spill] sm:$0xff] }
 0x7a8   : > { %v1300_v20 = vsel %vm1140_vm11, %v12458_v12, 0.0  ;;  %vm1457_vm2 = vcmp.eq.s32.totalorder %v12463_v49, %v7422_v0  ;;  %v10167_v12 = vpop.permute.xlu0 %2220  ;;  %v12478_v49 = vld [vmem:[#allocation14_spill] sm:$0xff]  ;;  %vm3475_vm11 = vweird.f32 %v10138_v51 }
 0x7a9   : > { %v3895_v24 = vmax.f32 %v3732_v58, 0.0  ;;  %v10122_v62 = vadd.f32 %v1300_v20, %v1012_v44  ;;  %v3893_v39 = vmax.f32 %v3730_v15, 0.0  ;;  %v3465_v58 = vand.u32 2147483648, %v10038_v37  ;;  %v12469_v15 = vld [vmem:[#allocation301_spill] sm:$0xff] }
 0x7aa   : > { %vm1777_vm14 = vcmp.eq.s32.totalorder %v12469_v15, %v7422_v0 }
 0x7ab   : > { %v3948_v14 = vpack.c.bf16 %v3895_v24, %v3893_v39  ;;  %v3466_v20 = vor.u32 1.1754944e-38, %v3465_v58  ;;  %v3722_v24 = vadd.f32 %v9926_v7, %v10029_v31  ;;  %v10199_v7 = vpop.eup %5760  ;;  %v2577_v58 = vsel %vm2417_vm15, %v12478_v49, 0.0 }
 0x7ac   : > { %vm12502_vm15 = vcmask 523264  }
 0x7ae   : > { %4363 = vmatpush.bf16.xpose.msra.mxu0 %v3952_v9  ;;  %v12455_v9 = vld [vmem:[#allocation169_spill] sm:$0xff] }
 0x7af   : > { %4376 = vmatpush.bf16.xpose.msra.mxu1 %v3953_v47  ;;  %vm1139_vm4 = vcmp.eq.s32.totalorder %v12455_v9, %v7422_v0  ;;  %v12456_v47 = vld [vmem:[#allocation168_spill] sm:$0xff]  ;;  %v3814_v9 = vadd.f32 %v9936_v60, %v10031_v50  ;;  %v3891_v60 = vmax.f32 %v3727_v27, 0.0  ;;  %v12476_v27 = vld [vmem:[#allocation61_spill] sm:$0xff] }
 0x7b0   : > { %vm1138_vm13 = vcmp.eq.s32.totalorder %v12456_v47, %v7422_v0  ;;  %v1299_v30 = vsel %vm1139_vm4, %v12460_v6, 0.0  ;;  %v12467_v47 = vld [vmem:[#allocation227_spill] sm:$0xff]  ;;  %vm2098_vm4 = vcmp.eq.s32.totalorder %v10051_v46, %v7422_v0 }
 0x7b1   : > { %v1298_v55 = vsel %vm1138_vm13, %v12459_v56, 0.0  ;;  %v10130_v13 = vadd.f32 %v1299_v30, %v1011_v53  ;;  %v3816_v53 = vadd.f32 %v9942_v4, %v10031_v50  ;;  %v3725_v4 = vadd.f32 %v9934_v36, %v10029_v31  ;;  %vm10234_vm13 = vmor %vm3474_vm1, %vm3475_vm11 }
 0x7b2   : > { %v1330_v22 = vadd.f32 %v1298_v55, %v1010_v23  ;;  %vm1460_vm6 = vcmp.eq.s32.totalorder %v12467_v47, %v7422_v0  ;;  %v3890_v56 = vmax.f32 %v3814_v9, 0.0  ;;  %v3471_v30 = vsub.f32 1.0, %v3470_v32 }
 0x7b3   : > { %v3892_v36 = vmax.f32 %v3816_v53, 0.0  ;;  %v3889_v44 = vmax.f32 %v3725_v4, 0.0  ;;  %v2257_v23 = vsel %vm2097_vm7, %v2209_v11, 0.0  ;;  %v1620_v11 = vsel %vm1460_vm6, %v12474_v19, 0.0  ;;  %v12486_v19 = vld [vmem:[#allocation36_spill] sm:$0xff] }
 0x7b4   : > { %v1650_v17 = vadd.f32 %v1618_v41, %v1330_v22  ;;  %v12473_v22 = vld [vmem:[#allocation247_spill] sm:$0xff]  ;;  %v3485_v41 = vmul.f32 %v10181_v29, %v10126_v63  ;;  %v3720_v53 = vadd.f32 %v12476_v27, %v10029_v31  ;;  %v3478_v4 = vand.u32 2147483647, %v10094_v48 }
 0x7b5   : > { %v3947_v59 = vpack.c.bf16 %v3892_v36, %v3890_v56  ;;  %v1619_v39 = vsel %vm1459_vm12, %v12473_v22, 0.0  ;;  %v3480_v9 = vand.u32 2147483648, %v10094_v48  ;;  %v3887_v47 = vmax.f32 %v3722_v24, 0.0  ;;  %v12484_v24 = vld [vmem:[#allocation47_spill] sm:$0xff] }
 0x7b6   : > { %4364 = vmatpush.bf16.xpose.msra.mxu0 %v3950_v35  ;;  %v1617_v35 = vsel %vm1457_vm2, %v12464_v16, 0.0  ;;  %v3472_v16 = vmul.f32 %v10138_v51, %v3471_v30  ;;  %v10221_v32 = vmul.f32 %v10199_v7, %v10136_v34  ;;  %v3885_v15 = vmax.f32 %v3720_v53, 0.0  ;;  %v12488_v53 = vld [vmem:[#allocation54_spill] sm:$0xff] }
 0x7b7   : > { %4377 = vmatpush.bf16.xpose.msra.mxu1 %v3951_v10  ;;  %v1649_v37 = vadd.f32 %v1617_v35, %v1329_v38  ;;  %v1889_v18 = vpop.permute.xlu1 %1888  ;;  %v3946_v38 = vpack.c.bf16 %v3891_v60, %v3889_v44  ;;  %v10212_v35 = vpop.permute.xlu0 %2066  ;;  %v3467_v10 = vsel %vm10177_vm9, %v3466_v20, %v3462_v45  ;;  %v12479_v60 = vld [vmem:[#allocation63_spill] sm:$0xff]  ;;  %v3486_v20 = vsub.f32 1.0, %v3485_v41  ;;  %v12480_v44 = vld [vmem:[#allocation58_spill] sm:$0xff] }
 0x7b8   : > { %v1937_v6 = vsel %vm1777_vm14, %v1889_v18, 0.0  ;;  %v3717_v56 = vadd.f32 %v12480_v44, %v10029_v31  ;;  %v3473_v30 = vadd.f32 %v10138_v51, %v3472_v16  ;;  %v2258_v43 = vsel %vm2098_vm4, %v12484_v24, 0.0  ;;  %v12487_v41 = vld [vmem:[#allocation51_spill] sm:$0xff]  ;;  %v12494_v44 = vld [vmem:[#allocation48_spill] sm:$0xff] }
 0x7b9   : > { %v1969_v21 = vadd.f32 %v1937_v6, %v1649_v37  ;;  %v3944_v25 = vpack.c.bf16 %v3887_v47, %v3885_v15  ;;  %v10243_v22 = vadd.f32 %v1620_v11, %v10122_v62  ;;  %v3481_v54 = vor.u32 1.1754944e-38, %v3480_v9  ;;  %v12490_v47 = vld [vmem:[#allocation65_spill] sm:$0xff] }
 0x7ba   : > { %v3715_v27 = vadd.f32 %v12487_v41, %v10029_v31  ;;  %v3487_v62 = vmul.f32 %v10181_v29, %v3486_v20  ;;  %v3477_v11 = vsel %vm10234_vm13, %v10138_v51, %v3473_v30  ;;  %vm3479_vm10 = vcmp.eq.f32.partialorder %v3478_v4, 8.507059e+37  ;;  %v12491_v51 = vld [vmem:[#allocation304_spill] sm:$0xff] }
 0x7bb   : > { %v2289_v40 = vadd.f32 %v2257_v23, %v1969_v21  ;;  %v12483_v23 = vld [vmem:[#allocation60_spill] sm:$0xff]  ;;  %v3501_v49 = vsub.f32 1.0, %v10221_v32  ;;  %vm3490_vm2 = vweird.f32 %v10181_v29  ;;  %vm1780_vm8 = vcmp.eq.s32.totalorder %v12491_v51, %v7422_v0 }
 0x7bc   : > { %v3806_v21 = vadd.f32 %v12483_v23, %v10031_v50  ;;  %v3881_v4 = vmax.f32 %v3715_v27, 0.0  ;;  %vm2419_vm6 = vcmp.eq.s32.totalorder %v10024_v2, %v7422_v0  ;;  %v3488_v15 = vadd.f32 %v10181_v29, %v3487_v62  ;;  %vm10282_vm12 = vmor %vm3489_vm3, %vm3490_vm2 }
 0x7bd   : > { %v2609_v1 = vadd.f32 %v2577_v58, %v2289_v40  ;;  %v10249_v40 = vadd.f32 %v12486_v19, %v10029_v31  ;;  %v3883_v58 = vmax.f32 %v3717_v56, 0.0  ;;  %v3712_v56 = vadd.f32 %v12494_v44, %v10029_v31  ;;  %v12512_v44 = vld [vmem:[#allocation11_spill] sm:$0xff] }
 0x7be   : > { %4365 = vmatpush.bf16.xpose.msra.mxu0 %v3948_v14  ;;  %v12477_v14 = vld [vmem:[#allocation62_spill] sm:$0xff]  ;;  %v3884_v16 = vmax.f32 %v3806_v21, 0.0  ;;  %vm3504_vm7 = vweird.f32 %v10136_v34  ;;  %vm2739_vm14 = vcmp.eq.s32.totalorder %v10089_v52, %v7422_v0  ;;  %v3502_v19 = vmul.f32 %v10199_v7, %v3501_v49 }
 0x7bf   : > { %4378 = vmatpush.bf16.xpose.msra.mxu1 %v3949_v33  ;;  %v3809_v33 = vadd.f32 %v12477_v14, %v10031_v50  ;;  %v2929_v36 = vadd.f32 %v12479_v60, %v2609_v1  ;;  %v1893_v37 = vpop.permute.xlu1 %1892  ;;  %v3804_v14 = vadd.f32 %v12488_v53, %v10031_v50  ;;  %v3495_v1 = vand.u32 2147483648, %v10126_v63  ;;  %v10267_v9 = vpop.permute.xlu0 %2069 }
 0x7c0   : > { %v1938_v18 = vsel %vm1778_vm0, %v1893_v37, 0.0  ;;  %v3942_v46 = vpack.c.bf16 %v3883_v58, %v3881_v4  ;;  %vm12503_vm0 = vmmov %vm12502_vm15  ;;  %v3508_v2 = vand.u32 2147483647, %v10136_v34  ;;  %vm3505_vm4 = vweird.f32 %v10199_v7 }
 0x7c1   : > { %v3886_v45 = vmax.f32 %v3809_v33, 0.0  ;;  %v3570_v55 = vmul.f32 %v3467_v10, %v2929_v36  ;;  %v1970_v6 = vadd.f32 %v1938_v18, %v1650_v17  ;;  %v12485_v17 = vld [vmem:[#allocation309_spill] sm:$0xff]  ;;  %v10255_v33 = vpop.xlane.xlu2 %3030  ;;  %v3493_v10 = vand.u32 2147483647, %v10126_v63  ;;  %v12497_v63 = vld [vmem:[#allocation83_spill] sm:$0xff]  ;;  %vm12505_vm1 = vmmov %vm12503_vm0 }
 0x7c2   : > { %vm1779_vm5 = vcmp.eq.s32.totalorder %v12485_v17, %v7422_v0  ;;  %v3882_v32 = vmax.f32 %v3804_v14, 0.0  ;;  %v3482_v36 = vsel %vm3479_vm10, %v3481_v54, %v3477_v11  ;;  %v12504_v14 = vld [vmem:[#allocation7_spill] sm:$0xff]  ;;  %vm12506_vm11 = vmmov %vm12503_vm0  ;;  %v3510_v62 = vand.u32 2147483648, %v10136_v34  ;;  %v12519_v54 = vld [vmem:[#allocation56_spill] sm:$0xff] }
 0x7c3   : > { %v2290_v48 = vadd.f32 %v2258_v43, %v1970_v6  ;;  %v12495_v6 = vld [vmem:[#allocation49_spill] sm:$0xff]  ;;  %v3496_v43 = vor.u32 1.1754944e-38, %v3495_v1  ;;  %vm10308_vm9 = vcmp.eq.f32.partialorder %v3493_v10, 8.507059e+37  ;;  %vm2100_vm13 = vcmp.eq.s32.totalorder %v10096_v61, %v7422_v0  ;;  %vm10346_vm10 = vmor %vm3504_vm7, %vm3505_vm4 }
 0x7c4   : > { %v3801_v30 = vadd.f32 %v12495_v6, %v10031_v50  ;;  %v3943_v23 = vpack.c.bf16 %v3884_v16, %v3882_v32  ;;  %v3503_v61 = vadd.f32 %v10199_v7, %v3502_v19  ;;  %v2260_v51 = vsel %vm2100_vm13, %v10167_v12, 0.0  ;;  %v12510_v32 = vld [vmem:[#allocation30_spill] sm:$0xff]  ;;  %vm12517_vm7 = vmmov %vm12503_vm0  ;;  %v12518_v19 = vld [vmem:[#allocation116_spill] sm:$0xff] }
 0x7c5   : > { %vm2740_vm3 = vcmp.eq.s32.totalorder %v10208_v5, %v7422_v0  ;;  %vm3509_vm2 = vcmp.eq.f32.partialorder %v3508_v2, 8.507059e+37  ;;  %v3875_v18 = vmax.f32 %v10249_v40, 0.0 }
 0x7c6   : > { %4366 = vmatpush.bf16.xpose.msra.mxu0 %v3946_v38  ;;  %v3945_v38 = vpack.c.bf16 %v3888_v26, %v3886_v45  ;;  %v3880_v27 = vmax.f32 %v3801_v30, 0.0  ;;  %v3507_v12 = vsel %vm10346_vm10, %v10199_v7, %v3503_v61  ;;  %v10368_v7 = vmax.f32 %v10128_v42, 1.0 }
 0x7c7   : > { %4379 = vmatpush.bf16.xpose.msra.mxu1 %v3947_v59  ;;  %v1651_v59 = vadd.f32 %v1619_v39, %v10130_v13  ;;  %v12489_v13 = vld [vmem:[#allocation57_spill] sm:$0xff]  ;;  %v1897_v60 = vpop.permute.xlu1 %1896  ;;  %v2541_v16 = vpop.permute.xlu0 %2540  ;;  %vm2102_vm10 = vcmp.eq.s32.totalorder %v10267_v9, %v7422_v0 }
 0x7c8   : > { %v2610_v39 = vadd.f32 %v12489_v13, %v2290_v48  ;;  %v1939_v37 = vsel %vm1779_vm5, %v1897_v60, 0.0  ;;  %v2579_v48 = vsel %vm2419_vm6, %v10140_v3, 0.0  ;;  %v3879_v3 = vmax.f32 %v3712_v56, 0.0  ;;  %vm12515_vm6 = vmmov %vm12503_vm0  ;;  %v12528_v60 = vld [vmem:[#allocation172_spill] sm:$0xff] }
 0x7c9   : > { %v1971_v45 = vadd.f32 %v1939_v37, %v1651_v59  ;;  %v12499_v59 = vld [vmem:[#allocation46_spill] sm:$0xff]  ;;  %v10317_v53 = vpop.permute.xlu2 %1908  ;;  %vm2420_vm5 = vcmp.eq.s32.totalorder %v10048_v28, %v7422_v0  ;;  %v12511_v37 = vld [vmem:[#allocation31_spill] sm:$0xff]  ;;  %v2900_v56 = vsel %vm2740_vm3, %v12512_v44, 0.0 }
 0x7ca   : > { %v2930_v26 = vadd.f32 %v12490_v47, %v2610_v39  ;;  %v3799_v17 = vadd.f32 %v12499_v59, %v10031_v50  ;;  %v12507_v47 = vld [vmem:[#allocation37_spill] sm:$0xff]  ;;  %v2580_v34 = vsel %vm2420_vm5, %v2541_v16, 0.0  ;;  %v10363_v59 = vmax.f32 %v10255_v33, 1.0  ;;  %v4266_v33 = vld [vmem:[%s11260_s4 + $0x2] sm:$0x3] }
 0x7cb   : > { %v2291_v24 = vadd.f32 %v12497_v63, %v1971_v45  ;;  %4300 = vst [vmem:[#allocation1] ss:$9 sm:$0xff] %v4266_v33 }
 0x7cc   : > { %v3571_v20 = vmul.f32 %v3482_v36, %v2930_v26  ;;  %v3878_v49 = vmax.f32 %v3799_v17, 0.0  ;;  %v3796_v26 = vadd.f32 %v12507_v47, %v10031_v50  ;;  %v3705_v36 = vadd.f32 %v12510_v32, %v10029_v31  ;;  %v12527_v47 = vld [vmem:[#allocation16_spill] sm:$0xff] }
 0x7cd   : > { %v2611_v41 = vadd.f32 %v2579_v48, %v2291_v24  ;;  %5762 = vrcp.f32 %v10363_v59 }
 0x7ce   : > { %4367 = vmatpush.bf16.xpose.msra.mxu0 %v3944_v25  ;;  %v10293_v21 = vpack.c.bf16 %v3571_v20, %v3570_v55  ;;  %v12498_v25 = vld [vmem:[#allocation43_spill] sm:$0xff]  ;;  %v3492_v55 = vsel %vm10282_vm12, %v10181_v29, %v3488_v15  ;;  %v2899_v29 = vsel %vm2739_vm14, %v12504_v14, 0.0  ;;  %v3941_v4 = vpack.c.bf16 %v3880_v27, %v3878_v49  ;;  %vm12516_vm12 = vmmov %vm12503_vm0  ;;  %v12524_v49 = vld [vmem:[#allocation173_spill] sm:$0xff] }
 0x7cf   : > { %4380 = vmatpush.bf16.xpose.msra.mxu1 %v3945_v38  ;;  %v3710_v38 = vadd.f32 %v12498_v25, %v10029_v31  ;;  %v2931_v13 = vadd.f32 %v2899_v29, %v2611_v41  ;;  %v1901_v39 = vpop.permute.xlu1 %1900  ;;  %v3497_v52 = vsel %vm10308_vm9, %v3496_v43, %v3492_v55  ;;  %v3794_v20 = vadd.f32 %v12511_v37, %v10031_v50  ;;  %v12520_v41 = vld [vmem:[#allocation140_spill] sm:$0xff]  ;;  %v2387_v29 = vpop.permute.xlu0 %2386 }
 0x7d0   : > { %12496 = vst [vmem:[#allocation66_spill] sm:$0xff] %v10293_v21  ;;  %5349 = vmatmul.msk.bf16.gmra.mxu0 %vm12502_vm15, %v10293_v21  ;;  %5365 = vmatmul.msk.bf16.gmra.mxu1 %vm12503_vm0, %v10293_v21  ;;  %v1940_v58 = vsel %vm1780_vm8, %v1901_v39, 0.0  ;;  %v3511_v15 = vor.u32 1.1754944e-38, %v3510_v62  ;;  %v3876_v5 = vmax.f32 %v3796_v26, 0.0  ;;  %vm12514_vm8 = vmmov %vm12503_vm0  ;;  %5764 = vrcp.f32 %v10368_v7 }
 0x7d1   : > { %5413 = vmatmul.msk.bf16.gmra.mxu2 %vm12505_vm1, %v10293_v21  ;;  %5429 = vmatmul.msk.bf16.gmra.mxu3 %vm12506_vm11, %v10293_v21  ;;  %v3877_v11 = vmax.f32 %v3710_v38, 0.0  ;;  %v3572_v10 = vmul.f32 %v3497_v52, %v2931_v13  ;;  %v1972_v1 = vadd.f32 %v1940_v58, %v10243_v22  ;;  %v2229_v63 = vpop.permute.xlu2 %2228  ;;  %vm822_vm14 = vcmp.eq.s32.totalorder %v12518_v19, %v7422_v0  ;;  %v12522_v13 = vld [vmem:[#allocation87_spill] sm:$0xff] }
 0x7d2   : > { %v3512_v24 = vsel %vm3509_vm2, %v3511_v15, %v3507_v12  ;;  %vm469_vm9 = vcmp.eq.s32.totalorder %v12519_v54, %v7422_v0  ;;  %v982_v2 = vsel %vm822_vm14, %v12520_v41, 0.0  ;;  %vm1142_vm1 = vcmp.eq.s32.totalorder %v12524_v49, %v7422_v0  ;;  %v12525_v58 = vld [vmem:[#allocation75_spill] sm:$0xff]  ;;  %v12534_v12 = vld [vmem:[#allocation262_spill] sm:$0xff] }
 0x7d3   : > { %v3940_v28 = vpack.c.bf16 %v3879_v3, %v3877_v11  ;;  %v2292_v22 = vadd.f32 %v2260_v51, %v1972_v1  ;;  %v10385_v48 = vpop.eup %5762  ;;  %v12521_v3 = vld [vmem:[#allocation55_spill] sm:$0xff]  ;;  %v12523_v11 = vld [vmem:[#allocation38_spill] sm:$0xff]  ;;  %v661_v16 = vsel %vm469_vm9, %v12525_v58, 0.0  ;;  %v1302_v26 = vsel %vm1142_vm1, %v12527_v47, 0.0  ;;  %v12529_v51 = vld [vmem:[#allocation216_spill] sm:$0xff] }
 0x7d4   : > { %vm470_vm15 = vcmp.eq.s32.totalorder %v12521_v3, %v7422_v0  ;;  %v3530_v27 = vmul.f32 %v10385_v48, %v10363_v59  ;;  %vm821_vm0 = vcmp.eq.s32.totalorder %v12523_v11, %v7422_v0  ;;  %v12526_v1 = vld [vmem:[#allocation146_spill] sm:$0xff]  ;;  %vm1141_vm11 = vcmp.eq.s32.totalorder %v12528_v60, %v7422_v0  ;;  %v10453_v11 = vpop.f32.mrf.mxu1 }
 0x7d5   : > { %v2612_v45 = vadd.f32 %v2580_v34, %v2292_v22  ;;  %v662_v39 = vsel %vm470_vm15, %v12522_v13, 0.0  ;;  %v981_v61 = vsel %vm821_vm0, %v12526_v1, 0.0  ;;  %vm1461_vm4 = vcmp.eq.s32.totalorder %v12529_v51, %v7422_v0  ;;  %v12532_v22 = vld [vmem:[#allocation194_spill] sm:$0xff]  ;;  %12539 = vst [vmem:[#allocation74_spill] sm:$0xff] %v10453_v11 }
 0x7d6   : > { %4368 = vmatpush.bf16.xpose.msra.mxu0 %v3942_v46  ;;  %v3873_v46 = vmax.f32 %v3705_v36, 0.0  ;;  %v10389_v55 = vpop.eup %5764  ;;  %v1301_v32 = vsel %vm1141_vm11, %v12532_v22, 0.0  ;;  %v12533_v36 = vld [vmem:[#allocation250_spill] sm:$0xff]  ;;  %v1013_v34 = vadd.f32 %v981_v61, %v661_v16  ;;  %vm2101_vm2 = vcmp.eq.s32.totalorder %v10212_v35, %v7422_v0 }
 0x7d7   : > { %4381 = vmatpush.bf16.xpose.msra.mxu1 %v3943_v23  ;;  %v2932_v6 = vadd.f32 %v2900_v56, %v2612_v45  ;;  %v1905_v30 = vpop.permute.xlu1 %1904  ;;  %v3874_v23 = vmax.f32 %v3794_v20, 0.0  ;;  %v3515_v14 = vmul.f32 %v10389_v55, %v10368_v7  ;;  %v3531_v20 = vsub.f32 1.0, %v3530_v27  ;;  %v5434_v13 = vld [vmem:[%s11258_s2 + $0x10] sm:$0xf] }
 0x7d8   : > { %v3938_v25 = vpack.c.bf16 %v3875_v18, %v3873_v46  ;;  %v1621_v18 = vsel %vm1461_vm4, %v12534_v12, 0.0  ;;  %v1333_v44 = vadd.f32 %v1301_v32, %v1013_v34  ;;  %v2262_v46 = vsel %vm2102_vm10, %v2229_v63, 0.0  ;;  %v3937_v63 = vld [vmem:[%s11260_s4] sm:$0x3]  ;;  %v10471_v32 = vpop.f32.mrf.mxu2  ;;  %v4711_v34 = vld [vmem:[%s11260_s4 + $0x4] sm:$0x3] }
 0x7d9   : > { %v3573_v43 = vmul.f32 %v3512_v24, %v2932_v6  ;;  %v3939_v38 = vpack.c.bf16 %v3876_v5, %v3874_v23  ;;  %v10380_v40 = vpop.permute.xlu2 %2544  ;;  %v3516_v15 = vsub.f32 1.0, %v3515_v14  ;;  %v12535_v6 = vld [vmem:[#allocation24_spill] sm:$0xff]  ;;  %v3540_v27 = vand.u32 2147483648, %v10363_v59 }
 0x7da   : > { %vm1781_vm3 = vcmp.eq.s32.totalorder %v12535_v6, %v7422_v0  ;;  %v1653_v33 = vadd.f32 %v1621_v18, %v1333_v44  ;;  %vm3520_vm9 = vweird.f32 %v10389_v55  ;;  %vm3519_vm0 = vweird.f32 %v10368_v7  ;;  %v5458_v44 = vld [vmem:[%s11258_s2 + $0xd0] sm:$0xf]  ;;  %v5586_v6 = vld [vmem:[%s11258_s2 + $0xd4] sm:$0xf] }
 0x7db   : > { %v10365_v17 = vpack.c.bf16 %v3573_v43, %v3572_v10  ;;  %v1014_v10 = vadd.f32 %v982_v2, %v662_v39  ;;  %v1941_v23 = vsel %vm1781_vm3, %v1905_v30, 0.0  ;;  %v2710_v43 = vpop.permute.xlu0 %2709  ;;  %v10436_v30 = vld [vmem:[#allocation1 + $0x9] sm:$0xff]  ;;  %v3538_v39 = vand.u32 2147483647, %v10363_v59  ;;  %vm10458_vm1 = vmor %vm3519_vm0, %vm3520_vm9 }
 0x7dc   : > { %v1973_v35 = vadd.f32 %v1941_v23, %v1653_v33  ;;  %vm2742_vm14 = vcmp.eq.s32.totalorder %v2710_v43, %v7422_v0  ;;  %v3525_v16 = vand.u32 2147483648, %v10368_v7  ;;  %v3523_v1 = vand.u32 2147483647, %v10368_v7  ;;  %v5450_v43 = vld [vmem:[%s11258_s2 + $0x90] sm:$0xf] }
 0x7dd   : > { %12513 = vst [vmem:[#allocation71_spill] sm:$0xff] %v10365_v17  ;;  %v1334_v45 = vadd.f32 %v1302_v26, %v1014_v10  ;;  %v3541_v61 = vor.u32 1.1754944e-38, %v3540_v27  ;;  %vm3539_vm4 = vcmp.eq.f32.partialorder %v3538_v39, 8.507059e+37  ;;  %v5452_v33 = vld [vmem:[%s11258_s2 + $0xb0] sm:$0xf0] }
 0x7de   : > { %4369 = vmatpush.bf16.xpose.msra.mxu0 %v3940_v28  ;;  %v12530_v28 = vld [vmem:[#allocation228_spill] sm:$0xff]  ;;  %v3526_v51 = vor.u32 1.1754944e-38, %v3525_v16  ;;  %v5581_v39 = vld [vmem:[%s11258_s2 + $0x2c] sm:$0xf0] }
 0x7df   : > { %4382 = vmatpush.bf16.xpose.msra.mxu1 %v3941_v4  ;;  %vm1462_vm13 = vcmp.eq.s32.totalorder %v12530_v28, %v7422_v0  ;;  %v12531_v4 = vld [vmem:[#allocation17_spill] sm:$0xff]  ;;  %v5435_v16 = vor.u32 %v5581_v39, %v5434_v13 }
 0x7e0   : > { %5350 = vmatmul.msk.bf16.gmra.mxu0 %vm12514_vm8, %v10365_v17  ;;  %5366 = vmatmul.msk.bf16.gmra.mxu1 %vm12515_vm6, %v10365_v17  ;;  %v2225_v42 = vpop.permute.xlu1 %2224  ;;  %vm1782_vm5 = vcmp.eq.s32.totalorder %v12531_v4, %v7422_v0  ;;  %v1622_v37 = vsel %vm1462_vm13, %v12533_v36, 0.0  ;;  %vm3534_vm6 = vweird.f32 %v10363_v59  ;;  %vm3524_vm13 = vcmp.eq.f32.partialorder %v3523_v1, 8.507059e+37  ;;  %v12575_v13 = vld [vmem:[#allocation305_spill] sm:$0xff] }
 0x7e1   : > { %5414 = vmatmul.msk.bf16.gmra.mxu2 %vm12516_vm12, %v10365_v17  ;;  %5430 = vmatmul.msk.bf16.gmra.mxu3 %vm12517_vm7, %v10365_v17  ;;  %v10405_v52 = vpop.permute.xlu2 %2706  ;;  %v1942_v5 = vsel %vm1782_vm5, %v10317_v53, 0.0  ;;  %v1654_v56 = vadd.f32 %v1622_v37, %v1334_v45  ;;  %v10431_v53 = vld [vmem:[#allocation1] sm:$0xff]  ;;  %v2261_v19 = vsel %vm2101_vm2, %v2225_v42, 0.0  ;;  %vm3535_vm12 = vweird.f32 %v10385_v48  ;;  %v10496_v45 = vpop.f32.mrf.mxu2 }
 0x7e2   : > { %4358 = vst [vmem:[#allocation1] ss:$9 sm:$0xff] %v3937_v63  ;;  %vm2421_vm7 = vcmp.eq.s32.totalorder %v2387_v29, %v7422_v0  ;;  %v2293_v42 = vadd.f32 %v2261_v19, %v1973_v35  ;;  %vm10446_vm15 = vmor %vm3534_vm6, %vm3535_vm12  ;;  %v10451_v29 = vpop.f32.mrf.mxu0  ;;  %vm2741_vm11 = vcmp.eq.s32.totalorder %v10405_v52, %v7422_v0  ;;  %vm12545_vm5 = vcmask 523264   ;;  %v5583_v35 = vld [vmem:[%s11258_s2 + $0x6c] sm:$0xf0] }
 0x7e3   : > { %v1974_v9 = vadd.f32 %v1942_v5, %v1654_v56  ;;  %12538 = vst [vmem:[#allocation73_spill] sm:$0xff] %v10451_v29  ;;  %v2581_v49 = vsel %vm2421_vm7, %v10380_v40, 0.0  ;;  %vm12546_vm10 = vmmov %vm12545_vm5  ;;  %v5587_v56 = vld [vmem:[%s11258_s2 + $0xec] sm:$0xf0] }
 0x7e4   : > { %v2613_v47 = vadd.f32 %v2581_v49, %v2293_v42  ;;  %vm12549_vm3 = vmmov %vm12545_vm5  ;;  %v5459_v23 = vor.u32 %v5587_v56, %v5458_v44  ;;  %v5580_v49 = vld [vmem:[%s11258_s2 + $0x14] sm:$0xf]  ;;  %v12581_v29 = vld [vmem:[#allocation314_spill] sm:$0xff] }
 0x7e5   : > { %v2294_v41 = vadd.f32 %v2262_v46, %v1974_v9  ;;  %vm12550_vm2 = vmmov %vm12549_vm3  ;;  %v5460_v46 = vld [vmem:[%s11258_s2 + $0xf0] sm:$0xf0] }
 0x7e6   : > { %4370 = vmatpush.bf16.xpose.msra.mxu0 %v3938_v25  ;;  %v3532_v25 = vmul.f32 %v10385_v48, %v3531_v20  ;;  %vm12561_vm6 = vmmov %vm12550_vm2 }
 0x7e7   : > { %4383 = vmatpush.bf16.xpose.msra.mxu1 %v3939_v38  ;;  %v3517_v38 = vmul.f32 %v10389_v55, %v3516_v15  ;;  %vm12567_vm12 = vmmov %vm12550_vm2 }
 0x7e8   : > { %v3533_v3 = vadd.f32 %v10385_v48, %v3532_v25  ;;  %v5585_v25 = vld [vmem:[%s11258_s2 + $0xac] sm:$0xf0]  ;;  %vm12568_vm7 = vmmov %vm12550_vm2 }
 0x7e9   : > { %v2390_v62 = vpop.permute.xlu1 %2389  ;;  %v2869_v2 = vpop.permute.xlu2 %2868  ;;  %v3518_v14 = vadd.f32 %v10389_v55, %v3517_v38  ;;  %v10485_v52 = vld [vmem:[#allocation1] sm:$0xff]  ;;  %v10487_v15 = vld [vmem:[#allocation1 + $0x9] sm:$0xff]  ;;  %v5584_v38 = vld [vmem:[%s11258_s2 + $0x94] sm:$0xf]  ;;  %v5451_v19 = vor.u32 %v5585_v25, %v5450_v43 }
 0x7ea   : > { %vm2422_vm8 = vcmp.eq.s32.totalorder %v2390_v62, %v7422_v0  ;;  %v2902_v58 = vsel %vm2742_vm14, %v2869_v2, 0.0  ;;  %v3537_v59 = vsel %vm10446_vm15, %v10385_v48, %v3533_v3  ;;  %v10473_v48 = vpop.f32.mrf.mxu3  ;;  %v10477_v20 = vpop.f32.mrf.mxu0  ;;  %12547 = vst [vmem:[#allocation82_spill] sm:$0xff] %v10485_v52  ;;  %v5582_v2 = vld [vmem:[%s11258_s2 + $0x54] sm:$0xf]  ;;  %vm12573_vm14 = vmmov %vm12550_vm2 }
 0x7eb   : > { %v3522_v40 = vsel %vm10458_vm1, %v10389_v55, %v3518_v14  ;;  %v3542_v4 = vsel %vm3539_vm4, %v3541_v61, %v3537_v59  ;;  %12543 = vst [vmem:[#allocation77_spill] sm:$0xff] %v10477_v20  ;;  %v10479_v0 = vpop.f32.mrf.mxu1  ;;  %v10528_v9 = vpop.f32.mrf.mxu2  ;;  %v5444_v3 = vld [vmem:[%s11258_s2 + $0x70] sm:$0xf0]  ;;  %vm12574_vm9 = vmmov %vm12550_vm2 }
 0x7ec   : > { %v3527_v22 = vsel %vm3524_vm13, %v3526_v51, %v3522_v40  ;;  %12544 = vst [vmem:[#allocation79_spill] sm:$0xff] %v10479_v0  ;;  %vm12576_vm15 = vmmov %vm12550_vm2 }
 0x7ed   : > { %12548 = vst [vmem:[#allocation92_spill] sm:$0xff] %v10487_v15  ;;  %vm12577_vm0 = vmmov %vm12550_vm2 }
 0x7ee   : > { %4745 = vst [vmem:[#allocation1] ss:$9 sm:$0xff] %v4711_v34  ;;  %vm12579_vm1 = vmmov %vm12577_vm0 }
 0x7ef   : > { %vm12582_vm4 = vmmov %vm12577_vm0 }
 0x7f0   : > { %vm12583_vm13 = vmmov %vm12577_vm0 }
 0x7f1   : > { %v2549_v24 = vpop.permute.xlu1 %2548 }
 0x7f2   : > { %v2582_v54 = vsel %vm2422_vm8, %v2549_v24, 0.0  ;;  %v10498_v12 = vpop.f32.mrf.mxu3  ;;  %v10500_v18 = vpop.f32.mrf.mxu0  ;;  %v5463_v24 = vor.u32 %v5586_v6, %v5460_v46  ;;  %vm12560_vm8 = vmmov %vm12550_vm2  ;;  %v12566_v6 = vld [vmem:[#allocation287_spill] sm:$0xff] }
 0x7f3   : > { %v2614_v62 = vadd.f32 %v2582_v54, %v2294_v41  ;;  %12551 = vst [vmem:[#allocation95_spill] sm:$0xff] %v10500_v18  ;;  %v10502_v5 = vpop.f32.mrf.mxu1  ;;  %v5455_v54 = vor.u32 %v5584_v38, %v5452_v33  ;;  %v5442_v41 = vld [vmem:[%s11258_s2 + $0x50] sm:$0xf]  ;;  %v10562_v1 = vpop.f32.mrf.mxu2 }
 0x7f4   : > { %12552 = vst [vmem:[#allocation101_spill] sm:$0xff] %v10502_v5  ;;  %v5443_v42 = vor.u32 %v5583_v35, %v5442_v41 }
 0x7f5   : > { %v2934_v26 = vadd.f32 %v2902_v58, %v2614_v62  ;;  %v5447_v62 = vor.u32 %v5582_v2, %v5444_v3  ;;  %v5436_v58 = vld [vmem:[%s11258_s2 + $0x30] sm:$0xf0] }
 0x7f6   : > { %v5439_v10 = vor.u32 %v5580_v49, %v5436_v58 }
 0x7f7   : > { %v3575_v36 = vmul.f32 %v3542_v4, %v2934_v26  ;;  %v12559_v4 = vld [vmem:[#allocation15_spill] sm:$0xff] }
 0x7fa   : > { %v2865_v60 = vpop.permute.xlu1 %2864  ;;  %v10530_v63 = vpop.f32.mrf.mxu3 }
 0x7fb   : > { %v2901_v28 = vsel %vm2741_vm11, %v2865_v60, 0.0  ;;  %v10546_v27 = vpop.f32.mrf.mxu0  ;;  %v10548_v14 = vpop.f32.mrf.mxu1  ;;  %vm12580_vm11 = vmmov %vm12577_vm0 }
 0x7fc   : > { %v2933_v7 = vadd.f32 %v2901_v28, %v2613_v47  ;;  %12553 = vst [vmem:[#allocation111_spill] sm:$0xff] %v10546_v27  ;;  %v10572_v47 = vpop.f32.mrf.mxu2 }
 0x7fd   : > { %12554 = vst [vmem:[#allocation86_spill] sm:$0xff] %v10548_v14 }
 0x7fe   : > { %v3574_v37 = vmul.f32 %v3527_v22, %v2933_v7 }
 0x800   : > { %v10475_v55 = vpack.c.bf16 %v3575_v36, %v3574_v37 }
 0x802   : > { %12542 = vst [vmem:[#allocation76_spill] sm:$0xff] %v10475_v55  ;;  %5351 = vmatmul.msk.bf16.gmra.mxu0 %vm12545_vm5, %v10475_v55  ;;  %5367 = vmatmul.msk.bf16.gmra.mxu1 %vm12546_vm10, %v10475_v55  ;;  %v10564_v59 = vpop.f32.mrf.mxu3  ;;  %vm12585_vm5 = vmmov %vm12577_vm0 }
 0x803   : > { %5415 = vmatmul.msk.bf16.gmra.mxu2 %vm12549_vm3, %v10475_v55  ;;  %5431 = vmatmul.msk.bf16.gmra.mxu3 %vm12550_vm2, %v10475_v55  ;;  %v10566_v61 = vpop.f32.mrf.mxu0  ;;  %v10568_v40 = vpop.f32.mrf.mxu1  ;;  %vm12586_vm10 = vmmov %vm12577_vm0 }
 0x804   : > { %12555 = vst [vmem:[#allocation88_spill] sm:$0xff] %v10566_v61  ;;  %v10580_v28 = vpop.f32.mrf.mxu2  ;;  %vm12588_vm3 = vmmov %vm12577_vm0 }
 0x805   : > { %12556 = vst [vmem:[#allocation90_spill] sm:$0xff] %v10568_v40  ;;  %vm12589_vm2 = vmmov %vm12577_vm0 }
 0x80a   : > { %v10574_v26 = vpop.f32.mrf.mxu3 }
 0x80b   : > { %v10576_v60 = vpop.f32.mrf.mxu0  ;;  %v10578_v51 = vpop.f32.mrf.mxu1 }
 0x80c   : > { %12557 = vst [vmem:[#allocation104_spill] sm:$0xff] %v10576_v60  ;;  %v10592_v37 = vpop.f32.mrf.mxu2 }
 0x80d   : > { %12558 = vst [vmem:[#allocation91_spill] sm:$0xff] %v10578_v51 }
 0x812   : > { %4313 = vmatmul.bf16.vlgmr.msrb.gmra.mxu0 %v10431_v53  ;;  %4326 = vmatmul.bf16.vlgmr.msrb.gmra.mxu1 %v10436_v30  ;;  %v10582_v7 = vpop.f32.mrf.mxu3 }
 0x813   : > { %4473 = vmatpush.bf16.msrb.mxu0 %v5459_v23  ;;  %4562 = vmatpush.bf16.msrb.mxu1 %v5463_v24  ;;  %v10588_v22 = vpop.f32.mrf.mxu0  ;;  %v10590_v36 = vpop.f32.mrf.mxu1 }
 0x814   : > { %12562 = vst [vmem:[#allocation93_spill] sm:$0xff] %v10588_v22  ;;  %v10604_v46 = vpop.f32.mrf.mxu2 }
 0x815   : > { %12563 = vst [vmem:[#allocation94_spill] sm:$0xff] %v10590_v36 }
 0x817   : > { %4474 = vmatpush.bf16.msrb.mxu0 %v5451_v19  ;;  %4563 = vmatpush.bf16.msrb.mxu1 %v5455_v54  ;;  %v12572_v54 = vld [vmem:[#allocation317_spill] sm:$0xff] }
 0x81a   : > { %v10594_v34 = vpop.f32.mrf.mxu3 }
 0x81b   : > { %4475 = vmatpush.bf16.msrb.mxu0 %v5443_v42  ;;  %4564 = vmatpush.bf16.msrb.mxu1 %v5447_v62  ;;  %v10596_v44 = vpop.f32.mrf.mxu0  ;;  %v10598_v56 = vpop.f32.mrf.mxu1 }
 0x81c   : > { %12564 = vst [vmem:[#allocation97_spill] sm:$0xff] %v10596_v44  ;;  %v10612_v25 = vpop.f32.mrf.mxu2 }
 0x81d   : > { %12565 = vst [vmem:[#allocation114_spill] sm:$0xff] %v10598_v56 }
 0x81f   : > { %4476 = vmatpush.bf16.msrb.mxu0 %v5435_v16  ;;  %4565 = vmatpush.bf16.msrb.mxu1 %v5439_v10 }
 0x822   : > { %4371 = vmatmul.bf16.vlgmr.msra.gmra.mxu0 %v10485_v52  ;;  %4384 = vmatmul.bf16.vlgmr.msra.gmra.mxu1 %v10487_v15  ;;  %v10606_v23 = vpop.f32.mrf.mxu3 }
 0x823   : > { %v10608_v24 = vpop.f32.mrf.mxu0  ;;  %v10610_v43 = vpop.f32.mrf.mxu1 }
 0x824   : > { %12569 = vst [vmem:[#allocation119_spill] sm:$0xff] %v10608_v24  ;;  %v10624_v41 = vpop.f32.mrf.mxu2 }
 0x825   : > { %12570 = vst [vmem:[#allocation120_spill] sm:$0xff] %v10610_v43 }
 0x82a   : > { %v10614_v38 = vpop.f32.mrf.mxu3 }
 0x82b   : > { %v10616_v33 = vpop.f32.mrf.mxu0  ;;  %v10618_v19 = vpop.f32.mrf.mxu1 }
 0x82c   : > { %12571 = vst [vmem:[#allocation121_spill] sm:$0xff] %v10618_v19 }
 0x832   : > { %5464 = vmatmul.msk.bf16.vlgmr.msrb.gmra.mxu0 %vm12560_vm8, %v12559_v4  ;;  %5480 = vmatmul.msk.bf16.vlgmr.msrb.gmra.mxu1 %vm12561_vm6, %v12559_v4  ;;  %v10626_v35 = vpop.f32.mrf.mxu3  ;;  %vm12591_vm8 = vmmov %vm12577_vm0 }
 0x833   : > { %vm12592_vm6 = vmmov %vm12577_vm0 }
 0x842   : > { %5465 = vmatmul.msk.bf16.gmra.mxu0 %vm12567_vm12, %v12566_v6  ;;  %5481 = vmatmul.msk.bf16.gmra.mxu1 %vm12568_vm7, %v12566_v6  ;;  %v12578_v6 = vld [vmem:[#allocation154_spill] sm:$0xff]  ;;  %vm12594_vm12 = vmmov %vm12577_vm0 }
 0x843   : > { %vm12595_vm7 = vmmov %vm12577_vm0 }
 0x84d   : > { %v10628_v2 = vpop.f32.mrf.mxu0  ;;  %v10630_v3 = vpop.f32.mrf.mxu1 }
 0x852   : > { %5466 = vmatmul.msk.bf16.gmra.mxu0 %vm12573_vm14, %v12572_v54  ;;  %5482 = vmatmul.msk.bf16.gmra.mxu1 %vm12574_vm9, %v12572_v54  ;;  %vm12597_vm14 = vmmov %vm12577_vm0 }
 0x853   : > { %vm12598_vm9 = vmmov %vm12577_vm0 }
 0x854   : > { %v10632_v42 = vpop.f32.mrf.mxu2  ;;  %v10634_v62 = vpop.f32.mrf.mxu3 }
 0x855   : > { %v10640_v39 = vpop.f32.mrf.mxu0  ;;  %v10642_v49 = vpop.f32.mrf.mxu1 }
 0x85c   : > { %v4100_v58 = vpop.f32.mrf.mxu2  ;;  %v4189_v16 = vpop.f32.mrf.mxu3 }
 0x85d   : > { %v10644_v10 = vpop.f32.mrf.mxu0  ;;  %v10646_v54 = vpop.f32.mrf.mxu1 }
 0x862   : > { %5467 = vmatmul.msk.bf16.gmra.mxu0 %vm12576_vm15, %v12575_v13  ;;  %5483 = vmatmul.msk.bf16.gmra.mxu1 %vm12577_vm0, %v12575_v13  ;;  %vm12603_vm15 = vmmov %vm12577_vm0 }
 0x864   : > { %v4103_v4 = vpop.f32.mrf.mxu2  ;;  %v4192_v55 = vpop.f32.mrf.mxu3 }
 0x865   : > { %v10652_v17 = vpop.f32.mrf.mxu0  ;;  %v10654_v13 = vpop.f32.mrf.mxu1 }
 0x86c   : > { %v4105_v15 = vpop.f32.mrf.mxu2  ;;  %v4194_v52 = vpop.f32.mrf.mxu3 }
 0x872   : > { %5468 = vmatmul.msk.bf16.gmra.mxu0 %vm12579_vm1, %v12578_v6  ;;  %5484 = vmatmul.msk.bf16.gmra.mxu1 %vm12580_vm11, %v12578_v6  ;;  %vm12613_vm1 = vmmov %vm12577_vm0 }
 0x873   : > { %vm12614_vm11 = vmmov %vm12577_vm0 }
 0x87f   : > { %v3779_v21 = vpop.f32.mrf.mxu0  ;;  %v3868_v11 = vpop.f32.mrf.mxu1 }
 0x880   : > { %v3780_v0 = vadd.f32 %v3779_v21, %v10029_v31  ;;  %v3869_v6 = vadd.f32 %v3868_v11, %v10031_v50 }
 0x882   : > { %5469 = vmatmul.msk.bf16.gmra.mxu0 %vm12582_vm4, %v12581_v29  ;;  %5485 = vmatmul.msk.bf16.gmra.mxu1 %vm12583_vm13, %v12581_v29  ;;  %v3933_v61 = vmax.f32 %v3780_v0, 0.0  ;;  %v3934_v51 = vmax.f32 %v3869_v6, 0.0  ;;  %vm12624_vm4 = vmmov %vm12577_vm0 }
 0x883   : > { %vm12625_vm13 = vmmov %vm12577_vm0 }
 0x886   : > { %v4108_v20 = vpop.f32.mrf.mxu2  ;;  %v4197_v5 = vpop.f32.mrf.mxu3 }
 0x887   : > { %v3781_v18 = vpop.f32.mrf.mxu0  ;;  %v3870_v14 = vpop.f32.mrf.mxu1  ;;  %v4109_v21 = vadd.f32 %v4108_v20, %v9950_v57  ;;  %v4198_v11 = vadd.f32 %v4197_v5, %v9952_v8  ;;  %v4106_v20 = vadd.f32 %v4105_v15, %v9950_v57  ;;  %v4195_v5 = vadd.f32 %v4194_v52, %v9952_v8 }
 0x888   : > { %v3782_v27 = vadd.f32 %v3781_v18, %v10029_v31  ;;  %v3871_v40 = vadd.f32 %v3870_v14, %v10031_v50  ;;  %v4190_v15 = vadd.f32 %v4189_v16, %v9952_v8  ;;  %v12587_v16 = vld [vmem:[#allocation9_spill] sm:$0xff] }
 0x889   : > { %v4262_v6 = vmax.f32 %v4109_v21, 0.0 }
 0x88a   : > { %v3935_v60 = vmax.f32 %v3782_v27, 0.0  ;;  %v3936_v36 = vmax.f32 %v3871_v40, 0.0  ;;  %v4263_v27 = vmax.f32 %v4198_v11, 0.0 }
 0x88c   : > { %v10664_v22 = vpack.c.bf16 %v3935_v60, %v3933_v61  ;;  %v10666_v56 = vpack.c.bf16 %v3936_v36, %v3934_v51  ;;  %v12584_v60 = vld [vmem:[#allocation8_spill] sm:$0xff]  ;;  %v4104_v36 = vadd.f32 %v4103_v4, %v9950_v57 }
 0x88e   : > { %v4110_v29 = vpop.f32.mrf.mxu2  ;;  %v4199_v44 = vpop.f32.mrf.mxu3 }
 0x88f   : > { %v4111_v43 = vadd.f32 %v4110_v29, %v9950_v57  ;;  %v4200_v18 = vadd.f32 %v4199_v44, %v9952_v8  ;;  %v4314_v24 = vpop.f32.mrf.mxu0  ;;  %v4327_v14 = vpop.f32.mrf.mxu1  ;;  %v4193_v44 = vadd.f32 %v4192_v55, %v9952_v8  ;;  %v4188_v55 = vadd.f32 %v10634_v62, %v9952_v8 }
 0x890   : > { %v4328_v0 = vadd.f32 %v4327_v14, %v4314_v24  ;;  %v4260_v24 = vmax.f32 %v4106_v20, 0.0 }
 0x891   : > { %v4264_v40 = vmax.f32 %v4111_v43, 0.0  ;;  %v4265_v61 = vmax.f32 %v4200_v18, 0.0  ;;  %v4261_v43 = vmax.f32 %v4195_v5, 0.0  ;;  %v4258_v18 = vmax.f32 %v4104_v36, 0.0 }
 0x892   : > { %5470 = vmatmul.msk.bf16.gmra.mxu0 %vm12585_vm5, %v12584_v60  ;;  %5486 = vmatmul.msk.bf16.gmra.mxu1 %vm12586_vm10, %v12584_v60  ;;  %v4259_v14 = vmax.f32 %v4193_v44, 0.0  ;;  %v4101_v60 = vadd.f32 %v4100_v58, %v9950_v57  ;;  %vm12629_vm5 = vmmov %vm12577_vm0 }
 0x893   : > { %v4297_v29 = vpack.c.bf16 %v4264_v40, %v4262_v6  ;;  %v4298_v51 = vpack.c.bf16 %v4265_v61, %v4263_v27  ;;  %v4295_v19 = vpack.c.bf16 %v4260_v24, %v4258_v18  ;;  %v4099_v6 = vadd.f32 %v10632_v42, %v9950_v57  ;;  %vm12630_vm10 = vmmov %vm12577_vm0 }
 0x894   : > { %v4296_v52 = vpack.c.bf16 %v4261_v43, %v4259_v14  ;;  %v4256_v4 = vmax.f32 %v4101_v60, 0.0  ;;  %v4257_v27 = vmax.f32 %v4190_v15, 0.0  ;;  %v4096_v42 = vadd.f32 %v10624_v41, %v9950_v57 }
 0x895   : > { %4331 = vmatpush.bf16.xpose.msrb.mxu2 %v4297_v29  ;;  %4344 = vmatpush.bf16.xpose.msrb.mxu3 %v4298_v51  ;;  %v4254_v5 = vmax.f32 %v4099_v6, 0.0  ;;  %v4255_v29 = vmax.f32 %v4188_v55, 0.0  ;;  %v4183_v51 = vadd.f32 %v10614_v38, %v9952_v8  ;;  %v4091_v41 = vadd.f32 %v10604_v46, %v9950_v57  ;;  %v4423_v6 = vld [vmem:[%s11259_s3 + $0x4] sm:$0x3] }
 0x896   : > { %v4252_v36 = vmax.f32 %v4096_v42, 0.0  ;;  %v4178_v38 = vadd.f32 %v10594_v34, %v9952_v8  ;;  %v4086_v34 = vadd.f32 %v10580_v28, %v9950_v57  ;;  %v4173_v42 = vadd.f32 %v10574_v26, %v9952_v8 }
 0x897   : > { %v4316_v21 = vpop.f32.mrf.mxu0  ;;  %v4329_v11 = vpop.f32.mrf.mxu1  ;;  %v4293_v62 = vpack.c.bf16 %v4256_v4, %v4254_v5  ;;  %v4294_v60 = vpack.c.bf16 %v4257_v27, %v4255_v29  ;;  %v4248_v15 = vmax.f32 %v4091_v41, 0.0  ;;  %v10711_v27 = vperm.slane %v4423_v6, 0 }
 0x898   : > { %v4251_v11 = vmax.f32 %v4183_v51, 0.0  ;;  %v4084_v29 = vadd.f32 %v10572_v47, %v9950_v57  ;;  %v4170_v41 = vadd.f32 %v10564_v59, %v9952_v8 }
 0x89d   : > { %4332 = vmatpush.bf16.xpose.msrb.mxu2 %v4295_v19  ;;  %4345 = vmatpush.bf16.xpose.msrb.mxu3 %v4296_v52  ;;  %v4185_v19 = vadd.f32 %v10626_v35, %v9952_v8  ;;  %v4180_v35 = vadd.f32 %v10606_v23, %v9952_v8  ;;  %v4247_v23 = vmax.f32 %v4178_v38, 0.0  ;;  %v4079_v38 = vadd.f32 %v10528_v9, %v9950_v57 }
 0x89e   : > { %v4076_v9 = vadd.f32 %v10496_v45, %v9950_v57 }
 0x89f   : > { %v4372_v40 = vpop.f32.mrf.mxu0  ;;  %v4385_v61 = vpop.f32.mrf.mxu1  ;;  %v4253_v44 = vmax.f32 %v4185_v19, 0.0  ;;  %v4249_v52 = vmax.f32 %v4180_v35, 0.0 }
 0x8a0   : > { %v4373_v20 = vadd.f32 %v4372_v40, %v4328_v0  ;;  %v4094_v0 = vadd.f32 %v10612_v25, %v9950_v57  ;;  %v4089_v25 = vadd.f32 %v10592_v37, %v9950_v57  ;;  %v10713_v40 = vperm.slane %v4423_v6, 1  ;;  %v12590_v37 = vld [vmem:[#allocation18_spill] sm:$0xff] }
 0x8a1   : > { %v4292_v14 = vpack.c.bf16 %v4253_v44, %v4251_v11  ;;  %v4290_v5 = vpack.c.bf16 %v4249_v52, %v4247_v23  ;;  %v4242_v44 = vmax.f32 %v4084_v29, 0.0  ;;  %v4081_v11 = vadd.f32 %v10562_v1, %v9950_v57 }
 0x8a2   : > { %v10686_v58 = vadd.f32 %v4385_v61, %v4373_v20  ;;  %5471 = vmatmul.msk.bf16.gmra.mxu0 %vm12588_vm3, %v12587_v16  ;;  %5487 = vmatmul.msk.bf16.gmra.mxu1 %vm12589_vm2, %v12587_v16  ;;  %v4250_v21 = vmax.f32 %v4094_v0, 0.0  ;;  %v4246_v4 = vmax.f32 %v4089_v25, 0.0  ;;  %v4175_v61 = vadd.f32 %v10582_v7, %v9952_v8  ;;  %vm12632_vm3 = vmmov %vm12577_vm0 }
 0x8a3   : > { %v4240_v52 = vmax.f32 %v4081_v11, 0.0  ;;  %v4241_v6 = vmax.f32 %v4170_v41, 0.0  ;;  %vm12633_vm2 = vmmov %vm12577_vm0 }
 0x8a4   : > { %v4291_v18 = vpack.c.bf16 %v4252_v36, %v4250_v21  ;;  %v4289_v20 = vpack.c.bf16 %v4248_v15, %v4246_v4  ;;  %v4245_v0 = vmax.f32 %v4175_v61, 0.0  ;;  %v4168_v15 = vadd.f32 %v10530_v63, %v9952_v8  ;;  %v12593_v4 = vld [vmem:[#allocation19_spill] sm:$0xff] }
 0x8a5   : > { %4333 = vmatpush.bf16.xpose.msrb.mxu2 %v4293_v62  ;;  %4346 = vmatpush.bf16.xpose.msrb.mxu3 %v4294_v60  ;;  %v4244_v60 = vmax.f32 %v4086_v34, 0.0  ;;  %v4165_v63 = vadd.f32 %v10498_v12, %v9952_v8  ;;  %v4074_v61 = vadd.f32 %v10471_v32, %v9950_v57 }
 0x8a6   : > { %v4239_v59 = vmax.f32 %v4168_v15, 0.0  ;;  %v3859_v15 = vadd.f32 %v10630_v3, %v10031_v50 }
 0x8a7   : > { %v4374_v24 = vpop.f32.mrf.mxu0  ;;  %v4387_v43 = vpop.f32.mrf.mxu1  ;;  %v4287_v35 = vpack.c.bf16 %v4244_v60, %v4242_v44  ;;  %v3866_v44 = vadd.f32 %v10654_v13, %v10031_v50 }
 0x8a8   : > { %v4243_v24 = vmax.f32 %v4173_v42, 0.0  ;;  %v4286_v34 = vpack.c.bf16 %v4241_v6, %v4239_v59  ;;  %v4236_v42 = vmax.f32 %v4076_v9, 0.0  ;;  %v3926_v59 = vmax.f32 %v3859_v15, 0.0 }
 0x8a9   : > { %v3932_v13 = vmax.f32 %v3866_v44, 0.0 }
 0x8ad   : > { %4334 = vmatpush.bf16.xpose.msrb.mxu2 %v4291_v18  ;;  %4347 = vmatpush.bf16.xpose.msrb.mxu3 %v4292_v14  ;;  %v4288_v18 = vpack.c.bf16 %v4245_v0, %v4243_v24  ;;  %v4234_v0 = vmax.f32 %v4074_v61, 0.0 }
 0x8af   : > { %v4478_v46 = vpop.f32.mrf.mxu0  ;;  %v4567_v55 = vpop.f32.mrf.mxu1 }
 0x8b0   : > { %v4479_v19 = vadd.f32 %v4478_v46, %v10711_v27  ;;  %v4568_v62 = vadd.f32 %v4567_v55, %v10713_v40  ;;  %v4238_v55 = vmax.f32 %v4079_v38, 0.0  ;;  %v3770_v38 = vadd.f32 %v10628_v2, %v10029_v31 }
 0x8b2   : > { %5472 = vmatmul.msk.bf16.gmra.mxu0 %vm12591_vm8, %v12590_v37  ;;  %5488 = vmatmul.msk.bf16.gmra.mxu1 %vm12592_vm6, %v12590_v37  ;;  %v4647_v47 = vmax.f32 %v4479_v19, 0.0  ;;  %v4648_v43 = vmax.f32 %v4568_v62, 0.0  ;;  %v4285_v23 = vpack.c.bf16 %v4240_v52, %v4238_v55  ;;  %v4237_v19 = vmax.f32 %v4165_v63, 0.0  ;;  %vm12635_vm8 = vmmov %vm12577_vm0 }
 0x8b3   : > { %v3925_v55 = vmax.f32 %v3770_v38, 0.0  ;;  %vm12636_vm6 = vmmov %vm12577_vm0 }
 0x8b5   : > { %4335 = vmatpush.bf16.xpose.msrb.mxu2 %v4289_v20  ;;  %4348 = vmatpush.bf16.xpose.msrb.mxu3 %v4290_v5  ;;  %v4163_v20 = vadd.f32 %v10473_v48, %v9952_v8  ;;  %v4283_v48 = vpack.c.bf16 %v4236_v42, %v4234_v0 }
 0x8b7   : > { %v4480_v28 = vpop.f32.mrf.mxu0  ;;  %v4569_v51 = vpop.f32.mrf.mxu1 }
 0x8b8   : > { %v4481_v7 = vadd.f32 %v4480_v28, %v10711_v27  ;;  %v4570_v36 = vadd.f32 %v4569_v51, %v10713_v40  ;;  %v4235_v28 = vmax.f32 %v4163_v20, 0.0 }
 0x8ba   : > { %v4649_v21 = vmax.f32 %v4481_v7, 0.0  ;;  %v4650_v26 = vmax.f32 %v4570_v36, 0.0  ;;  %v4284_v7 = vpack.c.bf16 %v4237_v19, %v4235_v28  ;;  %v3777_v36 = vadd.f32 %v10652_v17, %v10029_v31  ;;  %v12600_v19 = vld [vmem:[#allocation119_spill] sm:$0xff] }
 0x8bc   : > { %v10735_v14 = vpack.c.bf16 %v4649_v21, %v4647_v47  ;;  %v10737_v25 = vpack.c.bf16 %v4650_v26, %v4648_v43  ;;  %v3775_v43 = vadd.f32 %v10644_v10, %v10029_v31  ;;  %v3864_v21 = vadd.f32 %v10646_v54, %v10031_v50 }
 0x8bd   : > { %4336 = vmatpush.bf16.xpose.msrb.mxu2 %v4287_v35  ;;  %4349 = vmatpush.bf16.xpose.msrb.mxu3 %v4288_v18  ;;  %v3931_v11 = vmax.f32 %v3777_v36, 0.0  ;;  %v12596_v18 = vld [vmem:[#allocation23_spill] sm:$0xff]  ;;  %v3772_v10 = vadd.f32 %v10640_v39, %v10029_v31 }
 0x8be   : > { %v3929_v41 = vmax.f32 %v3775_v43, 0.0  ;;  %v3930_v35 = vmax.f32 %v3864_v21, 0.0  ;;  %v12606_v21 = vld [vmem:[#allocation93_spill] sm:$0xff] }
 0x8bf   : > { %v4483_v1 = vpop.f32.mrf.mxu0  ;;  %v4572_v46 = vpop.f32.mrf.mxu1 }
 0x8c0   : > { %v4484_v5 = vadd.f32 %v4483_v1, %v10711_v27  ;;  %v4573_v29 = vadd.f32 %v4572_v46, %v10713_v40  ;;  %v3966_v54 = vpack.c.bf16 %v3931_v11, %v3929_v41  ;;  %v3927_v1 = vmax.f32 %v3772_v10, 0.0 }
 0x8c2   : > { %5473 = vmatmul.msk.bf16.gmra.mxu0 %vm12594_vm12, %v12593_v4  ;;  %5489 = vmatmul.msk.bf16.gmra.mxu1 %vm12595_vm7, %v12593_v4  ;;  %v4651_v57 = vmax.f32 %v4484_v5, 0.0  ;;  %v4652_v32 = vmax.f32 %v4573_v29, 0.0  ;;  %v3964_v20 = vpack.c.bf16 %v3927_v1, %v3925_v55  ;;  %vm12638_vm12 = vmmov %vm12577_vm0 }
 0x8c3   : > { %vm12639_vm7 = vmmov %vm12577_vm0 }
 0x8c5   : > { %4337 = vmatpush.bf16.xpose.msrb.mxu2 %v4285_v23  ;;  %4350 = vmatpush.bf16.xpose.msrb.mxu3 %v4286_v34  ;;  %v3767_v23 = vadd.f32 %v10616_v33, %v10029_v31  ;;  %v12599_v34 = vld [vmem:[#allocation121_spill] sm:$0xff] }
 0x8c6   : > { %v3856_v61 = vadd.f32 %v12599_v34, %v10031_v50  ;;  %v12611_v34 = vld [vmem:[#allocation90_spill] sm:$0xff] }
 0x8c7   : > { %v4485_v45 = vpop.f32.mrf.mxu0  ;;  %v4574_v62 = vpop.f32.mrf.mxu1  ;;  %v3923_v33 = vmax.f32 %v3767_v23, 0.0 }
 0x8c8   : > { %v4486_v12 = vadd.f32 %v4485_v45, %v10711_v27  ;;  %v4575_v60 = vadd.f32 %v4574_v62, %v10713_v40  ;;  %v3765_v45 = vadd.f32 %v12600_v19, %v10029_v31  ;;  %v12601_v62 = vld [vmem:[#allocation120_spill] sm:$0xff]  ;;  %v3924_v28 = vmax.f32 %v3856_v61, 0.0 }
 0x8c9   : > { %v3844_v61 = vadd.f32 %v12611_v34, %v10031_v50 }
 0x8ca   : > { %v4653_v51 = vmax.f32 %v4486_v12, 0.0  ;;  %v4654_v8 = vmax.f32 %v4575_v60, 0.0  ;;  %v3854_v12 = vadd.f32 %v12601_v62, %v10031_v50 }
 0x8cc   : > { %v10763_v24 = vpack.c.bf16 %v4653_v51, %v4651_v57  ;;  %v10765_v47 = vpack.c.bf16 %v4654_v8, %v4652_v32  ;;  %v3921_v57 = vmax.f32 %v3765_v45, 0.0  ;;  %v3922_v32 = vmax.f32 %v3854_v12, 0.0  ;;  %v12602_v51 = vld [vmem:[#allocation25_spill] sm:$0xff] }
 0x8cd   : > { %4338 = vmatpush.bf16.xpose.msrb.mxu2 %v4283_v48  ;;  %4351 = vmatpush.bf16.xpose.msrb.mxu3 %v4284_v7  ;;  %v12604_v8 = vld [vmem:[#allocation97_spill] sm:$0xff]  ;;  %v12605_v7 = vld [vmem:[#allocation114_spill] sm:$0xff]  ;;  %v3914_v12 = vmax.f32 %v3844_v61, 0.0 }
 0x8ce   : > { %v3762_v48 = vadd.f32 %v12604_v8, %v10029_v31  ;;  %v3851_v36 = vadd.f32 %v12605_v7, %v10031_v50  ;;  %v3962_v44 = vpack.c.bf16 %v3923_v33, %v3921_v57  ;;  %v3963_v43 = vpack.c.bf16 %v3924_v28, %v3922_v32  ;;  %v12616_v28 = vld [vmem:[#allocation86_spill] sm:$0xff] }
 0x8cf   : > { %v4488_v17 = vpop.f32.mrf.mxu0  ;;  %v4577_v26 = vpop.f32.mrf.mxu1  ;;  %v3841_v57 = vadd.f32 %v12616_v28, %v10031_v50 }
 0x8d0   : > { %v4489_v52 = vadd.f32 %v4488_v17, %v10711_v27  ;;  %v4578_v6 = vadd.f32 %v4577_v26, %v10713_v40  ;;  %v3760_v17 = vadd.f32 %v12606_v21, %v10029_v31  ;;  %v12607_v26 = vld [vmem:[#allocation94_spill] sm:$0xff] }
 0x8d1   : > { %v3849_v11 = vadd.f32 %v12607_v26, %v10031_v50  ;;  %v3912_v26 = vmax.f32 %v3841_v57, 0.0 }
 0x8d2   : > { %5474 = vmatmul.msk.bf16.gmra.mxu0 %vm12597_vm14, %v12596_v18  ;;  %5490 = vmatmul.msk.bf16.gmra.mxu1 %vm12598_vm9, %v12596_v18  ;;  %v4655_v2 = vmax.f32 %v4489_v52, 0.0  ;;  %v4656_v9 = vmax.f32 %v4578_v6, 0.0  ;;  %v3917_v15 = vmax.f32 %v3760_v17, 0.0  ;;  %vm12641_vm14 = vmmov %vm12577_vm0 }
 0x8d3   : > { %v3918_v52 = vmax.f32 %v3849_v11, 0.0  ;;  %vm12642_vm9 = vmmov %vm12577_vm0 }
 0x8d4   : > { %4339 = vmatmul.bf16.vlgmr.msrb.gmra.mxu2 %v10431_v53  ;;  %4352 = vmatmul.bf16.vlgmr.msrb.gmra.mxu3 %v10436_v30 }
 0x8d5   : > { %4389 = vmatpush.bf16.xpose.msra.mxu2 %v10664_v22  ;;  %4402 = vmatpush.bf16.xpose.msra.mxu3 %v10666_v56  ;;  %v3861_v22 = vadd.f32 %v10642_v49, %v10031_v50  ;;  %v3967_v56 = vpack.c.bf16 %v3932_v13, %v3930_v35 }
 0x8d7   : > { %v4490_v39 = vpop.f32.mrf.mxu0  ;;  %v4579_v49 = vpop.f32.mrf.mxu1  ;;  %v3928_v46 = vmax.f32 %v3861_v22, 0.0  ;;  %v3919_v22 = vmax.f32 %v3762_v48, 0.0  ;;  %v12617_v48 = vld [vmem:[#allocation95_spill] sm:$0xff] }
 0x8d8   : > { %v4491_v53 = vadd.f32 %v4490_v39, %v10711_v27  ;;  %v4580_v30 = vadd.f32 %v4579_v49, %v10713_v40  ;;  %v3750_v7 = vadd.f32 %v12617_v48, %v10029_v31 }
 0x8d9   : > { %v3965_v5 = vpack.c.bf16 %v3928_v46, %v3926_v59  ;;  %v12608_v46 = vld [vmem:[#allocation104_spill] sm:$0xff]  ;;  %v3960_v59 = vpack.c.bf16 %v3919_v22, %v3917_v15 }
 0x8da   : > { %v4657_v63 = vmax.f32 %v4491_v53, 0.0  ;;  %v4658_v3 = vmax.f32 %v4580_v30, 0.0  ;;  %v3757_v53 = vadd.f32 %v12608_v46, %v10029_v31  ;;  %v12609_v30 = vld [vmem:[#allocation91_spill] sm:$0xff]  ;;  %v3909_v11 = vmax.f32 %v3750_v7, 0.0 }
 0x8db   : > { %v3846_v55 = vadd.f32 %v12609_v30, %v10031_v50 }
 0x8dc   : > { %v10795_v29 = vpack.c.bf16 %v4657_v63, %v4655_v2  ;;  %v10797_v42 = vpack.c.bf16 %v4658_v3, %v4656_v9  ;;  %v12610_v3 = vld [vmem:[#allocation88_spill] sm:$0xff]  ;;  %v3915_v19 = vmax.f32 %v3757_v53, 0.0 }
 0x8dd   : > { %4390 = vmatpush.bf16.xpose.msra.mxu2 %v3966_v54  ;;  %4403 = vmatpush.bf16.xpose.msra.mxu3 %v3967_v56  ;;  %v3920_v54 = vmax.f32 %v3851_v36, 0.0  ;;  %v3755_v23 = vadd.f32 %v12610_v3, %v10029_v31  ;;  %v3916_v45 = vmax.f32 %v3846_v55, 0.0  ;;  %v12618_v36 = vld [vmem:[#allocation101_spill] sm:$0xff]  ;;  %v12623_v55 = vld [vmem:[#allocation66_spill] sm:$0xff] }
 0x8de   : > { %v12626_v3 = vld [vmem:[#allocation82_spill] sm:$0xff] }
 0x8df   : > { %v4493_v60 = vpop.f32.mrf.mxu0  ;;  %v4582_v0 = vpop.f32.mrf.mxu1  ;;  %v3961_v2 = vpack.c.bf16 %v3920_v54, %v3918_v52  ;;  %v3913_v62 = vmax.f32 %v3755_v23, 0.0  ;;  %v3959_v8 = vpack.c.bf16 %v3916_v45, %v3914_v12  ;;  %v12622_v52 = vld [vmem:[#allocation74_spill] sm:$0xff]  ;;  %v12627_v23 = vld [vmem:[#allocation92_spill] sm:$0xff] }
 0x8e0   : > { %v4494_v13 = vadd.f32 %v4493_v60, %v10711_v27  ;;  %v4583_v41 = vadd.f32 %v4582_v0, %v10713_v40  ;;  %v12612_v60 = vld [vmem:[#allocation42_spill] sm:$0xff]  ;;  %v12615_v0 = vld [vmem:[#allocation111_spill] sm:$0xff] }
 0x8e1   : > { %v3752_v33 = vadd.f32 %v12615_v0, %v10029_v31  ;;  %v3958_v32 = vpack.c.bf16 %v3915_v19, %v3913_v62  ;;  %v12628_v19 = vld [vmem:[#allocation71_spill] sm:$0xff] }
 0x8e2   : > { %5475 = vmatmul.msk.bf16.gmra.mxu0 %vm12603_vm15, %v12602_v51  ;;  %5491 = vmatmul.msk.bf16.gmra.mxu1 %vm12577_vm0, %v12602_v51  ;;  %v4659_v6 = vmax.f32 %v4494_v13, 0.0  ;;  %v4660_v39 = vmax.f32 %v4583_v41, 0.0  ;;  %v12619_v41 = vld [vmem:[#allocation77_spill] sm:$0xff]  ;;  %vm12644_vm15 = vmmov %vm12577_vm0 }
 0x8e3   : > { %v3911_v17 = vmax.f32 %v3752_v33, 0.0  ;;  %v12631_v33 = vld [vmem:[#allocation76_spill] sm:$0xff] }
 0x8e5   : > { %4391 = vmatpush.bf16.xpose.msra.mxu2 %v3964_v20  ;;  %4404 = vmatpush.bf16.xpose.msra.mxu3 %v3965_v5  ;;  %v3956_v54 = vpack.c.bf16 %v3911_v17, %v3909_v11 }
 0x8e7   : > { %v4495_v35 = vpop.f32.mrf.mxu0  ;;  %v4584_v10 = vpop.f32.mrf.mxu1 }
 0x8e8   : > { %v4496_v56 = vadd.f32 %v4495_v35, %v10711_v27  ;;  %v4585_v38 = vadd.f32 %v4584_v10, %v10713_v40  ;;  %v3747_v35 = vadd.f32 %v12619_v41, %v10029_v31  ;;  %v12620_v10 = vld [vmem:[#allocation79_spill] sm:$0xff] }
 0x8e9   : > { %v3836_v22 = vadd.f32 %v12620_v10, %v10031_v50 }
 0x8ea   : > { %v4661_v49 = vmax.f32 %v4496_v56, 0.0  ;;  %v4662_v1 = vmax.f32 %v4585_v38, 0.0  ;;  %v12621_v38 = vld [vmem:[#allocation73_spill] sm:$0xff] }
 0x8eb   : > { %v3745_v15 = vadd.f32 %v12621_v38, %v10029_v31  ;;  %v3908_v46 = vmax.f32 %v3836_v22, 0.0 }
 0x8ec   : > { %v10823_v9 = vpack.c.bf16 %v4661_v49, %v4659_v6  ;;  %v10825_v63 = vpack.c.bf16 %v4662_v1, %v4660_v39  ;;  %v3834_v6 = vadd.f32 %v12622_v52, %v10031_v50  ;;  %v3907_v1 = vmax.f32 %v3747_v35, 0.0 }
 0x8ed   : > { %4392 = vmatpush.bf16.xpose.msra.mxu2 %v3962_v44  ;;  %4405 = vmatpush.bf16.xpose.msra.mxu3 %v3963_v43  ;;  %v3839_v44 = vadd.f32 %v12618_v36, %v10031_v50  ;;  %v3905_v53 = vmax.f32 %v3745_v15, 0.0 }
 0x8ee   : > { %v3906_v30 = vmax.f32 %v3834_v6, 0.0 }
 0x8ef   : > { %v10831_v20 = vpop.f32.mrf.mxu0  ;;  %v10833_v5 = vpop.f32.mrf.mxu1  ;;  %v3910_v13 = vmax.f32 %v3839_v44, 0.0 }
 0x8f1   : > { %v3957_v56 = vpack.c.bf16 %v3912_v26, %v3910_v13 }
 0x8f2   : > { %5476 = vmatmul.msk.bf16.gmra.mxu0 %vm12613_vm1, %v12612_v60  ;;  %5492 = vmatmul.msk.bf16.gmra.mxu1 %vm12614_vm11, %v12612_v60  ;;  %vm12646_vm1 = vmmov %vm12577_vm0 }
 0x8f3   : > { %vm12647_vm11 = vmmov %vm12577_vm0 }
 0x8f5   : > { %4393 = vmatpush.bf16.xpose.msra.mxu2 %v3960_v59  ;;  %4406 = vmatpush.bf16.xpose.msra.mxu3 %v3961_v2  ;;  %v3954_v59 = vpack.c.bf16 %v3907_v1, %v3905_v53  ;;  %v3955_v2 = vpack.c.bf16 %v3908_v46, %v3906_v30 }
 0x8f7   : > { %v10847_v43 = vpop.f32.mrf.mxu0  ;;  %v10849_v21 = vpop.f32.mrf.mxu1 }
 0x8fd   : > { %4394 = vmatpush.bf16.xpose.msra.mxu2 %v3958_v32  ;;  %4407 = vmatpush.bf16.xpose.msra.mxu3 %v3959_v8 }
 0x8ff   : > { %v4503_v39 = vpop.f32.mrf.mxu0  ;;  %v4592_v49 = vpop.f32.mrf.mxu1 }
 0x902   : > { %5477 = vmatmul.msk.bf16.gmra.mxu0 %vm12624_vm4, %v12623_v55  ;;  %5493 = vmatmul.msk.bf16.gmra.mxu1 %vm12625_vm13, %v12623_v55  ;;  %vm12649_vm4 = vmmov %vm12577_vm0 }
 0x903   : > { %vm12650_vm13 = vmmov %vm12577_vm0 }
 0x905   : > { %4395 = vmatpush.bf16.xpose.msra.mxu2 %v3956_v54  ;;  %4408 = vmatpush.bf16.xpose.msra.mxu3 %v3957_v56 }
 0x907   : > { %v4505_v31 = vpop.f32.mrf.mxu0  ;;  %v4594_v50 = vpop.f32.mrf.mxu1 }
 0x908   : > { %v4506_v1 = vadd.f32 %v4505_v31, %v10711_v27  ;;  %v4595_v46 = vadd.f32 %v4594_v50, %v10713_v40 }
 0x90d   : > { %4396 = vmatpush.bf16.xpose.msra.mxu2 %v3954_v59  ;;  %4409 = vmatpush.bf16.xpose.msra.mxu3 %v3955_v2  ;;  %v4504_v59 = vadd.f32 %v4503_v39, %v10711_v27  ;;  %v4593_v2 = vadd.f32 %v4592_v49, %v10713_v40 }
 0x90f   : > { %v4508_v34 = vpop.f32.mrf.mxu0  ;;  %v4597_v61 = vpop.f32.mrf.mxu1 }
 0x910   : > { %v4509_v10 = vadd.f32 %v4508_v34, %v10711_v27  ;;  %v4598_v22 = vadd.f32 %v4597_v61, %v10713_v40 }
 0x912   : > { %5478 = vmatmul.msk.bf16.gmra.mxu0 %vm12629_vm5, %v12628_v19  ;;  %5494 = vmatmul.msk.bf16.gmra.mxu1 %vm12630_vm10, %v12628_v19  ;;  %v4671_v52 = vmax.f32 %v4509_v10, 0.0  ;;  %v4672_v6 = vmax.f32 %v4598_v22, 0.0  ;;  %vm12652_vm5 = vmmov %vm12577_vm0 }
 0x913   : > { %vm12653_vm10 = vmmov %vm12577_vm0 }
 0x914   : > { %4397 = vmatmul.bf16.vlgmr.msra.gmra.mxu2 %v12626_v3  ;;  %4410 = vmatmul.bf16.vlgmr.msra.gmra.mxu3 %v12627_v23 }
 0x917   : > { %v4510_v45 = vpop.f32.mrf.mxu0  ;;  %v4599_v62 = vpop.f32.mrf.mxu1 }
 0x918   : > { %v4511_v11 = vadd.f32 %v4510_v45, %v10711_v27  ;;  %v4600_v13 = vadd.f32 %v4599_v62, %v10713_v40  ;;  %v4669_v45 = vmax.f32 %v4506_v1, 0.0  ;;  %v4670_v62 = vmax.f32 %v4595_v46, 0.0 }
 0x91a   : > { %v4673_v38 = vmax.f32 %v4511_v11, 0.0  ;;  %v4674_v15 = vmax.f32 %v4600_v13, 0.0 }
 0x91c   : > { %v4724_v53 = vpack.c.bf16 %v4673_v38, %v4671_v52  ;;  %v4725_v30 = vpack.c.bf16 %v4674_v15, %v4672_v6 }
 0x91f   : > { %v4513_v12 = vpop.f32.mrf.mxu0  ;;  %v4602_v0 = vpop.f32.mrf.mxu1 }
 0x920   : > { %v4514_v28 = vadd.f32 %v4513_v12, %v10711_v27  ;;  %v4603_v57 = vadd.f32 %v4602_v0, %v10713_v40  ;;  %v4667_v12 = vmax.f32 %v4504_v59, 0.0  ;;  %v4668_v0 = vmax.f32 %v4593_v2, 0.0  ;;  %v10909_v59 = vld [vmem:[#allocation1] sm:$0xff]  ;;  %v10911_v2 = vld [vmem:[#allocation1 + $0x9] sm:$0xff] }
 0x922   : > { %5479 = vmatmul.msk.bf16.gmra.mxu0 %vm12632_vm3, %v12631_v33  ;;  %5495 = vmatmul.msk.bf16.gmra.mxu1 %vm12633_vm2, %v12631_v33  ;;  %v4675_v36 = vmax.f32 %v4514_v28, 0.0  ;;  %v4676_v44 = vmax.f32 %v4603_v57, 0.0  ;;  %vm12654_vm3 = vmmov %vm12577_vm0 }
 0x923   : > { %vm12655_vm2 = vmmov %vm12577_vm0 }
 0x927   : > { %v4515_v32 = vpop.f32.mrf.mxu0  ;;  %v4604_v8 = vpop.f32.mrf.mxu1 }
 0x928   : > { %v4516_v48 = vadd.f32 %v4515_v32, %v10711_v27  ;;  %v4605_v7 = vadd.f32 %v4604_v8, %v10713_v40  ;;  %v4501_v32 = vadd.f32 %v10847_v43, %v10711_v27  ;;  %v4590_v8 = vadd.f32 %v10849_v21, %v10713_v40 }
 0x92a   : > { %v4677_v17 = vmax.f32 %v4516_v48, 0.0  ;;  %v4678_v26 = vmax.f32 %v4605_v7, 0.0  ;;  %v4665_v43 = vmax.f32 %v4501_v32, 0.0 }
 0x92c   : > { %v4726_v41 = vpack.c.bf16 %v4677_v17, %v4675_v36  ;;  %v4727_v35 = vpack.c.bf16 %v4678_v26, %v4676_v44  ;;  %v4722_v36 = vpack.c.bf16 %v4669_v45, %v4667_v12  ;;  %v4723_v44 = vpack.c.bf16 %v4670_v62, %v4668_v0 }
 0x92d   : > { %v4499_v17 = vadd.f32 %v10831_v20, %v10711_v27  ;;  %v4588_v26 = vadd.f32 %v10833_v5, %v10713_v40 }
 0x92e   : > { %4750 = vmatpush.bf16.xpose.msrb.mxu2 %v4726_v41  ;;  %4763 = vmatpush.bf16.xpose.msrb.mxu3 %v4727_v35  ;;  %v4666_v41 = vmax.f32 %v4590_v8, 0.0 }
 0x92f   : > { %v4518_v54 = vpop.f32.mrf.mxu0  ;;  %v4607_v56 = vpop.f32.mrf.mxu1  ;;  %v4663_v35 = vmax.f32 %v4499_v17, 0.0  ;;  %v4664_v21 = vmax.f32 %v4588_v26, 0.0 }
 0x930   : > { %v4519_v3 = vadd.f32 %v4518_v54, %v10711_v27  ;;  %v4608_v23 = vadd.f32 %v4607_v56, %v10713_v40 }
 0x931   : > { %v4720_v10 = vpack.c.bf16 %v4665_v43, %v4663_v35  ;;  %v4721_v22 = vpack.c.bf16 %v4666_v41, %v4664_v21 }
 0x932   : > { %v4679_v28 = vmax.f32 %v4519_v3, 0.0  ;;  %v4680_v39 = vmax.f32 %v4608_v23, 0.0  ;;  %v5100_v3 = vld [vmem:[%s11260_s4 + $0x6] sm:$0x3] }
 0x933   : > { %5134 = vst [vmem:[#allocation1] ss:$9 sm:$0xff] %v5100_v3 }
 0x936   : > { %4751 = vmatpush.bf16.xpose.msrb.mxu2 %v4724_v53  ;;  %4764 = vmatpush.bf16.xpose.msrb.mxu3 %v4725_v30 }
 0x937   : > { %v4520_v34 = vpop.f32.mrf.mxu0  ;;  %v4609_v61 = vpop.f32.mrf.mxu1 }
 0x938   : > { %v4521_v31 = vadd.f32 %v4520_v34, %v10711_v27  ;;  %v4610_v50 = vadd.f32 %v4609_v61, %v10713_v40 }
 0x93a   : > { %v4681_v57 = vmax.f32 %v4521_v31, 0.0  ;;  %v4682_v49 = vmax.f32 %v4610_v50, 0.0 }
 0x93c   : > { %v10893_v48 = vpack.c.bf16 %v4681_v57, %v4679_v28  ;;  %v10895_v7 = vpack.c.bf16 %v4682_v49, %v4680_v39 }
 0x93e   : > { %4752 = vmatpush.bf16.xpose.msrb.mxu2 %v4722_v36  ;;  %4765 = vmatpush.bf16.xpose.msrb.mxu3 %v4723_v44 }
 0x93f   : > { %v4523_v11 = vpop.f32.mrf.mxu0  ;;  %v4612_v13 = vpop.f32.mrf.mxu1 }
 0x940   : > { %v4524_v54 = vadd.f32 %v4523_v11, %v10711_v27  ;;  %v4613_v56 = vadd.f32 %v4612_v13, %v10713_v40 }
 0x942   : > { %v4683_v52 = vmax.f32 %v4524_v54, 0.0  ;;  %v4684_v6 = vmax.f32 %v4613_v56, 0.0 }
 0x946   : > { %4753 = vmatpush.bf16.xpose.msrb.mxu2 %v4720_v10  ;;  %4766 = vmatpush.bf16.xpose.msrb.mxu3 %v4721_v22 }
 0x947   : > { %v4525_v20 = vpop.f32.mrf.mxu0  ;;  %v4614_v38 = vpop.f32.mrf.mxu1 }
 0x948   : > { %v4526_v5 = vadd.f32 %v4525_v20, %v10711_v27  ;;  %v4615_v15 = vadd.f32 %v4614_v38, %v10713_v40 }
 0x94a   : > { %v4685_v1 = vmax.f32 %v4526_v5, 0.0  ;;  %v4686_v46 = vmax.f32 %v4615_v15, 0.0 }
 0x94c   : > { %v10905_v53 = vpack.c.bf16 %v4685_v1, %v4683_v52  ;;  %v10907_v30 = vpack.c.bf16 %v4686_v46, %v4684_v6 }
 0x94e   : > { %4754 = vmatpush.bf16.xpose.msrb.mxu2 %v10823_v9  ;;  %4767 = vmatpush.bf16.xpose.msrb.mxu3 %v10825_v63 }
 0x94f   : > { %v4528_v23 = vpop.f32.mrf.mxu0  ;;  %v4617_v34 = vpop.f32.mrf.mxu1 }
 0x950   : > { %v4529_v61 = vadd.f32 %v4528_v23, %v10711_v27  ;;  %v4618_v45 = vadd.f32 %v4617_v34, %v10713_v40 }
 0x952   : > { %v4687_v9 = vmax.f32 %v4529_v61, 0.0  ;;  %v4688_v0 = vmax.f32 %v4618_v45, 0.0 }
 0x956   : > { %4755 = vmatpush.bf16.xpose.msrb.mxu2 %v10795_v29  ;;  %4768 = vmatpush.bf16.xpose.msrb.mxu3 %v10797_v42 }
 0x957   : > { %v4530_v62 = vpop.f32.mrf.mxu0  ;;  %v4619_v31 = vpop.f32.mrf.mxu1 }
 0x958   : > { %v4531_v50 = vadd.f32 %v4530_v62, %v10711_v27  ;;  %v4620_v12 = vadd.f32 %v4619_v31, %v10713_v40 }
 0x95a   : > { %v4689_v63 = vmax.f32 %v4531_v50, 0.0  ;;  %v4690_v28 = vmax.f32 %v4620_v12, 0.0 }
 0x95c   : > { %v10924_v39 = vpack.c.bf16 %v4689_v63, %v4687_v9  ;;  %v10926_v57 = vpack.c.bf16 %v4690_v28, %v4688_v0 }
 0x95e   : > { %4756 = vmatpush.bf16.xpose.msrb.mxu2 %v10763_v24  ;;  %4769 = vmatpush.bf16.xpose.msrb.mxu3 %v10765_v47 }
 0x95f   : > { %v4533_v29 = vpop.f32.mrf.mxu0  ;;  %v4622_v42 = vpop.f32.mrf.mxu1 }
 0x960   : > { %v4534_v49 = vadd.f32 %v4533_v29, %v10711_v27  ;;  %v4623_v32 = vadd.f32 %v4622_v42, %v10713_v40 }
 0x962   : > { %v4691_v26 = vmax.f32 %v4534_v49, 0.0  ;;  %v4692_v24 = vmax.f32 %v4623_v32, 0.0 }
 0x966   : > { %4757 = vmatpush.bf16.xpose.msrb.mxu2 %v10735_v14  ;;  %4770 = vmatpush.bf16.xpose.msrb.mxu3 %v10737_v25 }
 0x967   : > { %v4535_v8 = vpop.f32.mrf.mxu0  ;;  %v4624_v36 = vpop.f32.mrf.mxu1 }
 0x968   : > { %v4536_v44 = vadd.f32 %v4535_v8, %v10711_v27  ;;  %v4625_v17 = vadd.f32 %v4624_v36, %v10713_v40 }
 0x96a   : > { %v4693_v11 = vmax.f32 %v4536_v44, 0.0  ;;  %v4694_v47 = vmax.f32 %v4625_v17, 0.0 }
 0x96c   : > { %v10936_v13 = vpack.c.bf16 %v4693_v11, %v4691_v26  ;;  %v10938_v43 = vpack.c.bf16 %v4694_v47, %v4692_v24  ;;  %v4340_v11 = vpop.f32.mrf.mxu2  ;;  %v4353_v47 = vpop.f32.mrf.mxu3 }
 0x96d   : > { %4758 = vmatmul.bf16.vlgmr.msrb.gmra.mxu2 %v10909_v59  ;;  %4771 = vmatmul.bf16.vlgmr.msrb.gmra.mxu3 %v10911_v2 }
 0x96f   : > { %v4538_v14 = vpop.f32.mrf.mxu0  ;;  %v4627_v25 = vpop.f32.mrf.mxu1 }
 0x970   : > { %v4539_v41 = vadd.f32 %v4538_v14, %v10711_v27  ;;  %v4628_v35 = vadd.f32 %v4627_v25, %v10713_v40  ;;  %v4354_v14 = vadd.f32 %v4353_v47, %v4340_v11 }
 0x972   : > { %v4695_v56 = vmax.f32 %v4539_v41, 0.0  ;;  %v4696_v20 = vmax.f32 %v4628_v35, 0.0 }
 0x977   : > { %v4540_v21 = vpop.f32.mrf.mxu0  ;;  %v4629_v10 = vpop.f32.mrf.mxu1 }
 0x978   : > { %v4541_v22 = vadd.f32 %v4540_v21, %v10711_v27  ;;  %v4630_v54 = vadd.f32 %v4629_v10, %v10713_v40 }
 0x97a   : > { %v4697_v38 = vmax.f32 %v4541_v22, 0.0  ;;  %v4698_v5 = vmax.f32 %v4630_v54, 0.0 }
 0x97c   : > { %v4736_v15 = vpack.c.bf16 %v4697_v38, %v4695_v56  ;;  %v4737_v52 = vpack.c.bf16 %v4698_v5, %v4696_v20  ;;  %v4342_v5 = vpop.f32.mrf.mxu2 }
 0x97f   : > { %v4543_v6 = vpop.f32.mrf.mxu0  ;;  %v4632_v1 = vpop.f32.mrf.mxu1 }
 0x980   : > { %v4544_v20 = vadd.f32 %v4543_v6, %v10711_v27  ;;  %v4633_v38 = vadd.f32 %v4632_v1, %v10713_v40  ;;  %v5522_v6 = vld [vmem:[%s11258_s2 + $0xd8] sm:$0xf]  ;;  %v5516_v1 = vld [vmem:[%s11258_s2 + $0xb8] sm:$0xf0] }
 0x987   : > { %v4545_v46 = vpop.f32.mrf.mxu0  ;;  %v4634_v3 = vpop.f32.mrf.mxu1 }
 0x988   : > { %v4546_v10 = vadd.f32 %v4545_v46, %v10711_v27  ;;  %v4635_v22 = vadd.f32 %v4634_v3, %v10713_v40 }
 0x98f   : > { %v4548_v23 = vpop.f32.mrf.mxu0  ;;  %v4637_v34 = vpop.f32.mrf.mxu1 }
 0x990   : > { %v4549_v26 = vadd.f32 %v4548_v23, %v10711_v27  ;;  %v4638_v24 = vadd.f32 %v4637_v34, %v10713_v40  ;;  %v4355_v23 = vpop.f32.mrf.mxu3  ;;  %v4701_v34 = vmax.f32 %v4546_v10, 0.0  ;;  %v12648_v10 = vld [vmem:[#allocation314_spill] sm:$0xff] }
 0x992   : > { %v4703_v35 = vmax.f32 %v4549_v26, 0.0  ;;  %v4704_v21 = vmax.f32 %v4638_v24, 0.0 }
 0x997   : > { %v4550_v61 = vpop.f32.mrf.mxu0  ;;  %v4639_v45 = vpop.f32.mrf.mxu1 }
 0x998   : > { %v4551_v8 = vadd.f32 %v4550_v61, %v10711_v27  ;;  %v4640_v36 = vadd.f32 %v4639_v45, %v10713_v40  ;;  %v4702_v61 = vmax.f32 %v4635_v22, 0.0  ;;  %v4699_v45 = vmax.f32 %v4544_v20, 0.0  ;;  %v4398_v46 = vpop.f32.mrf.mxu2  ;;  %v4411_v3 = vpop.f32.mrf.mxu3  ;;  %v12651_v22 = vld [vmem:[#allocation8_spill] sm:$0xff] }
 0x99a   : > { %v4705_v25 = vmax.f32 %v4551_v8, 0.0  ;;  %v4706_v41 = vmax.f32 %v4640_v36, 0.0  ;;  %v5589_v8 = vld [vmem:[%s11258_s2 + $0x34] sm:$0xf0]  ;;  %v5588_v36 = vld [vmem:[%s11258_s2 + $0x1c] sm:$0xf] }
 0x99c   : > { %v4740_v54 = vpack.c.bf16 %v4705_v25, %v4703_v35  ;;  %v4741_v56 = vpack.c.bf16 %v4706_v41, %v4704_v21  ;;  %v12634_v35 = vld [vmem:[#allocation15_spill] sm:$0xff]  ;;  %v12645_v21 = vld [vmem:[#allocation154_spill] sm:$0xff] }
 0x99f   : > { %v4553_v62 = vpop.f32.mrf.mxu0  ;;  %v4642_v31 = vpop.f32.mrf.mxu1 }
 0x9a0   : > { %v4554_v50 = vadd.f32 %v4553_v62, %v10711_v27  ;;  %v4643_v12 = vadd.f32 %v4642_v31, %v10713_v40  ;;  %v4700_v62 = vmax.f32 %v4633_v38, 0.0  ;;  %v4738_v31 = vpack.c.bf16 %v4701_v34, %v4699_v45  ;;  %v4812_v34 = vld [vmem:[%s11259_s3 + $0x6] sm:$0x3] }
 0x9a1   : > { %v11063_v45 = vperm.slane %v4812_v34, 0 }
 0x9a2   : > { %v4707_v29 = vmax.f32 %v4554_v50, 0.0  ;;  %v4708_v42 = vmax.f32 %v4643_v12, 0.0  ;;  %v4739_v50 = vpack.c.bf16 %v4702_v61, %v4700_v62  ;;  %v4399_v12 = vadd.f32 %v4398_v46, %v4354_v14 }
 0x9a3   : > { %v11065_v62 = vperm.slane %v4812_v34, 1 }
 0x9a7   : > { %v4555_v9 = vpop.f32.mrf.mxu0  ;;  %v4644_v0 = vpop.f32.mrf.mxu1 }
 0x9a8   : > { %v4556_v63 = vadd.f32 %v4555_v9, %v10711_v27  ;;  %v4645_v28 = vadd.f32 %v4644_v0, %v10713_v40  ;;  %v10958_v9 = vadd.f32 %v4411_v3, %v4399_v12  ;;  %v4400_v27 = vpop.f32.mrf.mxu2  ;;  %v4413_v40 = vpop.f32.mrf.mxu3 }
 0x9aa   : > { %v4709_v49 = vmax.f32 %v4556_v63, 0.0  ;;  %v4710_v32 = vmax.f32 %v4645_v28, 0.0  ;;  %v5506_v28 = vld [vmem:[%s11258_s2 + $0x58] sm:$0xf] }
 0x9ac   : > { %v4742_v44 = vpack.c.bf16 %v4709_v49, %v4707_v29  ;;  %v4743_v17 = vpack.c.bf16 %v4710_v32, %v4708_v42  ;;  %v5591_v29 = vld [vmem:[%s11258_s2 + $0x74] sm:$0xf0]  ;;  %v5590_v42 = vld [vmem:[%s11258_s2 + $0x5c] sm:$0xf] }
 0x9ad   : > { %v5498_v32 = vld [vmem:[%s11258_s2 + $0x18] sm:$0xf] }
 0x9ae   : > { %4776 = vmatpush.bf16.xpose.msra.mxu2 %v4742_v44  ;;  %4789 = vmatpush.bf16.xpose.msra.mxu3 %v4743_v17  ;;  %v5500_v44 = vld [vmem:[%s11258_s2 + $0x38] sm:$0xf0]  ;;  %v5499_v17 = vor.u32 %v5589_v8, %v5498_v32 }
 0x9af   : > { %v5503_v26 = vor.u32 %v5588_v36, %v5500_v44 }
 0x9b6   : > { %4777 = vmatpush.bf16.xpose.msra.mxu2 %v4740_v54  ;;  %4790 = vmatpush.bf16.xpose.msra.mxu3 %v4741_v56 }
 0x9be   : > { %4778 = vmatpush.bf16.xpose.msra.mxu2 %v4738_v31  ;;  %4791 = vmatpush.bf16.xpose.msra.mxu3 %v4739_v50 }
 0x9c6   : > { %4779 = vmatpush.bf16.xpose.msra.mxu2 %v4736_v15  ;;  %4792 = vmatpush.bf16.xpose.msra.mxu3 %v4737_v52  ;;  %v5595_v15 = vld [vmem:[%s11258_s2 + $0xf4] sm:$0xf0]  ;;  %v5592_v52 = vld [vmem:[%s11258_s2 + $0x9c] sm:$0xf] }
 0x9c7   : > { %v5519_v63 = vor.u32 %v5592_v52, %v5516_v1 }
 0x9ce   : > { %4780 = vmatpush.bf16.xpose.msra.mxu2 %v10936_v13  ;;  %4793 = vmatpush.bf16.xpose.msra.mxu3 %v10938_v43  ;;  %v5594_v13 = vld [vmem:[%s11258_s2 + $0xdc] sm:$0xf]  ;;  %v5593_v43 = vld [vmem:[%s11258_s2 + $0xb4] sm:$0xf0] }
 0x9d6   : > { %4781 = vmatpush.bf16.xpose.msra.mxu2 %v10924_v39  ;;  %4794 = vmatpush.bf16.xpose.msra.mxu3 %v10926_v57  ;;  %v5524_v39 = vld [vmem:[%s11258_s2 + $0xf8] sm:$0xf0]  ;;  %v5523_v57 = vor.u32 %v5595_v15, %v5522_v6 }
 0x9de   : > { %4782 = vmatpush.bf16.xpose.msra.mxu2 %v10905_v53  ;;  %4795 = vmatpush.bf16.xpose.msra.mxu3 %v10907_v30  ;;  %v5527_v53 = vor.u32 %v5594_v13, %v5524_v39  ;;  %v5514_v30 = vld [vmem:[%s11258_s2 + $0x98] sm:$0xf] }
 0x9df   : > { %v5515_v0 = vor.u32 %v5593_v43, %v5514_v30 }
 0x9e6   : > { %4783 = vmatpush.bf16.xpose.msra.mxu2 %v10893_v48  ;;  %4796 = vmatpush.bf16.xpose.msra.mxu3 %v10895_v7  ;;  %v5508_v48 = vld [vmem:[%s11258_s2 + $0x78] sm:$0xf0]  ;;  %v5507_v7 = vor.u32 %v5591_v29, %v5506_v28 }
 0x9e7   : > { %v5511_v49 = vor.u32 %v5590_v42, %v5508_v48 }
 0x9ed   : > { %4784 = vmatmul.bf16.vlgmr.msra.gmra.mxu2 %v10909_v59  ;;  %4797 = vmatmul.bf16.vlgmr.msra.gmra.mxu3 %v10911_v2  ;;  %v12637_v59 = vld [vmem:[#allocation287_spill] sm:$0xff]  ;;  %v12640_v2 = vld [vmem:[#allocation317_spill] sm:$0xff] }
 0x9ee   : > { %4862 = vmatpush.bf16.msrb.mxu2 %v5523_v57  ;;  %4951 = vmatpush.bf16.msrb.mxu3 %v5527_v53 }
 0x9f0   : > { %v4759_v24 = vpop.f32.mrf.mxu2  ;;  %v4772_v11 = vpop.f32.mrf.mxu3 }
 0x9f1   : > { %v4773_v47 = vadd.f32 %v4772_v11, %v4759_v24 }
 0x9f2   : > { %4863 = vmatpush.bf16.msrb.mxu2 %v5515_v0  ;;  %4952 = vmatpush.bf16.msrb.mxu3 %v5519_v63 }
 0x9f3   : > { %v11019_v14 = vadd.f32 %v4773_v47, %v10686_v58  ;;  %v12643_v58 = vld [vmem:[#allocation305_spill] sm:$0xff] }
 0x9f6   : > { %4864 = vmatpush.bf16.msrb.mxu2 %v5507_v7  ;;  %4953 = vmatpush.bf16.msrb.mxu3 %v5511_v49 }
 0x9f8   : > { %v4761_v25 = vpop.f32.mrf.mxu2  ;;  %v4774_v41 = vpop.f32.mrf.mxu3 }
 0x9fa   : > { %4865 = vmatpush.bf16.msrb.mxu2 %v5499_v17  ;;  %4954 = vmatpush.bf16.msrb.mxu3 %v5503_v26 }
 0x9fd   : > { %5528 = vmatmul.msk.bf16.vlgmr.msrb.gmra.mxu2 %vm12635_vm8, %v12634_v35  ;;  %5544 = vmatmul.msk.bf16.vlgmr.msrb.gmra.mxu3 %vm12636_vm6, %v12634_v35  ;;  %vm12656_vm8 = vmmov %vm12577_vm0 }
 0x9fe   : > { %vm12657_vm6 = vmmov %vm12577_vm0 }
 0xa0d   : > { %5529 = vmatmul.msk.bf16.gmra.mxu2 %vm12638_vm12, %v12637_v59  ;;  %5545 = vmatmul.msk.bf16.gmra.mxu3 %vm12639_vm7, %v12637_v59  ;;  %vm12658_vm12 = vmmov %vm12577_vm0 }
 0xa0e   : > { %vm12659_vm7 = vmmov %vm12577_vm0 }
 0xa1d   : > { %5530 = vmatmul.msk.bf16.gmra.mxu2 %vm12641_vm14, %v12640_v2  ;;  %5546 = vmatmul.msk.bf16.gmra.mxu3 %vm12642_vm9, %v12640_v2  ;;  %vm12660_vm14 = vmmov %vm12577_vm0 }
 0xa1e   : > { %vm12661_vm9 = vmmov %vm12577_vm0 }
 0xa2d   : > { %5531 = vmatmul.msk.bf16.gmra.mxu2 %vm12644_vm15, %v12643_v58  ;;  %5547 = vmatmul.msk.bf16.gmra.mxu3 %vm12577_vm0, %v12643_v58  ;;  %vm12662_vm15 = vmmov %vm12577_vm0 }
 0xa3d   : > { %5532 = vmatmul.msk.bf16.gmra.mxu2 %vm12646_vm1, %v12645_v21  ;;  %5548 = vmatmul.msk.bf16.gmra.mxu3 %vm12647_vm11, %v12645_v21  ;;  %vm12663_vm1 = vmmov %vm12577_vm0 }
 0xa3e   : > { %vm12664_vm11 = vmmov %vm12577_vm0 }
 0xa4d   : > { %5533 = vmatmul.msk.bf16.gmra.mxu2 %vm12649_vm4, %v12648_v10  ;;  %5549 = vmatmul.msk.bf16.gmra.mxu3 %vm12650_vm13, %v12648_v10  ;;  %vm12665_vm4 = vmmov %vm12577_vm0 }
 0xa4e   : > { %vm12666_vm13 = vmmov %vm12577_vm0 }
 0xa5d   : > { %5534 = vmatmul.msk.bf16.gmra.mxu2 %vm12652_vm5, %v12651_v22  ;;  %5550 = vmatmul.msk.bf16.gmra.mxu3 %vm12653_vm10, %v12651_v22  ;;  %vm12667_vm5 = vmmov %vm12577_vm0 }
 0xa5e   : > { %vm12668_vm10 = vmmov %vm12577_vm0 }
 0xa6d   : > { %5535 = vmatmul.msk.bf16.gmra.mxu2 %vm12654_vm3, %v12587_v16  ;;  %5551 = vmatmul.msk.bf16.gmra.mxu3 %vm12655_vm2, %v12587_v16  ;;  %vm12669_vm3 = vmmov %vm12577_vm0 }
 0xa6e   : > { %vm12670_vm2 = vmmov %vm12577_vm0 }
 0xa70   : > { %v4785_v54 = vpop.f32.mrf.mxu2  ;;  %v4798_v56 = vpop.f32.mrf.mxu3 }
 0xa71   : > { %v4799_v20 = vadd.f32 %v4798_v56, %v4785_v54 }
 0xa73   : > { %v11054_v38 = vadd.f32 %v4799_v20, %v10958_v9 }
 0xa78   : > { %v4787_v5 = vpop.f32.mrf.mxu2  ;;  %v4800_v23 = vpop.f32.mrf.mxu3 }
 0xa7d   : > { %5536 = vmatmul.msk.bf16.gmra.mxu2 %vm12656_vm8, %v12590_v37  ;;  %5552 = vmatmul.msk.bf16.gmra.mxu3 %vm12657_vm6, %v12590_v37  ;;  %vm5200_vm8 = vcmask 1040384  }
 0xa80   : > { %v4867_v61 = vpop.f32.mrf.mxu2  ;;  %v4956_v16 = vpop.f32.mrf.mxu3 }
 0xa81   : > { %v4868_v31 = vadd.f32 %v4867_v61, %v11063_v45  ;;  %v4957_v50 = vadd.f32 %v4956_v16, %v11065_v62 }
 0xa83   : > { %v5036_v9 = vmax.f32 %v4868_v31, 0.0  ;;  %v5037_v27 = vmax.f32 %v4957_v50, 0.0 }
 0xa88   : > { %v4869_v46 = vpop.f32.mrf.mxu2  ;;  %v4958_v3 = vpop.f32.mrf.mxu3 }
 0xa89   : > { %v4870_v12 = vadd.f32 %v4869_v46, %v11063_v45  ;;  %v4959_v37 = vadd.f32 %v4958_v3, %v11065_v62 }
 0xa8b   : > { %v5038_v40 = vmax.f32 %v4870_v12, 0.0  ;;  %v5039_v6 = vmax.f32 %v4959_v37, 0.0 }
 0xa8d   : > { %5537 = vmatmul.msk.bf16.gmra.mxu2 %vm12658_vm12, %v12593_v4  ;;  %5553 = vmatmul.msk.bf16.gmra.mxu3 %vm12659_vm7, %v12593_v4  ;;  %v11075_v15 = vpack.c.bf16 %v5038_v40, %v5036_v9  ;;  %v11077_v13 = vpack.c.bf16 %v5039_v6, %v5037_v27 }
 0xa90   : > { %v4872_v39 = vpop.f32.mrf.mxu2  ;;  %v4961_v57 = vpop.f32.mrf.mxu3 }
 0xa91   : > { %v4873_v53 = vadd.f32 %v4872_v39, %v11063_v45  ;;  %v4962_v30 = vadd.f32 %v4961_v57, %v11065_v62 }
 0xa93   : > { %v5040_v63 = vmax.f32 %v4873_v53, 0.0  ;;  %v5041_v28 = vmax.f32 %v4962_v30, 0.0 }
 0xa98   : > { %v4874_v43 = vpop.f32.mrf.mxu2  ;;  %v4963_v52 = vpop.f32.mrf.mxu3 }
 0xa99   : > { %v4875_v1 = vadd.f32 %v4874_v43, %v11063_v45  ;;  %v4964_v0 = vadd.f32 %v4963_v52, %v11065_v62 }
 0xa9b   : > { %v5042_v29 = vmax.f32 %v4875_v1, 0.0  ;;  %v5043_v4 = vmax.f32 %v4964_v0, 0.0 }
 0xa9d   : > { %5538 = vmatmul.msk.bf16.gmra.mxu2 %vm12660_vm14, %v12596_v18  ;;  %5554 = vmatmul.msk.bf16.gmra.mxu3 %vm12661_vm9, %v12596_v18  ;;  %v11087_v42 = vpack.c.bf16 %v5042_v29, %v5040_v63  ;;  %v11089_v48 = vpack.c.bf16 %v5043_v4, %v5041_v28 }
 0xaa0   : > { %v4877_v7 = vpop.f32.mrf.mxu2  ;;  %v4966_v49 = vpop.f32.mrf.mxu3 }
 0xaa1   : > { %v4878_v32 = vadd.f32 %v4877_v7, %v11063_v45  ;;  %v4967_v8 = vadd.f32 %v4966_v49, %v11065_v62 }
 0xaa3   : > { %v5044_v24 = vmax.f32 %v4878_v32, 0.0  ;;  %v5045_v11 = vmax.f32 %v4967_v8, 0.0 }
 0xaa8   : > { %v4879_v36 = vpop.f32.mrf.mxu2  ;;  %v4968_v44 = vpop.f32.mrf.mxu3 }
 0xaa9   : > { %v4880_v17 = vadd.f32 %v4879_v36, %v11063_v45  ;;  %v4969_v26 = vadd.f32 %v4968_v44, %v11065_v62 }
 0xaab   : > { %v5046_v47 = vmax.f32 %v4880_v17, 0.0  ;;  %v5047_v18 = vmax.f32 %v4969_v26, 0.0 }
 0xaad   : > { %5539 = vmatmul.msk.bf16.gmra.mxu2 %vm12662_vm15, %v12602_v51  ;;  %5555 = vmatmul.msk.bf16.gmra.mxu3 %vm12577_vm0, %v12602_v51  ;;  %v11099_v25 = vpack.c.bf16 %v5046_v47, %v5044_v24  ;;  %v11101_v41 = vpack.c.bf16 %v5047_v18, %v5045_v11 }
 0xab0   : > { %v4882_v35 = vpop.f32.mrf.mxu2  ;;  %v4971_v59 = vpop.f32.mrf.mxu3 }
 0xab1   : > { %v4883_v2 = vadd.f32 %v4882_v35, %v11063_v45  ;;  %v4972_v58 = vadd.f32 %v4971_v59, %v11065_v62 }
 0xab3   : > { %v5048_v56 = vmax.f32 %v4883_v2, 0.0  ;;  %v5049_v20 = vmax.f32 %v4972_v58, 0.0 }
 0xab8   : > { %v4884_v21 = vpop.f32.mrf.mxu2  ;;  %v4973_v10 = vpop.f32.mrf.mxu3 }
 0xab9   : > { %v4885_v22 = vadd.f32 %v4884_v21, %v11063_v45  ;;  %v4974_v54 = vadd.f32 %v4973_v10, %v11065_v62 }
 0xabb   : > { %v5050_v5 = vmax.f32 %v4885_v22, 0.0  ;;  %v5051_v51 = vmax.f32 %v4974_v54, 0.0 }
 0xabd   : > { %5540 = vmatmul.msk.bf16.gmra.mxu2 %vm12663_vm1, %v12612_v60  ;;  %5556 = vmatmul.msk.bf16.gmra.mxu3 %vm12664_vm11, %v12612_v60  ;;  %v11111_v23 = vpack.c.bf16 %v5050_v5, %v5048_v56  ;;  %v11113_v34 = vpack.c.bf16 %v5051_v51, %v5049_v20 }
 0xac0   : > { %v4887_v61 = vpop.f32.mrf.mxu2  ;;  %v4976_v16 = vpop.f32.mrf.mxu3 }
 0xac1   : > { %v4888_v31 = vadd.f32 %v4887_v61, %v11063_v45  ;;  %v4977_v50 = vadd.f32 %v4976_v16, %v11065_v62 }
 0xac3   : > { %v5052_v9 = vmax.f32 %v4888_v31, 0.0  ;;  %v5053_v27 = vmax.f32 %v4977_v50, 0.0 }
 0xac8   : > { %v4889_v46 = vpop.f32.mrf.mxu2  ;;  %v4978_v3 = vpop.f32.mrf.mxu3 }
 0xac9   : > { %v4890_v12 = vadd.f32 %v4889_v46, %v11063_v45  ;;  %v4979_v37 = vadd.f32 %v4978_v3, %v11065_v62 }
 0xacb   : > { %v5054_v40 = vmax.f32 %v4890_v12, 0.0  ;;  %v5055_v60 = vmax.f32 %v4979_v37, 0.0 }
 0xacd   : > { %v11119_v6 = vpack.c.bf16 %v5054_v40, %v5052_v9  ;;  %v11121_v39 = vpack.c.bf16 %v5055_v60, %v5053_v27  ;;  %5541 = vmatmul.msk.bf16.gmra.mxu2 %vm12665_vm4, %v12623_v55  ;;  %5557 = vmatmul.msk.bf16.gmra.mxu3 %vm12666_vm13, %v12623_v55 }
 0xad0   : > { %v4892_v57 = vpop.f32.mrf.mxu2  ;;  %v4981_v53 = vpop.f32.mrf.mxu3 }
 0xad1   : > { %v4893_v5 = vadd.f32 %v4892_v57, %v11063_v45  ;;  %v4982_v51 = vadd.f32 %v4981_v53, %v11065_v62 }
 0xad3   : > { %v5056_v9 = vmax.f32 %v4893_v5, 0.0  ;;  %v5057_v27 = vmax.f32 %v4982_v51, 0.0 }
 0xad8   : > { %v4894_v30 = vpop.f32.mrf.mxu2  ;;  %v4983_v43 = vpop.f32.mrf.mxu3 }
 0xad9   : > { %v4895_v22 = vadd.f32 %v4894_v30, %v11063_v45  ;;  %v4984_v54 = vadd.f32 %v4983_v43, %v11065_v62 }
 0xadb   : > { %v5058_v46 = vmax.f32 %v4895_v22, 0.0  ;;  %v5059_v3 = vmax.f32 %v4984_v54, 0.0 }
 0xadd   : > { %5542 = vmatmul.msk.bf16.gmra.mxu2 %vm12667_vm5, %v12628_v19  ;;  %5558 = vmatmul.msk.bf16.gmra.mxu3 %vm12668_vm10, %v12628_v19  ;;  %v5111_v30 = vpack.c.bf16 %v5058_v46, %v5056_v9  ;;  %v5112_v43 = vpack.c.bf16 %v5059_v3, %v5057_v27 }
 0xae0   : > { %v4897_v52 = vpop.f32.mrf.mxu2  ;;  %v4986_v1 = vpop.f32.mrf.mxu3 }
 0xae1   : > { %v4898_v47 = vadd.f32 %v4897_v52, %v11063_v45  ;;  %v4987_v18 = vadd.f32 %v4986_v1, %v11065_v62 }
 0xae3   : > { %v5060_v21 = vmax.f32 %v4898_v47, 0.0  ;;  %v5061_v10 = vmax.f32 %v4987_v18, 0.0 }
 0xae8   : > { %v4899_v0 = vpop.f32.mrf.mxu2  ;;  %v4988_v63 = vpop.f32.mrf.mxu3 }
 0xae9   : > { %v4900_v26 = vadd.f32 %v4899_v0, %v11063_v45 }
 0xaeb   : > { %v5062_v2 = vmax.f32 %v4900_v26, 0.0 }
 0xaed   : > { %5543 = vmatmul.msk.bf16.gmra.mxu2 %vm12669_vm3, %v12631_v33  ;;  %5559 = vmatmul.msk.bf16.gmra.mxu3 %vm12670_vm2, %v12631_v33  ;;  %v4989_v33 = vadd.f32 %v4988_v63, %v11065_v62  ;;  %v5113_v56 = vpack.c.bf16 %v5062_v2, %v5060_v21 }
 0xaef   : > { %v5063_v58 = vmax.f32 %v4989_v33, 0.0 }
 0xaf0   : > { %v4902_v55 = vpop.f32.mrf.mxu2  ;;  %v4991_v28 = vpop.f32.mrf.mxu3 }
 0xaf1   : > { %v4903_v29 = vadd.f32 %v4902_v55, %v11063_v45  ;;  %v4992_v4 = vadd.f32 %v4991_v28, %v11065_v62  ;;  %v5114_v20 = vpack.c.bf16 %v5063_v58, %v5061_v10 }
 0xaf3   : > { %v5064_v8 = vmax.f32 %v4903_v29, 0.0  ;;  %v5065_v36 = vmax.f32 %v4992_v4, 0.0 }
 0xaf8   : > { %v4904_v7 = vpop.f32.mrf.mxu2  ;;  %v4993_v49 = vpop.f32.mrf.mxu3 }
 0xaf9   : > { %v4905_v19 = vadd.f32 %v4904_v7, %v11063_v45  ;;  %v4994_v32 = vadd.f32 %v4993_v49, %v11065_v62 }
 0xafb   : > { %v5066_v44 = vmax.f32 %v4905_v19, 0.0  ;;  %v5067_v17 = vmax.f32 %v4994_v32, 0.0 }
 0xafd   : > { %v5115_v24 = vpack.c.bf16 %v5066_v44, %v5064_v8  ;;  %v5116_v11 = vpack.c.bf16 %v5067_v17, %v5065_v36 }
 0xaff   : > { %5139 = vmatpush.bf16.xpose.msra.mxu0 %v5115_v24  ;;  %5152 = vmatpush.bf16.xpose.msra.mxu1 %v5116_v11 }
 0xb00   : > { %v4907_v35 = vpop.f32.mrf.mxu2  ;;  %v4996_v59 = vpop.f32.mrf.mxu3 }
 0xb01   : > { %v4908_v61 = vadd.f32 %v4907_v35, %v11063_v45  ;;  %v4997_v16 = vadd.f32 %v4996_v59, %v11065_v62 }
 0xb03   : > { %v5068_v40 = vmax.f32 %v4908_v61, 0.0  ;;  %v5069_v60 = vmax.f32 %v4997_v16, 0.0  ;;  %v11185_v61 = vld [vmem:[#allocation1] sm:$0xff]  ;;  %v11187_v16 = vld [vmem:[#allocation1 + $0x9] sm:$0xff] }
 0xb07   : > { %5140 = vmatpush.bf16.xpose.msra.mxu0 %v5113_v56  ;;  %5153 = vmatpush.bf16.xpose.msra.mxu1 %v5114_v20 }
 0xb08   : > { %v4909_v31 = vpop.f32.mrf.mxu2  ;;  %v4998_v50 = vpop.f32.mrf.mxu3 }
 0xb09   : > { %v4910_v12 = vadd.f32 %v4909_v31, %v11063_v45  ;;  %v4999_v37 = vadd.f32 %v4998_v50, %v11065_v62 }
 0xb0b   : > { %v5070_v57 = vmax.f32 %v4910_v12, 0.0  ;;  %v5071_v53 = vmax.f32 %v4999_v37, 0.0 }
 0xb0d   : > { %v11151_v52 = vpack.c.bf16 %v5070_v57, %v5068_v40  ;;  %v11153_v1 = vpack.c.bf16 %v5071_v53, %v5069_v60 }
 0xb0f   : > { %5141 = vmatpush.bf16.xpose.msra.mxu0 %v5111_v30  ;;  %5154 = vmatpush.bf16.xpose.msra.mxu1 %v5112_v43 }
 0xb10   : > { %v4912_v0 = vpop.f32.mrf.mxu2  ;;  %v5001_v63 = vpop.f32.mrf.mxu3 }
 0xb11   : > { %v4913_v55 = vadd.f32 %v4912_v0, %v11063_v45  ;;  %v5002_v28 = vadd.f32 %v5001_v63, %v11065_v62 }
 0xb13   : > { %v5072_v19 = vmax.f32 %v4913_v55, 0.0  ;;  %v5073_v32 = vmax.f32 %v5002_v28, 0.0 }
 0xb17   : > { %5142 = vmatpush.bf16.xpose.msra.mxu0 %v11119_v6  ;;  %5155 = vmatpush.bf16.xpose.msra.mxu1 %v11121_v39 }
 0xb18   : > { %v4914_v29 = vpop.f32.mrf.mxu2  ;;  %v5003_v4 = vpop.f32.mrf.mxu3 }
 0xb19   : > { %v4915_v7 = vadd.f32 %v4914_v29, %v11063_v45  ;;  %v5004_v49 = vadd.f32 %v5003_v4, %v11065_v62 }
 0xb1b   : > { %v5074_v8 = vmax.f32 %v4915_v7, 0.0  ;;  %v5075_v36 = vmax.f32 %v5004_v49, 0.0 }
 0xb1d   : > { %v11161_v44 = vpack.c.bf16 %v5074_v8, %v5072_v19  ;;  %v11163_v17 = vpack.c.bf16 %v5075_v36, %v5073_v32 }
 0xb1f   : > { %5143 = vmatpush.bf16.xpose.msra.mxu0 %v11111_v23  ;;  %5156 = vmatpush.bf16.xpose.msra.mxu1 %v11113_v34 }
 0xb20   : > { %v4917_v6 = vpop.f32.mrf.mxu2  ;;  %v5006_v39 = vpop.f32.mrf.mxu3 }
 0xb21   : > { %v4918_v26 = vadd.f32 %v4917_v6, %v11063_v45  ;;  %v5007_v33 = vadd.f32 %v5006_v39, %v11065_v62 }
 0xb23   : > { %v5076_v35 = vmax.f32 %v4918_v26, 0.0  ;;  %v5077_v23 = vmax.f32 %v5007_v33, 0.0 }
 0xb27   : > { %5144 = vmatpush.bf16.xpose.msra.mxu0 %v11099_v25  ;;  %5157 = vmatpush.bf16.xpose.msra.mxu1 %v11101_v41 }
 0xb28   : > { %v4919_v24 = vpop.f32.mrf.mxu2  ;;  %v5008_v11 = vpop.f32.mrf.mxu3 }
 0xb29   : > { %v4920_v47 = vadd.f32 %v4919_v24, %v11063_v45  ;;  %v5009_v18 = vadd.f32 %v5008_v11, %v11065_v62 }
 0xb2b   : > { %v5078_v59 = vmax.f32 %v4920_v47, 0.0  ;;  %v5079_v34 = vmax.f32 %v5009_v18, 0.0 }
 0xb2d   : > { %v11173_v2 = vpack.c.bf16 %v5078_v59, %v5076_v35  ;;  %v11175_v58 = vpack.c.bf16 %v5079_v34, %v5077_v23 }
 0xb2f   : > { %5145 = vmatpush.bf16.xpose.msra.mxu0 %v11087_v42  ;;  %5158 = vmatpush.bf16.xpose.msra.mxu1 %v11089_v48 }
 0xb30   : > { %v4922_v25 = vpop.f32.mrf.mxu2  ;;  %v5011_v41 = vpop.f32.mrf.mxu3 }
 0xb31   : > { %v4923_v21 = vadd.f32 %v4922_v25, %v11063_v45  ;;  %v5012_v10 = vadd.f32 %v5011_v41, %v11065_v62 }
 0xb33   : > { %v5080_v5 = vmax.f32 %v4923_v21, 0.0  ;;  %v5081_v42 = vmax.f32 %v5012_v10, 0.0 }
 0xb37   : > { %5146 = vmatpush.bf16.xpose.msra.mxu0 %v11075_v15  ;;  %5159 = vmatpush.bf16.xpose.msra.mxu1 %v11077_v13 }
 0xb38   : > { %v4924_v22 = vpop.f32.mrf.mxu2  ;;  %v5013_v54 = vpop.f32.mrf.mxu3 }
 0xb39   : > { %v4925_v56 = vadd.f32 %v4924_v22, %v11063_v45  ;;  %v5014_v20 = vadd.f32 %v5013_v54, %v11065_v62 }
 0xb3b   : > { %v5082_v51 = vmax.f32 %v4925_v56, 0.0  ;;  %v5083_v48 = vmax.f32 %v5014_v20, 0.0 }
 0xb3d   : > { %v11189_v31 = vpack.c.bf16 %v5082_v51, %v5080_v5  ;;  %v11191_v50 = vpack.c.bf16 %v5083_v48, %v5081_v42 }
 0xb3e   : > { %5147 = vmatmul.bf16.vlgmr.msra.gmra.mxu0 %v11185_v61  ;;  %5160 = vmatmul.bf16.vlgmr.msra.gmra.mxu1 %v11187_v16 }
 0xb40   : > { %v4927_v15 = vpop.f32.mrf.mxu2  ;;  %v5016_v13 = vpop.f32.mrf.mxu3 }
 0xb41   : > { %v4928_v46 = vadd.f32 %v4927_v15, %v11063_v45  ;;  %v5017_v3 = vadd.f32 %v5016_v13, %v11065_v62 }
 0xb43   : > { %v5084_v40 = vmax.f32 %v4928_v46, 0.0  ;;  %v5085_v60 = vmax.f32 %v5017_v3, 0.0 }
 0xb48   : > { %v4929_v12 = vpop.f32.mrf.mxu2  ;;  %v5018_v37 = vpop.f32.mrf.mxu3 }
 0xb49   : > { %v4930_v9 = vadd.f32 %v4929_v12, %v11063_v45  ;;  %v5019_v27 = vadd.f32 %v5018_v37, %v11065_v62 }
 0xb4b   : > { %v5086_v57 = vmax.f32 %v4930_v9, 0.0  ;;  %v5087_v53 = vmax.f32 %v5019_v27, 0.0  ;;  %v12671_v27 = vlaneseq }
 0xb4d   : > { %v5125_v30 = vpack.c.bf16 %v5086_v57, %v5084_v40  ;;  %v5126_v43 = vpack.c.bf16 %v5087_v53, %v5085_v60  ;;  %vm5205_vm6 = vcmp.lt.s32.totalorder %v12671_v27, 256 }
 0xb50   : > { %v4932_v0 = vpop.f32.mrf.mxu2  ;;  %v5021_v63 = vpop.f32.mrf.mxu3 }
 0xb51   : > { %v4933_v51 = vadd.f32 %v4932_v0, %v11063_v45  ;;  %v5022_v48 = vadd.f32 %v5021_v63, %v11065_v62 }
 0xb53   : > { %v5088_v46 = vmax.f32 %v4933_v51, 0.0  ;;  %v5089_v3 = vmax.f32 %v5022_v48, 0.0 }
 0xb58   : > { %v4934_v55 = vpop.f32.mrf.mxu2  ;;  %v5023_v28 = vpop.f32.mrf.mxu3 }
 0xb59   : > { %v4935_v56 = vadd.f32 %v4934_v55, %v11063_v45  ;;  %v5024_v20 = vadd.f32 %v5023_v28, %v11065_v62 }
 0xb5b   : > { %v5090_v15 = vmax.f32 %v4935_v56, 0.0  ;;  %v5091_v13 = vmax.f32 %v5024_v20, 0.0 }
 0xb5d   : > { %v5127_v12 = vpack.c.bf16 %v5090_v15, %v5088_v46  ;;  %v5128_v37 = vpack.c.bf16 %v5091_v13, %v5089_v3 }
 0xb60   : > { %v4937_v29 = vpop.f32.mrf.mxu2  ;;  %v5026_v4 = vpop.f32.mrf.mxu3 }
 0xb61   : > { %v4938_v25 = vadd.f32 %v4937_v29, %v11063_v45  ;;  %v5027_v41 = vadd.f32 %v5026_v4, %v11065_v62 }
 0xb63   : > { %v5092_v22 = vmax.f32 %v4938_v25, 0.0  ;;  %v5093_v54 = vmax.f32 %v5027_v41, 0.0 }
 0xb68   : > { %v4939_v7 = vpop.f32.mrf.mxu2  ;;  %v5028_v49 = vpop.f32.mrf.mxu3 }
 0xb69   : > { %v4940_v35 = vadd.f32 %v4939_v7, %v11063_v45  ;;  %v5029_v23 = vadd.f32 %v5028_v49, %v11065_v62 }
 0xb6b   : > { %v5094_v21 = vmax.f32 %v4940_v35, 0.0  ;;  %v5095_v10 = vmax.f32 %v5029_v23, 0.0 }
 0xb6d   : > { %v5129_v5 = vpack.c.bf16 %v5094_v21, %v5092_v22  ;;  %v5130_v42 = vpack.c.bf16 %v5095_v10, %v5093_v54 }
 0xb70   : > { %v4942_v19 = vpop.f32.mrf.mxu2  ;;  %v5031_v32 = vpop.f32.mrf.mxu3 }
 0xb71   : > { %v4943_v8 = vadd.f32 %v4942_v19, %v11063_v45  ;;  %v5032_v36 = vadd.f32 %v5031_v32, %v11065_v62 }
 0xb73   : > { %v5096_v24 = vmax.f32 %v4943_v8, 0.0  ;;  %v5097_v11 = vmax.f32 %v5032_v36, 0.0 }
 0xb78   : > { %v4944_v6 = vpop.f32.mrf.mxu2  ;;  %v5033_v39 = vpop.f32.mrf.mxu3 }
 0xb79   : > { %v4945_v26 = vadd.f32 %v4944_v6, %v11063_v45  ;;  %v5034_v33 = vadd.f32 %v5033_v39, %v11065_v62 }
 0xb7b   : > { %v5098_v47 = vmax.f32 %v4945_v26, 0.0  ;;  %v5099_v18 = vmax.f32 %v5034_v33, 0.0 }
 0xb7d   : > { %v5131_v59 = vpack.c.bf16 %v5098_v47, %v5096_v24  ;;  %v5132_v34 = vpack.c.bf16 %v5099_v18, %v5097_v11 }
 0xb7f   : > { %5165 = vmatpush.bf16.xpose.msrb.mxu0 %v5131_v59  ;;  %5178 = vmatpush.bf16.xpose.msrb.mxu1 %v5132_v34 }
 0xb87   : > { %5166 = vmatpush.bf16.xpose.msrb.mxu0 %v5129_v5  ;;  %5179 = vmatpush.bf16.xpose.msrb.mxu1 %v5130_v42 }
 0xb8f   : > { %5167 = vmatpush.bf16.xpose.msrb.mxu0 %v5127_v12  ;;  %5180 = vmatpush.bf16.xpose.msrb.mxu1 %v5128_v37 }
 0xb97   : > { %5168 = vmatpush.bf16.xpose.msrb.mxu0 %v5125_v30  ;;  %5181 = vmatpush.bf16.xpose.msrb.mxu1 %v5126_v43 }
 0xb9f   : > { %5169 = vmatpush.bf16.xpose.msrb.mxu0 %v11189_v31  ;;  %5182 = vmatpush.bf16.xpose.msrb.mxu1 %v11191_v50 }
 0xba7   : > { %5170 = vmatpush.bf16.xpose.msrb.mxu0 %v11173_v2  ;;  %5183 = vmatpush.bf16.xpose.msrb.mxu1 %v11175_v58 }
 0xbaf   : > { %5171 = vmatpush.bf16.xpose.msrb.mxu0 %v11161_v44  ;;  %5184 = vmatpush.bf16.xpose.msrb.mxu1 %v11163_v17 }
 0xbb7   : > { %5172 = vmatpush.bf16.xpose.msrb.mxu0 %v11151_v52  ;;  %5185 = vmatpush.bf16.xpose.msrb.mxu1 %v11153_v1 }
 0xbbb   : > { %v5148_v45 = vpop.f32.mrf.mxu0  ;;  %v5161_v62 = vpop.f32.mrf.mxu1 }
 0xbbc   : > { %v5162_v9 = vadd.f32 %v5161_v62, %v5148_v45 }
 0xbbe   : > { %v5191_v31 = vadd.f32 %v5162_v9, %v11019_v14  ;;  %5173 = vmatmul.bf16.vlgmr.msrb.gmra.mxu0 %v11185_v61  ;;  %5186 = vmatmul.bf16.vlgmr.msrb.gmra.mxu1 %v11187_v16  ;;  %v5194_v14 = vstv %s5193_s10 }
 0xbc0   : > { %v5195_v61 = vadd.f32 %v5194_v14, %v5191_v31 }
 0xbc3   : > { %v5150_v2 = vpop.f32.mrf.mxu0  ;;  %v5163_v58 = vpop.f32.mrf.mxu1 }
 0xc3b   : > { %v5174_v44 = vpop.f32.mrf.mxu0  ;;  %v5187_v17 = vpop.f32.mrf.mxu1 }
 0xc3c   : > { %v5188_v52 = vadd.f32 %v5187_v17, %v5174_v44 }
 0xc3e   : > { %v5192_v1 = vadd.f32 %v5188_v52, %v11054_v38 }
 0xc40   : > { %v5196_v50 = vadd.f32 %v5194_v14, %v5192_v1 }
 0xc42   : > { %v5199_v16 = vrot.slane %v5196_v50, 7 }
 0xc43   : > { %v5176_v40 = vpop.f32.mrf.mxu0  ;;  %v5189_v60 = vpop.f32.mrf.mxu1 }
 0xc44   : > { %v5201_v57 = vsel %vm5200_vm8, %v5195_v61, %v5199_v16 }
 0xc45   : > { %5207 = vst.msk [vmem:[%s262_s16] sm:$0x3] %vm5205_vm6, %v5201_v57 }
 0xc46   : > { %5894 = shalt.err (!%p5891_p3)
}
 0xc47   : > { %5596 = dma.vmem_to_hbm [thread:$0]  (%p6015_p5), %s5222_s18, 32, %s5224_s19, %s5209_s5  }
 0xc48 PF: > { %p5602_p4 = scmp.ge.s32.totalorder %s5929_s26, 2  ;;  %s5235_s11 = sand.u32 1, %s5917_s23  }
 0xc49   : > { %s5236_s14 = scalar_lea.sflag [#allocation4], %s5235_s11 }
 0xc4a   : > { %p5599_p7 = pnand %p5602_p4, %p6019_p6 }
 0xc4c   : > { %p5600_p8 = pneg %p5599_p7 }
 0xc4e   : > { %5912 = dma.done.wait (%p5600_p8), %s5236_s14, 32  }
 0xc4f   : > { %5914 = vsyncadd (%p5600_p8), %s5236_s14, 4294967264  ;;  %p17_p9 = scmp.ge.s32.totalorder %s6002_s28, 4   ;;  %s12672_s23 = smov %s5921_s24 }
 0xc50   : > { %s12673_s24 = smov %s5925_s25  ;;  %s12674_s25 = smov %s6013_s7 }
 0xc51   : > { %s12675_s26 = smov %s6002_s28  ;;  %19 = sbr.rel (!%p17_p9) target bundleno = 5 (0x5), region = 82 }
 0xc56   :  { %5242 = vsyncpa [#allocation4], 1 }
 0xc57   :  { %5244 = vsyncpa [#allocation4 + $0x1], 1 }

</bundles_post_ra>
